<compile_context>
chip_gen: v6e
topology: v6e:2x2x1
jax: 0.10.0
libtpu: 0.0.40
codegen_flags: <defaults>
</compile_context>

<pallas_src>
import functools
import math

import numpy as np
import jax
import jax.numpy as jnp
from jax.experimental import pallas as pl
from jax.experimental.pallas import tpu as pltpu

VMEM = pltpu.MemorySpace.VMEM


def _vspecs(n):
    return [pl.BlockSpec(memory_space=VMEM) for _ in range(n)]


_STACK_KEYS = ("sa_wqkv", "sa_bqkv", "sa_wo", "sa_bo",
               "ca_wqkv", "ca_bqkv", "ca_wo", "ca_bo",
               "ffn_w1", "ffn_b1", "ffn_w2", "ffn_b2",
               "ln_g", "ln_b")


# ------------------------------- in-kernel helpers ----------------------------------

def _layer_norm(x, g, b, eps=1e-5):
    mean = jnp.mean(x, axis=-1, keepdims=True)
    var = jnp.mean(jnp.square(x - mean), axis=-1, keepdims=True)
    return (x - mean) * jax.lax.rsqrt(var + eps) * g + b


def _mha(xq, xkv, wqkv, bqkv, wo, bo, nhead, *, is_self):
    """nn.MultiheadAttention (eval) with fused QKV / K|V projections.

    NOTE: weights here use an [E, 3E] column-block layout; loading a real PyTorch
    checkpoint (in_proj_weight is [3E, E] row blocks) requires a transpose/re-block.
    """
    E = wo.shape[0]
    dh = E // nhead
    scale = 1.0 / math.sqrt(dh)
    if is_self:                       # self-attention: one fused [E, 3E] matmul
        qkv = jnp.dot(xq, wqkv, preferred_element_type=jnp.float32) + bqkv
        q, k, v = qkv[:, :E], qkv[:, E:2 * E], qkv[:, 2 * E:]
    else:                             # cross-attention: Q separate, K|V fused
        q = jnp.dot(xq, wqkv[:, :E], preferred_element_type=jnp.float32) + bqkv[:, :E]
        kv = jnp.dot(xkv, wqkv[:, E:], preferred_element_type=jnp.float32) + bqkv[:, E:]
        k, v = kv[:, :E], kv[:, E:]
    # Per-head attention; fold each head's context straight into the output
    # projection instead of lane-concatenating the heads (no XLU relayout).
    out = jnp.zeros((xq.shape[0], E), jnp.float32)
    for h in range(nhead):
        sl = slice(h * dh, (h + 1) * dh)
        qh, kh, vh = q[:, sl], k[:, sl], v[:, sl]
        s = jax.lax.dot_general(qh, kh, (((1,), (1,)), ((), ())),
                                preferred_element_type=jnp.float32) * scale
        s = s - jnp.max(s, axis=-1, keepdims=True)
        p = jnp.exp(s)
        p = p / jnp.sum(p, axis=-1, keepdims=True)      # exact divide (parity)
        ctx = jnp.dot(p, vh, preferred_element_type=jnp.float32)
        out = out + jnp.dot(ctx, wo[sl, :], preferred_element_type=jnp.float32)
    return out + bo


def _decoder_layer(x, mem, w, nhead):
    """nn.TransformerDecoderLayer (norm_first=False, relu, eval)."""
    (sa_wqkv, sa_bqkv, sa_wo, sa_bo,
     ca_wqkv, ca_bqkv, ca_wo, ca_bo,
     w1, b1, w2, b2, ln_g, ln_b) = w
    sa = _mha(x, x, sa_wqkv, sa_bqkv, sa_wo, sa_bo, nhead, is_self=True)
    x = _layer_norm(x + sa, ln_g[0:1], ln_b[0:1])
    ca = _mha(x, mem, ca_wqkv, ca_bqkv, ca_wo, ca_bo, nhead, is_self=False)
    x = _layer_norm(x + ca, ln_g[1:2], ln_b[1:2])
    h = jnp.maximum(jnp.dot(x, w1, preferred_element_type=jnp.float32) + b1, 0.0)
    ff = jnp.dot(h, w2, preferred_element_type=jnp.float32) + b2
    x = _layer_norm(x + ff, ln_g[2:3], ln_b[2:3])
    return x


# ------------------------------ single fused kernel ---------------------------------

def _l2_kernel(*refs, a, K, n_code, L_out, num_layers, nhead_code, nhead_md,
               hidden, rescale, pack_w):
    n = len(_STACK_KEYS)
    (xc_in, xm_in, convw_ref, posb_ref, mdw_ref, mdb_ref) = refs[:6]
    code_refs = refs[6:6 + n]
    md_refs = refs[6 + n:6 + 2 * n]
    (wq_ref, bq_ref, wkc_ref, bkc_ref, wkm_ref, bkm_ref) = refs[6 + 2 * n:12 + 2 * n]
    out_ref = refs[12 + 2 * n]
    xpad_ref = refs[13 + 2 * n]        # VMEM scratch for the conv zero-padding

    # ---------------- stem: Conv1d as one im2col matmul + fused biases ----------------
    # Fold the jnp.pad into the kernel: zero a VMEM scratch, store x at row offset a.
    xpad_ref[...] = jnp.zeros(xpad_ref.shape, jnp.float32)
    xpad_ref[a:a + n_code, :] = xc_in[...].astype(jnp.float32)
    # im2col: K static shifted slices lane-concatenated -> single [L_out, K*C] x
    # [K*C, D] MXU push (lane-aligned 128-wide contraction at the toy shapes).
    xcol = jnp.concatenate([xpad_ref[k:k + L_out, :] for k in range(K)], axis=-1)
    # posb_ref already folds conv bias + both positional-encoding projections
    # (precomputed outside jit; they are input-independent).
    xc = (jnp.dot(xcol, convw_ref[...], preferred_element_type=jnp.float32)
          + posb_ref[...])
    # md_2_dec linear.
    xm = (jnp.dot(xm_in[...].astype(jnp.float32), mdw_ref[...],
                  preferred_element_type=jnp.float32) + mdb_ref[...])

    # ---------------- interleaved code / md decoder stack ----------------
    # Static Python unroll is fine at NL=2; see module-level TODO for at-scale plan.
    for l in range(num_layers):
        cw = tuple(r[l] for r in code_refs)     # static layer-index loads
        mw = tuple(r[l] for r in md_refs)
        xc = _decoder_layer(xc, xm, cw, nhead_code)
        xm = _decoder_layer(xm, xc, mw, nhead_md)

    # ---------------- CrossAttention score heads, lane-packed output ----------------
    # One query projection for all 3 heads; one key projection shared by the two
    # heads keyed on x_code; one for the head keyed on x_md.
    q = jnp.dot(xm, wq_ref[...], preferred_element_type=jnp.float32) + bq_ref[...]
    kc = jnp.dot(xc, wkc_ref[...], preferred_element_type=jnp.float32) + bkc_ref[...]
    km = jnp.dot(xm, wkm_ref[...], preferred_element_type=jnp.float32) + bkm_ref[...]
    scale = (1.0 / math.sqrt(hidden)) if rescale else 1.0

    def score(qh, kh):
        return jax.lax.dot_general(qh, kh, (((1,), (1,)), ((), ())),
                                   preferred_element_type=jnp.float32) * scale

    s1 = score(q[:, :hidden], kc[:, :hidden])          # md_after_code   [n_md, L_out]
    s2 = score(q[:, hidden:2 * hidden], kc[:, hidden:])  # md_between_code [n_md, L_out]
    s3 = score(q[:, 2 * hidden:], km)                   # md_after_md     [n_md, n_md]

    pieces = [s1, s2, s3]
    used = 2 * L_out + s3.shape[1]
    if pack_w > used:
        pieces.append(jnp.zeros((s1.shape[0], pack_w - used), jnp.float32))
    # Single lane-dense (128-wide) store / single writeback DMA; sliced in wrapper.
    out_ref[...] = jnp.concatenate(pieces, axis=-1).astype(out_ref.dtype)


# ------------------------------------ forward ---------------------------------------

def l2_transformer_forward(params, x_code_pooled, x_md_pooled, *,
                           nb_combine, nhead_code, nhead_md, num_decoder_layers,
                           rescale_att=True):
    a = nb_combine
    K = 2 * a
    n_code, C = x_code_pooled.shape
    L_out = n_code + 1                     # Conv1d: n + 2a - 2a + 1
    n_md = x_md_pooled.shape[0]
    hidden = params["ca"]["wk_md"].shape[1]
    used = 2 * L_out + n_md
    pack_w = max(128, ((used + 127) // 128) * 128)

    args = [x_code_pooled, x_md_pooled,
            params["conv_w_flat"], params["pos_conv_b"],
            params["md2dec_w"], params["md2dec_b"]]
    args += [params["code_stack"][k] for k in _STACK_KEYS]
    args += [params["md_stack"][k] for k in _STACK_KEYS]
    ca = params["ca"]
    args += [ca["wq"], ca["bq"], ca["wk_code"], ca["bk_code"], ca["wk_md"], ca["bk_md"]]

    packed = pl.pallas_call(
        functools.partial(_l2_kernel, a=a, K=K, n_code=n_code, L_out=L_out,
                          num_layers=num_decoder_layers, nhead_code=nhead_code,
                          nhead_md=nhead_md, hidden=hidden, rescale=rescale_att,
                          pack_w=pack_w),
        out_shape=jax.ShapeDtypeStruct((n_md, pack_w), jnp.float32),
        in_specs=_vspecs(len(args)),
        out_specs=pl.BlockSpec(memory_space=VMEM),
        scratch_shapes=[pltpu.VMEM((n_code + 2 * a, C), jnp.float32)],
    )(*args)

    s1 = packed[:, :L_out]
    s2 = packed[:, L_out:2 * L_out]
    s3 = packed[:, 2 * L_out:2 * L_out + n_md]
    return dict(md_after_code=s1, md_between_code=s2, md_after_md=s3)


# ------------------------------ parameter construction ------------------------------

def make_pe(max_len, d_model):
    position = np.arange(max_len, dtype=np.float32)[:, None]
    div_term = np.exp(np.arange(0, d_model, 2, dtype=np.float32)
                      * (-math.log(10000.0) / d_model))
    ang = position * div_term
    # interleave: pe[:, 0::2] = sin, pe[:, 1::2] = cos
    return np.stack([np.sin(ang), np.cos(ang)], axis=-1).reshape(max_len, d_model)


def init_params(key, *, nb_combine, dec_dim, dim_feedforward, enc_code_dim,
                enc_md_dim, ca_mul, num_decoder_layers, max_len=1100):
    keys = iter(jax.random.split(key, 1024))

    def dense(shape, scale=0.05):
        return scale * jax.random.normal(next(keys), shape, dtype=jnp.float32)

    K = 2 * nb_combine
    E = dec_dim
    FF = dim_feedforward
    NL = num_decoder_layers
    params = {}

    # Conv1d weight (PyTorch layout [dec_dim, C_in, K]) flattened for the im2col
    # matmul: row index k*C + c maps to w[o, c, k].
    conv_w = dense((dec_dim, enc_code_dim, K))
    params["conv_w_flat"] = conv_w.transpose(2, 1, 0).reshape(K * enc_code_dim, dec_dim)
    params["conv_b"] = dense((1, dec_dim))

    params["md2dec_w"] = dense((enc_md_dim, dec_dim))
    params["md2dec_b"] = dense((1, dec_dim))

    params["pe"] = make_pe(max_len, dec_dim)          # numpy buffer (used at prepare)
    params["abs_w"] = dense((dec_dim, dec_dim))
    params["abs_b"] = dense((1, dec_dim))
    params["rel_w"] = dense((dec_dim, dec_dim))
    params["rel_b"] = dense((1, dec_dim))

    def stack(shape):
        return dense((NL,) + shape)

    def dec_stack():
        return {
            "sa_wqkv": stack((E, 3 * E)), "sa_bqkv": stack((1, 3 * E)),
            "sa_wo": stack((E, E)), "sa_bo": stack((1, E)),
            "ca_wqkv": stack((E, 3 * E)), "ca_bqkv": stack((1, 3 * E)),
            "ca_wo": stack((E, E)), "ca_bo": stack((1, E)),
            "ffn_w1": stack((E, FF)), "ffn_b1": stack((1, FF)),
            "ffn_w2": stack((FF, E)), "ffn_b2": stack((1, E)),
            "ln_g": jnp.ones((NL, 3, E), jnp.float32),
            "ln_b": jnp.zeros((NL, 3, E), jnp.float32),
        }

    params["code_stack"] = dec_stack()
    params["md_stack"] = dec_stack()

    hidden = int(dec_dim * ca_mul)
    params["ca"] = {
        # queries for (after_code | between_code | after_md) fused into one matrix;
        # keys for the two x_code-keyed heads fused; x_md-keyed key separate.
        "wq": dense((dec_dim, 3 * hidden)), "bq": dense((1, 3 * hidden)),
        "wk_code": dense((dec_dim, 2 * hidden)), "bk_code": dense((1, 2 * hidden)),
        "wk_md": dense((dec_dim, hidden)), "bk_md": dense((1, hidden)),
    }
    # TODO(synk): output_md_right_before_code / _right_before_md / _right_after_md are
    # defined in the reference __init__ but never used in forward(); omitted here.
    return params


def prepare_derived(params, n_code, *, rel_size=1024):
    """One-time (per code length) fold of the input-independent positional-encoding
    projections + conv bias into a single [L_out, D] bias.  Runs in numpy outside jit
    (rel_idx is static), so no gather / matmul XLA ops remain on the hot path."""
    L_out = n_code + 1
    pe = np.asarray(params["pe"], dtype=np.float32)
    rel_idx = np.arange(L_out)
    if L_out > 1:
        rel_idx = np.round(rel_idx.astype(np.float32) * (rel_size - 1)
                           / (L_out - 1)).astype(np.int64)
    pe_abs = pe[:L_out]
    pe_rel = pe[rel_idx]
    abs_w = np.asarray(params["abs_w"]); abs_b = np.asarray(params["abs_b"])
    rel_w = np.asarray(params["rel_w"]); rel_b = np.asarray(params["rel_b"])
    conv_b = np.asarray(params["conv_b"])
    pos_conv_b = pe_abs @ abs_w + abs_b + pe_rel @ rel_w + rel_b + conv_b
    out = dict(params)
    out["pos_conv_b"] = jnp.asarray(pos_conv_b, dtype=jnp.float32)
    # pe / abs_* / rel_* / conv_b are no longer needed inside the jitted forward.
    for k in ("pe", "abs_w", "abs_b", "rel_w", "rel_b", "conv_b"):
        out.pop(k)
    return out


# ------------------------------------- main ------------------------------------------

if __name__ == "__main__":
    nb_combine = 2
    dec_dim = 32
    dim_feedforward = 64
    nhead_code = 4
    nhead_md = 4
    num_decoder_layers = 2
    enc_code_dim = 32
    enc_md_dim = 32
    ca_mul = 2
    rel_size = 1024
    n_code, n_md = 8, 6

    key = jax.random.PRNGKey(0)
    kc, km = jax.random.split(key)
    x_code_pooled = jax.random.normal(kc, (n_code, enc_code_dim), dtype=jnp.float32)
    x_md_pooled = jax.random.normal(km, (n_md, enc_md_dim), dtype=jnp.float32)

    params = init_params(jax.random.PRNGKey(42),
                         nb_combine=nb_combine, dec_dim=dec_dim,
                         dim_feedforward=dim_feedforward,
                         enc_code_dim=enc_code_dim, enc_md_dim=enc_md_dim,
                         ca_mul=ca_mul, num_decoder_layers=num_decoder_layers)
    params = prepare_derived(params, n_code, rel_size=rel_size)

    fwd = jax.jit(functools.partial(
        l2_transformer_forward,
        nb_combine=nb_combine, nhead_code=nhead_code, nhead_md=nhead_md,
        num_decoder_layers=num_decoder_layers, rescale_att=True))

    out = fwd(params, x_code_pooled, x_md_pooled)
    jax.block_until_ready(out)

    assert out["md_after_code"].shape == (n_md, n_code + 1)
    assert out["md_between_code"].shape == (n_md, n_code + 1)
    assert out["md_after_md"].shape == (n_md, n_md)
    assert all(bool(jnp.all(jnp.isfinite(v))) for v in out.values())
    print("KERNEL_OK")
</pallas_src>

<mosaic_0001>
module attributes {stable_mosaic.version = 11 : i64} {
  func.func @_l2_kernel(%arg0: memref<8x32xf32, #tpu.memory_space<vmem>>, %arg1: memref<6x32xf32, #tpu.memory_space<vmem>>, %arg2: memref<128x32xf32, #tpu.memory_space<vmem>>, %arg3: memref<9x32xf32, #tpu.memory_space<vmem>>, %arg4: memref<32x32xf32, #tpu.memory_space<vmem>>, %arg5: memref<1x32xf32, #tpu.memory_space<vmem>>, %arg6: memref<2x32x96xf32, #tpu.memory_space<vmem>>, %arg7: memref<2x1x96xf32, #tpu.memory_space<vmem>>, %arg8: memref<2x32x32xf32, #tpu.memory_space<vmem>>, %arg9: memref<2x1x32xf32, #tpu.memory_space<vmem>>, %arg10: memref<2x32x96xf32, #tpu.memory_space<vmem>>, %arg11: memref<2x1x96xf32, #tpu.memory_space<vmem>>, %arg12: memref<2x32x32xf32, #tpu.memory_space<vmem>>, %arg13: memref<2x1x32xf32, #tpu.memory_space<vmem>>, %arg14: memref<2x32x64xf32, #tpu.memory_space<vmem>>, %arg15: memref<2x1x64xf32, #tpu.memory_space<vmem>>, %arg16: memref<2x64x32xf32, #tpu.memory_space<vmem>>, %arg17: memref<2x1x32xf32, #tpu.memory_space<vmem>>, %arg18: memref<2x3x32xf32, #tpu.memory_space<vmem>>, %arg19: memref<2x3x32xf32, #tpu.memory_space<vmem>>, %arg20: memref<2x32x96xf32, #tpu.memory_space<vmem>>, %arg21: memref<2x1x96xf32, #tpu.memory_space<vmem>>, %arg22: memref<2x32x32xf32, #tpu.memory_space<vmem>>, %arg23: memref<2x1x32xf32, #tpu.memory_space<vmem>>, %arg24: memref<2x32x96xf32, #tpu.memory_space<vmem>>, %arg25: memref<2x1x96xf32, #tpu.memory_space<vmem>>, %arg26: memref<2x32x32xf32, #tpu.memory_space<vmem>>, %arg27: memref<2x1x32xf32, #tpu.memory_space<vmem>>, %arg28: memref<2x32x64xf32, #tpu.memory_space<vmem>>, %arg29: memref<2x1x64xf32, #tpu.memory_space<vmem>>, %arg30: memref<2x64x32xf32, #tpu.memory_space<vmem>>, %arg31: memref<2x1x32xf32, #tpu.memory_space<vmem>>, %arg32: memref<2x3x32xf32, #tpu.memory_space<vmem>>, %arg33: memref<2x3x32xf32, #tpu.memory_space<vmem>>, %arg34: memref<32x192xf32, #tpu.memory_space<vmem>>, %arg35: memref<1x192xf32, #tpu.memory_space<vmem>>, %arg36: memref<32x128xf32, #tpu.memory_space<vmem>>, %arg37: memref<1x128xf32, #tpu.memory_space<vmem>>, %arg38: memref<32x64xf32, #tpu.memory_space<vmem>>, %arg39: memref<1x64xf32, #tpu.memory_space<vmem>>, %arg40: memref<6x128xf32, #tpu.memory_space<vmem>>, %arg41: memref<12x32xf32, #tpu.memory_space<vmem>>) attributes {dimension_semantics = [], scalar_prefetch = 0 : i64, scratch_operands = 1 : i64, tpu.core_type = #tpu.core_type<tc>} {
    %cst = arith.constant 0.000000e+00 : f32
    %0 = vector.broadcast %cst : f32 to vector<12x32xf32>
    %c0 = arith.constant 0 : index
    %c0_0 = arith.constant 0 : index
    %1 = vector.load %arg41[%c0, %c0_0] : memref<12x32xf32, #tpu.memory_space<vmem>>, vector<12x32xf32>
    tpu.vector_store %arg41[%c0, %c0_0], %0 {strides = array<i32>} : memref<12x32xf32, #tpu.memory_space<vmem>>, vector<12x32xf32>,
    %c0_1 = arith.constant 0 : index
    %c0_2 = arith.constant 0 : index
    %2 = vector.load %arg0[%c0_1, %c0_2] : memref<8x32xf32, #tpu.memory_space<vmem>>, vector<8x32xf32>
    %c2 = arith.constant 2 : index
    %c0_3 = arith.constant 0 : index
    %3 = vector.load %arg41[%c2, %c0_3] : memref<12x32xf32, #tpu.memory_space<vmem>>, vector<8x32xf32>
    tpu.vector_store %arg41[%c2, %c0_3], %2 {strides = array<i32>} : memref<12x32xf32, #tpu.memory_space<vmem>>, vector<8x32xf32>,
    %c0_4 = arith.constant 0 : index
    %c0_5 = arith.constant 0 : index
    %4 = vector.load %arg41[%c0_4, %c0_5] : memref<12x32xf32, #tpu.memory_space<vmem>>, vector<9x32xf32>
    %c1 = arith.constant 1 : index
    %c0_6 = arith.constant 0 : index
    %5 = vector.load %arg41[%c1, %c0_6] : memref<12x32xf32, #tpu.memory_space<vmem>>, vector<9x32xf32>
    %c2_7 = arith.constant 2 : index
    %c0_8 = arith.constant 0 : index
    %6 = vector.load %arg41[%c2_7, %c0_8] : memref<12x32xf32, #tpu.memory_space<vmem>>, vector<9x32xf32>
    %c3 = arith.constant 3 : index
    %c0_9 = arith.constant 0 : index
    %7 = vector.load %arg41[%c3, %c0_9] : memref<12x32xf32, #tpu.memory_space<vmem>>, vector<9x32xf32>
    %8 = tpu.concatenate %4, %5, %6, %7 in 1 : vector<9x32xf32>, vector<9x32xf32>, vector<9x32xf32>, vector<9x32xf32> -> vector<9x128xf32>
    %c0_10 = arith.constant 0 : index
    %c0_11 = arith.constant 0 : index
    %9 = vector.load %arg2[%c0_10, %c0_11] : memref<128x32xf32, #tpu.memory_space<vmem>>, vector<128x32xf32>
    %cst_12 = arith.constant dense<0.000000e+00> : vector<9x32xf32>
    %10 = tpu.matmul %8, %9, %cst_12 {dimension_numbers = #tpu.dot_dimension_numbers<[1], [0], [0], [1], [0, 0, 1, 1], [], []>} : vector<9x128xf32>, vector<128x32xf32>, vector<9x32xf32> -> vector<9x32xf32>
    %c0_13 = arith.constant 0 : index
    %c0_14 = arith.constant 0 : index
    %11 = vector.load %arg3[%c0_13, %c0_14] : memref<9x32xf32, #tpu.memory_space<vmem>>, vector<9x32xf32>
    %12 = arith.addf %10, %11 : vector<9x32xf32>
    %c0_15 = arith.constant 0 : index
    %c0_16 = arith.constant 0 : index
    %13 = vector.load %arg1[%c0_15, %c0_16] : memref<6x32xf32, #tpu.memory_space<vmem>>, vector<6x32xf32>
    %c0_17 = arith.constant 0 : index
    %c0_18 = arith.constant 0 : index
    %14 = vector.load %arg4[%c0_17, %c0_18] : memref<32x32xf32, #tpu.memory_space<vmem>>, vector<32x32xf32>
    %cst_19 = arith.constant dense<0.000000e+00> : vector<6x32xf32>
    %15 = tpu.matmul %13, %14, %cst_19 {dimension_numbers = #tpu.dot_dimension_numbers<[1], [0], [0], [1], [0, 0, 1, 1], [], []>} : vector<6x32xf32>, vector<32x32xf32>, vector<6x32xf32> -> vector<6x32xf32>
    %c0_20 = arith.constant 0 : index
    %c0_21 = arith.constant 0 : index
    %16 = vector.load %arg5[%c0_20, %c0_21] : memref<1x32xf32, #tpu.memory_space<vmem>>, vector<1x32xf32>
    %17 = vector.broadcast %16 : vector<1x32xf32> to vector<6x32xf32>
    %18 = arith.addf %15, %17 : vector<6x32xf32>
    %c0_22 = arith.constant 0 : index
    %c0_23 = arith.constant 0 : index
    %c0_24 = arith.constant 0 : index
    %19 = vector.load %arg6[%c0_22, %c0_23, %c0_24] : memref<2x32x96xf32, #tpu.memory_space<vmem>>, vector<1x32x96xf32>
    %20 = vector.shape_cast %19 : vector<1x32x96xf32> to vector<32x96xf32>
    %c0_25 = arith.constant 0 : index
    %c0_26 = arith.constant 0 : index
    %c0_27 = arith.constant 0 : index
    %21 = vector.load %arg7[%c0_25, %c0_26, %c0_27] : memref<2x1x96xf32, #tpu.memory_space<vmem>>, vector<1x1x96xf32>
    %22 = vector.shape_cast %21 : vector<1x1x96xf32> to vector<1x96xf32>
    %c0_28 = arith.constant 0 : index
    %c0_29 = arith.constant 0 : index
    %c0_30 = arith.constant 0 : index
    %23 = vector.load %arg8[%c0_28, %c0_29, %c0_30] : memref<2x32x32xf32, #tpu.memory_space<vmem>>, vector<1x32x32xf32>
    %24 = vector.shape_cast %23 : vector<1x32x32xf32> to vector<32x32xf32>
    %c0_31 = arith.constant 0 : index
    %c0_32 = arith.constant 0 : index
    %c0_33 = arith.constant 0 : index
    %25 = vector.load %arg9[%c0_31, %c0_32, %c0_33] : memref<2x1x32xf32, #tpu.memory_space<vmem>>, vector<1x1x32xf32>
    %26 = vector.shape_cast %25 : vector<1x1x32xf32> to vector<1x32xf32>
    %c0_34 = arith.constant 0 : index
    %c0_35 = arith.constant 0 : index
    %c0_36 = arith.constant 0 : index
    %27 = vector.load %arg10[%c0_34, %c0_35, %c0_36] : memref<2x32x96xf32, #tpu.memory_space<vmem>>, vector<1x32x96xf32>
    %28 = vector.shape_cast %27 : vector<1x32x96xf32> to vector<32x96xf32>
    %c0_37 = arith.constant 0 : index
    %c0_38 = arith.constant 0 : index
    %c0_39 = arith.constant 0 : index
    %29 = vector.load %arg11[%c0_37, %c0_38, %c0_39] : memref<2x1x96xf32, #tpu.memory_space<vmem>>, vector<1x1x96xf32>
    %30 = vector.shape_cast %29 : vector<1x1x96xf32> to vector<1x96xf32>
    %c0_40 = arith.constant 0 : index
    %c0_41 = arith.constant 0 : index
    %c0_42 = arith.constant 0 : index
    %31 = vector.load %arg12[%c0_40, %c0_41, %c0_42] : memref<2x32x32xf32, #tpu.memory_space<vmem>>, vector<1x32x32xf32>
    %32 = vector.shape_cast %31 : vector<1x32x32xf32> to vector<32x32xf32>
    %c0_43 = arith.constant 0 : index
    %c0_44 = arith.constant 0 : index
    %c0_45 = arith.constant 0 : index
    %33 = vector.load %arg13[%c0_43, %c0_44, %c0_45] : memref<2x1x32xf32, #tpu.memory_space<vmem>>, vector<1x1x32xf32>
    %34 = vector.shape_cast %33 : vector<1x1x32xf32> to vector<1x32xf32>
    %c0_46 = arith.constant 0 : index
    %c0_47 = arith.constant 0 : index
    %c0_48 = arith.constant 0 : index
    %35 = vector.load %arg14[%c0_46, %c0_47, %c0_48] : memref<2x32x64xf32, #tpu.memory_space<vmem>>, vector<1x32x64xf32>
    %36 = vector.shape_cast %35 : vector<1x32x64xf32> to vector<32x64xf32>
    %c0_49 = arith.constant 0 : index
    %c0_50 = arith.constant 0 : index
    %c0_51 = arith.constant 0 : index
    %37 = vector.load %arg15[%c0_49, %c0_50, %c0_51] : memref<2x1x64xf32, #tpu.memory_space<vmem>>, vector<1x1x64xf32>
    %38 = vector.shape_cast %37 : vector<1x1x64xf32> to vector<1x64xf32>
    %c0_52 = arith.constant 0 : index
    %c0_53 = arith.constant 0 : index
    %c0_54 = arith.constant 0 : index
    %39 = vector.load %arg16[%c0_52, %c0_53, %c0_54] : memref<2x64x32xf32, #tpu.memory_space<vmem>>, vector<1x64x32xf32>
    %40 = vector.shape_cast %39 : vector<1x64x32xf32> to vector<64x32xf32>
    %c0_55 = arith.constant 0 : index
    %c0_56 = arith.constant 0 : index
    %c0_57 = arith.constant 0 : index
    %41 = vector.load %arg17[%c0_55, %c0_56, %c0_57] : memref<2x1x32xf32, #tpu.memory_space<vmem>>, vector<1x1x32xf32>
    %42 = vector.shape_cast %41 : vector<1x1x32xf32> to vector<1x32xf32>
    %c0_58 = arith.constant 0 : index
    %c0_59 = arith.constant 0 : index
    %c0_60 = arith.constant 0 : index
    %43 = vector.load %arg18[%c0_58, %c0_59, %c0_60] : memref<2x3x32xf32, #tpu.memory_space<vmem>>, vector<1x3x32xf32>
    %44 = vector.shape_cast %43 : vector<1x3x32xf32> to vector<3x32xf32>
    %c0_61 = arith.constant 0 : index
    %c0_62 = arith.constant 0 : index
    %c0_63 = arith.constant 0 : index
    %45 = vector.load %arg19[%c0_61, %c0_62, %c0_63] : memref<2x3x32xf32, #tpu.memory_space<vmem>>, vector<1x3x32xf32>
    %46 = vector.shape_cast %45 : vector<1x3x32xf32> to vector<3x32xf32>
    %c0_64 = arith.constant 0 : index
    %c0_65 = arith.constant 0 : index
    %c0_66 = arith.constant 0 : index
    %47 = vector.load %arg20[%c0_64, %c0_65, %c0_66] : memref<2x32x96xf32, #tpu.memory_space<vmem>>, vector<1x32x96xf32>
    %48 = vector.shape_cast %47 : vector<1x32x96xf32> to vector<32x96xf32>
    %c0_67 = arith.constant 0 : index
    %c0_68 = arith.constant 0 : index
    %c0_69 = arith.constant 0 : index
    %49 = vector.load %arg21[%c0_67, %c0_68, %c0_69] : memref<2x1x96xf32, #tpu.memory_space<vmem>>, vector<1x1x96xf32>
    %50 = vector.shape_cast %49 : vector<1x1x96xf32> to vector<1x96xf32>
    %c0_70 = arith.constant 0 : index
    %c0_71 = arith.constant 0 : index
    %c0_72 = arith.constant 0 : index
    %51 = vector.load %arg22[%c0_70, %c0_71, %c0_72] : memref<2x32x32xf32, #tpu.memory_space<vmem>>, vector<1x32x32xf32>
    %52 = vector.shape_cast %51 : vector<1x32x32xf32> to vector<32x32xf32>
    %c0_73 = arith.constant 0 : index
    %c0_74 = arith.constant 0 : index
    %c0_75 = arith.constant 0 : index
    %53 = vector.load %arg23[%c0_73, %c0_74, %c0_75] : memref<2x1x32xf32, #tpu.memory_space<vmem>>, vector<1x1x32xf32>
    %54 = vector.shape_cast %53 : vector<1x1x32xf32> to vector<1x32xf32>
    %c0_76 = arith.constant 0 : index
    %c0_77 = arith.constant 0 : index
    %c0_78 = arith.constant 0 : index
    %55 = vector.load %arg24[%c0_76, %c0_77, %c0_78] : memref<2x32x96xf32, #tpu.memory_space<vmem>>, vector<1x32x96xf32>
    %56 = vector.shape_cast %55 : vector<1x32x96xf32> to vector<32x96xf32>
    %c0_79 = arith.constant 0 : index
    %c0_80 = arith.constant 0 : index
    %c0_81 = arith.constant 0 : index
    %57 = vector.load %arg25[%c0_79, %c0_80, %c0_81] : memref<2x1x96xf32, #tpu.memory_space<vmem>>, vector<1x1x96xf32>
    %58 = vector.shape_cast %57 : vector<1x1x96xf32> to vector<1x96xf32>
    %c0_82 = arith.constant 0 : index
    %c0_83 = arith.constant 0 : index
    %c0_84 = arith.constant 0 : index
    %59 = vector.load %arg26[%c0_82, %c0_83, %c0_84] : memref<2x32x32xf32, #tpu.memory_space<vmem>>, vector<1x32x32xf32>
    %60 = vector.shape_cast %59 : vector<1x32x32xf32> to vector<32x32xf32>
    %c0_85 = arith.constant 0 : index
    %c0_86 = arith.constant 0 : index
    %c0_87 = arith.constant 0 : index
    %61 = vector.load %arg27[%c0_85, %c0_86, %c0_87] : memref<2x1x32xf32, #tpu.memory_space<vmem>>, vector<1x1x32xf32>
    %62 = vector.shape_cast %61 : vector<1x1x32xf32> to vector<1x32xf32>
    %c0_88 = arith.constant 0 : index
    %c0_89 = arith.constant 0 : index
    %c0_90 = arith.constant 0 : index
    %63 = vector.load %arg28[%c0_88, %c0_89, %c0_90] : memref<2x32x64xf32, #tpu.memory_space<vmem>>, vector<1x32x64xf32>
    %64 = vector.shape_cast %63 : vector<1x32x64xf32> to vector<32x64xf32>
    %c0_91 = arith.constant 0 : index
    %c0_92 = arith.constant 0 : index
    %c0_93 = arith.constant 0 : index
    %65 = vector.load %arg29[%c0_91, %c0_92, %c0_93] : memref<2x1x64xf32, #tpu.memory_space<vmem>>, vector<1x1x64xf32>
    %66 = vector.shape_cast %65 : vector<1x1x64xf32> to vector<1x64xf32>
    %c0_94 = arith.constant 0 : index
    %c0_95 = arith.constant 0 : index
    %c0_96 = arith.constant 0 : index
    %67 = vector.load %arg30[%c0_94, %c0_95, %c0_96] : memref<2x64x32xf32, #tpu.memory_space<vmem>>, vector<1x64x32xf32>
    %68 = vector.shape_cast %67 : vector<1x64x32xf32> to vector<64x32xf32>
    %c0_97 = arith.constant 0 : index
    %c0_98 = arith.constant 0 : index
    %c0_99 = arith.constant 0 : index
    %69 = vector.load %arg31[%c0_97, %c0_98, %c0_99] : memref<2x1x32xf32, #tpu.memory_space<vmem>>, vector<1x1x32xf32>
    %70 = vector.shape_cast %69 : vector<1x1x32xf32> to vector<1x32xf32>
    %c0_100 = arith.constant 0 : index
    %c0_101 = arith.constant 0 : index
    %c0_102 = arith.constant 0 : index
    %71 = vector.load %arg32[%c0_100, %c0_101, %c0_102] : memref<2x3x32xf32, #tpu.memory_space<vmem>>, vector<1x3x32xf32>
    %72 = vector.shape_cast %71 : vector<1x3x32xf32> to vector<3x32xf32>
    %c0_103 = arith.constant 0 : index
    %c0_104 = arith.constant 0 : index
    %c0_105 = arith.constant 0 : index
    %73 = vector.load %arg33[%c0_103, %c0_104, %c0_105] : memref<2x3x32xf32, #tpu.memory_space<vmem>>, vector<1x3x32xf32>
    %74 = vector.shape_cast %73 : vector<1x3x32xf32> to vector<3x32xf32>
    %cst_106 = arith.constant dense<0.000000e+00> : vector<9x96xf32>
    %75 = tpu.matmul %12, %20, %cst_106 {dimension_numbers = #tpu.dot_dimension_numbers<[1], [0], [0], [1], [0, 0, 1, 1], [], []>} : vector<9x32xf32>, vector<32x96xf32>, vector<9x96xf32> -> vector<9x96xf32>
    %76 = vector.broadcast %22 : vector<1x96xf32> to vector<9x96xf32>
    %77 = arith.addf %75, %76 : vector<9x96xf32>
    %78 = vector.extract_strided_slice %77 {offsets = [0, 0], sizes = [9, 32], strides = [1, 1]} : vector<9x96xf32> to vector<9x32xf32>
    %79 = vector.extract_strided_slice %77 {offsets = [0, 32], sizes = [9, 32], strides = [1, 1]} : vector<9x96xf32> to vector<9x32xf32>
    %80 = vector.extract_strided_slice %77 {offsets = [0, 64], sizes = [9, 32], strides = [1, 1]} : vector<9x96xf32> to vector<9x32xf32>
    %cst_107 = arith.constant 0.000000e+00 : f32
    %81 = vector.broadcast %cst_107 : f32 to vector<9x32xf32>
    %82 = vector.extract_strided_slice %78 {offsets = [0, 0], sizes = [9, 8], strides = [1, 1]} : vector<9x32xf32> to vector<9x8xf32>
    %83 = vector.extract_strided_slice %79 {offsets = [0, 0], sizes = [9, 8], strides = [1, 1]} : vector<9x32xf32> to vector<9x8xf32>
    %84 = vector.extract_strided_slice %80 {offsets = [0, 0], sizes = [9, 8], strides = [1, 1]} : vector<9x32xf32> to vector<9x8xf32>
    %cst_108 = arith.constant dense<0.000000e+00> : vector<9x9xf32>
    %85 = tpu.matmul %82, %83, %cst_108 {dimension_numbers = #tpu.dot_dimension_numbers<[1], [1], [0], [0], [0, 0, 1, 0], [], []>} : vector<9x8xf32>, vector<9x8xf32>, vector<9x9xf32> -> vector<9x9xf32>
    %cst_109 = arith.constant 0.353553385 : f32
    %86 = vector.broadcast %cst_109 : f32 to vector<9x9xf32>
    %87 = arith.mulf %85, %86 : vector<9x9xf32>
    %cst_110 = arith.constant dense<0xFF800000> : vector<9xf32>
    %88 = vector.multi_reduction <maximumf>, %87, %cst_110 [1] : vector<9x9xf32> to vector<9xf32>
    %89 = vector.shape_cast %88 : vector<9xf32> to vector<9x1xf32>
    %90 = vector.broadcast %89 : vector<9x1xf32> to vector<9x9xf32>
    %91 = arith.subf %87, %90 : vector<9x9xf32>
    %92 = math.exp %91 : vector<9x9xf32>
    %cst_111 = arith.constant dense<0.000000e+00> : vector<9xf32>
    %93 = vector.multi_reduction <add>, %92, %cst_111 [1] : vector<9x9xf32> to vector<9xf32>
    %94 = vector.shape_cast %93 : vector<9xf32> to vector<9x1xf32>
    %95 = vector.broadcast %94 : vector<9x1xf32> to vector<9x9xf32>
    %96 = arith.divf %92, %95 : vector<9x9xf32>
    %cst_112 = arith.constant dense<0.000000e+00> : vector<9x8xf32>
    %97 = tpu.matmul %96, %84, %cst_112 {dimension_numbers = #tpu.dot_dimension_numbers<[1], [0], [0], [1], [0, 0, 1, 1], [], []>} : vector<9x9xf32>, vector<9x8xf32>, vector<9x8xf32> -> vector<9x8xf32>
    %98 = vector.extract_strided_slice %24 {offsets = [0, 0], sizes = [8, 32], strides = [1, 1]} : vector<32x32xf32> to vector<8x32xf32>
    %cst_113 = arith.constant dense<0.000000e+00> : vector<9x32xf32>
    %99 = tpu.matmul %97, %98, %cst_113 {dimension_numbers = #tpu.dot_dimension_numbers<[1], [0], [0], [1], [0, 0, 1, 1], [], []>} : vector<9x8xf32>, vector<8x32xf32>, vector<9x32xf32> -> vector<9x32xf32>
    %100 = arith.addf %81, %99 : vector<9x32xf32>
    %101 = vector.extract_strided_slice %78 {offsets = [0, 8], sizes = [9, 8], strides = [1, 1]} : vector<9x32xf32> to vector<9x8xf32>
    %102 = vector.extract_strided_slice %79 {offsets = [0, 8], sizes = [9, 8], strides = [1, 1]} : vector<9x32xf32> to vector<9x8xf32>
    %103 = vector.extract_strided_slice %80 {offsets = [0, 8], sizes = [9, 8], strides = [1, 1]} : vector<9x32xf32> to vector<9x8xf32>
    %cst_114 = arith.constant dense<0.000000e+00> : vector<9x9xf32>
    %104 = tpu.matmul %101, %102, %cst_114 {dimension_numbers = #tpu.dot_dimension_numbers<[1], [1], [0], [0], [0, 0, 1, 0], [], []>} : vector<9x8xf32>, vector<9x8xf32>, vector<9x9xf32> -> vector<9x9xf32>
    %cst_115 = arith.constant 0.353553385 : f32
    %105 = vector.broadcast %cst_115 : f32 to vector<9x9xf32>
    %106 = arith.mulf %104, %105 : vector<9x9xf32>
    %cst_116 = arith.constant dense<0xFF800000> : vector<9xf32>
    %107 = vector.multi_reduction <maximumf>, %106, %cst_116 [1] : vector<9x9xf32> to vector<9xf32>
    %108 = vector.shape_cast %107 : vector<9xf32> to vector<9x1xf32>
    %109 = vector.broadcast %108 : vector<9x1xf32> to vector<9x9xf32>
    %110 = arith.subf %106, %109 : vector<9x9xf32>
    %111 = math.exp %110 : vector<9x9xf32>
    %cst_117 = arith.constant dense<0.000000e+00> : vector<9xf32>
    %112 = vector.multi_reduction <add>, %111, %cst_117 [1] : vector<9x9xf32> to vector<9xf32>
    %113 = vector.shape_cast %112 : vector<9xf32> to vector<9x1xf32>
    %114 = vector.broadcast %113 : vector<9x1xf32> to vector<9x9xf32>
    %115 = arith.divf %111, %114 : vector<9x9xf32>
    %cst_118 = arith.constant dense<0.000000e+00> : vector<9x8xf32>
    %116 = tpu.matmul %115, %103, %cst_118 {dimension_numbers = #tpu.dot_dimension_numbers<[1], [0], [0], [1], [0, 0, 1, 1], [], []>} : vector<9x9xf32>, vector<9x8xf32>, vector<9x8xf32> -> vector<9x8xf32>
    %117 = vector.extract_strided_slice %24 {offsets = [8, 0], sizes = [8, 32], strides = [1, 1]} : vector<32x32xf32> to vector<8x32xf32>
    %cst_119 = arith.constant dense<0.000000e+00> : vector<9x32xf32>
    %118 = tpu.matmul %116, %117, %cst_119 {dimension_numbers = #tpu.dot_dimension_numbers<[1], [0], [0], [1], [0, 0, 1, 1], [], []>} : vector<9x8xf32>, vector<8x32xf32>, vector<9x32xf32> -> vector<9x32xf32>
    %119 = arith.addf %100, %118 : vector<9x32xf32>
    %120 = vector.extract_strided_slice %78 {offsets = [0, 16], sizes = [9, 8], strides = [1, 1]} : vector<9x32xf32> to vector<9x8xf32>
    %121 = vector.extract_strided_slice %79 {offsets = [0, 16], sizes = [9, 8], strides = [1, 1]} : vector<9x32xf32> to vector<9x8xf32>
    %122 = vector.extract_strided_slice %80 {offsets = [0, 16], sizes = [9, 8], strides = [1, 1]} : vector<9x32xf32> to vector<9x8xf32>
    %cst_120 = arith.constant dense<0.000000e+00> : vector<9x9xf32>
    %123 = tpu.matmul %120, %121, %cst_120 {dimension_numbers = #tpu.dot_dimension_numbers<[1], [1], [0], [0], [0, 0, 1, 0], [], []>} : vector<9x8xf32>, vector<9x8xf32>, vector<9x9xf32> -> vector<9x9xf32>
    %cst_121 = arith.constant 0.353553385 : f32
    %124 = vector.broadcast %cst_121 : f32 to vector<9x9xf32>
    %125 = arith.mulf %123, %124 : vector<9x9xf32>
    %cst_122 = arith.constant dense<0xFF800000> : vector<9xf32>
    %126 = vector.multi_reduction <maximumf>, %125, %cst_122 [1] : vector<9x9xf32> to vector<9xf32>
    %127 = vector.shape_cast %126 : vector<9xf32> to vector<9x1xf32>
    %128 = vector.broadcast %127 : vector<9x1xf32> to vector<9x9xf32>
    %129 = arith.subf %125, %128 : vector<9x9xf32>
    %130 = math.exp %129 : vector<9x9xf32>
    %cst_123 = arith.constant dense<0.000000e+00> : vector<9xf32>
    %131 = vector.multi_reduction <add>, %130, %cst_123 [1] : vector<9x9xf32> to vector<9xf32>
    %132 = vector.shape_cast %131 : vector<9xf32> to vector<9x1xf32>
    %133 = vector.broadcast %132 : vector<9x1xf32> to vector<9x9xf32>
    %134 = arith.divf %130, %133 : vector<9x9xf32>
    %cst_124 = arith.constant dense<0.000000e+00> : vector<9x8xf32>
    %135 = tpu.matmul %134, %122, %cst_124 {dimension_numbers = #tpu.dot_dimension_numbers<[1], [0], [0], [1], [0, 0, 1, 1], [], []>} : vector<9x9xf32>, vector<9x8xf32>, vector<9x8xf32> -> vector<9x8xf32>
    %136 = vector.extract_strided_slice %24 {offsets = [16, 0], sizes = [8, 32], strides = [1, 1]} : vector<32x32xf32> to vector<8x32xf32>
    %cst_125 = arith.constant dense<0.000000e+00> : vector<9x32xf32>
    %137 = tpu.matmul %135, %136, %cst_125 {dimension_numbers = #tpu.dot_dimension_numbers<[1], [0], [0], [1], [0, 0, 1, 1], [], []>} : vector<9x8xf32>, vector<8x32xf32>, vector<9x32xf32> -> vector<9x32xf32>
    %138 = arith.addf %119, %137 : vector<9x32xf32>
    %139 = vector.extract_strided_slice %78 {offsets = [0, 24], sizes = [9, 8], strides = [1, 1]} : vector<9x32xf32> to vector<9x8xf32>
    %140 = vector.extract_strided_slice %79 {offsets = [0, 24], sizes = [9, 8], strides = [1, 1]} : vector<9x32xf32> to vector<9x8xf32>
    %141 = vector.extract_strided_slice %80 {offsets = [0, 24], sizes = [9, 8], strides = [1, 1]} : vector<9x32xf32> to vector<9x8xf32>
    %cst_126 = arith.constant dense<0.000000e+00> : vector<9x9xf32>
    %142 = tpu.matmul %139, %140, %cst_126 {dimension_numbers = #tpu.dot_dimension_numbers<[1], [1], [0], [0], [0, 0, 1, 0], [], []>} : vector<9x8xf32>, vector<9x8xf32>, vector<9x9xf32> -> vector<9x9xf32>
    %cst_127 = arith.constant 0.353553385 : f32
    %143 = vector.broadcast %cst_127 : f32 to vector<9x9xf32>
    %144 = arith.mulf %142, %143 : vector<9x9xf32>
    %cst_128 = arith.constant dense<0xFF800000> : vector<9xf32>
    %145 = vector.multi_reduction <maximumf>, %144, %cst_128 [1] : vector<9x9xf32> to vector<9xf32>
    %146 = vector.shape_cast %145 : vector<9xf32> to vector<9x1xf32>
    %147 = vector.broadcast %146 : vector<9x1xf32> to vector<9x9xf32>
    %148 = arith.subf %144, %147 : vector<9x9xf32>
    %149 = math.exp %148 : vector<9x9xf32>
    %cst_129 = arith.constant dense<0.000000e+00> : vector<9xf32>
    %150 = vector.multi_reduction <add>, %149, %cst_129 [1] : vector<9x9xf32> to vector<9xf32>
    %151 = vector.shape_cast %150 : vector<9xf32> to vector<9x1xf32>
    %152 = vector.broadcast %151 : vector<9x1xf32> to vector<9x9xf32>
    %153 = arith.divf %149, %152 : vector<9x9xf32>
    %cst_130 = arith.constant dense<0.000000e+00> : vector<9x8xf32>
    %154 = tpu.matmul %153, %141, %cst_130 {dimension_numbers = #tpu.dot_dimension_numbers<[1], [0], [0], [1], [0, 0, 1, 1], [], []>} : vector<9x9xf32>, vector<9x8xf32>, vector<9x8xf32> -> vector<9x8xf32>
    %155 = vector.extract_strided_slice %24 {offsets = [24, 0], sizes = [8, 32], strides = [1, 1]} : vector<32x32xf32> to vector<8x32xf32>
    %cst_131 = arith.constant dense<0.000000e+00> : vector<9x32xf32>
    %156 = tpu.matmul %154, %155, %cst_131 {dimension_numbers = #tpu.dot_dimension_numbers<[1], [0], [0], [1], [0, 0, 1, 1], [], []>} : vector<9x8xf32>, vector<8x32xf32>, vector<9x32xf32> -> vector<9x32xf32>
    %157 = arith.addf %138, %156 : vector<9x32xf32>
    %158 = vector.broadcast %26 : vector<1x32xf32> to vector<9x32xf32>
    %159 = arith.addf %157, %158 : vector<9x32xf32>
    %160 = arith.addf %12, %159 : vector<9x32xf32>
    %161 = vector.extract_strided_slice %44 {offsets = [0, 0], sizes = [1, 32], strides = [1, 1]} : vector<3x32xf32> to vector<1x32xf32>
    %162 = vector.extract_strided_slice %46 {offsets = [0, 0], sizes = [1, 32], strides = [1, 1]} : vector<3x32xf32> to vector<1x32xf32>
    %cst_132 = arith.constant dense<0.000000e+00> : vector<9xf32>
    %163 = vector.multi_reduction <add>, %160, %cst_132 [1] : vector<9x32xf32> to vector<9xf32>
    %164 = vector.shape_cast %163 : vector<9xf32> to vector<9x1xf32>
    %cst_133 = arith.constant 3.200000e+01 : f32
    %165 = vector.broadcast %cst_133 : f32 to vector<9x1xf32>
    %166 = arith.divf %164, %165 : vector<9x1xf32>
    %167 = vector.broadcast %166 : vector<9x1xf32> to vector<9x32xf32>
    %168 = arith.subf %160, %167 : vector<9x32xf32>
    %169 = arith.mulf %168, %168 : vector<9x32xf32>
    %cst_134 = arith.constant dense<0.000000e+00> : vector<9xf32>
    %170 = vector.multi_reduction <add>, %169, %cst_134 [1] : vector<9x32xf32> to vector<9xf32>
    %171 = vector.shape_cast %170 : vector<9xf32> to vector<9x1xf32>
    %cst_135 = arith.constant 3.200000e+01 : f32
    %172 = vector.broadcast %cst_135 : f32 to vector<9x1xf32>
    %173 = arith.divf %171, %172 : vector<9x1xf32>
    %174 = vector.broadcast %166 : vector<9x1xf32> to vector<9x32xf32>
    %175 = arith.subf %160, %174 : vector<9x32xf32>
    %cst_136 = arith.constant 9.99999974E-6 : f32
    %176 = vector.broadcast %cst_136 : f32 to vector<9x1xf32>
    %177 = arith.addf %173, %176 : vector<9x1xf32>
    %178 = math.rsqrt %177 : vector<9x1xf32>
    %179 = vector.broadcast %178 : vector<9x1xf32> to vector<9x32xf32>
    %180 = arith.mulf %175, %179 : vector<9x32xf32>
    %181 = vector.broadcast %161 : vector<1x32xf32> to vector<9x32xf32>
    %182 = arith.mulf %180, %181 : vector<9x32xf32>
    %183 = vector.broadcast %162 : vector<1x32xf32> to vector<9x32xf32>
    %184 = arith.addf %182, %183 : vector<9x32xf32>
    %185 = vector.extract_strided_slice %28 {offsets = [0, 0], sizes = [32, 32], strides = [1, 1]} : vector<32x96xf32> to vector<32x32xf32>
    %cst_137 = arith.constant dense<0.000000e+00> : vector<9x32xf32>
    %186 = tpu.matmul %184, %185, %cst_137 {dimension_numbers = #tpu.dot_dimension_numbers<[1], [0], [0], [1], [0, 0, 1, 1], [], []>} : vector<9x32xf32>, vector<32x32xf32>, vector<9x32xf32> -> vector<9x32xf32>
    %187 = vector.extract_strided_slice %30 {offsets = [0, 0], sizes = [1, 32], strides = [1, 1]} : vector<1x96xf32> to vector<1x32xf32>
    %188 = vector.broadcast %187 : vector<1x32xf32> to vector<9x32xf32>
    %189 = arith.addf %186, %188 : vector<9x32xf32>
    %190 = vector.extract_strided_slice %28 {offsets = [0, 32], sizes = [32, 64], strides = [1, 1]} : vector<32x96xf32> to vector<32x64xf32>
    %cst_138 = arith.constant dense<0.000000e+00> : vector<6x64xf32>
    %191 = tpu.matmul %18, %190, %cst_138 {dimension_numbers = #tpu.dot_dimension_numbers<[1], [0], [0], [1], [0, 0, 1, 1], [], []>} : vector<6x32xf32>, vector<32x64xf32>, vector<6x64xf32> -> vector<6x64xf32>
    %192 = vector.extract_strided_slice %30 {offsets = [0, 32], sizes = [1, 64], strides = [1, 1]} : vector<1x96xf32> to vector<1x64xf32>
    %193 = vector.broadcast %192 : vector<1x64xf32> to vector<6x64xf32>
    %194 = arith.addf %191, %193 : vector<6x64xf32>
    %195 = vector.extract_strided_slice %194 {offsets = [0, 0], sizes = [6, 32], strides = [1, 1]} : vector<6x64xf32> to vector<6x32xf32>
    %196 = vector.extract_strided_slice %194 {offsets = [0, 32], sizes = [6, 32], strides = [1, 1]} : vector<6x64xf32> to vector<6x32xf32>
    %cst_139 = arith.constant 0.000000e+00 : f32
    %197 = vector.broadcast %cst_139 : f32 to vector<9x32xf32>
    %198 = vector.extract_strided_slice %189 {offsets = [0, 0], sizes = [9, 8], strides = [1, 1]} : vector<9x32xf32> to vector<9x8xf32>
    %199 = vector.extract_strided_slice %195 {offsets = [0, 0], sizes = [6, 8], strides = [1, 1]} : vector<6x32xf32> to vector<6x8xf32>
    %200 = vector.extract_strided_slice %196 {offsets = [0, 0], sizes = [6, 8], strides = [1, 1]} : vector<6x32xf32> to vector<6x8xf32>
    %cst_140 = arith.constant dense<0.000000e+00> : vector<9x6xf32>
    %201 = tpu.matmul %198, %199, %cst_140 {dimension_numbers = #tpu.dot_dimension_numbers<[1], [1], [0], [0], [0, 0, 1, 0], [], []>} : vector<9x8xf32>, vector<6x8xf32>, vector<9x6xf32> -> vector<9x6xf32>
    %cst_141 = arith.constant 0.353553385 : f32
    %202 = vector.broadcast %cst_141 : f32 to vector<9x6xf32>
    %203 = arith.mulf %201, %202 : vector<9x6xf32>
    %cst_142 = arith.constant dense<0xFF800000> : vector<9xf32>
    %204 = vector.multi_reduction <maximumf>, %203, %cst_142 [1] : vector<9x6xf32> to vector<9xf32>
    %205 = vector.shape_cast %204 : vector<9xf32> to vector<9x1xf32>
    %206 = vector.broadcast %205 : vector<9x1xf32> to vector<9x6xf32>
    %207 = arith.subf %203, %206 : vector<9x6xf32>
    %208 = math.exp %207 : vector<9x6xf32>
    %cst_143 = arith.constant dense<0.000000e+00> : vector<9xf32>
    %209 = vector.multi_reduction <add>, %208, %cst_143 [1] : vector<9x6xf32> to vector<9xf32>
    %210 = vector.shape_cast %209 : vector<9xf32> to vector<9x1xf32>
    %211 = vector.broadcast %210 : vector<9x1xf32> to vector<9x6xf32>
    %212 = arith.divf %208, %211 : vector<9x6xf32>
    %cst_144 = arith.constant dense<0.000000e+00> : vector<9x8xf32>
    %213 = tpu.matmul %212, %200, %cst_144 {dimension_numbers = #tpu.dot_dimension_numbers<[1], [0], [0], [1], [0, 0, 1, 1], [], []>} : vector<9x6xf32>, vector<6x8xf32>, vector<9x8xf32> -> vector<9x8xf32>
    %214 = vector.extract_strided_slice %32 {offsets = [0, 0], sizes = [8, 32], strides = [1, 1]} : vector<32x32xf32> to vector<8x32xf32>
    %cst_145 = arith.constant dense<0.000000e+00> : vector<9x32xf32>
    %215 = tpu.matmul %213, %214, %cst_145 {dimension_numbers = #tpu.dot_dimension_numbers<[1], [0], [0], [1], [0, 0, 1, 1], [], []>} : vector<9x8xf32>, vector<8x32xf32>, vector<9x32xf32> -> vector<9x32xf32>
    %216 = arith.addf %197, %215 : vector<9x32xf32>
    %217 = vector.extract_strided_slice %189 {offsets = [0, 8], sizes = [9, 8], strides = [1, 1]} : vector<9x32xf32> to vector<9x8xf32>
    %218 = vector.extract_strided_slice %195 {offsets = [0, 8], sizes = [6, 8], strides = [1, 1]} : vector<6x32xf32> to vector<6x8xf32>
    %219 = vector.extract_strided_slice %196 {offsets = [0, 8], sizes = [6, 8], strides = [1, 1]} : vector<6x32xf32> to vector<6x8xf32>
    %cst_146 = arith.constant dense<0.000000e+00> : vector<9x6xf32>
    %220 = tpu.matmul %217, %218, %cst_146 {dimension_numbers = #tpu.dot_dimension_numbers<[1], [1], [0], [0], [0, 0, 1, 0], [], []>} : vector<9x8xf32>, vector<6x8xf32>, vector<9x6xf32> -> vector<9x6xf32>
    %cst_147 = arith.constant 0.353553385 : f32
    %221 = vector.broadcast %cst_147 : f32 to vector<9x6xf32>
    %222 = arith.mulf %220, %221 : vector<9x6xf32>
    %cst_148 = arith.constant dense<0xFF800000> : vector<9xf32>
    %223 = vector.multi_reduction <maximumf>, %222, %cst_148 [1] : vector<9x6xf32> to vector<9xf32>
    %224 = vector.shape_cast %223 : vector<9xf32> to vector<9x1xf32>
    %225 = vector.broadcast %224 : vector<9x1xf32> to vector<9x6xf32>
    %226 = arith.subf %222, %225 : vector<9x6xf32>
    %227 = math.exp %226 : vector<9x6xf32>
    %cst_149 = arith.constant dense<0.000000e+00> : vector<9xf32>
    %228 = vector.multi_reduction <add>, %227, %cst_149 [1] : vector<9x6xf32> to vector<9xf32>
    %229 = vector.shape_cast %228 : vector<9xf32> to vector<9x1xf32>
    %230 = vector.broadcast %229 : vector<9x1xf32> to vector<9x6xf32>
    %231 = arith.divf %227, %230 : vector<9x6xf32>
    %cst_150 = arith.constant dense<0.000000e+00> : vector<9x8xf32>
    %232 = tpu.matmul %231, %219, %cst_150 {dimension_numbers = #tpu.dot_dimension_numbers<[1], [0], [0], [1], [0, 0, 1, 1], [], []>} : vector<9x6xf32>, vector<6x8xf32>, vector<9x8xf32> -> vector<9x8xf32>
    %233 = vector.extract_strided_slice %32 {offsets = [8, 0], sizes = [8, 32], strides = [1, 1]} : vector<32x32xf32> to vector<8x32xf32>
    %cst_151 = arith.constant dense<0.000000e+00> : vector<9x32xf32>
    %234 = tpu.matmul %232, %233, %cst_151 {dimension_numbers = #tpu.dot_dimension_numbers<[1], [0], [0], [1], [0, 0, 1, 1], [], []>} : vector<9x8xf32>, vector<8x32xf32>, vector<9x32xf32> -> vector<9x32xf32>
    %235 = arith.addf %216, %234 : vector<9x32xf32>
    %236 = vector.extract_strided_slice %189 {offsets = [0, 16], sizes = [9, 8], strides = [1, 1]} : vector<9x32xf32> to vector<9x8xf32>
    %237 = vector.extract_strided_slice %195 {offsets = [0, 16], sizes = [6, 8], strides = [1, 1]} : vector<6x32xf32> to vector<6x8xf32>
    %238 = vector.extract_strided_slice %196 {offsets = [0, 16], sizes = [6, 8], strides = [1, 1]} : vector<6x32xf32> to vector<6x8xf32>
    %cst_152 = arith.constant dense<0.000000e+00> : vector<9x6xf32>
    %239 = tpu.matmul %236, %237, %cst_152 {dimension_numbers = #tpu.dot_dimension_numbers<[1], [1], [0], [0], [0, 0, 1, 0], [], []>} : vector<9x8xf32>, vector<6x8xf32>, vector<9x6xf32> -> vector<9x6xf32>
    %cst_153 = arith.constant 0.353553385 : f32
    %240 = vector.broadcast %cst_153 : f32 to vector<9x6xf32>
    %241 = arith.mulf %239, %240 : vector<9x6xf32>
    %cst_154 = arith.constant dense<0xFF800000> : vector<9xf32>
    %242 = vector.multi_reduction <maximumf>, %241, %cst_154 [1] : vector<9x6xf32> to vector<9xf32>
    %243 = vector.shape_cast %242 : vector<9xf32> to vector<9x1xf32>
    %244 = vector.broadcast %243 : vector<9x1xf32> to vector<9x6xf32>
    %245 = arith.subf %241, %244 : vector<9x6xf32>
    %246 = math.exp %245 : vector<9x6xf32>
    %cst_155 = arith.constant dense<0.000000e+00> : vector<9xf32>
    %247 = vector.multi_reduction <add>, %246, %cst_155 [1] : vector<9x6xf32> to vector<9xf32>
    %248 = vector.shape_cast %247 : vector<9xf32> to vector<9x1xf32>
    %249 = vector.broadcast %248 : vector<9x1xf32> to vector<9x6xf32>
    %250 = arith.divf %246, %249 : vector<9x6xf32>
    %cst_156 = arith.constant dense<0.000000e+00> : vector<9x8xf32>
    %251 = tpu.matmul %250, %238, %cst_156 {dimension_numbers = #tpu.dot_dimension_numbers<[1], [0], [0], [1], [0, 0, 1, 1], [], []>} : vector<9x6xf32>, vector<6x8xf32>, vector<9x8xf32> -> vector<9x8xf32>
    %252 = vector.extract_strided_slice %32 {offsets = [16, 0], sizes = [8, 32], strides = [1, 1]} : vector<32x32xf32> to vector<8x32xf32>
    %cst_157 = arith.constant dense<0.000000e+00> : vector<9x32xf32>
    %253 = tpu.matmul %251, %252, %cst_157 {dimension_numbers = #tpu.dot_dimension_numbers<[1], [0], [0], [1], [0, 0, 1, 1], [], []>} : vector<9x8xf32>, vector<8x32xf32>, vector<9x32xf32> -> vector<9x32xf32>
    %254 = arith.addf %235, %253 : vector<9x32xf32>
    %255 = vector.extract_strided_slice %189 {offsets = [0, 24], sizes = [9, 8], strides = [1, 1]} : vector<9x32xf32> to vector<9x8xf32>
    %256 = vector.extract_strided_slice %195 {offsets = [0, 24], sizes = [6, 8], strides = [1, 1]} : vector<6x32xf32> to vector<6x8xf32>
    %257 = vector.extract_strided_slice %196 {offsets = [0, 24], sizes = [6, 8], strides = [1, 1]} : vector<6x32xf32> to vector<6x8xf32>
    %cst_158 = arith.constant dense<0.000000e+00> : vector<9x6xf32>
    %258 = tpu.matmul %255, %256, %cst_158 {dimension_numbers = #tpu.dot_dimension_numbers<[1], [1], [0], [0], [0, 0, 1, 0], [], []>} : vector<9x8xf32>, vector<6x8xf32>, vector<9x6xf32> -> vector<9x6xf32>
    %cst_159 = arith.constant 0.353553385 : f32
    %259 = vector.broadcast %cst_159 : f32 to vector<9x6xf32>
    %260 = arith.mulf %258, %259 : vector<9x6xf32>
    %cst_160 = arith.constant dense<0xFF800000> : vector<9xf32>
    %261 = vector.multi_reduction <maximumf>, %260, %cst_160 [1] : vector<9x6xf32> to vector<9xf32>
    %262 = vector.shape_cast %261 : vector<9xf32> to vector<9x1xf32>
    %263 = vector.broadcast %262 : vector<9x1xf32> to vector<9x6xf32>
    %264 = arith.subf %260, %263 : vector<9x6xf32>
    %265 = math.exp %264 : vector<9x6xf32>
    %cst_161 = arith.constant dense<0.000000e+00> : vector<9xf32>
    %266 = vector.multi_reduction <add>, %265, %cst_161 [1] : vector<9x6xf32> to vector<9xf32>
    %267 = vector.shape_cast %266 : vector<9xf32> to vector<9x1xf32>
    %268 = vector.broadcast %267 : vector<9x1xf32> to vector<9x6xf32>
    %269 = arith.divf %265, %268 : vector<9x6xf32>
    %cst_162 = arith.constant dense<0.000000e+00> : vector<9x8xf32>
    %270 = tpu.matmul %269, %257, %cst_162 {dimension_numbers = #tpu.dot_dimension_numbers<[1], [0], [0], [1], [0, 0, 1, 1], [], []>} : vector<9x6xf32>, vector<6x8xf32>, vector<9x8xf32> -> vector<9x8xf32>
    %271 = vector.extract_strided_slice %32 {offsets = [24, 0], sizes = [8, 32], strides = [1, 1]} : vector<32x32xf32> to vector<8x32xf32>
    %cst_163 = arith.constant dense<0.000000e+00> : vector<9x32xf32>
    %272 = tpu.matmul %270, %271, %cst_163 {dimension_numbers = #tpu.dot_dimension_numbers<[1], [0], [0], [1], [0, 0, 1, 1], [], []>} : vector<9x8xf32>, vector<8x32xf32>, vector<9x32xf32> -> vector<9x32xf32>
    %273 = arith.addf %254, %272 : vector<9x32xf32>
    %274 = vector.broadcast %34 : vector<1x32xf32> to vector<9x32xf32>
    %275 = arith.addf %273, %274 : vector<9x32xf32>
    %276 = arith.addf %184, %275 : vector<9x32xf32>
    %277 = vector.extract_strided_slice %44 {offsets = [1, 0], sizes = [1, 32], strides = [1, 1]} : vector<3x32xf32> to vector<1x32xf32>
    %278 = vector.extract_strided_slice %46 {offsets = [1, 0], sizes = [1, 32], strides = [1, 1]} : vector<3x32xf32> to vector<1x32xf32>
    %cst_164 = arith.constant dense<0.000000e+00> : vector<9xf32>
    %279 = vector.multi_reduction <add>, %276, %cst_164 [1] : vector<9x32xf32> to vector<9xf32>
    %280 = vector.shape_cast %279 : vector<9xf32> to vector<9x1xf32>
    %cst_165 = arith.constant 3.200000e+01 : f32
    %281 = vector.broadcast %cst_165 : f32 to vector<9x1xf32>
    %282 = arith.divf %280, %281 : vector<9x1xf32>
    %283 = vector.broadcast %282 : vector<9x1xf32> to vector<9x32xf32>
    %284 = arith.subf %276, %283 : vector<9x32xf32>
    %285 = arith.mulf %284, %284 : vector<9x32xf32>
    %cst_166 = arith.constant dense<0.000000e+00> : vector<9xf32>
    %286 = vector.multi_reduction <add>, %285, %cst_166 [1] : vector<9x32xf32> to vector<9xf32>
    %287 = vector.shape_cast %286 : vector<9xf32> to vector<9x1xf32>
    %cst_167 = arith.constant 3.200000e+01 : f32
    %288 = vector.broadcast %cst_167 : f32 to vector<9x1xf32>
    %289 = arith.divf %287, %288 : vector<9x1xf32>
    %290 = vector.broadcast %282 : vector<9x1xf32> to vector<9x32xf32>
    %291 = arith.subf %276, %290 : vector<9x32xf32>
    %cst_168 = arith.constant 9.99999974E-6 : f32
    %292 = vector.broadcast %cst_168 : f32 to vector<9x1xf32>
    %293 = arith.addf %289, %292 : vector<9x1xf32>
    %294 = math.rsqrt %293 : vector<9x1xf32>
    %295 = vector.broadcast %294 : vector<9x1xf32> to vector<9x32xf32>
    %296 = arith.mulf %291, %295 : vector<9x32xf32>
    %297 = vector.broadcast %277 : vector<1x32xf32> to vector<9x32xf32>
    %298 = arith.mulf %296, %297 : vector<9x32xf32>
    %299 = vector.broadcast %278 : vector<1x32xf32> to vector<9x32xf32>
    %300 = arith.addf %298, %299 : vector<9x32xf32>
    %cst_169 = arith.constant dense<0.000000e+00> : vector<9x64xf32>
    %301 = tpu.matmul %300, %36, %cst_169 {dimension_numbers = #tpu.dot_dimension_numbers<[1], [0], [0], [1], [0, 0, 1, 1], [], []>} : vector<9x32xf32>, vector<32x64xf32>, vector<9x64xf32> -> vector<9x64xf32>
    %302 = vector.broadcast %38 : vector<1x64xf32> to vector<9x64xf32>
    %303 = arith.addf %301, %302 : vector<9x64xf32>
    %cst_170 = arith.constant 0.000000e+00 : f32
    %304 = vector.broadcast %cst_170 : f32 to vector<9x64xf32>
    %305 = arith.maximumf %303, %304 : vector<9x64xf32>
    %cst_171 = arith.constant dense<0.000000e+00> : vector<9x32xf32>
    %306 = tpu.matmul %305, %40, %cst_171 {dimension_numbers = #tpu.dot_dimension_numbers<[1], [0], [0], [1], [0, 0, 1, 1], [], []>} : vector<9x64xf32>, vector<64x32xf32>, vector<9x32xf32> -> vector<9x32xf32>
    %307 = vector.broadcast %42 : vector<1x32xf32> to vector<9x32xf32>
    %308 = arith.addf %306, %307 : vector<9x32xf32>
    %309 = arith.addf %300, %308 : vector<9x32xf32>
    %310 = vector.extract_strided_slice %44 {offsets = [2, 0], sizes = [1, 32], strides = [1, 1]} : vector<3x32xf32> to vector<1x32xf32>
    %311 = vector.extract_strided_slice %46 {offsets = [2, 0], sizes = [1, 32], strides = [1, 1]} : vector<3x32xf32> to vector<1x32xf32>
    %cst_172 = arith.constant dense<0.000000e+00> : vector<9xf32>
    %312 = vector.multi_reduction <add>, %309, %cst_172 [1] : vector<9x32xf32> to vector<9xf32>
    %313 = vector.shape_cast %312 : vector<9xf32> to vector<9x1xf32>
    %cst_173 = arith.constant 3.200000e+01 : f32
    %314 = vector.broadcast %cst_173 : f32 to vector<9x1xf32>
    %315 = arith.divf %313, %314 : vector<9x1xf32>
    %316 = vector.broadcast %315 : vector<9x1xf32> to vector<9x32xf32>
    %317 = arith.subf %309, %316 : vector<9x32xf32>
    %318 = arith.mulf %317, %317 : vector<9x32xf32>
    %cst_174 = arith.constant dense<0.000000e+00> : vector<9xf32>
    %319 = vector.multi_reduction <add>, %318, %cst_174 [1] : vector<9x32xf32> to vector<9xf32>
    %320 = vector.shape_cast %319 : vector<9xf32> to vector<9x1xf32>
    %cst_175 = arith.constant 3.200000e+01 : f32
    %321 = vector.broadcast %cst_175 : f32 to vector<9x1xf32>
    %322 = arith.divf %320, %321 : vector<9x1xf32>
    %323 = vector.broadcast %315 : vector<9x1xf32> to vector<9x32xf32>
    %324 = arith.subf %309, %323 : vector<9x32xf32>
    %cst_176 = arith.constant 9.99999974E-6 : f32
    %325 = vector.broadcast %cst_176 : f32 to vector<9x1xf32>
    %326 = arith.addf %322, %325 : vector<9x1xf32>
    %327 = math.rsqrt %326 : vector<9x1xf32>
    %328 = vector.broadcast %327 : vector<9x1xf32> to vector<9x32xf32>
    %329 = arith.mulf %324, %328 : vector<9x32xf32>
    %330 = vector.broadcast %310 : vector<1x32xf32> to vector<9x32xf32>
    %331 = arith.mulf %329, %330 : vector<9x32xf32>
    %332 = vector.broadcast %311 : vector<1x32xf32> to vector<9x32xf32>
    %333 = arith.addf %331, %332 : vector<9x32xf32>
    %cst_177 = arith.constant dense<0.000000e+00> : vector<6x96xf32>
    %334 = tpu.matmul %18, %48, %cst_177 {dimension_numbers = #tpu.dot_dimension_numbers<[1], [0], [0], [1], [0, 0, 1, 1], [], []>} : vector<6x32xf32>, vector<32x96xf32>, vector<6x96xf32> -> vector<6x96xf32>
    %335 = vector.broadcast %50 : vector<1x96xf32> to vector<6x96xf32>
    %336 = arith.addf %334, %335 : vector<6x96xf32>
    %337 = vector.extract_strided_slice %336 {offsets = [0, 0], sizes = [6, 32], strides = [1, 1]} : vector<6x96xf32> to vector<6x32xf32>
    %338 = vector.extract_strided_slice %336 {offsets = [0, 32], sizes = [6, 32], strides = [1, 1]} : vector<6x96xf32> to vector<6x32xf32>
    %339 = vector.extract_strided_slice %336 {offsets = [0, 64], sizes = [6, 32], strides = [1, 1]} : vector<6x96xf32> to vector<6x32xf32>
    %cst_178 = arith.constant 0.000000e+00 : f32
    %340 = vector.broadcast %cst_178 : f32 to vector<6x32xf32>
    %341 = vector.extract_strided_slice %337 {offsets = [0, 0], sizes = [6, 8], strides = [1, 1]} : vector<6x32xf32> to vector<6x8xf32>
    %342 = vector.extract_strided_slice %338 {offsets = [0, 0], sizes = [6, 8], strides = [1, 1]} : vector<6x32xf32> to vector<6x8xf32>
    %343 = vector.extract_strided_slice %339 {offsets = [0, 0], sizes = [6, 8], strides = [1, 1]} : vector<6x32xf32> to vector<6x8xf32>
    %cst_179 = arith.constant dense<0.000000e+00> : vector<6x6xf32>
    %344 = tpu.matmul %341, %342, %cst_179 {dimension_numbers = #tpu.dot_dimension_numbers<[1], [1], [0], [0], [0, 0, 1, 0], [], []>} : vector<6x8xf32>, vector<6x8xf32>, vector<6x6xf32> -> vector<6x6xf32>
    %cst_180 = arith.constant 0.353553385 : f32
    %345 = vector.broadcast %cst_180 : f32 to vector<6x6xf32>
    %346 = arith.mulf %344, %345 : vector<6x6xf32>
    %cst_181 = arith.constant dense<0xFF800000> : vector<6xf32>
    %347 = vector.multi_reduction <maximumf>, %346, %cst_181 [1] : vector<6x6xf32> to vector<6xf32>
    %348 = vector.shape_cast %347 : vector<6xf32> to vector<6x1xf32>
    %349 = vector.broadcast %348 : vector<6x1xf32> to vector<6x6xf32>
    %350 = arith.subf %346, %349 : vector<6x6xf32>
    %351 = math.exp %350 : vector<6x6xf32>
    %cst_182 = arith.constant dense<0.000000e+00> : vector<6xf32>
    %352 = vector.multi_reduction <add>, %351, %cst_182 [1] : vector<6x6xf32> to vector<6xf32>
    %353 = vector.shape_cast %352 : vector<6xf32> to vector<6x1xf32>
    %354 = vector.broadcast %353 : vector<6x1xf32> to vector<6x6xf32>
    %355 = arith.divf %351, %354 : vector<6x6xf32>
    %cst_183 = arith.constant dense<0.000000e+00> : vector<6x8xf32>
    %356 = tpu.matmul %355, %343, %cst_183 {dimension_numbers = #tpu.dot_dimension_numbers<[1], [0], [0], [1], [0, 0, 1, 1], [], []>} : vector<6x6xf32>, vector<6x8xf32>, vector<6x8xf32> -> vector<6x8xf32>
    %357 = vector.extract_strided_slice %52 {offsets = [0, 0], sizes = [8, 32], strides = [1, 1]} : vector<32x32xf32> to vector<8x32xf32>
    %cst_184 = arith.constant dense<0.000000e+00> : vector<6x32xf32>
    %358 = tpu.matmul %356, %357, %cst_184 {dimension_numbers = #tpu.dot_dimension_numbers<[1], [0], [0], [1], [0, 0, 1, 1], [], []>} : vector<6x8xf32>, vector<8x32xf32>, vector<6x32xf32> -> vector<6x32xf32>
    %359 = arith.addf %340, %358 : vector<6x32xf32>
    %360 = vector.extract_strided_slice %337 {offsets = [0, 8], sizes = [6, 8], strides = [1, 1]} : vector<6x32xf32> to vector<6x8xf32>
    %361 = vector.extract_strided_slice %338 {offsets = [0, 8], sizes = [6, 8], strides = [1, 1]} : vector<6x32xf32> to vector<6x8xf32>
    %362 = vector.extract_strided_slice %339 {offsets = [0, 8], sizes = [6, 8], strides = [1, 1]} : vector<6x32xf32> to vector<6x8xf32>
    %cst_185 = arith.constant dense<0.000000e+00> : vector<6x6xf32>
    %363 = tpu.matmul %360, %361, %cst_185 {dimension_numbers = #tpu.dot_dimension_numbers<[1], [1], [0], [0], [0, 0, 1, 0], [], []>} : vector<6x8xf32>, vector<6x8xf32>, vector<6x6xf32> -> vector<6x6xf32>
    %cst_186 = arith.constant 0.353553385 : f32
    %364 = vector.broadcast %cst_186 : f32 to vector<6x6xf32>
    %365 = arith.mulf %363, %364 : vector<6x6xf32>
    %cst_187 = arith.constant dense<0xFF800000> : vector<6xf32>
    %366 = vector.multi_reduction <maximumf>, %365, %cst_187 [1] : vector<6x6xf32> to vector<6xf32>
    %367 = vector.shape_cast %366 : vector<6xf32> to vector<6x1xf32>
    %368 = vector.broadcast %367 : vector<6x1xf32> to vector<6x6xf32>
    %369 = arith.subf %365, %368 : vector<6x6xf32>
    %370 = math.exp %369 : vector<6x6xf32>
    %cst_188 = arith.constant dense<0.000000e+00> : vector<6xf32>
    %371 = vector.multi_reduction <add>, %370, %cst_188 [1] : vector<6x6xf32> to vector<6xf32>
    %372 = vector.shape_cast %371 : vector<6xf32> to vector<6x1xf32>
    %373 = vector.broadcast %372 : vector<6x1xf32> to vector<6x6xf32>
    %374 = arith.divf %370, %373 : vector<6x6xf32>
    %cst_189 = arith.constant dense<0.000000e+00> : vector<6x8xf32>
    %375 = tpu.matmul %374, %362, %cst_189 {dimension_numbers = #tpu.dot_dimension_numbers<[1], [0], [0], [1], [0, 0, 1, 1], [], []>} : vector<6x6xf32>, vector<6x8xf32>, vector<6x8xf32> -> vector<6x8xf32>
    %376 = vector.extract_strided_slice %52 {offsets = [8, 0], sizes = [8, 32], strides = [1, 1]} : vector<32x32xf32> to vector<8x32xf32>
    %cst_190 = arith.constant dense<0.000000e+00> : vector<6x32xf32>
    %377 = tpu.matmul %375, %376, %cst_190 {dimension_numbers = #tpu.dot_dimension_numbers<[1], [0], [0], [1], [0, 0, 1, 1], [], []>} : vector<6x8xf32>, vector<8x32xf32>, vector<6x32xf32> -> vector<6x32xf32>
    %378 = arith.addf %359, %377 : vector<6x32xf32>
    %379 = vector.extract_strided_slice %337 {offsets = [0, 16], sizes = [6, 8], strides = [1, 1]} : vector<6x32xf32> to vector<6x8xf32>
    %380 = vector.extract_strided_slice %338 {offsets = [0, 16], sizes = [6, 8], strides = [1, 1]} : vector<6x32xf32> to vector<6x8xf32>
    %381 = vector.extract_strided_slice %339 {offsets = [0, 16], sizes = [6, 8], strides = [1, 1]} : vector<6x32xf32> to vector<6x8xf32>
    %cst_191 = arith.constant dense<0.000000e+00> : vector<6x6xf32>
    %382 = tpu.matmul %379, %380, %cst_191 {dimension_numbers = #tpu.dot_dimension_numbers<[1], [1], [0], [0], [0, 0, 1, 0], [], []>} : vector<6x8xf32>, vector<6x8xf32>, vector<6x6xf32> -> vector<6x6xf32>
    %cst_192 = arith.constant 0.353553385 : f32
    %383 = vector.broadcast %cst_192 : f32 to vector<6x6xf32>
    %384 = arith.mulf %382, %383 : vector<6x6xf32>
    %cst_193 = arith.constant dense<0xFF800000> : vector<6xf32>
    %385 = vector.multi_reduction <maximumf>, %384, %cst_193 [1] : vector<6x6xf32> to vector<6xf32>
    %386 = vector.shape_cast %385 : vector<6xf32> to vector<6x1xf32>
    %387 = vector.broadcast %386 : vector<6x1xf32> to vector<6x6xf32>
    %388 = arith.subf %384, %387 : vector<6x6xf32>
    %389 = math.exp %388 : vector<6x6xf32>
    %cst_194 = arith.constant dense<0.000000e+00> : vector<6xf32>
    %390 = vector.multi_reduction <add>, %389, %cst_194 [1] : vector<6x6xf32> to vector<6xf32>
    %391 = vector.shape_cast %390 : vector<6xf32> to vector<6x1xf32>
    %392 = vector.broadcast %391 : vector<6x1xf32> to vector<6x6xf32>
    %393 = arith.divf %389, %392 : vector<6x6xf32>
    %cst_195 = arith.constant dense<0.000000e+00> : vector<6x8xf32>
    %394 = tpu.matmul %393, %381, %cst_195 {dimension_numbers = #tpu.dot_dimension_numbers<[1], [0], [0], [1], [0, 0, 1, 1], [], []>} : vector<6x6xf32>, vector<6x8xf32>, vector<6x8xf32> -> vector<6x8xf32>
    %395 = vector.extract_strided_slice %52 {offsets = [16, 0], sizes = [8, 32], strides = [1, 1]} : vector<32x32xf32> to vector<8x32xf32>
    %cst_196 = arith.constant dense<0.000000e+00> : vector<6x32xf32>
    %396 = tpu.matmul %394, %395, %cst_196 {dimension_numbers = #tpu.dot_dimension_numbers<[1], [0], [0], [1], [0, 0, 1, 1], [], []>} : vector<6x8xf32>, vector<8x32xf32>, vector<6x32xf32> -> vector<6x32xf32>
    %397 = arith.addf %378, %396 : vector<6x32xf32>
    %398 = vector.extract_strided_slice %337 {offsets = [0, 24], sizes = [6, 8], strides = [1, 1]} : vector<6x32xf32> to vector<6x8xf32>
    %399 = vector.extract_strided_slice %338 {offsets = [0, 24], sizes = [6, 8], strides = [1, 1]} : vector<6x32xf32> to vector<6x8xf32>
    %400 = vector.extract_strided_slice %339 {offsets = [0, 24], sizes = [6, 8], strides = [1, 1]} : vector<6x32xf32> to vector<6x8xf32>
    %cst_197 = arith.constant dense<0.000000e+00> : vector<6x6xf32>
    %401 = tpu.matmul %398, %399, %cst_197 {dimension_numbers = #tpu.dot_dimension_numbers<[1], [1], [0], [0], [0, 0, 1, 0], [], []>} : vector<6x8xf32>, vector<6x8xf32>, vector<6x6xf32> -> vector<6x6xf32>
    %cst_198 = arith.constant 0.353553385 : f32
    %402 = vector.broadcast %cst_198 : f32 to vector<6x6xf32>
    %403 = arith.mulf %401, %402 : vector<6x6xf32>
    %cst_199 = arith.constant dense<0xFF800000> : vector<6xf32>
    %404 = vector.multi_reduction <maximumf>, %403, %cst_199 [1] : vector<6x6xf32> to vector<6xf32>
    %405 = vector.shape_cast %404 : vector<6xf32> to vector<6x1xf32>
    %406 = vector.broadcast %405 : vector<6x1xf32> to vector<6x6xf32>
    %407 = arith.subf %403, %406 : vector<6x6xf32>
    %408 = math.exp %407 : vector<6x6xf32>
    %cst_200 = arith.constant dense<0.000000e+00> : vector<6xf32>
    %409 = vector.multi_reduction <add>, %408, %cst_200 [1] : vector<6x6xf32> to vector<6xf32>
    %410 = vector.shape_cast %409 : vector<6xf32> to vector<6x1xf32>
    %411 = vector.broadcast %410 : vector<6x1xf32> to vector<6x6xf32>
    %412 = arith.divf %408, %411 : vector<6x6xf32>
    %cst_201 = arith.constant dense<0.000000e+00> : vector<6x8xf32>
    %413 = tpu.matmul %412, %400, %cst_201 {dimension_numbers = #tpu.dot_dimension_numbers<[1], [0], [0], [1], [0, 0, 1, 1], [], []>} : vector<6x6xf32>, vector<6x8xf32>, vector<6x8xf32> -> vector<6x8xf32>
    %414 = vector.extract_strided_slice %52 {offsets = [24, 0], sizes = [8, 32], strides = [1, 1]} : vector<32x32xf32> to vector<8x32xf32>
    %cst_202 = arith.constant dense<0.000000e+00> : vector<6x32xf32>
    %415 = tpu.matmul %413, %414, %cst_202 {dimension_numbers = #tpu.dot_dimension_numbers<[1], [0], [0], [1], [0, 0, 1, 1], [], []>} : vector<6x8xf32>, vector<8x32xf32>, vector<6x32xf32> -> vector<6x32xf32>
    %416 = arith.addf %397, %415 : vector<6x32xf32>
    %417 = vector.broadcast %54 : vector<1x32xf32> to vector<6x32xf32>
    %418 = arith.addf %416, %417 : vector<6x32xf32>
    %419 = arith.addf %18, %418 : vector<6x32xf32>
    %420 = vector.extract_strided_slice %72 {offsets = [0, 0], sizes = [1, 32], strides = [1, 1]} : vector<3x32xf32> to vector<1x32xf32>
    %421 = vector.extract_strided_slice %74 {offsets = [0, 0], sizes = [1, 32], strides = [1, 1]} : vector<3x32xf32> to vector<1x32xf32>
    %cst_203 = arith.constant dense<0.000000e+00> : vector<6xf32>
    %422 = vector.multi_reduction <add>, %419, %cst_203 [1] : vector<6x32xf32> to vector<6xf32>
    %423 = vector.shape_cast %422 : vector<6xf32> to vector<6x1xf32>
    %cst_204 = arith.constant 3.200000e+01 : f32
    %424 = vector.broadcast %cst_204 : f32 to vector<6x1xf32>
    %425 = arith.divf %423, %424 : vector<6x1xf32>
    %426 = vector.broadcast %425 : vector<6x1xf32> to vector<6x32xf32>
    %427 = arith.subf %419, %426 : vector<6x32xf32>
    %428 = arith.mulf %427, %427 : vector<6x32xf32>
    %cst_205 = arith.constant dense<0.000000e+00> : vector<6xf32>
    %429 = vector.multi_reduction <add>, %428, %cst_205 [1] : vector<6x32xf32> to vector<6xf32>
    %430 = vector.shape_cast %429 : vector<6xf32> to vector<6x1xf32>
    %cst_206 = arith.constant 3.200000e+01 : f32
    %431 = vector.broadcast %cst_206 : f32 to vector<6x1xf32>
    %432 = arith.divf %430, %431 : vector<6x1xf32>
    %433 = vector.broadcast %425 : vector<6x1xf32> to vector<6x32xf32>
    %434 = arith.subf %419, %433 : vector<6x32xf32>
    %cst_207 = arith.constant 9.99999974E-6 : f32
    %435 = vector.broadcast %cst_207 : f32 to vector<6x1xf32>
    %436 = arith.addf %432, %435 : vector<6x1xf32>
    %437 = math.rsqrt %436 : vector<6x1xf32>
    %438 = vector.broadcast %437 : vector<6x1xf32> to vector<6x32xf32>
    %439 = arith.mulf %434, %438 : vector<6x32xf32>
    %440 = vector.broadcast %420 : vector<1x32xf32> to vector<6x32xf32>
    %441 = arith.mulf %439, %440 : vector<6x32xf32>
    %442 = vector.broadcast %421 : vector<1x32xf32> to vector<6x32xf32>
    %443 = arith.addf %441, %442 : vector<6x32xf32>
    %444 = vector.extract_strided_slice %56 {offsets = [0, 0], sizes = [32, 32], strides = [1, 1]} : vector<32x96xf32> to vector<32x32xf32>
    %cst_208 = arith.constant dense<0.000000e+00> : vector<6x32xf32>
    %445 = tpu.matmul %443, %444, %cst_208 {dimension_numbers = #tpu.dot_dimension_numbers<[1], [0], [0], [1], [0, 0, 1, 1], [], []>} : vector<6x32xf32>, vector<32x32xf32>, vector<6x32xf32> -> vector<6x32xf32>
    %446 = vector.extract_strided_slice %58 {offsets = [0, 0], sizes = [1, 32], strides = [1, 1]} : vector<1x96xf32> to vector<1x32xf32>
    %447 = vector.broadcast %446 : vector<1x32xf32> to vector<6x32xf32>
    %448 = arith.addf %445, %447 : vector<6x32xf32>
    %449 = vector.extract_strided_slice %56 {offsets = [0, 32], sizes = [32, 64], strides = [1, 1]} : vector<32x96xf32> to vector<32x64xf32>
    %cst_209 = arith.constant dense<0.000000e+00> : vector<9x64xf32>
    %450 = tpu.matmul %333, %449, %cst_209 {dimension_numbers = #tpu.dot_dimension_numbers<[1], [0], [0], [1], [0, 0, 1, 1], [], []>} : vector<9x32xf32>, vector<32x64xf32>, vector<9x64xf32> -> vector<9x64xf32>
    %451 = vector.extract_strided_slice %58 {offsets = [0, 32], sizes = [1, 64], strides = [1, 1]} : vector<1x96xf32> to vector<1x64xf32>
    %452 = vector.broadcast %451 : vector<1x64xf32> to vector<9x64xf32>
    %453 = arith.addf %450, %452 : vector<9x64xf32>
    %454 = vector.extract_strided_slice %453 {offsets = [0, 0], sizes = [9, 32], strides = [1, 1]} : vector<9x64xf32> to vector<9x32xf32>
    %455 = vector.extract_strided_slice %453 {offsets = [0, 32], sizes = [9, 32], strides = [1, 1]} : vector<9x64xf32> to vector<9x32xf32>
    %cst_210 = arith.constant 0.000000e+00 : f32
    %456 = vector.broadcast %cst_210 : f32 to vector<6x32xf32>
    %457 = vector.extract_strided_slice %448 {offsets = [0, 0], sizes = [6, 8], strides = [1, 1]} : vector<6x32xf32> to vector<6x8xf32>
    %458 = vector.extract_strided_slice %454 {offsets = [0, 0], sizes = [9, 8], strides = [1, 1]} : vector<9x32xf32> to vector<9x8xf32>
    %459 = vector.extract_strided_slice %455 {offsets = [0, 0], sizes = [9, 8], strides = [1, 1]} : vector<9x32xf32> to vector<9x8xf32>
    %cst_211 = arith.constant dense<0.000000e+00> : vector<6x9xf32>
    %460 = tpu.matmul %457, %458, %cst_211 {dimension_numbers = #tpu.dot_dimension_numbers<[1], [1], [0], [0], [0, 0, 1, 0], [], []>} : vector<6x8xf32>, vector<9x8xf32>, vector<6x9xf32> -> vector<6x9xf32>
    %cst_212 = arith.constant 0.353553385 : f32
    %461 = vector.broadcast %cst_212 : f32 to vector<6x9xf32>
    %462 = arith.mulf %460, %461 : vector<6x9xf32>
    %cst_213 = arith.constant dense<0xFF800000> : vector<6xf32>
    %463 = vector.multi_reduction <maximumf>, %462, %cst_213 [1] : vector<6x9xf32> to vector<6xf32>
    %464 = vector.shape_cast %463 : vector<6xf32> to vector<6x1xf32>
    %465 = vector.broadcast %464 : vector<6x1xf32> to vector<6x9xf32>
    %466 = arith.subf %462, %465 : vector<6x9xf32>
    %467 = math.exp %466 : vector<6x9xf32>
    %cst_214 = arith.constant dense<0.000000e+00> : vector<6xf32>
    %468 = vector.multi_reduction <add>, %467, %cst_214 [1] : vector<6x9xf32> to vector<6xf32>
    %469 = vector.shape_cast %468 : vector<6xf32> to vector<6x1xf32>
    %470 = vector.broadcast %469 : vector<6x1xf32> to vector<6x9xf32>
    %471 = arith.divf %467, %470 : vector<6x9xf32>
    %cst_215 = arith.constant dense<0.000000e+00> : vector<6x8xf32>
    %472 = tpu.matmul %471, %459, %cst_215 {dimension_numbers = #tpu.dot_dimension_numbers<[1], [0], [0], [1], [0, 0, 1, 1], [], []>} : vector<6x9xf32>, vector<9x8xf32>, vector<6x8xf32> -> vector<6x8xf32>
    %473 = vector.extract_strided_slice %60 {offsets = [0, 0], sizes = [8, 32], strides = [1, 1]} : vector<32x32xf32> to vector<8x32xf32>
    %cst_216 = arith.constant dense<0.000000e+00> : vector<6x32xf32>
    %474 = tpu.matmul %472, %473, %cst_216 {dimension_numbers = #tpu.dot_dimension_numbers<[1], [0], [0], [1], [0, 0, 1, 1], [], []>} : vector<6x8xf32>, vector<8x32xf32>, vector<6x32xf32> -> vector<6x32xf32>
    %475 = arith.addf %456, %474 : vector<6x32xf32>
    %476 = vector.extract_strided_slice %448 {offsets = [0, 8], sizes = [6, 8], strides = [1, 1]} : vector<6x32xf32> to vector<6x8xf32>
    %477 = vector.extract_strided_slice %454 {offsets = [0, 8], sizes = [9, 8], strides = [1, 1]} : vector<9x32xf32> to vector<9x8xf32>
    %478 = vector.extract_strided_slice %455 {offsets = [0, 8], sizes = [9, 8], strides = [1, 1]} : vector<9x32xf32> to vector<9x8xf32>
    %cst_217 = arith.constant dense<0.000000e+00> : vector<6x9xf32>
    %479 = tpu.matmul %476, %477, %cst_217 {dimension_numbers = #tpu.dot_dimension_numbers<[1], [1], [0], [0], [0, 0, 1, 0], [], []>} : vector<6x8xf32>, vector<9x8xf32>, vector<6x9xf32> -> vector<6x9xf32>
    %cst_218 = arith.constant 0.353553385 : f32
    %480 = vector.broadcast %cst_218 : f32 to vector<6x9xf32>
    %481 = arith.mulf %479, %480 : vector<6x9xf32>
    %cst_219 = arith.constant dense<0xFF800000> : vector<6xf32>
    %482 = vector.multi_reduction <maximumf>, %481, %cst_219 [1] : vector<6x9xf32> to vector<6xf32>
    %483 = vector.shape_cast %482 : vector<6xf32> to vector<6x1xf32>
    %484 = vector.broadcast %483 : vector<6x1xf32> to vector<6x9xf32>
    %485 = arith.subf %481, %484 : vector<6x9xf32>
    %486 = math.exp %485 : vector<6x9xf32>
    %cst_220 = arith.constant dense<0.000000e+00> : vector<6xf32>
    %487 = vector.multi_reduction <add>, %486, %cst_220 [1] : vector<6x9xf32> to vector<6xf32>
    %488 = vector.shape_cast %487 : vector<6xf32> to vector<6x1xf32>
    %489 = vector.broadcast %488 : vector<6x1xf32> to vector<6x9xf32>
    %490 = arith.divf %486, %489 : vector<6x9xf32>
    %cst_221 = arith.constant dense<0.000000e+00> : vector<6x8xf32>
    %491 = tpu.matmul %490, %478, %cst_221 {dimension_numbers = #tpu.dot_dimension_numbers<[1], [0], [0], [1], [0, 0, 1, 1], [], []>} : vector<6x9xf32>, vector<9x8xf32>, vector<6x8xf32> -> vector<6x8xf32>
    %492 = vector.extract_strided_slice %60 {offsets = [8, 0], sizes = [8, 32], strides = [1, 1]} : vector<32x32xf32> to vector<8x32xf32>
    %cst_222 = arith.constant dense<0.000000e+00> : vector<6x32xf32>
    %493 = tpu.matmul %491, %492, %cst_222 {dimension_numbers = #tpu.dot_dimension_numbers<[1], [0], [0], [1], [0, 0, 1, 1], [], []>} : vector<6x8xf32>, vector<8x32xf32>, vector<6x32xf32> -> vector<6x32xf32>
    %494 = arith.addf %475, %493 : vector<6x32xf32>
    %495 = vector.extract_strided_slice %448 {offsets = [0, 16], sizes = [6, 8], strides = [1, 1]} : vector<6x32xf32> to vector<6x8xf32>
    %496 = vector.extract_strided_slice %454 {offsets = [0, 16], sizes = [9, 8], strides = [1, 1]} : vector<9x32xf32> to vector<9x8xf32>
    %497 = vector.extract_strided_slice %455 {offsets = [0, 16], sizes = [9, 8], strides = [1, 1]} : vector<9x32xf32> to vector<9x8xf32>
    %cst_223 = arith.constant dense<0.000000e+00> : vector<6x9xf32>
    %498 = tpu.matmul %495, %496, %cst_223 {dimension_numbers = #tpu.dot_dimension_numbers<[1], [1], [0], [0], [0, 0, 1, 0], [], []>} : vector<6x8xf32>, vector<9x8xf32>, vector<6x9xf32> -> vector<6x9xf32>
    %cst_224 = arith.constant 0.353553385 : f32
    %499 = vector.broadcast %cst_224 : f32 to vector<6x9xf32>
    %500 = arith.mulf %498, %499 : vector<6x9xf32>
    %cst_225 = arith.constant dense<0xFF800000> : vector<6xf32>
    %501 = vector.multi_reduction <maximumf>, %500, %cst_225 [1] : vector<6x9xf32> to vector<6xf32>
    %502 = vector.shape_cast %501 : vector<6xf32> to vector<6x1xf32>
    %503 = vector.broadcast %502 : vector<6x1xf32> to vector<6x9xf32>
    %504 = arith.subf %500, %503 : vector<6x9xf32>
    %505 = math.exp %504 : vector<6x9xf32>
    %cst_226 = arith.constant dense<0.000000e+00> : vector<6xf32>
    %506 = vector.multi_reduction <add>, %505, %cst_226 [1] : vector<6x9xf32> to vector<6xf32>
    %507 = vector.shape_cast %506 : vector<6xf32> to vector<6x1xf32>
    %508 = vector.broadcast %507 : vector<6x1xf32> to vector<6x9xf32>
    %509 = arith.divf %505, %508 : vector<6x9xf32>
    %cst_227 = arith.constant dense<0.000000e+00> : vector<6x8xf32>
    %510 = tpu.matmul %509, %497, %cst_227 {dimension_numbers = #tpu.dot_dimension_numbers<[1], [0], [0], [1], [0, 0, 1, 1], [], []>} : vector<6x9xf32>, vector<9x8xf32>, vector<6x8xf32> -> vector<6x8xf32>
    %511 = vector.extract_strided_slice %60 {offsets = [16, 0], sizes = [8, 32], strides = [1, 1]} : vector<32x32xf32> to vector<8x32xf32>
    %cst_228 = arith.constant dense<0.000000e+00> : vector<6x32xf32>
    %512 = tpu.matmul %510, %511, %cst_228 {dimension_numbers = #tpu.dot_dimension_numbers<[1], [0], [0], [1], [0, 0, 1, 1], [], []>} : vector<6x8xf32>, vector<8x32xf32>, vector<6x32xf32> -> vector<6x32xf32>
    %513 = arith.addf %494, %512 : vector<6x32xf32>
    %514 = vector.extract_strided_slice %448 {offsets = [0, 24], sizes = [6, 8], strides = [1, 1]} : vector<6x32xf32> to vector<6x8xf32>
    %515 = vector.extract_strided_slice %454 {offsets = [0, 24], sizes = [9, 8], strides = [1, 1]} : vector<9x32xf32> to vector<9x8xf32>
    %516 = vector.extract_strided_slice %455 {offsets = [0, 24], sizes = [9, 8], strides = [1, 1]} : vector<9x32xf32> to vector<9x8xf32>
    %cst_229 = arith.constant dense<0.000000e+00> : vector<6x9xf32>
    %517 = tpu.matmul %514, %515, %cst_229 {dimension_numbers = #tpu.dot_dimension_numbers<[1], [1], [0], [0], [0, 0, 1, 0], [], []>} : vector<6x8xf32>, vector<9x8xf32>, vector<6x9xf32> -> vector<6x9xf32>
    %cst_230 = arith.constant 0.353553385 : f32
    %518 = vector.broadcast %cst_230 : f32 to vector<6x9xf32>
    %519 = arith.mulf %517, %518 : vector<6x9xf32>
    %cst_231 = arith.constant dense<0xFF800000> : vector<6xf32>
    %520 = vector.multi_reduction <maximumf>, %519, %cst_231 [1] : vector<6x9xf32> to vector<6xf32>
    %521 = vector.shape_cast %520 : vector<6xf32> to vector<6x1xf32>
    %522 = vector.broadcast %521 : vector<6x1xf32> to vector<6x9xf32>
    %523 = arith.subf %519, %522 : vector<6x9xf32>
    %524 = math.exp %523 : vector<6x9xf32>
    %cst_232 = arith.constant dense<0.000000e+00> : vector<6xf32>
    %525 = vector.multi_reduction <add>, %524, %cst_232 [1] : vector<6x9xf32> to vector<6xf32>
    %526 = vector.shape_cast %525 : vector<6xf32> to vector<6x1xf32>
    %527 = vector.broadcast %526 : vector<6x1xf32> to vector<6x9xf32>
    %528 = arith.divf %524, %527 : vector<6x9xf32>
    %cst_233 = arith.constant dense<0.000000e+00> : vector<6x8xf32>
    %529 = tpu.matmul %528, %516, %cst_233 {dimension_numbers = #tpu.dot_dimension_numbers<[1], [0], [0], [1], [0, 0, 1, 1], [], []>} : vector<6x9xf32>, vector<9x8xf32>, vector<6x8xf32> -> vector<6x8xf32>
    %530 = vector.extract_strided_slice %60 {offsets = [24, 0], sizes = [8, 32], strides = [1, 1]} : vector<32x32xf32> to vector<8x32xf32>
    %cst_234 = arith.constant dense<0.000000e+00> : vector<6x32xf32>
    %531 = tpu.matmul %529, %530, %cst_234 {dimension_numbers = #tpu.dot_dimension_numbers<[1], [0], [0], [1], [0, 0, 1, 1], [], []>} : vector<6x8xf32>, vector<8x32xf32>, vector<6x32xf32> -> vector<6x32xf32>
    %532 = arith.addf %513, %531 : vector<6x32xf32>
    %533 = vector.broadcast %62 : vector<1x32xf32> to vector<6x32xf32>
    %534 = arith.addf %532, %533 : vector<6x32xf32>
    %535 = arith.addf %443, %534 : vector<6x32xf32>
    %536 = vector.extract_strided_slice %72 {offsets = [1, 0], sizes = [1, 32], strides = [1, 1]} : vector<3x32xf32> to vector<1x32xf32>
    %537 = vector.extract_strided_slice %74 {offsets = [1, 0], sizes = [1, 32], strides = [1, 1]} : vector<3x32xf32> to vector<1x32xf32>
    %cst_235 = arith.constant dense<0.000000e+00> : vector<6xf32>
    %538 = vector.multi_reduction <add>, %535, %cst_235 [1] : vector<6x32xf32> to vector<6xf32>
    %539 = vector.shape_cast %538 : vector<6xf32> to vector<6x1xf32>
    %cst_236 = arith.constant 3.200000e+01 : f32
    %540 = vector.broadcast %cst_236 : f32 to vector<6x1xf32>
    %541 = arith.divf %539, %540 : vector<6x1xf32>
    %542 = vector.broadcast %541 : vector<6x1xf32> to vector<6x32xf32>
    %543 = arith.subf %535, %542 : vector<6x32xf32>
    %544 = arith.mulf %543, %543 : vector<6x32xf32>
    %cst_237 = arith.constant dense<0.000000e+00> : vector<6xf32>
    %545 = vector.multi_reduction <add>, %544, %cst_237 [1] : vector<6x32xf32> to vector<6xf32>
    %546 = vector.shape_cast %545 : vector<6xf32> to vector<6x1xf32>
    %cst_238 = arith.constant 3.200000e+01 : f32
    %547 = vector.broadcast %cst_238 : f32 to vector<6x1xf32>
    %548 = arith.divf %546, %547 : vector<6x1xf32>
    %549 = vector.broadcast %541 : vector<6x1xf32> to vector<6x32xf32>
    %550 = arith.subf %535, %549 : vector<6x32xf32>
    %cst_239 = arith.constant 9.99999974E-6 : f32
    %551 = vector.broadcast %cst_239 : f32 to vector<6x1xf32>
    %552 = arith.addf %548, %551 : vector<6x1xf32>
    %553 = math.rsqrt %552 : vector<6x1xf32>
    %554 = vector.broadcast %553 : vector<6x1xf32> to vector<6x32xf32>
    %555 = arith.mulf %550, %554 : vector<6x32xf32>
    %556 = vector.broadcast %536 : vector<1x32xf32> to vector<6x32xf32>
    %557 = arith.mulf %555, %556 : vector<6x32xf32>
    %558 = vector.broadcast %537 : vector<1x32xf32> to vector<6x32xf32>
    %559 = arith.addf %557, %558 : vector<6x32xf32>
    %cst_240 = arith.constant dense<0.000000e+00> : vector<6x64xf32>
    %560 = tpu.matmul %559, %64, %cst_240 {dimension_numbers = #tpu.dot_dimension_numbers<[1], [0], [0], [1], [0, 0, 1, 1], [], []>} : vector<6x32xf32>, vector<32x64xf32>, vector<6x64xf32> -> vector<6x64xf32>
    %561 = vector.broadcast %66 : vector<1x64xf32> to vector<6x64xf32>
    %562 = arith.addf %560, %561 : vector<6x64xf32>
    %cst_241 = arith.constant 0.000000e+00 : f32
    %563 = vector.broadcast %cst_241 : f32 to vector<6x64xf32>
    %564 = arith.maximumf %562, %563 : vector<6x64xf32>
    %cst_242 = arith.constant dense<0.000000e+00> : vector<6x32xf32>
    %565 = tpu.matmul %564, %68, %cst_242 {dimension_numbers = #tpu.dot_dimension_numbers<[1], [0], [0], [1], [0, 0, 1, 1], [], []>} : vector<6x64xf32>, vector<64x32xf32>, vector<6x32xf32> -> vector<6x32xf32>
    %566 = vector.broadcast %70 : vector<1x32xf32> to vector<6x32xf32>
    %567 = arith.addf %565, %566 : vector<6x32xf32>
    %568 = arith.addf %559, %567 : vector<6x32xf32>
    %569 = vector.extract_strided_slice %72 {offsets = [2, 0], sizes = [1, 32], strides = [1, 1]} : vector<3x32xf32> to vector<1x32xf32>
    %570 = vector.extract_strided_slice %74 {offsets = [2, 0], sizes = [1, 32], strides = [1, 1]} : vector<3x32xf32> to vector<1x32xf32>
    %cst_243 = arith.constant dense<0.000000e+00> : vector<6xf32>
    %571 = vector.multi_reduction <add>, %568, %cst_243 [1] : vector<6x32xf32> to vector<6xf32>
    %572 = vector.shape_cast %571 : vector<6xf32> to vector<6x1xf32>
    %cst_244 = arith.constant 3.200000e+01 : f32
    %573 = vector.broadcast %cst_244 : f32 to vector<6x1xf32>
    %574 = arith.divf %572, %573 : vector<6x1xf32>
    %575 = vector.broadcast %574 : vector<6x1xf32> to vector<6x32xf32>
    %576 = arith.subf %568, %575 : vector<6x32xf32>
    %577 = arith.mulf %576, %576 : vector<6x32xf32>
    %cst_245 = arith.constant dense<0.000000e+00> : vector<6xf32>
    %578 = vector.multi_reduction <add>, %577, %cst_245 [1] : vector<6x32xf32> to vector<6xf32>
    %579 = vector.shape_cast %578 : vector<6xf32> to vector<6x1xf32>
    %cst_246 = arith.constant 3.200000e+01 : f32
    %580 = vector.broadcast %cst_246 : f32 to vector<6x1xf32>
    %581 = arith.divf %579, %580 : vector<6x1xf32>
    %582 = vector.broadcast %574 : vector<6x1xf32> to vector<6x32xf32>
    %583 = arith.subf %568, %582 : vector<6x32xf32>
    %cst_247 = arith.constant 9.99999974E-6 : f32
    %584 = vector.broadcast %cst_247 : f32 to vector<6x1xf32>
    %585 = arith.addf %581, %584 : vector<6x1xf32>
    %586 = math.rsqrt %585 : vector<6x1xf32>
    %587 = vector.broadcast %586 : vector<6x1xf32> to vector<6x32xf32>
    %588 = arith.mulf %583, %587 : vector<6x32xf32>
    %589 = vector.broadcast %569 : vector<1x32xf32> to vector<6x32xf32>
    %590 = arith.mulf %588, %589 : vector<6x32xf32>
    %591 = vector.broadcast %570 : vector<1x32xf32> to vector<6x32xf32>
    %592 = arith.addf %590, %591 : vector<6x32xf32>
    %c1_248 = arith.constant 1 : index
    %c0_249 = arith.constant 0 : index
    %c0_250 = arith.constant 0 : index
    %593 = vector.load %arg6[%c1_248, %c0_249, %c0_250] : memref<2x32x96xf32, #tpu.memory_space<vmem>>, vector<1x32x96xf32>
    %594 = vector.shape_cast %593 : vector<1x32x96xf32> to vector<32x96xf32>
    %c1_251 = arith.constant 1 : index
    %c0_252 = arith.constant 0 : index
    %c0_253 = arith.constant 0 : index
    %595 = vector.load %arg7[%c1_251, %c0_252, %c0_253] : memref<2x1x96xf32, #tpu.memory_space<vmem>>, vector<1x1x96xf32>
    %596 = vector.shape_cast %595 : vector<1x1x96xf32> to vector<1x96xf32>
    %c1_254 = arith.constant 1 : index
    %c0_255 = arith.constant 0 : index
    %c0_256 = arith.constant 0 : index
    %597 = vector.load %arg8[%c1_254, %c0_255, %c0_256] : memref<2x32x32xf32, #tpu.memory_space<vmem>>, vector<1x32x32xf32>
    %598 = vector.shape_cast %597 : vector<1x32x32xf32> to vector<32x32xf32>
    %c1_257 = arith.constant 1 : index
    %c0_258 = arith.constant 0 : index
    %c0_259 = arith.constant 0 : index
    %599 = vector.load %arg9[%c1_257, %c0_258, %c0_259] : memref<2x1x32xf32, #tpu.memory_space<vmem>>, vector<1x1x32xf32>
    %600 = vector.shape_cast %599 : vector<1x1x32xf32> to vector<1x32xf32>
    %c1_260 = arith.constant 1 : index
    %c0_261 = arith.constant 0 : index
    %c0_262 = arith.constant 0 : index
    %601 = vector.load %arg10[%c1_260, %c0_261, %c0_262] : memref<2x32x96xf32, #tpu.memory_space<vmem>>, vector<1x32x96xf32>
    %602 = vector.shape_cast %601 : vector<1x32x96xf32> to vector<32x96xf32>
    %c1_263 = arith.constant 1 : index
    %c0_264 = arith.constant 0 : index
    %c0_265 = arith.constant 0 : index
    %603 = vector.load %arg11[%c1_263, %c0_264, %c0_265] : memref<2x1x96xf32, #tpu.memory_space<vmem>>, vector<1x1x96xf32>
    %604 = vector.shape_cast %603 : vector<1x1x96xf32> to vector<1x96xf32>
    %c1_266 = arith.constant 1 : index
    %c0_267 = arith.constant 0 : index
    %c0_268 = arith.constant 0 : index
    %605 = vector.load %arg12[%c1_266, %c0_267, %c0_268] : memref<2x32x32xf32, #tpu.memory_space<vmem>>, vector<1x32x32xf32>
    %606 = vector.shape_cast %605 : vector<1x32x32xf32> to vector<32x32xf32>
    %c1_269 = arith.constant 1 : index
    %c0_270 = arith.constant 0 : index
    %c0_271 = arith.constant 0 : index
    %607 = vector.load %arg13[%c1_269, %c0_270, %c0_271] : memref<2x1x32xf32, #tpu.memory_space<vmem>>, vector<1x1x32xf32>
    %608 = vector.shape_cast %607 : vector<1x1x32xf32> to vector<1x32xf32>
    %c1_272 = arith.constant 1 : index
    %c0_273 = arith.constant 0 : index
    %c0_274 = arith.constant 0 : index
    %609 = vector.load %arg14[%c1_272, %c0_273, %c0_274] : memref<2x32x64xf32, #tpu.memory_space<vmem>>, vector<1x32x64xf32>
    %610 = vector.shape_cast %609 : vector<1x32x64xf32> to vector<32x64xf32>
    %c1_275 = arith.constant 1 : index
    %c0_276 = arith.constant 0 : index
    %c0_277 = arith.constant 0 : index
    %611 = vector.load %arg15[%c1_275, %c0_276, %c0_277] : memref<2x1x64xf32, #tpu.memory_space<vmem>>, vector<1x1x64xf32>
    %612 = vector.shape_cast %611 : vector<1x1x64xf32> to vector<1x64xf32>
    %c1_278 = arith.constant 1 : index
    %c0_279 = arith.constant 0 : index
    %c0_280 = arith.constant 0 : index
    %613 = vector.load %arg16[%c1_278, %c0_279, %c0_280] : memref<2x64x32xf32, #tpu.memory_space<vmem>>, vector<1x64x32xf32>
    %614 = vector.shape_cast %613 : vector<1x64x32xf32> to vector<64x32xf32>
    %c1_281 = arith.constant 1 : index
    %c0_282 = arith.constant 0 : index
    %c0_283 = arith.constant 0 : index
    %615 = vector.load %arg17[%c1_281, %c0_282, %c0_283] : memref<2x1x32xf32, #tpu.memory_space<vmem>>, vector<1x1x32xf32>
    %616 = vector.shape_cast %615 : vector<1x1x32xf32> to vector<1x32xf32>
    %c1_284 = arith.constant 1 : index
    %c0_285 = arith.constant 0 : index
    %c0_286 = arith.constant 0 : index
    %617 = vector.load %arg18[%c1_284, %c0_285, %c0_286] : memref<2x3x32xf32, #tpu.memory_space<vmem>>, vector<1x3x32xf32>
    %618 = vector.shape_cast %617 : vector<1x3x32xf32> to vector<3x32xf32>
    %c1_287 = arith.constant 1 : index
    %c0_288 = arith.constant 0 : index
    %c0_289 = arith.constant 0 : index
    %619 = vector.load %arg19[%c1_287, %c0_288, %c0_289] : memref<2x3x32xf32, #tpu.memory_space<vmem>>, vector<1x3x32xf32>
    %620 = vector.shape_cast %619 : vector<1x3x32xf32> to vector<3x32xf32>
    %c1_290 = arith.constant 1 : index
    %c0_291 = arith.constant 0 : index
    %c0_292 = arith.constant 0 : index
    %621 = vector.load %arg20[%c1_290, %c0_291, %c0_292] : memref<2x32x96xf32, #tpu.memory_space<vmem>>, vector<1x32x96xf32>
    %622 = vector.shape_cast %621 : vector<1x32x96xf32> to vector<32x96xf32>
    %c1_293 = arith.constant 1 : index
    %c0_294 = arith.constant 0 : index
    %c0_295 = arith.constant 0 : index
    %623 = vector.load %arg21[%c1_293, %c0_294, %c0_295] : memref<2x1x96xf32, #tpu.memory_space<vmem>>, vector<1x1x96xf32>
    %624 = vector.shape_cast %623 : vector<1x1x96xf32> to vector<1x96xf32>
    %c1_296 = arith.constant 1 : index
    %c0_297 = arith.constant 0 : index
    %c0_298 = arith.constant 0 : index
    %625 = vector.load %arg22[%c1_296, %c0_297, %c0_298] : memref<2x32x32xf32, #tpu.memory_space<vmem>>, vector<1x32x32xf32>
    %626 = vector.shape_cast %625 : vector<1x32x32xf32> to vector<32x32xf32>
    %c1_299 = arith.constant 1 : index
    %c0_300 = arith.constant 0 : index
    %c0_301 = arith.constant 0 : index
    %627 = vector.load %arg23[%c1_299, %c0_300, %c0_301] : memref<2x1x32xf32, #tpu.memory_space<vmem>>, vector<1x1x32xf32>
    %628 = vector.shape_cast %627 : vector<1x1x32xf32> to vector<1x32xf32>
    %c1_302 = arith.constant 1 : index
    %c0_303 = arith.constant 0 : index
    %c0_304 = arith.constant 0 : index
    %629 = vector.load %arg24[%c1_302, %c0_303, %c0_304] : memref<2x32x96xf32, #tpu.memory_space<vmem>>, vector<1x32x96xf32>
    %630 = vector.shape_cast %629 : vector<1x32x96xf32> to vector<32x96xf32>
    %c1_305 = arith.constant 1 : index
    %c0_306 = arith.constant 0 : index
    %c0_307 = arith.constant 0 : index
    %631 = vector.load %arg25[%c1_305, %c0_306, %c0_307] : memref<2x1x96xf32, #tpu.memory_space<vmem>>, vector<1x1x96xf32>
    %632 = vector.shape_cast %631 : vector<1x1x96xf32> to vector<1x96xf32>
    %c1_308 = arith.constant 1 : index
    %c0_309 = arith.constant 0 : index
    %c0_310 = arith.constant 0 : index
    %633 = vector.load %arg26[%c1_308, %c0_309, %c0_310] : memref<2x32x32xf32, #tpu.memory_space<vmem>>, vector<1x32x32xf32>
    %634 = vector.shape_cast %633 : vector<1x32x32xf32> to vector<32x32xf32>
    %c1_311 = arith.constant 1 : index
    %c0_312 = arith.constant 0 : index
    %c0_313 = arith.constant 0 : index
    %635 = vector.load %arg27[%c1_311, %c0_312, %c0_313] : memref<2x1x32xf32, #tpu.memory_space<vmem>>, vector<1x1x32xf32>
    %636 = vector.shape_cast %635 : vector<1x1x32xf32> to vector<1x32xf32>
    %c1_314 = arith.constant 1 : index
    %c0_315 = arith.constant 0 : index
    %c0_316 = arith.constant 0 : index
    %637 = vector.load %arg28[%c1_314, %c0_315, %c0_316] : memref<2x32x64xf32, #tpu.memory_space<vmem>>, vector<1x32x64xf32>
    %638 = vector.shape_cast %637 : vector<1x32x64xf32> to vector<32x64xf32>
    %c1_317 = arith.constant 1 : index
    %c0_318 = arith.constant 0 : index
    %c0_319 = arith.constant 0 : index
    %639 = vector.load %arg29[%c1_317, %c0_318, %c0_319] : memref<2x1x64xf32, #tpu.memory_space<vmem>>, vector<1x1x64xf32>
    %640 = vector.shape_cast %639 : vector<1x1x64xf32> to vector<1x64xf32>
    %c1_320 = arith.constant 1 : index
    %c0_321 = arith.constant 0 : index
    %c0_322 = arith.constant 0 : index
    %641 = vector.load %arg30[%c1_320, %c0_321, %c0_322] : memref<2x64x32xf32, #tpu.memory_space<vmem>>, vector<1x64x32xf32>
    %642 = vector.shape_cast %641 : vector<1x64x32xf32> to vector<64x32xf32>
    %c1_323 = arith.constant 1 : index
    %c0_324 = arith.constant 0 : index
    %c0_325 = arith.constant 0 : index
    %643 = vector.load %arg31[%c1_323, %c0_324, %c0_325] : memref<2x1x32xf32, #tpu.memory_space<vmem>>, vector<1x1x32xf32>
    %644 = vector.shape_cast %643 : vector<1x1x32xf32> to vector<1x32xf32>
    %c1_326 = arith.constant 1 : index
    %c0_327 = arith.constant 0 : index
    %c0_328 = arith.constant 0 : index
    %645 = vector.load %arg32[%c1_326, %c0_327, %c0_328] : memref<2x3x32xf32, #tpu.memory_space<vmem>>, vector<1x3x32xf32>
    %646 = vector.shape_cast %645 : vector<1x3x32xf32> to vector<3x32xf32>
    %c1_329 = arith.constant 1 : index
    %c0_330 = arith.constant 0 : index
    %c0_331 = arith.constant 0 : index
    %647 = vector.load %arg33[%c1_329, %c0_330, %c0_331] : memref<2x3x32xf32, #tpu.memory_space<vmem>>, vector<1x3x32xf32>
    %648 = vector.shape_cast %647 : vector<1x3x32xf32> to vector<3x32xf32>
    %cst_332 = arith.constant dense<0.000000e+00> : vector<9x96xf32>
    %649 = tpu.matmul %333, %594, %cst_332 {dimension_numbers = #tpu.dot_dimension_numbers<[1], [0], [0], [1], [0, 0, 1, 1], [], []>} : vector<9x32xf32>, vector<32x96xf32>, vector<9x96xf32> -> vector<9x96xf32>
    %650 = vector.broadcast %596 : vector<1x96xf32> to vector<9x96xf32>
    %651 = arith.addf %649, %650 : vector<9x96xf32>
    %652 = vector.extract_strided_slice %651 {offsets = [0, 0], sizes = [9, 32], strides = [1, 1]} : vector<9x96xf32> to vector<9x32xf32>
    %653 = vector.extract_strided_slice %651 {offsets = [0, 32], sizes = [9, 32], strides = [1, 1]} : vector<9x96xf32> to vector<9x32xf32>
    %654 = vector.extract_strided_slice %651 {offsets = [0, 64], sizes = [9, 32], strides = [1, 1]} : vector<9x96xf32> to vector<9x32xf32>
    %cst_333 = arith.constant 0.000000e+00 : f32
    %655 = vector.broadcast %cst_333 : f32 to vector<9x32xf32>
    %656 = vector.extract_strided_slice %652 {offsets = [0, 0], sizes = [9, 8], strides = [1, 1]} : vector<9x32xf32> to vector<9x8xf32>
    %657 = vector.extract_strided_slice %653 {offsets = [0, 0], sizes = [9, 8], strides = [1, 1]} : vector<9x32xf32> to vector<9x8xf32>
    %658 = vector.extract_strided_slice %654 {offsets = [0, 0], sizes = [9, 8], strides = [1, 1]} : vector<9x32xf32> to vector<9x8xf32>
    %cst_334 = arith.constant dense<0.000000e+00> : vector<9x9xf32>
    %659 = tpu.matmul %656, %657, %cst_334 {dimension_numbers = #tpu.dot_dimension_numbers<[1], [1], [0], [0], [0, 0, 1, 0], [], []>} : vector<9x8xf32>, vector<9x8xf32>, vector<9x9xf32> -> vector<9x9xf32>
    %cst_335 = arith.constant 0.353553385 : f32
    %660 = vector.broadcast %cst_335 : f32 to vector<9x9xf32>
    %661 = arith.mulf %659, %660 : vector<9x9xf32>
    %cst_336 = arith.constant dense<0xFF800000> : vector<9xf32>
    %662 = vector.multi_reduction <maximumf>, %661, %cst_336 [1] : vector<9x9xf32> to vector<9xf32>
    %663 = vector.shape_cast %662 : vector<9xf32> to vector<9x1xf32>
    %664 = vector.broadcast %663 : vector<9x1xf32> to vector<9x9xf32>
    %665 = arith.subf %661, %664 : vector<9x9xf32>
    %666 = math.exp %665 : vector<9x9xf32>
    %cst_337 = arith.constant dense<0.000000e+00> : vector<9xf32>
    %667 = vector.multi_reduction <add>, %666, %cst_337 [1] : vector<9x9xf32> to vector<9xf32>
    %668 = vector.shape_cast %667 : vector<9xf32> to vector<9x1xf32>
    %669 = vector.broadcast %668 : vector<9x1xf32> to vector<9x9xf32>
    %670 = arith.divf %666, %669 : vector<9x9xf32>
    %cst_338 = arith.constant dense<0.000000e+00> : vector<9x8xf32>
    %671 = tpu.matmul %670, %658, %cst_338 {dimension_numbers = #tpu.dot_dimension_numbers<[1], [0], [0], [1], [0, 0, 1, 1], [], []>} : vector<9x9xf32>, vector<9x8xf32>, vector<9x8xf32> -> vector<9x8xf32>
    %672 = vector.extract_strided_slice %598 {offsets = [0, 0], sizes = [8, 32], strides = [1, 1]} : vector<32x32xf32> to vector<8x32xf32>
    %cst_339 = arith.constant dense<0.000000e+00> : vector<9x32xf32>
    %673 = tpu.matmul %671, %672, %cst_339 {dimension_numbers = #tpu.dot_dimension_numbers<[1], [0], [0], [1], [0, 0, 1, 1], [], []>} : vector<9x8xf32>, vector<8x32xf32>, vector<9x32xf32> -> vector<9x32xf32>
    %674 = arith.addf %655, %673 : vector<9x32xf32>
    %675 = vector.extract_strided_slice %652 {offsets = [0, 8], sizes = [9, 8], strides = [1, 1]} : vector<9x32xf32> to vector<9x8xf32>
    %676 = vector.extract_strided_slice %653 {offsets = [0, 8], sizes = [9, 8], strides = [1, 1]} : vector<9x32xf32> to vector<9x8xf32>
    %677 = vector.extract_strided_slice %654 {offsets = [0, 8], sizes = [9, 8], strides = [1, 1]} : vector<9x32xf32> to vector<9x8xf32>
    %cst_340 = arith.constant dense<0.000000e+00> : vector<9x9xf32>
    %678 = tpu.matmul %675, %676, %cst_340 {dimension_numbers = #tpu.dot_dimension_numbers<[1], [1], [0], [0], [0, 0, 1, 0], [], []>} : vector<9x8xf32>, vector<9x8xf32>, vector<9x9xf32> -> vector<9x9xf32>
    %cst_341 = arith.constant 0.353553385 : f32
    %679 = vector.broadcast %cst_341 : f32 to vector<9x9xf32>
    %680 = arith.mulf %678, %679 : vector<9x9xf32>
    %cst_342 = arith.constant dense<0xFF800000> : vector<9xf32>
    %681 = vector.multi_reduction <maximumf>, %680, %cst_342 [1] : vector<9x9xf32> to vector<9xf32>
    %682 = vector.shape_cast %681 : vector<9xf32> to vector<9x1xf32>
    %683 = vector.broadcast %682 : vector<9x1xf32> to vector<9x9xf32>
    %684 = arith.subf %680, %683 : vector<9x9xf32>
    %685 = math.exp %684 : vector<9x9xf32>
    %cst_343 = arith.constant dense<0.000000e+00> : vector<9xf32>
    %686 = vector.multi_reduction <add>, %685, %cst_343 [1] : vector<9x9xf32> to vector<9xf32>
    %687 = vector.shape_cast %686 : vector<9xf32> to vector<9x1xf32>
    %688 = vector.broadcast %687 : vector<9x1xf32> to vector<9x9xf32>
    %689 = arith.divf %685, %688 : vector<9x9xf32>
    %cst_344 = arith.constant dense<0.000000e+00> : vector<9x8xf32>
    %690 = tpu.matmul %689, %677, %cst_344 {dimension_numbers = #tpu.dot_dimension_numbers<[1], [0], [0], [1], [0, 0, 1, 1], [], []>} : vector<9x9xf32>, vector<9x8xf32>, vector<9x8xf32> -> vector<9x8xf32>
    %691 = vector.extract_strided_slice %598 {offsets = [8, 0], sizes = [8, 32], strides = [1, 1]} : vector<32x32xf32> to vector<8x32xf32>
    %cst_345 = arith.constant dense<0.000000e+00> : vector<9x32xf32>
    %692 = tpu.matmul %690, %691, %cst_345 {dimension_numbers = #tpu.dot_dimension_numbers<[1], [0], [0], [1], [0, 0, 1, 1], [], []>} : vector<9x8xf32>, vector<8x32xf32>, vector<9x32xf32> -> vector<9x32xf32>
    %693 = arith.addf %674, %692 : vector<9x32xf32>
    %694 = vector.extract_strided_slice %652 {offsets = [0, 16], sizes = [9, 8], strides = [1, 1]} : vector<9x32xf32> to vector<9x8xf32>
    %695 = vector.extract_strided_slice %653 {offsets = [0, 16], sizes = [9, 8], strides = [1, 1]} : vector<9x32xf32> to vector<9x8xf32>
    %696 = vector.extract_strided_slice %654 {offsets = [0, 16], sizes = [9, 8], strides = [1, 1]} : vector<9x32xf32> to vector<9x8xf32>
    %cst_346 = arith.constant dense<0.000000e+00> : vector<9x9xf32>
    %697 = tpu.matmul %694, %695, %cst_346 {dimension_numbers = #tpu.dot_dimension_numbers<[1], [1], [0], [0], [0, 0, 1, 0], [], []>} : vector<9x8xf32>, vector<9x8xf32>, vector<9x9xf32> -> vector<9x9xf32>
    %cst_347 = arith.constant 0.353553385 : f32
    %698 = vector.broadcast %cst_347 : f32 to vector<9x9xf32>
    %699 = arith.mulf %697, %698 : vector<9x9xf32>
    %cst_348 = arith.constant dense<0xFF800000> : vector<9xf32>
    %700 = vector.multi_reduction <maximumf>, %699, %cst_348 [1] : vector<9x9xf32> to vector<9xf32>
    %701 = vector.shape_cast %700 : vector<9xf32> to vector<9x1xf32>
    %702 = vector.broadcast %701 : vector<9x1xf32> to vector<9x9xf32>
    %703 = arith.subf %699, %702 : vector<9x9xf32>
    %704 = math.exp %703 : vector<9x9xf32>
    %cst_349 = arith.constant dense<0.000000e+00> : vector<9xf32>
    %705 = vector.multi_reduction <add>, %704, %cst_349 [1] : vector<9x9xf32> to vector<9xf32>
    %706 = vector.shape_cast %705 : vector<9xf32> to vector<9x1xf32>
    %707 = vector.broadcast %706 : vector<9x1xf32> to vector<9x9xf32>
    %708 = arith.divf %704, %707 : vector<9x9xf32>
    %cst_350 = arith.constant dense<0.000000e+00> : vector<9x8xf32>
    %709 = tpu.matmul %708, %696, %cst_350 {dimension_numbers = #tpu.dot_dimension_numbers<[1], [0], [0], [1], [0, 0, 1, 1], [], []>} : vector<9x9xf32>, vector<9x8xf32>, vector<9x8xf32> -> vector<9x8xf32>
    %710 = vector.extract_strided_slice %598 {offsets = [16, 0], sizes = [8, 32], strides = [1, 1]} : vector<32x32xf32> to vector<8x32xf32>
    %cst_351 = arith.constant dense<0.000000e+00> : vector<9x32xf32>
    %711 = tpu.matmul %709, %710, %cst_351 {dimension_numbers = #tpu.dot_dimension_numbers<[1], [0], [0], [1], [0, 0, 1, 1], [], []>} : vector<9x8xf32>, vector<8x32xf32>, vector<9x32xf32> -> vector<9x32xf32>
    %712 = arith.addf %693, %711 : vector<9x32xf32>
    %713 = vector.extract_strided_slice %652 {offsets = [0, 24], sizes = [9, 8], strides = [1, 1]} : vector<9x32xf32> to vector<9x8xf32>
    %714 = vector.extract_strided_slice %653 {offsets = [0, 24], sizes = [9, 8], strides = [1, 1]} : vector<9x32xf32> to vector<9x8xf32>
    %715 = vector.extract_strided_slice %654 {offsets = [0, 24], sizes = [9, 8], strides = [1, 1]} : vector<9x32xf32> to vector<9x8xf32>
    %cst_352 = arith.constant dense<0.000000e+00> : vector<9x9xf32>
    %716 = tpu.matmul %713, %714, %cst_352 {dimension_numbers = #tpu.dot_dimension_numbers<[1], [1], [0], [0], [0, 0, 1, 0], [], []>} : vector<9x8xf32>, vector<9x8xf32>, vector<9x9xf32> -> vector<9x9xf32>
    %cst_353 = arith.constant 0.353553385 : f32
    %717 = vector.broadcast %cst_353 : f32 to vector<9x9xf32>
    %718 = arith.mulf %716, %717 : vector<9x9xf32>
    %cst_354 = arith.constant dense<0xFF800000> : vector<9xf32>
    %719 = vector.multi_reduction <maximumf>, %718, %cst_354 [1] : vector<9x9xf32> to vector<9xf32>
    %720 = vector.shape_cast %719 : vector<9xf32> to vector<9x1xf32>
    %721 = vector.broadcast %720 : vector<9x1xf32> to vector<9x9xf32>
    %722 = arith.subf %718, %721 : vector<9x9xf32>
    %723 = math.exp %722 : vector<9x9xf32>
    %cst_355 = arith.constant dense<0.000000e+00> : vector<9xf32>
    %724 = vector.multi_reduction <add>, %723, %cst_355 [1] : vector<9x9xf32> to vector<9xf32>
    %725 = vector.shape_cast %724 : vector<9xf32> to vector<9x1xf32>
    %726 = vector.broadcast %725 : vector<9x1xf32> to vector<9x9xf32>
    %727 = arith.divf %723, %726 : vector<9x9xf32>
    %cst_356 = arith.constant dense<0.000000e+00> : vector<9x8xf32>
    %728 = tpu.matmul %727, %715, %cst_356 {dimension_numbers = #tpu.dot_dimension_numbers<[1], [0], [0], [1], [0, 0, 1, 1], [], []>} : vector<9x9xf32>, vector<9x8xf32>, vector<9x8xf32> -> vector<9x8xf32>
    %729 = vector.extract_strided_slice %598 {offsets = [24, 0], sizes = [8, 32], strides = [1, 1]} : vector<32x32xf32> to vector<8x32xf32>
    %cst_357 = arith.constant dense<0.000000e+00> : vector<9x32xf32>
    %730 = tpu.matmul %728, %729, %cst_357 {dimension_numbers = #tpu.dot_dimension_numbers<[1], [0], [0], [1], [0, 0, 1, 1], [], []>} : vector<9x8xf32>, vector<8x32xf32>, vector<9x32xf32> -> vector<9x32xf32>
    %731 = arith.addf %712, %730 : vector<9x32xf32>
    %732 = vector.broadcast %600 : vector<1x32xf32> to vector<9x32xf32>
    %733 = arith.addf %731, %732 : vector<9x32xf32>
    %734 = arith.addf %333, %733 : vector<9x32xf32>
    %735 = vector.extract_strided_slice %618 {offsets = [0, 0], sizes = [1, 32], strides = [1, 1]} : vector<3x32xf32> to vector<1x32xf32>
    %736 = vector.extract_strided_slice %620 {offsets = [0, 0], sizes = [1, 32], strides = [1, 1]} : vector<3x32xf32> to vector<1x32xf32>
    %cst_358 = arith.constant dense<0.000000e+00> : vector<9xf32>
    %737 = vector.multi_reduction <add>, %734, %cst_358 [1] : vector<9x32xf32> to vector<9xf32>
    %738 = vector.shape_cast %737 : vector<9xf32> to vector<9x1xf32>
    %cst_359 = arith.constant 3.200000e+01 : f32
    %739 = vector.broadcast %cst_359 : f32 to vector<9x1xf32>
    %740 = arith.divf %738, %739 : vector<9x1xf32>
    %741 = vector.broadcast %740 : vector<9x1xf32> to vector<9x32xf32>
    %742 = arith.subf %734, %741 : vector<9x32xf32>
    %743 = arith.mulf %742, %742 : vector<9x32xf32>
    %cst_360 = arith.constant dense<0.000000e+00> : vector<9xf32>
    %744 = vector.multi_reduction <add>, %743, %cst_360 [1] : vector<9x32xf32> to vector<9xf32>
    %745 = vector.shape_cast %744 : vector<9xf32> to vector<9x1xf32>
    %cst_361 = arith.constant 3.200000e+01 : f32
    %746 = vector.broadcast %cst_361 : f32 to vector<9x1xf32>
    %747 = arith.divf %745, %746 : vector<9x1xf32>
    %748 = vector.broadcast %740 : vector<9x1xf32> to vector<9x32xf32>
    %749 = arith.subf %734, %748 : vector<9x32xf32>
    %cst_362 = arith.constant 9.99999974E-6 : f32
    %750 = vector.broadcast %cst_362 : f32 to vector<9x1xf32>
    %751 = arith.addf %747, %750 : vector<9x1xf32>
    %752 = math.rsqrt %751 : vector<9x1xf32>
    %753 = vector.broadcast %752 : vector<9x1xf32> to vector<9x32xf32>
    %754 = arith.mulf %749, %753 : vector<9x32xf32>
    %755 = vector.broadcast %735 : vector<1x32xf32> to vector<9x32xf32>
    %756 = arith.mulf %754, %755 : vector<9x32xf32>
    %757 = vector.broadcast %736 : vector<1x32xf32> to vector<9x32xf32>
    %758 = arith.addf %756, %757 : vector<9x32xf32>
    %759 = vector.extract_strided_slice %602 {offsets = [0, 0], sizes = [32, 32], strides = [1, 1]} : vector<32x96xf32> to vector<32x32xf32>
    %cst_363 = arith.constant dense<0.000000e+00> : vector<9x32xf32>
    %760 = tpu.matmul %758, %759, %cst_363 {dimension_numbers = #tpu.dot_dimension_numbers<[1], [0], [0], [1], [0, 0, 1, 1], [], []>} : vector<9x32xf32>, vector<32x32xf32>, vector<9x32xf32> -> vector<9x32xf32>
    %761 = vector.extract_strided_slice %604 {offsets = [0, 0], sizes = [1, 32], strides = [1, 1]} : vector<1x96xf32> to vector<1x32xf32>
    %762 = vector.broadcast %761 : vector<1x32xf32> to vector<9x32xf32>
    %763 = arith.addf %760, %762 : vector<9x32xf32>
    %764 = vector.extract_strided_slice %602 {offsets = [0, 32], sizes = [32, 64], strides = [1, 1]} : vector<32x96xf32> to vector<32x64xf32>
    %cst_364 = arith.constant dense<0.000000e+00> : vector<6x64xf32>
    %765 = tpu.matmul %592, %764, %cst_364 {dimension_numbers = #tpu.dot_dimension_numbers<[1], [0], [0], [1], [0, 0, 1, 1], [], []>} : vector<6x32xf32>, vector<32x64xf32>, vector<6x64xf32> -> vector<6x64xf32>
    %766 = vector.extract_strided_slice %604 {offsets = [0, 32], sizes = [1, 64], strides = [1, 1]} : vector<1x96xf32> to vector<1x64xf32>
    %767 = vector.broadcast %766 : vector<1x64xf32> to vector<6x64xf32>
    %768 = arith.addf %765, %767 : vector<6x64xf32>
    %769 = vector.extract_strided_slice %768 {offsets = [0, 0], sizes = [6, 32], strides = [1, 1]} : vector<6x64xf32> to vector<6x32xf32>
    %770 = vector.extract_strided_slice %768 {offsets = [0, 32], sizes = [6, 32], strides = [1, 1]} : vector<6x64xf32> to vector<6x32xf32>
    %cst_365 = arith.constant 0.000000e+00 : f32
    %771 = vector.broadcast %cst_365 : f32 to vector<9x32xf32>
    %772 = vector.extract_strided_slice %763 {offsets = [0, 0], sizes = [9, 8], strides = [1, 1]} : vector<9x32xf32> to vector<9x8xf32>
    %773 = vector.extract_strided_slice %769 {offsets = [0, 0], sizes = [6, 8], strides = [1, 1]} : vector<6x32xf32> to vector<6x8xf32>
    %774 = vector.extract_strided_slice %770 {offsets = [0, 0], sizes = [6, 8], strides = [1, 1]} : vector<6x32xf32> to vector<6x8xf32>
    %cst_366 = arith.constant dense<0.000000e+00> : vector<9x6xf32>
    %775 = tpu.matmul %772, %773, %cst_366 {dimension_numbers = #tpu.dot_dimension_numbers<[1], [1], [0], [0], [0, 0, 1, 0], [], []>} : vector<9x8xf32>, vector<6x8xf32>, vector<9x6xf32> -> vector<9x6xf32>
    %cst_367 = arith.constant 0.353553385 : f32
    %776 = vector.broadcast %cst_367 : f32 to vector<9x6xf32>
    %777 = arith.mulf %775, %776 : vector<9x6xf32>
    %cst_368 = arith.constant dense<0xFF800000> : vector<9xf32>
    %778 = vector.multi_reduction <maximumf>, %777, %cst_368 [1] : vector<9x6xf32> to vector<9xf32>
    %779 = vector.shape_cast %778 : vector<9xf32> to vector<9x1xf32>
    %780 = vector.broadcast %779 : vector<9x1xf32> to vector<9x6xf32>
    %781 = arith.subf %777, %780 : vector<9x6xf32>
    %782 = math.exp %781 : vector<9x6xf32>
    %cst_369 = arith.constant dense<0.000000e+00> : vector<9xf32>
    %783 = vector.multi_reduction <add>, %782, %cst_369 [1] : vector<9x6xf32> to vector<9xf32>
    %784 = vector.shape_cast %783 : vector<9xf32> to vector<9x1xf32>
    %785 = vector.broadcast %784 : vector<9x1xf32> to vector<9x6xf32>
    %786 = arith.divf %782, %785 : vector<9x6xf32>
    %cst_370 = arith.constant dense<0.000000e+00> : vector<9x8xf32>
    %787 = tpu.matmul %786, %774, %cst_370 {dimension_numbers = #tpu.dot_dimension_numbers<[1], [0], [0], [1], [0, 0, 1, 1], [], []>} : vector<9x6xf32>, vector<6x8xf32>, vector<9x8xf32> -> vector<9x8xf32>
    %788 = vector.extract_strided_slice %606 {offsets = [0, 0], sizes = [8, 32], strides = [1, 1]} : vector<32x32xf32> to vector<8x32xf32>
    %cst_371 = arith.constant dense<0.000000e+00> : vector<9x32xf32>
    %789 = tpu.matmul %787, %788, %cst_371 {dimension_numbers = #tpu.dot_dimension_numbers<[1], [0], [0], [1], [0, 0, 1, 1], [], []>} : vector<9x8xf32>, vector<8x32xf32>, vector<9x32xf32> -> vector<9x32xf32>
    %790 = arith.addf %771, %789 : vector<9x32xf32>
    %791 = vector.extract_strided_slice %763 {offsets = [0, 8], sizes = [9, 8], strides = [1, 1]} : vector<9x32xf32> to vector<9x8xf32>
    %792 = vector.extract_strided_slice %769 {offsets = [0, 8], sizes = [6, 8], strides = [1, 1]} : vector<6x32xf32> to vector<6x8xf32>
    %793 = vector.extract_strided_slice %770 {offsets = [0, 8], sizes = [6, 8], strides = [1, 1]} : vector<6x32xf32> to vector<6x8xf32>
    %cst_372 = arith.constant dense<0.000000e+00> : vector<9x6xf32>
    %794 = tpu.matmul %791, %792, %cst_372 {dimension_numbers = #tpu.dot_dimension_numbers<[1], [1], [0], [0], [0, 0, 1, 0], [], []>} : vector<9x8xf32>, vector<6x8xf32>, vector<9x6xf32> -> vector<9x6xf32>
    %cst_373 = arith.constant 0.353553385 : f32
    %795 = vector.broadcast %cst_373 : f32 to vector<9x6xf32>
    %796 = arith.mulf %794, %795 : vector<9x6xf32>
    %cst_374 = arith.constant dense<0xFF800000> : vector<9xf32>
    %797 = vector.multi_reduction <maximumf>, %796, %cst_374 [1] : vector<9x6xf32> to vector<9xf32>
    %798 = vector.shape_cast %797 : vector<9xf32> to vector<9x1xf32>
    %799 = vector.broadcast %798 : vector<9x1xf32> to vector<9x6xf32>
    %800 = arith.subf %796, %799 : vector<9x6xf32>
    %801 = math.exp %800 : vector<9x6xf32>
    %cst_375 = arith.constant dense<0.000000e+00> : vector<9xf32>
    %802 = vector.multi_reduction <add>, %801, %cst_375 [1] : vector<9x6xf32> to vector<9xf32>
    %803 = vector.shape_cast %802 : vector<9xf32> to vector<9x1xf32>
    %804 = vector.broadcast %803 : vector<9x1xf32> to vector<9x6xf32>
    %805 = arith.divf %801, %804 : vector<9x6xf32>
    %cst_376 = arith.constant dense<0.000000e+00> : vector<9x8xf32>
    %806 = tpu.matmul %805, %793, %cst_376 {dimension_numbers = #tpu.dot_dimension_numbers<[1], [0], [0], [1], [0, 0, 1, 1], [], []>} : vector<9x6xf32>, vector<6x8xf32>, vector<9x8xf32> -> vector<9x8xf32>
    %807 = vector.extract_strided_slice %606 {offsets = [8, 0], sizes = [8, 32], strides = [1, 1]} : vector<32x32xf32> to vector<8x32xf32>
    %cst_377 = arith.constant dense<0.000000e+00> : vector<9x32xf32>
    %808 = tpu.matmul %806, %807, %cst_377 {dimension_numbers = #tpu.dot_dimension_numbers<[1], [0], [0], [1], [0, 0, 1, 1], [], []>} : vector<9x8xf32>, vector<8x32xf32>, vector<9x32xf32> -> vector<9x32xf32>
    %809 = arith.addf %790, %808 : vector<9x32xf32>
    %810 = vector.extract_strided_slice %763 {offsets = [0, 16], sizes = [9, 8], strides = [1, 1]} : vector<9x32xf32> to vector<9x8xf32>
    %811 = vector.extract_strided_slice %769 {offsets = [0, 16], sizes = [6, 8], strides = [1, 1]} : vector<6x32xf32> to vector<6x8xf32>
    %812 = vector.extract_strided_slice %770 {offsets = [0, 16], sizes = [6, 8], strides = [1, 1]} : vector<6x32xf32> to vector<6x8xf32>
    %cst_378 = arith.constant dense<0.000000e+00> : vector<9x6xf32>
    %813 = tpu.matmul %810, %811, %cst_378 {dimension_numbers = #tpu.dot_dimension_numbers<[1], [1], [0], [0], [0, 0, 1, 0], [], []>} : vector<9x8xf32>, vector<6x8xf32>, vector<9x6xf32> -> vector<9x6xf32>
    %cst_379 = arith.constant 0.353553385 : f32
    %814 = vector.broadcast %cst_379 : f32 to vector<9x6xf32>
    %815 = arith.mulf %813, %814 : vector<9x6xf32>
    %cst_380 = arith.constant dense<0xFF800000> : vector<9xf32>
    %816 = vector.multi_reduction <maximumf>, %815, %cst_380 [1] : vector<9x6xf32> to vector<9xf32>
    %817 = vector.shape_cast %816 : vector<9xf32> to vector<9x1xf32>
    %818 = vector.broadcast %817 : vector<9x1xf32> to vector<9x6xf32>
    %819 = arith.subf %815, %818 : vector<9x6xf32>
    %820 = math.exp %819 : vector<9x6xf32>
    %cst_381 = arith.constant dense<0.000000e+00> : vector<9xf32>
    %821 = vector.multi_reduction <add>, %820, %cst_381 [1] : vector<9x6xf32> to vector<9xf32>
    %822 = vector.shape_cast %821 : vector<9xf32> to vector<9x1xf32>
    %823 = vector.broadcast %822 : vector<9x1xf32> to vector<9x6xf32>
    %824 = arith.divf %820, %823 : vector<9x6xf32>
    %cst_382 = arith.constant dense<0.000000e+00> : vector<9x8xf32>
    %825 = tpu.matmul %824, %812, %cst_382 {dimension_numbers = #tpu.dot_dimension_numbers<[1], [0], [0], [1], [0, 0, 1, 1], [], []>} : vector<9x6xf32>, vector<6x8xf32>, vector<9x8xf32> -> vector<9x8xf32>
    %826 = vector.extract_strided_slice %606 {offsets = [16, 0], sizes = [8, 32], strides = [1, 1]} : vector<32x32xf32> to vector<8x32xf32>
    %cst_383 = arith.constant dense<0.000000e+00> : vector<9x32xf32>
    %827 = tpu.matmul %825, %826, %cst_383 {dimension_numbers = #tpu.dot_dimension_numbers<[1], [0], [0], [1], [0, 0, 1, 1], [], []>} : vector<9x8xf32>, vector<8x32xf32>, vector<9x32xf32> -> vector<9x32xf32>
    %828 = arith.addf %809, %827 : vector<9x32xf32>
    %829 = vector.extract_strided_slice %763 {offsets = [0, 24], sizes = [9, 8], strides = [1, 1]} : vector<9x32xf32> to vector<9x8xf32>
    %830 = vector.extract_strided_slice %769 {offsets = [0, 24], sizes = [6, 8], strides = [1, 1]} : vector<6x32xf32> to vector<6x8xf32>
    %831 = vector.extract_strided_slice %770 {offsets = [0, 24], sizes = [6, 8], strides = [1, 1]} : vector<6x32xf32> to vector<6x8xf32>
    %cst_384 = arith.constant dense<0.000000e+00> : vector<9x6xf32>
    %832 = tpu.matmul %829, %830, %cst_384 {dimension_numbers = #tpu.dot_dimension_numbers<[1], [1], [0], [0], [0, 0, 1, 0], [], []>} : vector<9x8xf32>, vector<6x8xf32>, vector<9x6xf32> -> vector<9x6xf32>
    %cst_385 = arith.constant 0.353553385 : f32
    %833 = vector.broadcast %cst_385 : f32 to vector<9x6xf32>
    %834 = arith.mulf %832, %833 : vector<9x6xf32>
    %cst_386 = arith.constant dense<0xFF800000> : vector<9xf32>
    %835 = vector.multi_reduction <maximumf>, %834, %cst_386 [1] : vector<9x6xf32> to vector<9xf32>
    %836 = vector.shape_cast %835 : vector<9xf32> to vector<9x1xf32>
    %837 = vector.broadcast %836 : vector<9x1xf32> to vector<9x6xf32>
    %838 = arith.subf %834, %837 : vector<9x6xf32>
    %839 = math.exp %838 : vector<9x6xf32>
    %cst_387 = arith.constant dense<0.000000e+00> : vector<9xf32>
    %840 = vector.multi_reduction <add>, %839, %cst_387 [1] : vector<9x6xf32> to vector<9xf32>
    %841 = vector.shape_cast %840 : vector<9xf32> to vector<9x1xf32>
    %842 = vector.broadcast %841 : vector<9x1xf32> to vector<9x6xf32>
    %843 = arith.divf %839, %842 : vector<9x6xf32>
    %cst_388 = arith.constant dense<0.000000e+00> : vector<9x8xf32>
    %844 = tpu.matmul %843, %831, %cst_388 {dimension_numbers = #tpu.dot_dimension_numbers<[1], [0], [0], [1], [0, 0, 1, 1], [], []>} : vector<9x6xf32>, vector<6x8xf32>, vector<9x8xf32> -> vector<9x8xf32>
    %845 = vector.extract_strided_slice %606 {offsets = [24, 0], sizes = [8, 32], strides = [1, 1]} : vector<32x32xf32> to vector<8x32xf32>
    %cst_389 = arith.constant dense<0.000000e+00> : vector<9x32xf32>
    %846 = tpu.matmul %844, %845, %cst_389 {dimension_numbers = #tpu.dot_dimension_numbers<[1], [0], [0], [1], [0, 0, 1, 1], [], []>} : vector<9x8xf32>, vector<8x32xf32>, vector<9x32xf32> -> vector<9x32xf32>
    %847 = arith.addf %828, %846 : vector<9x32xf32>
    %848 = vector.broadcast %608 : vector<1x32xf32> to vector<9x32xf32>
    %849 = arith.addf %847, %848 : vector<9x32xf32>
    %850 = arith.addf %758, %849 : vector<9x32xf32>
    %851 = vector.extract_strided_slice %618 {offsets = [1, 0], sizes = [1, 32], strides = [1, 1]} : vector<3x32xf32> to vector<1x32xf32>
    %852 = vector.extract_strided_slice %620 {offsets = [1, 0], sizes = [1, 32], strides = [1, 1]} : vector<3x32xf32> to vector<1x32xf32>
    %cst_390 = arith.constant dense<0.000000e+00> : vector<9xf32>
    %853 = vector.multi_reduction <add>, %850, %cst_390 [1] : vector<9x32xf32> to vector<9xf32>
    %854 = vector.shape_cast %853 : vector<9xf32> to vector<9x1xf32>
    %cst_391 = arith.constant 3.200000e+01 : f32
    %855 = vector.broadcast %cst_391 : f32 to vector<9x1xf32>
    %856 = arith.divf %854, %855 : vector<9x1xf32>
    %857 = vector.broadcast %856 : vector<9x1xf32> to vector<9x32xf32>
    %858 = arith.subf %850, %857 : vector<9x32xf32>
    %859 = arith.mulf %858, %858 : vector<9x32xf32>
    %cst_392 = arith.constant dense<0.000000e+00> : vector<9xf32>
    %860 = vector.multi_reduction <add>, %859, %cst_392 [1] : vector<9x32xf32> to vector<9xf32>
    %861 = vector.shape_cast %860 : vector<9xf32> to vector<9x1xf32>
    %cst_393 = arith.constant 3.200000e+01 : f32
    %862 = vector.broadcast %cst_393 : f32 to vector<9x1xf32>
    %863 = arith.divf %861, %862 : vector<9x1xf32>
    %864 = vector.broadcast %856 : vector<9x1xf32> to vector<9x32xf32>
    %865 = arith.subf %850, %864 : vector<9x32xf32>
    %cst_394 = arith.constant 9.99999974E-6 : f32
    %866 = vector.broadcast %cst_394 : f32 to vector<9x1xf32>
    %867 = arith.addf %863, %866 : vector<9x1xf32>
    %868 = math.rsqrt %867 : vector<9x1xf32>
    %869 = vector.broadcast %868 : vector<9x1xf32> to vector<9x32xf32>
    %870 = arith.mulf %865, %869 : vector<9x32xf32>
    %871 = vector.broadcast %851 : vector<1x32xf32> to vector<9x32xf32>
    %872 = arith.mulf %870, %871 : vector<9x32xf32>
    %873 = vector.broadcast %852 : vector<1x32xf32> to vector<9x32xf32>
    %874 = arith.addf %872, %873 : vector<9x32xf32>
    %cst_395 = arith.constant dense<0.000000e+00> : vector<9x64xf32>
    %875 = tpu.matmul %874, %610, %cst_395 {dimension_numbers = #tpu.dot_dimension_numbers<[1], [0], [0], [1], [0, 0, 1, 1], [], []>} : vector<9x32xf32>, vector<32x64xf32>, vector<9x64xf32> -> vector<9x64xf32>
    %876 = vector.broadcast %612 : vector<1x64xf32> to vector<9x64xf32>
    %877 = arith.addf %875, %876 : vector<9x64xf32>
    %cst_396 = arith.constant 0.000000e+00 : f32
    %878 = vector.broadcast %cst_396 : f32 to vector<9x64xf32>
    %879 = arith.maximumf %877, %878 : vector<9x64xf32>
    %cst_397 = arith.constant dense<0.000000e+00> : vector<9x32xf32>
    %880 = tpu.matmul %879, %614, %cst_397 {dimension_numbers = #tpu.dot_dimension_numbers<[1], [0], [0], [1], [0, 0, 1, 1], [], []>} : vector<9x64xf32>, vector<64x32xf32>, vector<9x32xf32> -> vector<9x32xf32>
    %881 = vector.broadcast %616 : vector<1x32xf32> to vector<9x32xf32>
    %882 = arith.addf %880, %881 : vector<9x32xf32>
    %883 = arith.addf %874, %882 : vector<9x32xf32>
    %884 = vector.extract_strided_slice %618 {offsets = [2, 0], sizes = [1, 32], strides = [1, 1]} : vector<3x32xf32> to vector<1x32xf32>
    %885 = vector.extract_strided_slice %620 {offsets = [2, 0], sizes = [1, 32], strides = [1, 1]} : vector<3x32xf32> to vector<1x32xf32>
    %cst_398 = arith.constant dense<0.000000e+00> : vector<9xf32>
    %886 = vector.multi_reduction <add>, %883, %cst_398 [1] : vector<9x32xf32> to vector<9xf32>
    %887 = vector.shape_cast %886 : vector<9xf32> to vector<9x1xf32>
    %cst_399 = arith.constant 3.200000e+01 : f32
    %888 = vector.broadcast %cst_399 : f32 to vector<9x1xf32>
    %889 = arith.divf %887, %888 : vector<9x1xf32>
    %890 = vector.broadcast %889 : vector<9x1xf32> to vector<9x32xf32>
    %891 = arith.subf %883, %890 : vector<9x32xf32>
    %892 = arith.mulf %891, %891 : vector<9x32xf32>
    %cst_400 = arith.constant dense<0.000000e+00> : vector<9xf32>
    %893 = vector.multi_reduction <add>, %892, %cst_400 [1] : vector<9x32xf32> to vector<9xf32>
    %894 = vector.shape_cast %893 : vector<9xf32> to vector<9x1xf32>
    %cst_401 = arith.constant 3.200000e+01 : f32
    %895 = vector.broadcast %cst_401 : f32 to vector<9x1xf32>
    %896 = arith.divf %894, %895 : vector<9x1xf32>
    %897 = vector.broadcast %889 : vector<9x1xf32> to vector<9x32xf32>
    %898 = arith.subf %883, %897 : vector<9x32xf32>
    %cst_402 = arith.constant 9.99999974E-6 : f32
    %899 = vector.broadcast %cst_402 : f32 to vector<9x1xf32>
    %900 = arith.addf %896, %899 : vector<9x1xf32>
    %901 = math.rsqrt %900 : vector<9x1xf32>
    %902 = vector.broadcast %901 : vector<9x1xf32> to vector<9x32xf32>
    %903 = arith.mulf %898, %902 : vector<9x32xf32>
    %904 = vector.broadcast %884 : vector<1x32xf32> to vector<9x32xf32>
    %905 = arith.mulf %903, %904 : vector<9x32xf32>
    %906 = vector.broadcast %885 : vector<1x32xf32> to vector<9x32xf32>
    %907 = arith.addf %905, %906 : vector<9x32xf32>
    %cst_403 = arith.constant dense<0.000000e+00> : vector<6x96xf32>
    %908 = tpu.matmul %592, %622, %cst_403 {dimension_numbers = #tpu.dot_dimension_numbers<[1], [0], [0], [1], [0, 0, 1, 1], [], []>} : vector<6x32xf32>, vector<32x96xf32>, vector<6x96xf32> -> vector<6x96xf32>
    %909 = vector.broadcast %624 : vector<1x96xf32> to vector<6x96xf32>
    %910 = arith.addf %908, %909 : vector<6x96xf32>
    %911 = vector.extract_strided_slice %910 {offsets = [0, 0], sizes = [6, 32], strides = [1, 1]} : vector<6x96xf32> to vector<6x32xf32>
    %912 = vector.extract_strided_slice %910 {offsets = [0, 32], sizes = [6, 32], strides = [1, 1]} : vector<6x96xf32> to vector<6x32xf32>
    %913 = vector.extract_strided_slice %910 {offsets = [0, 64], sizes = [6, 32], strides = [1, 1]} : vector<6x96xf32> to vector<6x32xf32>
    %cst_404 = arith.constant 0.000000e+00 : f32
    %914 = vector.broadcast %cst_404 : f32 to vector<6x32xf32>
    %915 = vector.extract_strided_slice %911 {offsets = [0, 0], sizes = [6, 8], strides = [1, 1]} : vector<6x32xf32> to vector<6x8xf32>
    %916 = vector.extract_strided_slice %912 {offsets = [0, 0], sizes = [6, 8], strides = [1, 1]} : vector<6x32xf32> to vector<6x8xf32>
    %917 = vector.extract_strided_slice %913 {offsets = [0, 0], sizes = [6, 8], strides = [1, 1]} : vector<6x32xf32> to vector<6x8xf32>
    %cst_405 = arith.constant dense<0.000000e+00> : vector<6x6xf32>
    %918 = tpu.matmul %915, %916, %cst_405 {dimension_numbers = #tpu.dot_dimension_numbers<[1], [1], [0], [0], [0, 0, 1, 0], [], []>} : vector<6x8xf32>, vector<6x8xf32>, vector<6x6xf32> -> vector<6x6xf32>
    %cst_406 = arith.constant 0.353553385 : f32
    %919 = vector.broadcast %cst_406 : f32 to vector<6x6xf32>
    %920 = arith.mulf %918, %919 : vector<6x6xf32>
    %cst_407 = arith.constant dense<0xFF800000> : vector<6xf32>
    %921 = vector.multi_reduction <maximumf>, %920, %cst_407 [1] : vector<6x6xf32> to vector<6xf32>
    %922 = vector.shape_cast %921 : vector<6xf32> to vector<6x1xf32>
    %923 = vector.broadcast %922 : vector<6x1xf32> to vector<6x6xf32>
    %924 = arith.subf %920, %923 : vector<6x6xf32>
    %925 = math.exp %924 : vector<6x6xf32>
    %cst_408 = arith.constant dense<0.000000e+00> : vector<6xf32>
    %926 = vector.multi_reduction <add>, %925, %cst_408 [1] : vector<6x6xf32> to vector<6xf32>
    %927 = vector.shape_cast %926 : vector<6xf32> to vector<6x1xf32>
    %928 = vector.broadcast %927 : vector<6x1xf32> to vector<6x6xf32>
    %929 = arith.divf %925, %928 : vector<6x6xf32>
    %cst_409 = arith.constant dense<0.000000e+00> : vector<6x8xf32>
    %930 = tpu.matmul %929, %917, %cst_409 {dimension_numbers = #tpu.dot_dimension_numbers<[1], [0], [0], [1], [0, 0, 1, 1], [], []>} : vector<6x6xf32>, vector<6x8xf32>, vector<6x8xf32> -> vector<6x8xf32>
    %931 = vector.extract_strided_slice %626 {offsets = [0, 0], sizes = [8, 32], strides = [1, 1]} : vector<32x32xf32> to vector<8x32xf32>
    %cst_410 = arith.constant dense<0.000000e+00> : vector<6x32xf32>
    %932 = tpu.matmul %930, %931, %cst_410 {dimension_numbers = #tpu.dot_dimension_numbers<[1], [0], [0], [1], [0, 0, 1, 1], [], []>} : vector<6x8xf32>, vector<8x32xf32>, vector<6x32xf32> -> vector<6x32xf32>
    %933 = arith.addf %914, %932 : vector<6x32xf32>
    %934 = vector.extract_strided_slice %911 {offsets = [0, 8], sizes = [6, 8], strides = [1, 1]} : vector<6x32xf32> to vector<6x8xf32>
    %935 = vector.extract_strided_slice %912 {offsets = [0, 8], sizes = [6, 8], strides = [1, 1]} : vector<6x32xf32> to vector<6x8xf32>
    %936 = vector.extract_strided_slice %913 {offsets = [0, 8], sizes = [6, 8], strides = [1, 1]} : vector<6x32xf32> to vector<6x8xf32>
    %cst_411 = arith.constant dense<0.000000e+00> : vector<6x6xf32>
    %937 = tpu.matmul %934, %935, %cst_411 {dimension_numbers = #tpu.dot_dimension_numbers<[1], [1], [0], [0], [0, 0, 1, 0], [], []>} : vector<6x8xf32>, vector<6x8xf32>, vector<6x6xf32> -> vector<6x6xf32>
    %cst_412 = arith.constant 0.353553385 : f32
    %938 = vector.broadcast %cst_412 : f32 to vector<6x6xf32>
    %939 = arith.mulf %937, %938 : vector<6x6xf32>
    %cst_413 = arith.constant dense<0xFF800000> : vector<6xf32>
    %940 = vector.multi_reduction <maximumf>, %939, %cst_413 [1] : vector<6x6xf32> to vector<6xf32>
    %941 = vector.shape_cast %940 : vector<6xf32> to vector<6x1xf32>
    %942 = vector.broadcast %941 : vector<6x1xf32> to vector<6x6xf32>
    %943 = arith.subf %939, %942 : vector<6x6xf32>
    %944 = math.exp %943 : vector<6x6xf32>
    %cst_414 = arith.constant dense<0.000000e+00> : vector<6xf32>
    %945 = vector.multi_reduction <add>, %944, %cst_414 [1] : vector<6x6xf32> to vector<6xf32>
    %946 = vector.shape_cast %945 : vector<6xf32> to vector<6x1xf32>
    %947 = vector.broadcast %946 : vector<6x1xf32> to vector<6x6xf32>
    %948 = arith.divf %944, %947 : vector<6x6xf32>
    %cst_415 = arith.constant dense<0.000000e+00> : vector<6x8xf32>
    %949 = tpu.matmul %948, %936, %cst_415 {dimension_numbers = #tpu.dot_dimension_numbers<[1], [0], [0], [1], [0, 0, 1, 1], [], []>} : vector<6x6xf32>, vector<6x8xf32>, vector<6x8xf32> -> vector<6x8xf32>
    %950 = vector.extract_strided_slice %626 {offsets = [8, 0], sizes = [8, 32], strides = [1, 1]} : vector<32x32xf32> to vector<8x32xf32>
    %cst_416 = arith.constant dense<0.000000e+00> : vector<6x32xf32>
    %951 = tpu.matmul %949, %950, %cst_416 {dimension_numbers = #tpu.dot_dimension_numbers<[1], [0], [0], [1], [0, 0, 1, 1], [], []>} : vector<6x8xf32>, vector<8x32xf32>, vector<6x32xf32> -> vector<6x32xf32>
    %952 = arith.addf %933, %951 : vector<6x32xf32>
    %953 = vector.extract_strided_slice %911 {offsets = [0, 16], sizes = [6, 8], strides = [1, 1]} : vector<6x32xf32> to vector<6x8xf32>
    %954 = vector.extract_strided_slice %912 {offsets = [0, 16], sizes = [6, 8], strides = [1, 1]} : vector<6x32xf32> to vector<6x8xf32>
    %955 = vector.extract_strided_slice %913 {offsets = [0, 16], sizes = [6, 8], strides = [1, 1]} : vector<6x32xf32> to vector<6x8xf32>
    %cst_417 = arith.constant dense<0.000000e+00> : vector<6x6xf32>
    %956 = tpu.matmul %953, %954, %cst_417 {dimension_numbers = #tpu.dot_dimension_numbers<[1], [1], [0], [0], [0, 0, 1, 0], [], []>} : vector<6x8xf32>, vector<6x8xf32>, vector<6x6xf32> -> vector<6x6xf32>
    %cst_418 = arith.constant 0.353553385 : f32
    %957 = vector.broadcast %cst_418 : f32 to vector<6x6xf32>
    %958 = arith.mulf %956, %957 : vector<6x6xf32>
    %cst_419 = arith.constant dense<0xFF800000> : vector<6xf32>
    %959 = vector.multi_reduction <maximumf>, %958, %cst_419 [1] : vector<6x6xf32> to vector<6xf32>
    %960 = vector.shape_cast %959 : vector<6xf32> to vector<6x1xf32>
    %961 = vector.broadcast %960 : vector<6x1xf32> to vector<6x6xf32>
    %962 = arith.subf %958, %961 : vector<6x6xf32>
    %963 = math.exp %962 : vector<6x6xf32>
    %cst_420 = arith.constant dense<0.000000e+00> : vector<6xf32>
    %964 = vector.multi_reduction <add>, %963, %cst_420 [1] : vector<6x6xf32> to vector<6xf32>
    %965 = vector.shape_cast %964 : vector<6xf32> to vector<6x1xf32>
    %966 = vector.broadcast %965 : vector<6x1xf32> to vector<6x6xf32>
    %967 = arith.divf %963, %966 : vector<6x6xf32>
    %cst_421 = arith.constant dense<0.000000e+00> : vector<6x8xf32>
    %968 = tpu.matmul %967, %955, %cst_421 {dimension_numbers = #tpu.dot_dimension_numbers<[1], [0], [0], [1], [0, 0, 1, 1], [], []>} : vector<6x6xf32>, vector<6x8xf32>, vector<6x8xf32> -> vector<6x8xf32>
    %969 = vector.extract_strided_slice %626 {offsets = [16, 0], sizes = [8, 32], strides = [1, 1]} : vector<32x32xf32> to vector<8x32xf32>
    %cst_422 = arith.constant dense<0.000000e+00> : vector<6x32xf32>
    %970 = tpu.matmul %968, %969, %cst_422 {dimension_numbers = #tpu.dot_dimension_numbers<[1], [0], [0], [1], [0, 0, 1, 1], [], []>} : vector<6x8xf32>, vector<8x32xf32>, vector<6x32xf32> -> vector<6x32xf32>
    %971 = arith.addf %952, %970 : vector<6x32xf32>
    %972 = vector.extract_strided_slice %911 {offsets = [0, 24], sizes = [6, 8], strides = [1, 1]} : vector<6x32xf32> to vector<6x8xf32>
    %973 = vector.extract_strided_slice %912 {offsets = [0, 24], sizes = [6, 8], strides = [1, 1]} : vector<6x32xf32> to vector<6x8xf32>
    %974 = vector.extract_strided_slice %913 {offsets = [0, 24], sizes = [6, 8], strides = [1, 1]} : vector<6x32xf32> to vector<6x8xf32>
    %cst_423 = arith.constant dense<0.000000e+00> : vector<6x6xf32>
    %975 = tpu.matmul %972, %973, %cst_423 {dimension_numbers = #tpu.dot_dimension_numbers<[1], [1], [0], [0], [0, 0, 1, 0], [], []>} : vector<6x8xf32>, vector<6x8xf32>, vector<6x6xf32> -> vector<6x6xf32>
    %cst_424 = arith.constant 0.353553385 : f32
    %976 = vector.broadcast %cst_424 : f32 to vector<6x6xf32>
    %977 = arith.mulf %975, %976 : vector<6x6xf32>
    %cst_425 = arith.constant dense<0xFF800000> : vector<6xf32>
    %978 = vector.multi_reduction <maximumf>, %977, %cst_425 [1] : vector<6x6xf32> to vector<6xf32>
    %979 = vector.shape_cast %978 : vector<6xf32> to vector<6x1xf32>
    %980 = vector.broadcast %979 : vector<6x1xf32> to vector<6x6xf32>
    %981 = arith.subf %977, %980 : vector<6x6xf32>
    %982 = math.exp %981 : vector<6x6xf32>
    %cst_426 = arith.constant dense<0.000000e+00> : vector<6xf32>
    %983 = vector.multi_reduction <add>, %982, %cst_426 [1] : vector<6x6xf32> to vector<6xf32>
    %984 = vector.shape_cast %983 : vector<6xf32> to vector<6x1xf32>
    %985 = vector.broadcast %984 : vector<6x1xf32> to vector<6x6xf32>
    %986 = arith.divf %982, %985 : vector<6x6xf32>
    %cst_427 = arith.constant dense<0.000000e+00> : vector<6x8xf32>
    %987 = tpu.matmul %986, %974, %cst_427 {dimension_numbers = #tpu.dot_dimension_numbers<[1], [0], [0], [1], [0, 0, 1, 1], [], []>} : vector<6x6xf32>, vector<6x8xf32>, vector<6x8xf32> -> vector<6x8xf32>
    %988 = vector.extract_strided_slice %626 {offsets = [24, 0], sizes = [8, 32], strides = [1, 1]} : vector<32x32xf32> to vector<8x32xf32>
    %cst_428 = arith.constant dense<0.000000e+00> : vector<6x32xf32>
    %989 = tpu.matmul %987, %988, %cst_428 {dimension_numbers = #tpu.dot_dimension_numbers<[1], [0], [0], [1], [0, 0, 1, 1], [], []>} : vector<6x8xf32>, vector<8x32xf32>, vector<6x32xf32> -> vector<6x32xf32>
    %990 = arith.addf %971, %989 : vector<6x32xf32>
    %991 = vector.broadcast %628 : vector<1x32xf32> to vector<6x32xf32>
    %992 = arith.addf %990, %991 : vector<6x32xf32>
    %993 = arith.addf %592, %992 : vector<6x32xf32>
    %994 = vector.extract_strided_slice %646 {offsets = [0, 0], sizes = [1, 32], strides = [1, 1]} : vector<3x32xf32> to vector<1x32xf32>
    %995 = vector.extract_strided_slice %648 {offsets = [0, 0], sizes = [1, 32], strides = [1, 1]} : vector<3x32xf32> to vector<1x32xf32>
    %cst_429 = arith.constant dense<0.000000e+00> : vector<6xf32>
    %996 = vector.multi_reduction <add>, %993, %cst_429 [1] : vector<6x32xf32> to vector<6xf32>
    %997 = vector.shape_cast %996 : vector<6xf32> to vector<6x1xf32>
    %cst_430 = arith.constant 3.200000e+01 : f32
    %998 = vector.broadcast %cst_430 : f32 to vector<6x1xf32>
    %999 = arith.divf %997, %998 : vector<6x1xf32>
    %1000 = vector.broadcast %999 : vector<6x1xf32> to vector<6x32xf32>
    %1001 = arith.subf %993, %1000 : vector<6x32xf32>
    %1002 = arith.mulf %1001, %1001 : vector<6x32xf32>
    %cst_431 = arith.constant dense<0.000000e+00> : vector<6xf32>
    %1003 = vector.multi_reduction <add>, %1002, %cst_431 [1] : vector<6x32xf32> to vector<6xf32>
    %1004 = vector.shape_cast %1003 : vector<6xf32> to vector<6x1xf32>
    %cst_432 = arith.constant 3.200000e+01 : f32
    %1005 = vector.broadcast %cst_432 : f32 to vector<6x1xf32>
    %1006 = arith.divf %1004, %1005 : vector<6x1xf32>
    %1007 = vector.broadcast %999 : vector<6x1xf32> to vector<6x32xf32>
    %1008 = arith.subf %993, %1007 : vector<6x32xf32>
    %cst_433 = arith.constant 9.99999974E-6 : f32
    %1009 = vector.broadcast %cst_433 : f32 to vector<6x1xf32>
    %1010 = arith.addf %1006, %1009 : vector<6x1xf32>
    %1011 = math.rsqrt %1010 : vector<6x1xf32>
    %1012 = vector.broadcast %1011 : vector<6x1xf32> to vector<6x32xf32>
    %1013 = arith.mulf %1008, %1012 : vector<6x32xf32>
    %1014 = vector.broadcast %994 : vector<1x32xf32> to vector<6x32xf32>
    %1015 = arith.mulf %1013, %1014 : vector<6x32xf32>
    %1016 = vector.broadcast %995 : vector<1x32xf32> to vector<6x32xf32>
    %1017 = arith.addf %1015, %1016 : vector<6x32xf32>
    %1018 = vector.extract_strided_slice %630 {offsets = [0, 0], sizes = [32, 32], strides = [1, 1]} : vector<32x96xf32> to vector<32x32xf32>
    %cst_434 = arith.constant dense<0.000000e+00> : vector<6x32xf32>
    %1019 = tpu.matmul %1017, %1018, %cst_434 {dimension_numbers = #tpu.dot_dimension_numbers<[1], [0], [0], [1], [0, 0, 1, 1], [], []>} : vector<6x32xf32>, vector<32x32xf32>, vector<6x32xf32> -> vector<6x32xf32>
    %1020 = vector.extract_strided_slice %632 {offsets = [0, 0], sizes = [1, 32], strides = [1, 1]} : vector<1x96xf32> to vector<1x32xf32>
    %1021 = vector.broadcast %1020 : vector<1x32xf32> to vector<6x32xf32>
    %1022 = arith.addf %1019, %1021 : vector<6x32xf32>
    %1023 = vector.extract_strided_slice %630 {offsets = [0, 32], sizes = [32, 64], strides = [1, 1]} : vector<32x96xf32> to vector<32x64xf32>
    %cst_435 = arith.constant dense<0.000000e+00> : vector<9x64xf32>
    %1024 = tpu.matmul %907, %1023, %cst_435 {dimension_numbers = #tpu.dot_dimension_numbers<[1], [0], [0], [1], [0, 0, 1, 1], [], []>} : vector<9x32xf32>, vector<32x64xf32>, vector<9x64xf32> -> vector<9x64xf32>
    %1025 = vector.extract_strided_slice %632 {offsets = [0, 32], sizes = [1, 64], strides = [1, 1]} : vector<1x96xf32> to vector<1x64xf32>
    %1026 = vector.broadcast %1025 : vector<1x64xf32> to vector<9x64xf32>
    %1027 = arith.addf %1024, %1026 : vector<9x64xf32>
    %1028 = vector.extract_strided_slice %1027 {offsets = [0, 0], sizes = [9, 32], strides = [1, 1]} : vector<9x64xf32> to vector<9x32xf32>
    %1029 = vector.extract_strided_slice %1027 {offsets = [0, 32], sizes = [9, 32], strides = [1, 1]} : vector<9x64xf32> to vector<9x32xf32>
    %cst_436 = arith.constant 0.000000e+00 : f32
    %1030 = vector.broadcast %cst_436 : f32 to vector<6x32xf32>
    %1031 = vector.extract_strided_slice %1022 {offsets = [0, 0], sizes = [6, 8], strides = [1, 1]} : vector<6x32xf32> to vector<6x8xf32>
    %1032 = vector.extract_strided_slice %1028 {offsets = [0, 0], sizes = [9, 8], strides = [1, 1]} : vector<9x32xf32> to vector<9x8xf32>
    %1033 = vector.extract_strided_slice %1029 {offsets = [0, 0], sizes = [9, 8], strides = [1, 1]} : vector<9x32xf32> to vector<9x8xf32>
    %cst_437 = arith.constant dense<0.000000e+00> : vector<6x9xf32>
    %1034 = tpu.matmul %1031, %1032, %cst_437 {dimension_numbers = #tpu.dot_dimension_numbers<[1], [1], [0], [0], [0, 0, 1, 0], [], []>} : vector<6x8xf32>, vector<9x8xf32>, vector<6x9xf32> -> vector<6x9xf32>
    %cst_438 = arith.constant 0.353553385 : f32
    %1035 = vector.broadcast %cst_438 : f32 to vector<6x9xf32>
    %1036 = arith.mulf %1034, %1035 : vector<6x9xf32>
    %cst_439 = arith.constant dense<0xFF800000> : vector<6xf32>
    %1037 = vector.multi_reduction <maximumf>, %1036, %cst_439 [1] : vector<6x9xf32> to vector<6xf32>
    %1038 = vector.shape_cast %1037 : vector<6xf32> to vector<6x1xf32>
    %1039 = vector.broadcast %1038 : vector<6x1xf32> to vector<6x9xf32>
    %1040 = arith.subf %1036, %1039 : vector<6x9xf32>
    %1041 = math.exp %1040 : vector<6x9xf32>
    %cst_440 = arith.constant dense<0.000000e+00> : vector<6xf32>
    %1042 = vector.multi_reduction <add>, %1041, %cst_440 [1] : vector<6x9xf32> to vector<6xf32>
    %1043 = vector.shape_cast %1042 : vector<6xf32> to vector<6x1xf32>
    %1044 = vector.broadcast %1043 : vector<6x1xf32> to vector<6x9xf32>
    %1045 = arith.divf %1041, %1044 : vector<6x9xf32>
    %cst_441 = arith.constant dense<0.000000e+00> : vector<6x8xf32>
    %1046 = tpu.matmul %1045, %1033, %cst_441 {dimension_numbers = #tpu.dot_dimension_numbers<[1], [0], [0], [1], [0, 0, 1, 1], [], []>} : vector<6x9xf32>, vector<9x8xf32>, vector<6x8xf32> -> vector<6x8xf32>
    %1047 = vector.extract_strided_slice %634 {offsets = [0, 0], sizes = [8, 32], strides = [1, 1]} : vector<32x32xf32> to vector<8x32xf32>
    %cst_442 = arith.constant dense<0.000000e+00> : vector<6x32xf32>
    %1048 = tpu.matmul %1046, %1047, %cst_442 {dimension_numbers = #tpu.dot_dimension_numbers<[1], [0], [0], [1], [0, 0, 1, 1], [], []>} : vector<6x8xf32>, vector<8x32xf32>, vector<6x32xf32> -> vector<6x32xf32>
    %1049 = arith.addf %1030, %1048 : vector<6x32xf32>
    %1050 = vector.extract_strided_slice %1022 {offsets = [0, 8], sizes = [6, 8], strides = [1, 1]} : vector<6x32xf32> to vector<6x8xf32>
    %1051 = vector.extract_strided_slice %1028 {offsets = [0, 8], sizes = [9, 8], strides = [1, 1]} : vector<9x32xf32> to vector<9x8xf32>
    %1052 = vector.extract_strided_slice %1029 {offsets = [0, 8], sizes = [9, 8], strides = [1, 1]} : vector<9x32xf32> to vector<9x8xf32>
    %cst_443 = arith.constant dense<0.000000e+00> : vector<6x9xf32>
    %1053 = tpu.matmul %1050, %1051, %cst_443 {dimension_numbers = #tpu.dot_dimension_numbers<[1], [1], [0], [0], [0, 0, 1, 0], [], []>} : vector<6x8xf32>, vector<9x8xf32>, vector<6x9xf32> -> vector<6x9xf32>
    %cst_444 = arith.constant 0.353553385 : f32
    %1054 = vector.broadcast %cst_444 : f32 to vector<6x9xf32>
    %1055 = arith.mulf %1053, %1054 : vector<6x9xf32>
    %cst_445 = arith.constant dense<0xFF800000> : vector<6xf32>
    %1056 = vector.multi_reduction <maximumf>, %1055, %cst_445 [1] : vector<6x9xf32> to vector<6xf32>
    %1057 = vector.shape_cast %1056 : vector<6xf32> to vector<6x1xf32>
    %1058 = vector.broadcast %1057 : vector<6x1xf32> to vector<6x9xf32>
    %1059 = arith.subf %1055, %1058 : vector<6x9xf32>
    %1060 = math.exp %1059 : vector<6x9xf32>
    %cst_446 = arith.constant dense<0.000000e+00> : vector<6xf32>
    %1061 = vector.multi_reduction <add>, %1060, %cst_446 [1] : vector<6x9xf32> to vector<6xf32>
    %1062 = vector.shape_cast %1061 : vector<6xf32> to vector<6x1xf32>
    %1063 = vector.broadcast %1062 : vector<6x1xf32> to vector<6x9xf32>
    %1064 = arith.divf %1060, %1063 : vector<6x9xf32>
    %cst_447 = arith.constant dense<0.000000e+00> : vector<6x8xf32>
    %1065 = tpu.matmul %1064, %1052, %cst_447 {dimension_numbers = #tpu.dot_dimension_numbers<[1], [0], [0], [1], [0, 0, 1, 1], [], []>} : vector<6x9xf32>, vector<9x8xf32>, vector<6x8xf32> -> vector<6x8xf32>
    %1066 = vector.extract_strided_slice %634 {offsets = [8, 0], sizes = [8, 32], strides = [1, 1]} : vector<32x32xf32> to vector<8x32xf32>
    %cst_448 = arith.constant dense<0.000000e+00> : vector<6x32xf32>
    %1067 = tpu.matmul %1065, %1066, %cst_448 {dimension_numbers = #tpu.dot_dimension_numbers<[1], [0], [0], [1], [0, 0, 1, 1], [], []>} : vector<6x8xf32>, vector<8x32xf32>, vector<6x32xf32> -> vector<6x32xf32>
    %1068 = arith.addf %1049, %1067 : vector<6x32xf32>
    %1069 = vector.extract_strided_slice %1022 {offsets = [0, 16], sizes = [6, 8], strides = [1, 1]} : vector<6x32xf32> to vector<6x8xf32>
    %1070 = vector.extract_strided_slice %1028 {offsets = [0, 16], sizes = [9, 8], strides = [1, 1]} : vector<9x32xf32> to vector<9x8xf32>
    %1071 = vector.extract_strided_slice %1029 {offsets = [0, 16], sizes = [9, 8], strides = [1, 1]} : vector<9x32xf32> to vector<9x8xf32>
    %cst_449 = arith.constant dense<0.000000e+00> : vector<6x9xf32>
    %1072 = tpu.matmul %1069, %1070, %cst_449 {dimension_numbers = #tpu.dot_dimension_numbers<[1], [1], [0], [0], [0, 0, 1, 0], [], []>} : vector<6x8xf32>, vector<9x8xf32>, vector<6x9xf32> -> vector<6x9xf32>
    %cst_450 = arith.constant 0.353553385 : f32
    %1073 = vector.broadcast %cst_450 : f32 to vector<6x9xf32>
    %1074 = arith.mulf %1072, %1073 : vector<6x9xf32>
    %cst_451 = arith.constant dense<0xFF800000> : vector<6xf32>
    %1075 = vector.multi_reduction <maximumf>, %1074, %cst_451 [1] : vector<6x9xf32> to vector<6xf32>
    %1076 = vector.shape_cast %1075 : vector<6xf32> to vector<6x1xf32>
    %1077 = vector.broadcast %1076 : vector<6x1xf32> to vector<6x9xf32>
    %1078 = arith.subf %1074, %1077 : vector<6x9xf32>
    %1079 = math.exp %1078 : vector<6x9xf32>
    %cst_452 = arith.constant dense<0.000000e+00> : vector<6xf32>
    %1080 = vector.multi_reduction <add>, %1079, %cst_452 [1] : vector<6x9xf32> to vector<6xf32>
    %1081 = vector.shape_cast %1080 : vector<6xf32> to vector<6x1xf32>
    %1082 = vector.broadcast %1081 : vector<6x1xf32> to vector<6x9xf32>
    %1083 = arith.divf %1079, %1082 : vector<6x9xf32>
    %cst_453 = arith.constant dense<0.000000e+00> : vector<6x8xf32>
    %1084 = tpu.matmul %1083, %1071, %cst_453 {dimension_numbers = #tpu.dot_dimension_numbers<[1], [0], [0], [1], [0, 0, 1, 1], [], []>} : vector<6x9xf32>, vector<9x8xf32>, vector<6x8xf32> -> vector<6x8xf32>
    %1085 = vector.extract_strided_slice %634 {offsets = [16, 0], sizes = [8, 32], strides = [1, 1]} : vector<32x32xf32> to vector<8x32xf32>
    %cst_454 = arith.constant dense<0.000000e+00> : vector<6x32xf32>
    %1086 = tpu.matmul %1084, %1085, %cst_454 {dimension_numbers = #tpu.dot_dimension_numbers<[1], [0], [0], [1], [0, 0, 1, 1], [], []>} : vector<6x8xf32>, vector<8x32xf32>, vector<6x32xf32> -> vector<6x32xf32>
    %1087 = arith.addf %1068, %1086 : vector<6x32xf32>
    %1088 = vector.extract_strided_slice %1022 {offsets = [0, 24], sizes = [6, 8], strides = [1, 1]} : vector<6x32xf32> to vector<6x8xf32>
    %1089 = vector.extract_strided_slice %1028 {offsets = [0, 24], sizes = [9, 8], strides = [1, 1]} : vector<9x32xf32> to vector<9x8xf32>
    %1090 = vector.extract_strided_slice %1029 {offsets = [0, 24], sizes = [9, 8], strides = [1, 1]} : vector<9x32xf32> to vector<9x8xf32>
    %cst_455 = arith.constant dense<0.000000e+00> : vector<6x9xf32>
    %1091 = tpu.matmul %1088, %1089, %cst_455 {dimension_numbers = #tpu.dot_dimension_numbers<[1], [1], [0], [0], [0, 0, 1, 0], [], []>} : vector<6x8xf32>, vector<9x8xf32>, vector<6x9xf32> -> vector<6x9xf32>
    %cst_456 = arith.constant 0.353553385 : f32
    %1092 = vector.broadcast %cst_456 : f32 to vector<6x9xf32>
    %1093 = arith.mulf %1091, %1092 : vector<6x9xf32>
    %cst_457 = arith.constant dense<0xFF800000> : vector<6xf32>
    %1094 = vector.multi_reduction <maximumf>, %1093, %cst_457 [1] : vector<6x9xf32> to vector<6xf32>
    %1095 = vector.shape_cast %1094 : vector<6xf32> to vector<6x1xf32>
    %1096 = vector.broadcast %1095 : vector<6x1xf32> to vector<6x9xf32>
    %1097 = arith.subf %1093, %1096 : vector<6x9xf32>
    %1098 = math.exp %1097 : vector<6x9xf32>
    %cst_458 = arith.constant dense<0.000000e+00> : vector<6xf32>
    %1099 = vector.multi_reduction <add>, %1098, %cst_458 [1] : vector<6x9xf32> to vector<6xf32>
    %1100 = vector.shape_cast %1099 : vector<6xf32> to vector<6x1xf32>
    %1101 = vector.broadcast %1100 : vector<6x1xf32> to vector<6x9xf32>
    %1102 = arith.divf %1098, %1101 : vector<6x9xf32>
    %cst_459 = arith.constant dense<0.000000e+00> : vector<6x8xf32>
    %1103 = tpu.matmul %1102, %1090, %cst_459 {dimension_numbers = #tpu.dot_dimension_numbers<[1], [0], [0], [1], [0, 0, 1, 1], [], []>} : vector<6x9xf32>, vector<9x8xf32>, vector<6x8xf32> -> vector<6x8xf32>
    %1104 = vector.extract_strided_slice %634 {offsets = [24, 0], sizes = [8, 32], strides = [1, 1]} : vector<32x32xf32> to vector<8x32xf32>
    %cst_460 = arith.constant dense<0.000000e+00> : vector<6x32xf32>
    %1105 = tpu.matmul %1103, %1104, %cst_460 {dimension_numbers = #tpu.dot_dimension_numbers<[1], [0], [0], [1], [0, 0, 1, 1], [], []>} : vector<6x8xf32>, vector<8x32xf32>, vector<6x32xf32> -> vector<6x32xf32>
    %1106 = arith.addf %1087, %1105 : vector<6x32xf32>
    %1107 = vector.broadcast %636 : vector<1x32xf32> to vector<6x32xf32>
    %1108 = arith.addf %1106, %1107 : vector<6x32xf32>
    %1109 = arith.addf %1017, %1108 : vector<6x32xf32>
    %1110 = vector.extract_strided_slice %646 {offsets = [1, 0], sizes = [1, 32], strides = [1, 1]} : vector<3x32xf32> to vector<1x32xf32>
    %1111 = vector.extract_strided_slice %648 {offsets = [1, 0], sizes = [1, 32], strides = [1, 1]} : vector<3x32xf32> to vector<1x32xf32>
    %cst_461 = arith.constant dense<0.000000e+00> : vector<6xf32>
    %1112 = vector.multi_reduction <add>, %1109, %cst_461 [1] : vector<6x32xf32> to vector<6xf32>
    %1113 = vector.shape_cast %1112 : vector<6xf32> to vector<6x1xf32>
    %cst_462 = arith.constant 3.200000e+01 : f32
    %1114 = vector.broadcast %cst_462 : f32 to vector<6x1xf32>
    %1115 = arith.divf %1113, %1114 : vector<6x1xf32>
    %1116 = vector.broadcast %1115 : vector<6x1xf32> to vector<6x32xf32>
    %1117 = arith.subf %1109, %1116 : vector<6x32xf32>
    %1118 = arith.mulf %1117, %1117 : vector<6x32xf32>
    %cst_463 = arith.constant dense<0.000000e+00> : vector<6xf32>
    %1119 = vector.multi_reduction <add>, %1118, %cst_463 [1] : vector<6x32xf32> to vector<6xf32>
    %1120 = vector.shape_cast %1119 : vector<6xf32> to vector<6x1xf32>
    %cst_464 = arith.constant 3.200000e+01 : f32
    %1121 = vector.broadcast %cst_464 : f32 to vector<6x1xf32>
    %1122 = arith.divf %1120, %1121 : vector<6x1xf32>
    %1123 = vector.broadcast %1115 : vector<6x1xf32> to vector<6x32xf32>
    %1124 = arith.subf %1109, %1123 : vector<6x32xf32>
    %cst_465 = arith.constant 9.99999974E-6 : f32
    %1125 = vector.broadcast %cst_465 : f32 to vector<6x1xf32>
    %1126 = arith.addf %1122, %1125 : vector<6x1xf32>
    %1127 = math.rsqrt %1126 : vector<6x1xf32>
    %1128 = vector.broadcast %1127 : vector<6x1xf32> to vector<6x32xf32>
    %1129 = arith.mulf %1124, %1128 : vector<6x32xf32>
    %1130 = vector.broadcast %1110 : vector<1x32xf32> to vector<6x32xf32>
    %1131 = arith.mulf %1129, %1130 : vector<6x32xf32>
    %1132 = vector.broadcast %1111 : vector<1x32xf32> to vector<6x32xf32>
    %1133 = arith.addf %1131, %1132 : vector<6x32xf32>
    %cst_466 = arith.constant dense<0.000000e+00> : vector<6x64xf32>
    %1134 = tpu.matmul %1133, %638, %cst_466 {dimension_numbers = #tpu.dot_dimension_numbers<[1], [0], [0], [1], [0, 0, 1, 1], [], []>} : vector<6x32xf32>, vector<32x64xf32>, vector<6x64xf32> -> vector<6x64xf32>
    %1135 = vector.broadcast %640 : vector<1x64xf32> to vector<6x64xf32>
    %1136 = arith.addf %1134, %1135 : vector<6x64xf32>
    %cst_467 = arith.constant 0.000000e+00 : f32
    %1137 = vector.broadcast %cst_467 : f32 to vector<6x64xf32>
    %1138 = arith.maximumf %1136, %1137 : vector<6x64xf32>
    %cst_468 = arith.constant dense<0.000000e+00> : vector<6x32xf32>
    %1139 = tpu.matmul %1138, %642, %cst_468 {dimension_numbers = #tpu.dot_dimension_numbers<[1], [0], [0], [1], [0, 0, 1, 1], [], []>} : vector<6x64xf32>, vector<64x32xf32>, vector<6x32xf32> -> vector<6x32xf32>
    %1140 = vector.broadcast %644 : vector<1x32xf32> to vector<6x32xf32>
    %1141 = arith.addf %1139, %1140 : vector<6x32xf32>
    %1142 = arith.addf %1133, %1141 : vector<6x32xf32>
    %1143 = vector.extract_strided_slice %646 {offsets = [2, 0], sizes = [1, 32], strides = [1, 1]} : vector<3x32xf32> to vector<1x32xf32>
    %1144 = vector.extract_strided_slice %648 {offsets = [2, 0], sizes = [1, 32], strides = [1, 1]} : vector<3x32xf32> to vector<1x32xf32>
    %cst_469 = arith.constant dense<0.000000e+00> : vector<6xf32>
    %1145 = vector.multi_reduction <add>, %1142, %cst_469 [1] : vector<6x32xf32> to vector<6xf32>
    %1146 = vector.shape_cast %1145 : vector<6xf32> to vector<6x1xf32>
    %cst_470 = arith.constant 3.200000e+01 : f32
    %1147 = vector.broadcast %cst_470 : f32 to vector<6x1xf32>
    %1148 = arith.divf %1146, %1147 : vector<6x1xf32>
    %1149 = vector.broadcast %1148 : vector<6x1xf32> to vector<6x32xf32>
    %1150 = arith.subf %1142, %1149 : vector<6x32xf32>
    %1151 = arith.mulf %1150, %1150 : vector<6x32xf32>
    %cst_471 = arith.constant dense<0.000000e+00> : vector<6xf32>
    %1152 = vector.multi_reduction <add>, %1151, %cst_471 [1] : vector<6x32xf32> to vector<6xf32>
    %1153 = vector.shape_cast %1152 : vector<6xf32> to vector<6x1xf32>
    %cst_472 = arith.constant 3.200000e+01 : f32
    %1154 = vector.broadcast %cst_472 : f32 to vector<6x1xf32>
    %1155 = arith.divf %1153, %1154 : vector<6x1xf32>
    %1156 = vector.broadcast %1148 : vector<6x1xf32> to vector<6x32xf32>
    %1157 = arith.subf %1142, %1156 : vector<6x32xf32>
    %cst_473 = arith.constant 9.99999974E-6 : f32
    %1158 = vector.broadcast %cst_473 : f32 to vector<6x1xf32>
    %1159 = arith.addf %1155, %1158 : vector<6x1xf32>
    %1160 = math.rsqrt %1159 : vector<6x1xf32>
    %1161 = vector.broadcast %1160 : vector<6x1xf32> to vector<6x32xf32>
    %1162 = arith.mulf %1157, %1161 : vector<6x32xf32>
    %1163 = vector.broadcast %1143 : vector<1x32xf32> to vector<6x32xf32>
    %1164 = arith.mulf %1162, %1163 : vector<6x32xf32>
    %1165 = vector.broadcast %1144 : vector<1x32xf32> to vector<6x32xf32>
    %1166 = arith.addf %1164, %1165 : vector<6x32xf32>
    %c0_474 = arith.constant 0 : index
    %c0_475 = arith.constant 0 : index
    %1167 = vector.load %arg34[%c0_474, %c0_475] : memref<32x192xf32, #tpu.memory_space<vmem>>, vector<32x192xf32>
    %cst_476 = arith.constant dense<0.000000e+00> : vector<6x192xf32>
    %1168 = tpu.matmul %1166, %1167, %cst_476 {dimension_numbers = #tpu.dot_dimension_numbers<[1], [0], [0], [1], [0, 0, 1, 1], [], []>} : vector<6x32xf32>, vector<32x192xf32>, vector<6x192xf32> -> vector<6x192xf32>
    %c0_477 = arith.constant 0 : index
    %c0_478 = arith.constant 0 : index
    %1169 = vector.load %arg35[%c0_477, %c0_478] : memref<1x192xf32, #tpu.memory_space<vmem>>, vector<1x192xf32>
    %1170 = vector.broadcast %1169 : vector<1x192xf32> to vector<6x192xf32>
    %1171 = arith.addf %1168, %1170 : vector<6x192xf32>
    %c0_479 = arith.constant 0 : index
    %c0_480 = arith.constant 0 : index
    %1172 = vector.load %arg36[%c0_479, %c0_480] : memref<32x128xf32, #tpu.memory_space<vmem>>, vector<32x128xf32>
    %cst_481 = arith.constant dense<0.000000e+00> : vector<9x128xf32>
    %1173 = tpu.matmul %907, %1172, %cst_481 {dimension_numbers = #tpu.dot_dimension_numbers<[1], [0], [0], [1], [0, 0, 1, 1], [], []>} : vector<9x32xf32>, vector<32x128xf32>, vector<9x128xf32> -> vector<9x128xf32>
    %c0_482 = arith.constant 0 : index
    %c0_483 = arith.constant 0 : index
    %1174 = vector.load %arg37[%c0_482, %c0_483] : memref<1x128xf32, #tpu.memory_space<vmem>>, vector<1x128xf32>
    %1175 = vector.broadcast %1174 : vector<1x128xf32> to vector<9x128xf32>
    %1176 = arith.addf %1173, %1175 : vector<9x128xf32>
    %c0_484 = arith.constant 0 : index
    %c0_485 = arith.constant 0 : index
    %1177 = vector.load %arg38[%c0_484, %c0_485] : memref<32x64xf32, #tpu.memory_space<vmem>>, vector<32x64xf32>
    %cst_486 = arith.constant dense<0.000000e+00> : vector<6x64xf32>
    %1178 = tpu.matmul %1166, %1177, %cst_486 {dimension_numbers = #tpu.dot_dimension_numbers<[1], [0], [0], [1], [0, 0, 1, 1], [], []>} : vector<6x32xf32>, vector<32x64xf32>, vector<6x64xf32> -> vector<6x64xf32>
    %c0_487 = arith.constant 0 : index
    %c0_488 = arith.constant 0 : index
    %1179 = vector.load %arg39[%c0_487, %c0_488] : memref<1x64xf32, #tpu.memory_space<vmem>>, vector<1x64xf32>
    %1180 = vector.broadcast %1179 : vector<1x64xf32> to vector<6x64xf32>
    %1181 = arith.addf %1178, %1180 : vector<6x64xf32>
    %1182 = vector.extract_strided_slice %1171 {offsets = [0, 0], sizes = [6, 64], strides = [1, 1]} : vector<6x192xf32> to vector<6x64xf32>
    %1183 = vector.extract_strided_slice %1176 {offsets = [0, 0], sizes = [9, 64], strides = [1, 1]} : vector<9x128xf32> to vector<9x64xf32>
    %cst_489 = arith.constant dense<0.000000e+00> : vector<6x9xf32>
    %1184 = tpu.matmul %1182, %1183, %cst_489 {dimension_numbers = #tpu.dot_dimension_numbers<[1], [1], [0], [0], [0, 0, 1, 0], [], []>} : vector<6x64xf32>, vector<9x64xf32>, vector<6x9xf32> -> vector<6x9xf32>
    %cst_490 = arith.constant 1.250000e-01 : f32
    %1185 = vector.broadcast %cst_490 : f32 to vector<6x9xf32>
    %1186 = arith.mulf %1184, %1185 : vector<6x9xf32>
    %1187 = vector.extract_strided_slice %1171 {offsets = [0, 64], sizes = [6, 64], strides = [1, 1]} : vector<6x192xf32> to vector<6x64xf32>
    %1188 = vector.extract_strided_slice %1176 {offsets = [0, 64], sizes = [9, 64], strides = [1, 1]} : vector<9x128xf32> to vector<9x64xf32>
    %cst_491 = arith.constant dense<0.000000e+00> : vector<6x9xf32>
    %1189 = tpu.matmul %1187, %1188, %cst_491 {dimension_numbers = #tpu.dot_dimension_numbers<[1], [1], [0], [0], [0, 0, 1, 0], [], []>} : vector<6x64xf32>, vector<9x64xf32>, vector<6x9xf32> -> vector<6x9xf32>
    %cst_492 = arith.constant 1.250000e-01 : f32
    %1190 = vector.broadcast %cst_492 : f32 to vector<6x9xf32>
    %1191 = arith.mulf %1189, %1190 : vector<6x9xf32>
    %1192 = vector.extract_strided_slice %1171 {offsets = [0, 128], sizes = [6, 64], strides = [1, 1]} : vector<6x192xf32> to vector<6x64xf32>
    %cst_493 = arith.constant dense<0.000000e+00> : vector<6x6xf32>
    %1193 = tpu.matmul %1192, %1181, %cst_493 {dimension_numbers = #tpu.dot_dimension_numbers<[1], [1], [0], [0], [0, 0, 1, 0], [], []>} : vector<6x64xf32>, vector<6x64xf32>, vector<6x6xf32> -> vector<6x6xf32>
    %cst_494 = arith.constant 1.250000e-01 : f32
    %1194 = vector.broadcast %cst_494 : f32 to vector<6x6xf32>
    %1195 = arith.mulf %1193, %1194 : vector<6x6xf32>
    %cst_495 = arith.constant 0.000000e+00 : f32
    %1196 = vector.broadcast %cst_495 : f32 to vector<6x104xf32>
    %1197 = tpu.concatenate %1186, %1191, %1195, %1196 in 1 : vector<6x9xf32>, vector<6x9xf32>, vector<6x6xf32>, vector<6x104xf32> -> vector<6x128xf32>
    %c0_496 = arith.constant 0 : index
    %c0_497 = arith.constant 0 : index
    %1198 = vector.load %arg40[%c0_496, %c0_497] : memref<6x128xf32, #tpu.memory_space<vmem>>, vector<6x128xf32>
    tpu.vector_store %arg40[%c0_496, %c0_497], %1197 {strides = array<i32>} : memref<6x128xf32, #tpu.memory_space<vmem>>, vector<6x128xf32>,
    return
  }
}

</mosaic_0001>

<bundles_post_ra>
// kernel: l2_transformer_forward.1
= control target key start
LH: loop header
LB: loop body
LE: loop exit
PB: predicated region body
PF: predicated region fallthrough
CT: control target
= control target key end

     0   :  { %s14376_s6 = smov 1   ;;  %s14377_s10 = smov 2   ;;  %s16125_s0 = inlined_call_operand.smem [shape: u32[41], index: -1, kind: input, shape index: {}] }
   0x1   :  { %s14465_s5 = sld [smem:[%s16125_s0]]   ;;  %s14378_s14 = smov 3  }
   0x2   :  { %s14470_s9 = sld [smem:[%s16125_s0 + %s14376_s6]]   ;;  %s14379_s18 = smov 4  }
   0x3   :  { %s14475_s13 = sld [smem:[%s16125_s0 + %s14377_s10]]   ;;  %s14380_s22 = smov 5  }
   0x4   :  { %s14480_s17 = sld [smem:[%s16125_s0 + %s14378_s14]]   ;;  %s14381_s26 = smov 6  }
   0x5   :  { %s14485_s21 = sld [smem:[%s16125_s0 + %s14379_s18]]   ;;  %s14382_s30 = smov 7  }
   0x6   :  { %s14490_s25 = sld [smem:[%s16125_s0 + %s14380_s22]]   ;;  %s14383_s4 = smov 8  }
   0x7   :  { %16144 = sst [smem:[#allocation45_spill]] %s14465_s5  ;;  %s14384_s10 = smov 9  }
   0x8   :  { %s14495_s29 = sld [smem:[%s16125_s0 + %s14381_s26]]   ;;  %s14385_s15 = smov 10  }
   0x9   :  { %16145 = sst [smem:[#allocation46_spill]] %s14475_s13  ;;  %s14386_s20 = smov 11  }
   0xa   :  { %16146 = sst [smem:[#allocation47_spill]] %s14480_s17  ;;  %s14387_s26 = smov 12  }
   0xb   :  { %s14500_s3 = sld [smem:[%s16125_s0 + %s14382_s30]]   ;;  %s14388_s1 = smov 13  }
   0xc   :  { %16147 = sst [smem:[#allocation48_spill]] %s14490_s25  ;;  %s14389_s7 = smov 14  }
   0xd   :  { %s14505_s8 = sld [smem:[%s16125_s0 + %s14383_s4]]   ;;  %s14391_s22 = smov 16  }
   0xe   :  { %16148 = sst [smem:[#allocation49_spill]] %s14495_s29  ;;  %s14392_s28 = smov 17  }
   0xf   :  { %s14510_s14 = sld [smem:[%s16125_s0 + %s14384_s10]]  }
  0x10   :  { %s14515_s19 = sld [smem:[%s16125_s0 + %s14385_s15]]   ;;  %s14390_s15 = smov 15  }
  0x11   :  { %s14520_s24 = sld [smem:[%s16125_s0 + %s14386_s20]]  }
  0x12   :  { %s14525_s30 = sld [smem:[%s16125_s0 + %s14387_s26]]  }
  0x13   :  { %16149 = sst [smem:[#allocation50_spill]] %s14505_s8 }
  0x14   :  { %s14530_s6 = sld [smem:[%s16125_s0 + %s14388_s1]]  }
  0x15   :  { %s14535_s12 = sld [smem:[%s16125_s0 + %s14389_s7]]   ;;  %s14393_s7 = smov 18  }
  0x16   :  { %16150 = sst [smem:[#allocation51_spill]] %s14515_s19 }
  0x17   :  { %s14540_s20 = sld [smem:[%s16125_s0 + %s14390_s15]]   ;;  %s14394_s15 = smov 19  }
  0x18   :  { %16151 = sst [smem:[#allocation52_spill]] %s14525_s30 }
  0x19   :  { %s14545_s27 = sld [smem:[%s16125_s0 + %s14391_s22]]   ;;  %s14395_s22 = smov 20  }
  0x1a   :  { %s14550_s4 = sld [smem:[%s16125_s0 + %s14392_s28]]   ;;  %s14396_s28 = smov 21  }
  0x1b   :  { %16152 = sst [smem:[#allocation53_spill]] %s14535_s12 }
  0x1c   :  { %s14555_s12 = sld [smem:[%s16125_s0 + %s14393_s7]]   ;;  %s14397_s7 = smov 22  }
  0x1d   :  { %s14560_s30 = sld [smem:[%s16125_s0 + %s14394_s15]]   ;;  %s14398_s15 = smov 23  }
  0x1e   :  { %s14570_s25 = sld [smem:[%s16125_s0 + %s14396_s28]]   ;;  %s14400_s28 = smov 25  }
  0x1f   :  { %16153 = sst [smem:[#allocation54_spill]] %s14545_s27 }
  0x20   :  { %s14565_s27 = sld [smem:[%s16125_s0 + %s14395_s22]]   ;;  %s14399_s22 = smov 24  }
  0x21   :  { %s14590_s19 = sld [smem:[%s16125_s0 + %s14400_s28]]   ;;  %s14404_s28 = smov 29  }
  0x22   :  { %16154 = sst [smem:[#allocation55_spill]] %s14555_s12 }
  0x23   :  { %16155 = sst [smem:[#allocation56_spill]] %s14560_s30 }
  0x24   :  { %s14575_s12 = sld [smem:[%s16125_s0 + %s14397_s7]]   ;;  %s14401_s7 = smov 26  }
  0x25   :  { %s14580_s30 = sld [smem:[%s16125_s0 + %s14398_s15]]   ;;  %s14402_s15 = smov 27  }
  0x26   :  { %16156 = sst [smem:[#allocation57_spill]] %s14565_s27 }
  0x27   :  { %s14585_s27 = sld [smem:[%s16125_s0 + %s14399_s22]]   ;;  %s14403_s22 = smov 28  }
  0x28   :  { %s14600_s8 = sld [smem:[%s16125_s0 + %s14402_s15]]   ;;  %s14406_s15 = smov 31  }
  0x29   :  { %s14610_s17 = sld [smem:[%s16125_s0 + %s14404_s28]]   ;;  %s14408_s28 = smov 33  }
  0x2a   :  { %16157 = sst [smem:[#allocation58_spill]] %s14575_s12 }
  0x2b   :  { %s14595_s12 = sld [smem:[%s16125_s0 + %s14401_s7]]   ;;  %s14405_s7 = smov 30  }
  0x2c   :  { %s14620_s29 = sld [smem:[%s16125_s0 + %s14406_s15]]   ;;  %s14410_s15 = smov 35  }
  0x2d   :  { %16158 = sst [smem:[#allocation59_spill]] %s14585_s27 }
  0x2e   :  { %s14605_s27 = sld [smem:[%s16125_s0 + %s14403_s22]]   ;;  %s14407_s22 = smov 32  }
  0x2f   :  { %16161 = sst [smem:[#allocation62_spill]] %s14610_s17 }
  0x30   :  { %s14630_s13 = sld [smem:[%s16125_s0 + %s14408_s28]]   ;;  %s14412_s28 = smov 37  }
  0x31   :  { %16159 = sst [smem:[#allocation60_spill]] %s14595_s12 }
  0x32   :  { %s14615_s12 = sld [smem:[%s16125_s0 + %s14405_s7]]   ;;  %s14409_s7 = smov 34  }
  0x33   :  { %s14640_s5 = sld [smem:[%s16125_s0 + %s14410_s15]]   ;;  %s14414_s15 = smov 39  }
  0x34   :  { %16160 = sst [smem:[#allocation61_spill]] %s14605_s27 }
  0x35   :  { %s14625_s27 = sld [smem:[%s16125_s0 + %s14407_s22]]   ;;  %s14411_s22 = smov 36  }
  0x36   :  { %16164 = sst [smem:[#allocation65_spill]] %s14630_s13 }
  0x37   :  { %s14650_s13 = sld [smem:[%s16125_s0 + %s14412_s28]]  }
  0x38   :  { %16162 = sst [smem:[#allocation63_spill]] %s14615_s12 }
  0x39   :  { %s14635_s12 = sld [smem:[%s16125_s0 + %s14409_s7]]   ;;  %s14413_s7 = smov 38  }
  0x3a   :  { %s14660_s17 = sld [smem:[%s16125_s0 + %s14414_s15]]  }
  0x3b   :  { %16163 = sst [smem:[#allocation64_spill]] %s14625_s27 }
  0x3c   :  { %s14645_s27 = sld [smem:[%s16125_s0 + %s14411_s22]]   ;;  %s14415_s22 = smov 40  }
  0x3f   :  { %16165 = sst [smem:[#allocation66_spill]] %s14635_s12 }
  0x40   :  { %s14655_s12 = sld [smem:[%s16125_s0 + %s14413_s7]]  }
  0x42   :  { %16166 = sst [smem:[#allocation67_spill]] %s14645_s27 }
  0x43   :  { %s14665_s27 = sld [smem:[%s16125_s0 + %s14415_s22]]  }
  0x44   :  { %86 = vsyncpa [#allocation4], 0 }
  0x45   :  { %87 = vsyncpa [#allocation6], 0 }
  0x46   :  { %88 = vsyncpa [#allocation9], 0 }
  0x47   :  { %89 = vsyncpa [#allocation12], 0 }
  0x48   :  { %90 = vsyncpa [#allocation15], 0 }
  0x49   :  { %91 = vsyncpa [#allocation18], 0 }
  0x4a   :  { %92 = vsyncpa [#allocation21], 0 }
  0x4b   :  { %93 = vsyncpa [#allocation24], 0 }
  0x4c   :  { %94 = vsyncpa [#allocation27], 0 }
  0x4d   :  { %95 = vsyncpa [#allocation30], 0 }
  0x4e   :  { %96 = vsyncpa [#allocation33], 0  ;;  %s14416_s28 = smov [#allocation5]  }
  0x4f   :  { %s118_s1 = sshll.u32 %s14416_s28, 4  ;;  %s119_s1 = int_to_ptr.vmem [resolvable:$true] %s118_s1 }
  0x50   :  { %s13962_s2 = scalar_lea.vmem %s119_s1, 512  ;;  %p13967_p1 = scmp.lt.s32.totalorder %s119_s1, %s119_s1 }
  0x51   :  { %p13963_p0 = scmp.ne.s32.totalorder %s119_s1, %s13962_s2  ;;  %p13968_p2 = scmp.lt.s32.totalorder %s13962_s2, %s13962_s2 }
  0x53   :  { %p13969_p3 = por %p13968_p2, %p13967_p1 }
  0x55   :  { %p13970_p4 = pnand %p13969_p3, %p13963_p0 }
  0x57   :  { %13973 = shalt.err (!%p13970_p4)
}
  0x58   :  { %s14417_s0 = smov 128   ;;  %s14418_s7 = smov 8  }
  0x59   :  { %124 = dma.hbm_to_vmem [thread:$0]  %s14485_s21, 512, %s119_s1, [#allocation6], %s14417_s0, %s14417_s0, %s14418_s7  }
  0x5a   :  { %s14419_s10 = smov [#allocation8]   ;;  %s14420_s15 = smov [#allocation11]  }
  0x5b   :  { %s148_s11 = sshll.u32 %s14419_s10, 4  ;;  %s176_s16 = sshll.u32 %s14420_s15, 4  ;;  %s149_s11 = int_to_ptr.vmem [resolvable:$true] %s148_s11  ;;  %s177_s16 = int_to_ptr.vmem [resolvable:$true] %s176_s16 }
  0x5c   :  { %s13982_s18 = scalar_lea.vmem %s149_s11, 32  ;;  %p13987_p6 = scmp.lt.s32.totalorder %s149_s11, %s149_s11 }
  0x5d   :  { %p13983_p5 = scmp.ne.s32.totalorder %s149_s11, %s13982_s18  ;;  %p13988_p7 = scmp.lt.s32.totalorder %s13982_s18, %s13982_s18 }
  0x5f   :  { %p13989_p8 = por %p13988_p7, %p13987_p6 }
  0x61   :  { %p13990_p9 = pnand %p13989_p8, %p13983_p5 }
  0x63   :  { %13993 = shalt.err (!%p13990_p9)
}
  0x64   :  { %s14421_s22 = smov 16   ;;  %s14422_s23 = smov 1  }
  0x65   :  { %154 = dma.hbm_to_vmem [thread:$0]  %s14510_s14, 32, %s149_s11, [#allocation9], %s14421_s22, %s14421_s22, %s14422_s23  }
  0x66   :  { %s14002_s21 = scalar_lea.vmem %s177_s16, 32  ;;  %p14007_p11 = scmp.lt.s32.totalorder %s177_s16, %s177_s16 }
  0x67   :  { %p14003_p10 = scmp.ne.s32.totalorder %s177_s16, %s14002_s21  ;;  %p14008_p12 = scmp.lt.s32.totalorder %s14002_s21, %s14002_s21 }
  0x69   :  { %p14009_p13 = por %p14008_p12, %p14007_p11 }
  0x6b   :  { %p14010_p0 = pnand %p14009_p13, %p14003_p10 }
  0x6d   :  { %14013 = shalt.err (!%p14010_p0)
}
  0x6e   :  { %182 = dma.hbm_to_vmem [thread:$0]  %s14530_s6, 32, %s177_s16, [#allocation12], %s14421_s22, %s14421_s22, %s14422_s23  }
  0x6f   :  { %s14423_s26 = smov [#allocation14]   ;;  %s14424_s1 = smov [#allocation17]  }
  0x70   :  { %s204_s28 = sshll.u32 %s14423_s26, 4  ;;  %s236_s2 = sshll.u32 %s14424_s1, 4  ;;  %s205_s28 = int_to_ptr.vmem [resolvable:$true] %s204_s28  ;;  %s237_s2 = int_to_ptr.vmem [resolvable:$true] %s236_s2 }
  0x71   :  { %s14022_s10 = scalar_lea.vmem %s205_s28, 32  ;;  %p14027_p2 = scmp.lt.s32.totalorder %s205_s28, %s205_s28 }
  0x72   :  { %p14023_p1 = scmp.ne.s32.totalorder %s205_s28, %s14022_s10  ;;  %p14028_p3 = scmp.lt.s32.totalorder %s14022_s10, %s14022_s10 }
  0x74   :  { %p14029_p4 = por %p14028_p3, %p14027_p2 }
  0x76   :  { %p14030_p5 = pnand %p14029_p4, %p14023_p1 }
  0x78   :  { %14033 = shalt.err (!%p14030_p5)
}
  0x79   :  { %210 = dma.hbm_to_vmem [thread:$0]  %s14550_s4, 32, %s205_s28, [#allocation15], %s14421_s22, %s14421_s22, %s14422_s23  }
  0x7a   :  { %s14042_s14 = scalar_lea.vmem %s237_s2, 32  ;;  %p14047_p7 = scmp.lt.s32.totalorder %s237_s2, %s237_s2 }
  0x7b   :  { %p14043_p6 = scmp.ne.s32.totalorder %s237_s2, %s14042_s14  ;;  %p14048_p8 = scmp.lt.s32.totalorder %s14042_s14, %s14042_s14 }
  0x7d   :  { %p14049_p9 = por %p14048_p8, %p14047_p7 }
  0x7f   :  { %p14050_p10 = pnand %p14049_p9, %p14043_p6 }
  0x81   :  { %14053 = shalt.err (!%p14050_p10)
}
  0x82   :  { %242 = dma.hbm_to_vmem [thread:$0]  %s14580_s30, 32, %s237_s2, [#allocation18], %s14421_s22, %s14421_s22, %s14422_s23  }
  0x83   :  { %s14425_s6 = smov [#allocation20]   ;;  %s14426_s15 = smov [#allocation23]  }
  0x84   :  { %s264_s11 = sshll.u32 %s14425_s6, 4  ;;  %s292_s16 = sshll.u32 %s14426_s15, 4  ;;  %s265_s11 = int_to_ptr.vmem [resolvable:$true] %s264_s11  ;;  %s293_s16 = int_to_ptr.vmem [resolvable:$true] %s292_s16 }
  0x85   :  { %s14062_s18 = scalar_lea.vmem %s265_s11, 32  ;;  %p14067_p12 = scmp.lt.s32.totalorder %s265_s11, %s265_s11 }
  0x86   :  { %p14063_p11 = scmp.ne.s32.totalorder %s265_s11, %s14062_s18  ;;  %p14068_p13 = scmp.lt.s32.totalorder %s14062_s18, %s14062_s18 }
  0x88   :  { %p14069_p0 = por %p14068_p13, %p14067_p12 }
  0x8a   :  { %p14070_p1 = pnand %p14069_p0, %p14063_p11 }
  0x8c   :  { %14073 = shalt.err (!%p14070_p1)
}
  0x8d   :  { %270 = dma.hbm_to_vmem [thread:$0]  %s14600_s8, 32, %s265_s11, [#allocation21], %s14421_s22, %s14421_s22, %s14422_s23  }
  0x8e   :  { %s14082_s4 = scalar_lea.vmem %s293_s16, 32  ;;  %p14087_p3 = scmp.lt.s32.totalorder %s293_s16, %s293_s16 }
  0x8f   :  { %p14083_p2 = scmp.ne.s32.totalorder %s293_s16, %s14082_s4  ;;  %p14088_p4 = scmp.lt.s32.totalorder %s14082_s4, %s14082_s4 }
  0x91   :  { %p14089_p5 = por %p14088_p4, %p14087_p3 }
  0x93   :  { %p14090_p6 = pnand %p14089_p5, %p14083_p2 }
  0x95   :  { %14093 = shalt.err (!%p14090_p6)
}
  0x96   :  { %298 = dma.hbm_to_vmem [thread:$0]  %s14620_s29, 32, %s293_s16, [#allocation24], %s14421_s22, %s14421_s22, %s14422_s23  }
  0x97   :  { %s14427_s30 = smov [#allocation26]   ;;  %s14428_s26 = smov [#allocation29]  }
  0x98   :  { %s321_s21 = sshll.u32 %s14427_s30, 4  ;;  %s343_s28 = sshll.u32 %s14428_s26, 4  ;;  %s322_s21 = int_to_ptr.vmem [resolvable:$true] %s321_s21  ;;  %s344_s28 = int_to_ptr.vmem [resolvable:$true] %s343_s28 }
  0x99   :  { %s14102_s1 = scalar_lea.vmem %s322_s21, 32  ;;  %p14107_p8 = scmp.lt.s32.totalorder %s322_s21, %s322_s21 }
  0x9a   :  { %p14103_p7 = scmp.ne.s32.totalorder %s322_s21, %s14102_s1  ;;  %p14108_p9 = scmp.lt.s32.totalorder %s14102_s1, %s14102_s1 }
  0x9c   :  { %p14109_p10 = por %p14108_p9, %p14107_p8 }
  0x9e   :  { %p14110_p11 = pnand %p14109_p10, %p14103_p7 }
  0xa0   :  { %14113 = shalt.err (!%p14110_p11)
}
  0xa1   :  { %324 = dma.hbm_to_vmem [thread:$0]  %s14640_s5, 32, %s322_s21, [#allocation27]  }
  0xa2   :  { %s14122_s8 = scalar_lea.vmem %s344_s28, 16  ;;  %s14126_s2 = scalar_lea.vmem %s344_s28, 32 }
  0xa3   :  { %p14123_p12 = scmp.ne.s32.totalorder %s344_s28, %s14122_s8  ;;  %p14127_p13 = scmp.lt.s32.totalorder %s344_s28, %s344_s28 }
  0xa4   :  { %p14128_p0 = scmp.lt.s32.totalorder %s14126_s2, %s14122_s8 }
  0xa6   :  { %p14129_p1 = por %p14128_p0, %p14127_p13 }
  0xa8   :  { %p14130_p2 = pnand %p14129_p1, %p14123_p12 }
  0xaa   :  { %14133 = shalt.err (!%p14130_p2)
}
  0xab   :  { %346 = dma.hbm_to_vmem [thread:$0]  %s14650_s13, 16, %s344_s28, [#allocation30]  }
  0xac   :  { %s14429_s29 = smov [#allocation3]   ;;  %s14430_s14 = smov [#allocation7]  }
  0xad   :  { %s105_s10 = sshll.u32 %s14429_s29, 4  ;;  %s134_s6 = sshll.u32 %s14430_s14, 4  ;;  %s106_s10 = int_to_ptr.vmem [resolvable:$true] %s105_s10  ;;  %s135_s6 = int_to_ptr.vmem [resolvable:$true] %s134_s6 }
  0xae   :  { %s14142_s11 = scalar_lea.vmem %s106_s10, 128  ;;  %p14147_p4 = scmp.lt.s32.totalorder %s106_s10, %s106_s10 }
  0xaf   :  { %p14143_p3 = scmp.ne.s32.totalorder %s106_s10, %s14142_s11  ;;  %p14148_p5 = scmp.lt.s32.totalorder %s14142_s11, %s14142_s11 }
  0xb1   :  { %p14149_p6 = por %p14148_p5, %p14147_p4 }
  0xb3   :  { %p14150_p7 = pnand %p14149_p6, %p14143_p3 }
  0xb5   :  { %14153 = shalt.err (!%p14150_p7)
}
  0xb6   :  { %108 = dma.hbm_to_vmem [thread:$0]  %s14470_s9, 128, %s106_s10, [#allocation4]  }
  0xb7   :  { %s14162_s5 = scalar_lea.vmem %s135_s6, 32  ;;  %p14167_p9 = scmp.lt.s32.totalorder %s135_s6, %s135_s6 }
  0xb8   :  { %p14163_p8 = scmp.ne.s32.totalorder %s135_s6, %s14162_s5  ;;  %p14168_p10 = scmp.lt.s32.totalorder %s14162_s5, %s14162_s5 }
  0xba   :  { %p14169_p11 = por %p14168_p10, %p14167_p9 }
  0xbc   :  { %p14170_p12 = pnand %p14169_p11, %p14163_p8 }
  0xbe   :  { %14173 = shalt.err (!%p14170_p12)
}
  0xbf   :  { %140 = dma.hbm_to_vmem [thread:$0]  %s14500_s3, 32, %s135_s6, [#allocation6], %s14421_s22, %s14421_s22, %s14422_s23  }
  0xc0   :  { %s14431_s13 = smov [#allocation10]   ;;  %s14432_s16 = smov [#allocation13]  }
  0xc1   :  { %s162_s15 = sshll.u32 %s14431_s13, 4  ;;  %s190_s18 = sshll.u32 %s14432_s16, 4  ;;  %s163_s15 = int_to_ptr.vmem [resolvable:$true] %s162_s15  ;;  %s191_s18 = int_to_ptr.vmem [resolvable:$true] %s190_s18 }
  0xc2   :  { %s14182_s4 = scalar_lea.vmem %s163_s15, 32  ;;  %p14187_p0 = scmp.lt.s32.totalorder %s163_s15, %s163_s15 }
  0xc3   :  { %p14183_p13 = scmp.ne.s32.totalorder %s163_s15, %s14182_s4  ;;  %p14188_p1 = scmp.lt.s32.totalorder %s14182_s4, %s14182_s4 }
  0xc5   :  { %p14189_p2 = por %p14188_p1, %p14187_p0 }
  0xc7   :  { %p14190_p3 = pnand %p14189_p2, %p14183_p13 }
  0xc9   :  { %14193 = shalt.err (!%p14190_p3)
}
  0xca   :  { %168 = dma.hbm_to_vmem [thread:$0]  %s14520_s24, 32, %s163_s15, [#allocation9], %s14421_s22, %s14421_s22, %s14422_s23  }
  0xcb   :  { %s14202_s9 = scalar_lea.vmem %s191_s18, 32  ;;  %p14207_p5 = scmp.lt.s32.totalorder %s191_s18, %s191_s18 }
  0xcc   :  { %p14203_p4 = scmp.ne.s32.totalorder %s191_s18, %s14202_s9  ;;  %p14208_p6 = scmp.lt.s32.totalorder %s14202_s9, %s14202_s9 }
  0xce   :  { %p14209_p7 = por %p14208_p6, %p14207_p5 }
  0xd0   :  { %p14210_p8 = pnand %p14209_p7, %p14203_p4 }
  0xd2   :  { %14213 = shalt.err (!%p14210_p8)
}
  0xd3   :  { %196 = dma.hbm_to_vmem [thread:$0]  %s14540_s20, 32, %s191_s18, [#allocation12], %s14421_s22, %s14421_s22, %s14422_s23  }
  0xd4   :  { %s14433_s3 = smov [#allocation16]   ;;  %s14434_s21 = smov [#allocation19]  }
  0xd5   :  { %s222_s30 = sshll.u32 %s14433_s3, 4  ;;  %s250_s26 = sshll.u32 %s14434_s21, 4  ;;  %s223_s30 = int_to_ptr.vmem [resolvable:$true] %s222_s30  ;;  %s251_s26 = int_to_ptr.vmem [resolvable:$true] %s250_s26 }
  0xd6   :  { %s14222_s28 = scalar_lea.vmem %s223_s30, 32  ;;  %p14227_p10 = scmp.lt.s32.totalorder %s223_s30, %s223_s30 }
  0xd7   :  { %p14223_p9 = scmp.ne.s32.totalorder %s223_s30, %s14222_s28  ;;  %p14228_p11 = scmp.lt.s32.totalorder %s14222_s28, %s14222_s28 }
  0xd9   :  { %p14229_p12 = por %p14228_p11, %p14227_p10 }
  0xdb   :  { %p14230_p13 = pnand %p14229_p12, %p14223_p9 }
  0xdd   :  { %14233 = shalt.err (!%p14230_p13)
}
  0xde   :  { %228 = dma.hbm_to_vmem [thread:$0]  %s14570_s25, 32, %s223_s30, [#allocation15], %s14421_s22, %s14421_s22, %s14422_s23  }
  0xdf   :  { %s14242_s24 = scalar_lea.vmem %s251_s26, 32  ;;  %p14247_p1 = scmp.lt.s32.totalorder %s251_s26, %s251_s26 }
  0xe0   :  { %p14243_p0 = scmp.ne.s32.totalorder %s251_s26, %s14242_s24  ;;  %p14248_p2 = scmp.lt.s32.totalorder %s14242_s24, %s14242_s24 }
  0xe2   :  { %p14249_p3 = por %p14248_p2, %p14247_p1 }
  0xe4   :  { %p14250_p4 = pnand %p14249_p3, %p14243_p0 }
  0xe6   :  { %14253 = shalt.err (!%p14250_p4)
}
  0xe7   :  { %256 = dma.hbm_to_vmem [thread:$0]  %s14590_s19, 32, %s251_s26, [#allocation18], %s14421_s22, %s14421_s22, %s14422_s23  }
  0xe8   :  { %s14435_s20 = smov [#allocation22]   ;;  %s14436_s8 = smov [#allocation25]  }
  0xe9   :  { %s278_s1 = sshll.u32 %s14435_s20, 4  ;;  %s308_s2 = sshll.u32 %s14436_s8, 4  ;;  %s279_s1 = int_to_ptr.vmem [resolvable:$true] %s278_s1  ;;  %s309_s2 = int_to_ptr.vmem [resolvable:$true] %s308_s2 }
  0xea   :  { %s14262_s29 = scalar_lea.vmem %s279_s1, 32  ;;  %p14267_p6 = scmp.lt.s32.totalorder %s279_s1, %s279_s1 }
  0xeb   :  { %p14263_p5 = scmp.ne.s32.totalorder %s279_s1, %s14262_s29  ;;  %p14268_p7 = scmp.lt.s32.totalorder %s14262_s29, %s14262_s29 }
  0xed   :  { %p14269_p8 = por %p14268_p7, %p14267_p6 }
  0xef   :  { %p14270_p9 = pnand %p14269_p8, %p14263_p5 }
  0xf1   :  { %14273 = shalt.err (!%p14270_p9)
}
  0xf2   :  { %s16167_s25 = sld [smem:[#allocation62_spill]]  ;;  %s14282_s10 = scalar_lea.vmem %s309_s2, 1024 }
  0xf3   :  { %p14283_p10 = scmp.ne.s32.totalorder %s309_s2, %s14282_s10  ;;  %p14287_p11 = scmp.lt.s32.totalorder %s309_s2, %s309_s2 }
  0xf4   :  { %p14288_p12 = scmp.lt.s32.totalorder %s14282_s10, %s14282_s10 }
  0xf6   :  { %p14289_p13 = por %p14288_p12, %p14287_p11 }
  0xf8   :  { %284 = dma.hbm_to_vmem [thread:$0]  %s16167_s25, 32, %s279_s1, [#allocation21], %s14421_s22, %s14421_s22, %s14422_s23  }
  0xf9   :  { %p14290_p0 = pnand %p14289_p13, %p14283_p10 }
  0xfb   :  { %14293 = shalt.err (!%p14290_p0)
}
  0xfc   :  { %s14437_s19 = smov 256   ;;  %s16168_s14 = sld [smem:[#allocation66_spill]] }
  0xfd   :  { %s14438_s6 = smov [#allocation28]   ;;  %s14439_s5 = smov [#allocation31]  }
  0xfe   :  { %s330_s11 = sshll.u32 %s14438_s6, 4  ;;  %s352_s13 = sshll.u32 %s14439_s5, 4  ;;  %s331_s11 = int_to_ptr.vmem [resolvable:$true] %s330_s11  ;;  %s353_s13 = int_to_ptr.vmem [resolvable:$true] %s352_s13 }
  0xff   :  { %s14302_s15 = scalar_lea.vmem %s331_s11, 512  ;;  %p14307_p2 = scmp.lt.s32.totalorder %s331_s11, %s331_s11 }
 0x100   :  { %p14303_p1 = scmp.ne.s32.totalorder %s331_s11, %s14302_s15  ;;  %p14308_p3 = scmp.lt.s32.totalorder %s14302_s15, %s14302_s15 }
 0x102   :  { %314 = dma.hbm_to_vmem [thread:$0]  %s16168_s14, 1024, %s309_s2, [#allocation24], %s14437_s19, %s14437_s19, %s14421_s22  }
 0x103   :  { %p14309_p4 = por %p14308_p3, %p14307_p2 }
 0x105   :  { %p14310_p5 = pnand %p14309_p4, %p14303_p1 }
 0x107   :  { %14313 = shalt.err (!%p14310_p5)
}
 0x108   :  { %s16169_s23 = sld [smem:[#allocation67_spill]]  ;;  %s14322_s16 = scalar_lea.vmem %s353_s13, 512 }
 0x109   :  { %p14323_p6 = scmp.ne.s32.totalorder %s353_s13, %s14322_s16  ;;  %p14327_p7 = scmp.lt.s32.totalorder %s353_s13, %s353_s13 }
 0x10a   :  { %p14328_p8 = scmp.lt.s32.totalorder %s14322_s16, %s14322_s16 }
 0x10c   :  { %p14329_p9 = por %p14328_p8, %p14327_p7 }
 0x10e   :  { %336 = dma.hbm_to_vmem [thread:$0]  %s16169_s23, 512, %s331_s11, [#allocation27], %s14417_s0, %s14417_s0, %s14418_s7  }
 0x10f   :  { %p14330_p10 = pnand %p14329_p9, %p14323_p6 }
 0x111   :  { %14333 = shalt.err (!%p14330_p10)
}
 0x112   :  { %358 = dma.hbm_to_vmem [thread:$0]  %s14655_s12, 512, %s353_s13, [#allocation30], %s14417_s0, %s14417_s0, %s14418_s7  }
 0x113   :  { %s14440_s22 = smov [#allocation32]  }
 0x114   :  { %s365_s18 = sshll.u32 %s14440_s22, 4  ;;  %s366_s18 = int_to_ptr.vmem [resolvable:$true] %s365_s18 }
 0x115   :  { %s14342_s4 = scalar_lea.vmem %s366_s18, 16  ;;  %s14346_s9 = scalar_lea.vmem %s366_s18, 32 }
 0x116   :  { %p14343_p11 = scmp.ne.s32.totalorder %s366_s18, %s14342_s4  ;;  %p14347_p12 = scmp.lt.s32.totalorder %s366_s18, %s366_s18 }
 0x117   :  { %p14348_p13 = scmp.lt.s32.totalorder %s14346_s9, %s14342_s4 }
 0x119   :  { %p14349_p0 = por %p14348_p13, %p14347_p12 }
 0x11b   :  { %p14350_p1 = pnand %p14349_p0, %p14343_p11 }
 0x11d   :  { %14353 = shalt.err (!%p14350_p1)
}
 0x11e   :  { %368 = dma.hbm_to_vmem [thread:$0]  %s14660_s17, 16, %s366_s18, [#allocation33]  }
 0x11f   :  { %14354 = dma.done.wait [#allocation4], 128  }
 0x120   :  { %14355 = vsyncadd [#allocation4], 4294967168 }
 0x121   :  { %14356 = dma.done.wait [#allocation6], 544  }
 0x122   :  { %14357 = vsyncadd [#allocation6], 4294966752 }
 0x123   :  { %14358 = dma.done.wait [#allocation9], 64  }
 0x124   :  { %14359 = vsyncadd [#allocation9], 4294967232 }
 0x125   :  { %14360 = dma.done.wait [#allocation12], 64  }
 0x126   :  { %14361 = vsyncadd [#allocation12], 4294967232 }
 0x127   :  { %14362 = dma.done.wait [#allocation15], 64  }
 0x128   :  { %14363 = vsyncadd [#allocation15], 4294967232 }
 0x129   :  { %14364 = dma.done.wait [#allocation18], 64  }
 0x12a   :  { %14365 = vsyncadd [#allocation18], 4294967232 }
 0x12b   :  { %14366 = dma.done.wait [#allocation21], 64  }
 0x12c   :  { %14367 = vsyncadd [#allocation21], 4294967232 }
 0x12d   :  { %14368 = dma.done.wait [#allocation24], 1056  }
 0x12e   :  { %14369 = vsyncadd [#allocation24], 4294966240 }
 0x12f   :  { %14370 = dma.done.wait [#allocation27], 544  }
 0x130   :  { %14371 = vsyncadd [#allocation27], 4294966752 }
 0x131   :  { %14372 = dma.done.wait [#allocation30], 528  }
 0x132   :  { %14373 = vsyncadd [#allocation30], 4294966768 }
 0x133   :  { %14374 = dma.done.wait [#allocation33], 16  }
 0x134   :  { %14375 = vsyncadd [#allocation33], 4294967280  ;;  %s16170_s17 = sld [smem:[#allocation45_spill]]  ;;  %vm429_vm0 = vcmask 261120   ;;  %vm431_vm1 = vcmask 257024   ;;  %v14441_v0 = vmov 0.0  }
 0x135   :  { %s16171_s12 = sld [smem:[#allocation46_spill]]  ;;  %430 = vst.msk [vmem:[#allocation2] sm:$0xff] %vm429_vm0, %v14441_v0  ;;  %12776 = vmatprep.subr.mxu1 %v14441_v0  ;;  %v572_v10 = vld [vmem:[#allocation5 + $0x18] sm:$0xff]  ;;  %v571_v11 = vld [vmem:[#allocation5 + $0x10] sm:$0xff]  ;;  %s14442_s0 = smov 32   ;;  %v570_v20 = vld [vmem:[#allocation5 + $0x8] sm:$0xff] }
 0x136   :  { %432 = vst.msk [vmem:[#allocation2 + $0x8] sm:$0xf] %vm431_vm1, %v14441_v0  ;;  %12777 = vmatpush3.msra.mxu1 %v572_v10  ;;  %s14443_s7 = smov 96   ;;  %s16172_s3 = sld [smem:[#allocation49_spill]]  ;;  %v569_v23 = vld [vmem:[#allocation5] sm:$0xff]  ;;  %vm14445_vm2 = vmmov 0  }
 0x137   :  { %12778 = vmatprep.subr.mxu1 %v14441_v0  ;;  %s14444_s30 = smov 64   ;;  %v568_v25 = vld [vmem:[#allocation3] sm:$0x3f]  ;;  %12784 = vmatprep.mubr.msk.f32.mxu1 %vm14445_vm2, %v14441_v0  ;;  %vm469_vm3 = vcmask 523264   ;;  %vm472_vm4 = vcmask 785408   ;;  %s16173_s21 = sld [smem:[#allocation47_spill]] }
 0x138   :  { %12779 = vmatpush3.msra.mxu1 %v571_v11  ;;  %v11949_v61 = vld [vmem:[#allocation7] ss:$0 sm:$0xff]  ;;  %vm818_vm5 = vcmask 64512   ;;  %vm908_vm6 = vcmask 65536   ;;  %vm904_vm7 = vcmask 72704   ;;  %s14446_s26 = smov 88  }
 0x139   :  { %12780 = vmatprep.subr.mxu1 %v14441_v0  ;;  %s14447_s28 = smov 120   ;;  %vm939_vm8 = vcmask 1040384   ;;  %s16174_s24 = sld [smem:[#allocation50_spill]]  ;;  %vm1967_vm9 = vcmask 253952   ;;  %vm2273_vm10 = vcmask 40960   ;;  %vm2269_vm11 = vcmask 48128  }
 0x13a   :  { %v433_v1 = vld [vmem:[%s16170_s17] sm:$0xff]  ;;  %12781 = vmatpush3.msra.mxu1 %v570_v20  ;;  %s14448_s20 = smov 56   ;;  %s14449_s1 = smov 80   ;;  %vm2301_vm12 = vcmask 1045504   ;;  %vm3713_vm13 = vcmask 46080   ;;  %vm4605_vm14 = vcmask 259072  }
 0x13b   :  { %v490_v2 = vld [vmem:[%s16171_s12 + $0x78] sm:$0xff]  ;;  %v489_v3 = vld [vmem:[%s16171_s12 + $0x70] sm:$0xff]  ;;  %434 = vst.msk [vmem:[#allocation2 + $0x2] sm:$0xff] %vm429_vm0, %v433_v1  ;;  %v488_v4 = vld [vmem:[%s16171_s12 + $0x68] sm:$0xff]  ;;  %12782 = vmatprep.subr.mxu1 %v14441_v0  ;;  %s14450_s8 = smov 112   ;;  %s14451_s2 = smov 72  }
 0x13c   :  { %12741 = vmatprep.subr.mxu0 %v490_v2  ;;  %v487_v5 = vld [vmem:[%s16171_s12 + $0x60] sm:$0xff]  ;;  %v486_v8 = vld [vmem:[%s16171_s12 + $0x58] sm:$0xff]  ;;  %v485_v9 = vld [vmem:[%s16171_s12 + $0x50] sm:$0xff]  ;;  %12783 = vmatpush3.msra.mxu1 %v569_v23  ;;  %s14452_s29 = smov 104   ;;  %s14453_s25 = smov 48   ;;  %vm4888_vm15 = vcmask 70656  }
 0x13d   :  { %12742 = vmatpush3.msra.mxu0 %v490_v2  ;;  %v440_v6 = vld [vmem:[#allocation2 + $0xa] sm:$0x1]  ;;  %v442_v7 = vld [vmem:[#allocation2 + $0xb] sm:$0x1]  ;;  %v483_v21 = vld [vmem:[%s16171_s12 + $0x40] sm:$0xff]  ;;  %12785 = vmatmul.mubr.msk.f32.vlgmr.msra.gmra.mxu1 %vm429_vm0, %v568_v25  ;;  %s14454_s10 = smov 40  }
 0x13e   :  { %12743 = vmatprep.subr.mxu0 %v489_v3  ;;  %v484_v18 = vld [vmem:[%s16171_s12 + $0x48] sm:$0xff]  ;;  %v482_v22 = vld [vmem:[%s16171_s12 + $0x38] sm:$0xff]  ;;  %v481_v24 = vld [vmem:[%s16171_s12 + $0x30] sm:$0xff]  ;;  %s16175_s19 = sld [smem:[#allocation51_spill]]  ;;  %vm11889_vm1 = vcmask 195584  }
 0x13f   :  { %12744 = vmatpush3.msra.mxu0 %v489_v3  ;;  %v656_v26 = vld [vmem:[%s16172_s3 + $0x18] sm:$0xff]  ;;  %v480_v27 = vld [vmem:[%s16171_s12 + $0x28] sm:$0xff]  ;;  %v479_v28 = vld [vmem:[%s16171_s12 + $0x20] sm:$0xff]  ;;  %s16176_s14 = sld [smem:[#allocation48_spill]] }
 0x140   :  { %12745 = vmatprep.subr.mxu0 %v488_v4  ;;  %12787 = vmatprep.subr.mxu1 %v656_v26  ;;  %v478_v29 = vld [vmem:[%s16171_s12 + $0x18] sm:$0xff]  ;;  %v477_v30 = vld [vmem:[%s16171_s12 + $0x10] sm:$0xff]  ;;  %v476_v31 = vld [vmem:[%s16171_s12 + $0x8] sm:$0xff]  ;;  %s16177_s6 = sld [smem:[#allocation55_spill]] }
 0x141   :  { %12746 = vmatpush3.msra.mxu0 %v488_v4  ;;  %12788 = vmatpush3.msra.mxu1 %v656_v26  ;;  %v475_v32 = vld [vmem:[%s16171_s12] sm:$0xff]  ;;  %v655_v50 = vld [vmem:[%s16172_s3 + $0x10] sm:$0xff]  ;;  %v654_v51 = vld [vmem:[%s16172_s3 + $0x8] sm:$0xff]  ;;  %s16178_s11 = sld [smem:[#allocation56_spill]] }
 0x142   :  { %12747 = vmatprep.subr.mxu0 %v487_v5  ;;  %v437_v12 = vld [vmem:[#allocation2 + $0x1] sm:$0xff]  ;;  %v438_v13 = vld [vmem:[#allocation2 + $0x9] sm:$0x1]  ;;  %12789 = vmatprep.subr.mxu1 %v655_v50  ;;  %s16179_s5 = sld [smem:[#allocation52_spill]] }
 0x143   :  { %v439_v14 = vld [vmem:[#allocation2 + $0x2] sm:$0xff]  ;;  %12748 = vmatpush3.msra.mxu0 %v487_v5  ;;  %v13705_v15 = vpack.i.bf16 %v438_v13, %v437_v12  ;;  %12790 = vmatpush3.msra.mxu1 %v655_v50  ;;  %s16180_s13 = sld [smem:[#allocation53_spill]] }
 0x144   :  { %v441_v16 = vld [vmem:[#allocation2 + $0x3] sm:$0xff]  ;;  %12749 = vmatprep.subr.mxu0 %v486_v8  ;;  %v13710_v19 = vpack.i.bf16 %v440_v6, %v439_v14  ;;  %12791 = vmatprep.subr.mxu1 %v654_v51  ;;  %s16181_s15 = sld [smem:[#allocation54_spill]] }
 0x145   :  { %v13715_v17 = vpack.i.bf16 %v442_v7, %v441_v16  ;;  %12750 = vmatpush3.msra.mxu0 %v486_v8  ;;  %13706 = vrot.lane.b32.xlu0 %v13705_v15, %s14442_s0  ;;  %v435_v37 = vld [vmem:[#allocation2] sm:$0xff]  ;;  %v436_v38 = vld [vmem:[#allocation2 + $0x8] sm:$0x1]  ;;  %s16182_s23 = sld [smem:[#allocation57_spill]]  ;;  %s14455_s0 = smov 9  }
 0x146   :  { %12751 = vmatprep.subr.mxu0 %v485_v9  ;;  %12792 = vmatpush3.msra.mxu1 %v654_v51  ;;  %v653_v52 = vld [vmem:[%s16172_s3] sm:$0xff]  ;;  %v492_v57 = vld [vmem:[%s16173_s21 + $0x8] sm:$0x1]  ;;  %s16183_s16 = sld [smem:[#allocation58_spill]] }
 0x147   :  { %13716 = vrot.lane.b32.xlu1 %v13715_v17, %s14443_s7  ;;  %12752 = vmatpush3.msra.mxu0 %v485_v9  ;;  %v491_v56 = vld [vmem:[%s16173_s21] sm:$0xff]  ;;  %s16184_s22 = sld [smem:[#allocation59_spill]] }
 0x148   :  { %12753 = vmatprep.subr.mxu0 %v484_v18  ;;  %12793 = vmatprep.subr.mxu1 %v653_v52  ;;  %s16185_s18 = sld [smem:[#allocation64_spill]] }
 0x149   :  { %12754 = vmatpush3.msra.mxu0 %v484_v18  ;;  %13711 = vrot.lane.b32.xlu0 %v13710_v19, %s14444_s30  ;;  %s16186_s4 = sld [smem:[#allocation65_spill]] }
 0x14a   :  { %12755 = vmatprep.subr.mxu0 %v483_v21  ;;  %12794 = vmatpush3.msra.mxu1 %v653_v52  ;;  %s16187_s9 = sld [smem:[#allocation60_spill]] }
 0x14b   :  { %12756 = vmatpush3.msra.mxu0 %v483_v21  ;;  %s16188_s17 = sld [smem:[#allocation61_spill]] }
 0x14c   :  { %12757 = vmatprep.subr.mxu0 %v482_v22  ;;  %s16189_s12 = sld [smem:[#allocation63_spill]] }
 0x14d   :  { %12758 = vmatpush3.msra.mxu0 %v482_v22 }
 0x14e   :  { %12759 = vmatprep.subr.mxu0 %v481_v24 }
 0x14f   :  { %12760 = vmatpush3.msra.mxu0 %v481_v24 }
 0x150   :  { %12761 = vmatprep.subr.mxu0 %v480_v27 }
 0x151   :  { %12762 = vmatpush3.msra.mxu0 %v480_v27 }
 0x152   :  { %12763 = vmatprep.subr.mxu0 %v479_v28 }
 0x153   :  { %12764 = vmatpush3.msra.mxu0 %v479_v28 }
 0x154   :  { %12765 = vmatprep.subr.mxu0 %v478_v29 }
 0x155   :  { %12766 = vmatpush3.msra.mxu0 %v478_v29 }
 0x156   :  { %12767 = vmatprep.subr.mxu0 %v477_v30 }
 0x157   :  { %12768 = vmatpush3.msra.mxu0 %v477_v30 }
 0x158   :  { %12769 = vmatprep.subr.mxu0 %v476_v31 }
 0x159   :  { %12770 = vmatpush3.msra.mxu0 %v476_v31 }
 0x15a   :  { %12771 = vmatprep.subr.mxu0 %v475_v32 }
 0x15b   :  { %12772 = vmatpush3.msra.mxu0 %v475_v32 }
 0x1b7   :  { %v13707_v33 = vpop.permute.xlu0 %13706 }
 0x1b8   :  { %v13709_v35 = vunpack.i.h.bf16 %v13707_v33  ;;  %v13708_v36 = vunpack.i.l.bf16 %v13707_v33  ;;  %v658_v33 = vld [vmem:[%s16174_s24] sm:$0xff] }
 0x1b9   :  { %v13717_v34 = vpop.permute.xlu1 %13716 }
 0x1ba   :  { %v13719_v40 = vunpack.i.h.bf16 %v13717_v34  ;;  %v13718_v41 = vunpack.i.l.bf16 %v13717_v34  ;;  %v467_v44 = vsel %vm429_vm0, %v435_v37, %v13708_v36  ;;  %v468_v45 = vsel %vm429_vm0, %v436_v38, %v13709_v35 }
 0x1bb   :  { %v13712_v39 = vpop.permute.xlu0 %13711 }
 0x1bc   :  { %v13714_v42 = vunpack.i.h.bf16 %v13712_v39  ;;  %v13713_v43 = vunpack.i.l.bf16 %v13712_v39 }
 0x1be   :  { %v470_v46 = vsel %vm469_vm3, %v467_v44, %v13713_v43  ;;  %v471_v47 = vsel %vm469_vm3, %v468_v45, %v13714_v42 }
 0x1bf   :  { %v473_v48 = vsel %vm472_vm4, %v470_v46, %v13718_v41  ;;  %v474_v49 = vsel %vm472_vm4, %v471_v47, %v13719_v40 }
 0x1c0   :  { %12773 = vmatprep.mubr.f32.mxu0 %v473_v48 }
 0x1c1   :  { %12774 = vmatmul.mubr.f32.vlgmr.msra.gmra.mxu0 %v474_v49 }
 0x1fd   :  { %v14771_v53 = vpop.f32.mrf.mxu1 }
 0x1ff   :  { %v12786_v54 = vpop.f32.mrf.mxu1 }
 0x281   :  { %v12775_v55 = vpop.f32.mrf.mxu0 }
 0x282   :  { %v14777_v60 = vadd.f32 %v12775_v55, %v492_v57  ;;  %v659_v57 = vld [vmem:[%s16174_s24 + $0x8] sm:$0xff] }
 0x283   :  { %v559_v58 = vpop.f32.mrf.mxu0 }
 0x284   :  { %v14775_v59 = vadd.f32 %v559_v58, %v491_v56 }
 0x286   :  { %12795 = vmatprep.mubr.msk.f32.mxu1 %vm429_vm0, %v14775_v59 }
 0x287   :  { %12796 = vmatmul.mubr.msk.f32.vlgmr.msra.gmra.mxu1 %vm429_vm0, %v14777_v60 }
 0x347   :  { %v12797_v62 = vpop.f32.mrf.mxu1 }
 0x348   :  { %v14783_v63 = vadd.f32 %v12797_v62, %v11949_v61 }
 0x349   :  { %v803_v1 = vpop.f32.mrf.mxu1 }
 0x34a   :  { %v14785_v2 = vadd.f32 %v11949_v61, %v803_v1  ;;  %816 = vrot.lane.b32.xlu1 %v14783_v63, %s14443_s7 }
 0x34c   :  { %814 = vrot.lane.b32.xlu0 %v14785_v2, %s14443_s7  ;;  %12802 = vmatprep.mubr.msk.f32.mxu1 %vm818_vm5, %v14785_v2 }
 0x3bc   :  { %v817_v3 = vpop.permute.xlu1 %816 }
 0x3bd   :  { %12798 = vmatprep.subr.msk.mxu1 %vm818_vm5, %v817_v3 }
 0x3be   :  { %12799 = vmatpush3.xpose.msk.msra.mxu1 %vm818_vm5, %v817_v3  ;;  %v815_v4 = vpop.permute.xlu0 %814 }
 0x3bf   :  { %12800 = vmatprep.subr.msk.mxu1 %vm818_vm5, %v815_v4 }
 0x3c2   :  { %12801 = vmatpush3.xpose.msk.msra.mxu1 %vm818_vm5, %v815_v4 }
 0x3c5   :  { %12803 = vmatmul.mubr.msk.f32.vlgmr.msra.gmra.mxu1 %vm818_vm5, %v14783_v63 }
 0x485   :  { %v12804_v5 = vpop.f32.mrf.mxu1 }
 0x486   :  { %v903_v6 = vmul.f32 0.35355338, %v12804_v5 }
 0x487   :  { %v893_v7 = vpop.f32.mrf.mxu1 }
 0x488   :  { %v902_v8 = vmul.f32 0.35355338, %v893_v7  ;;  %v909_v9 = vsel %vm908_vm6, %v903_v6, -inf }
 0x489   :  { %910 = vmax.xlane.f32.xlu0 %v909_v9 }
 0x48a   :  { %v905_v10 = vsel %vm904_vm7, %v902_v8, -inf }
 0x48b   :  { %906 = vmax.xlane.f32.xlu1 %v905_v10 }
 0x512   :  { %v911_v11 = vpop.xlane.xlu0 %910 }
 0x513   :  { %v913_v12 = vsub.f32 %v903_v6, %v911_v11 }
 0x514   :  { %v907_v13 = vpop.xlane.xlu1 %906 }
 0x515   :  { %v916_v14 = vmul.f32 1.442695, %v913_v12  ;;  %v912_v15 = vsub.f32 %v902_v8, %v907_v13 }
 0x517   :  { %13720 = vpow2.f32 %v916_v14  ;;  %v914_v16 = vmul.f32 1.442695, %v912_v15 }
 0x519   :  { %13722 = vpow2.f32 %v914_v16 }
 0x524   :  { %v13721_v17 = vpop.eup %13720 }
 0x525   :  { %v921_v18 = vsel %vm908_vm6, %v13721_v17, 0.0 }
 0x526   :  { %v13723_v19 = vpop.eup %13722  ;;  %922 = vadd.xlane.f32.xlu1 %v921_v18 }
 0x527   :  { %v918_v20 = vsel %vm904_vm7, %v13723_v19, 0.0 }
 0x528   :  { %919 = vadd.xlane.f32.xlu0 %v918_v20 }
 0x537   :  { %928 = vrot.lane.b32.xlu1 %v14785_v2, %s14444_s30 }
 0x53b   :  { %1023 = vrot.lane.b32.xlu1 %v14783_v63, %s14446_s26 }
 0x53e   :  { %930 = vrot.lane.b32.xlu0 %v14783_v63, %s14444_s30 }
 0x53f   :  { %1017 = vrot.lane.b32.xlu1 %v14785_v2, %s14447_s28 }
 0x542   :  { %1021 = vrot.lane.b32.xlu0 %v14785_v2, %s14446_s26 }
 0x546   :  { %1019 = vrot.lane.b32.xlu0 %v14783_v63, %s14447_s28 }
 0x5af   :  { %v923_v21 = vpop.xlane.xlu1 %922 }
 0x5b0   :  { %13724 = vrcp.f32 %v923_v21 }
 0x5b1   :  { %v920_v22 = vpop.xlane.xlu0 %919 }
 0x5b2   :  { %13726 = vrcp.f32 %v920_v22 }
 0x5b3   :  { %v929_v23 = vpop.permute.xlu1 %928 }
 0x5b5   :  { %v931_v24 = vpop.permute.xlu0 %930 }
 0x5b6   :  { %12805 = vmatprep.subr.msk.mxu1 %vm939_vm8, %v931_v24 }
 0x5b7   :  { %12806 = vmatpush3.msk.msra.mxu1 %vm939_vm8, %v931_v24  ;;  %v1024_v25 = vpop.permute.xlu1 %1023 }
 0x5b8   :  { %12807 = vmatprep.subr.mxu1 %v929_v23 }
 0x5b9   :  { %12808 = vmatpush3.msra.mxu1 %v929_v23  ;;  %v1022_v31 = vpop.permute.xlu0 %1021 }
 0x5ba   :  { %12812 = vmatprep.subr.msk.mxu1 %vm818_vm5, %v1024_v25 }
 0x5bb   :  { %v1018_v30 = vpop.permute.xlu1 %1017 }
 0x5bd   :  { %v13725_v26 = vpop.eup %13724  ;;  %v1020_v32 = vpop.permute.xlu0 %1019 }
 0x5be   :  { %v927_v29 = vmul.f32 %v13725_v26, %v13721_v17 }
 0x5bf   :  { %v13727_v27 = vpop.eup %13726 }
 0x5c0   :  { %v925_v28 = vmul.f32 %v13727_v27, %v13723_v19 }
 0x5c2   :  { %12809 = vmatprep.mubr.msk.f32.mxu1 %vm904_vm7, %v925_v28 }
 0x5c3   :  { %12810 = vmatmul.mubr.msk.f32.vlgmr.msra.gmra.mxu1 %vm904_vm7, %v927_v29 }
 0x5c4   :  { %12813 = vmatpush3.xpose.msk.msra.mxu1 %vm818_vm5, %v1024_v25  ;;  %12816 = vmatprep.mubr.msk.f32.mxu1 %vm818_vm5, %v1018_v30 }
 0x5c5   :  { %12814 = vmatprep.subr.msk.mxu1 %vm818_vm5, %v1022_v31 }
 0x5c8   :  { %12815 = vmatpush3.xpose.msk.msra.mxu1 %vm818_vm5, %v1022_v31 }
 0x5c9   :  { %12831 = vmatprep.subr.mxu1 %v658_v33 }
 0x5cb   :  { %12817 = vmatmul.mubr.msk.f32.vlgmr.msra.gmra.mxu1 %vm818_vm5, %v1020_v32 }
 0x5cc   :  { %12832 = vmatpush3.msra.mxu1 %v658_v33 }
 0x683   :  { %v12811_v34 = vpop.f32.mrf.mxu1 }
 0x685   :  { %v1008_v35 = vpop.f32.mrf.mxu1 }
 0x686   :  { %12833 = vmatprep.mubr.msk.f32.mxu1 %vm818_vm5, %v1008_v35 }
 0x687   :  { %12834 = vmatmul.mubr.msk.f32.vlgmr.msra.gmra.mxu1 %vm818_vm5, %v12811_v34 }
 0x68b   :  { %v12818_v36 = vpop.f32.mrf.mxu1 }
 0x68c   :  { %v1109_v37 = vmul.f32 0.35355338, %v12818_v36 }
 0x68d   :  { %v1099_v38 = vpop.f32.mrf.mxu1 }
 0x68e   :  { %v1108_v39 = vmul.f32 0.35355338, %v1099_v38  ;;  %v1113_v40 = vsel %vm908_vm6, %v1109_v37, -inf }
 0x68f   :  { %1114 = vmax.xlane.f32.xlu0 %v1113_v40 }
 0x690   :  { %v1110_v41 = vsel %vm904_vm7, %v1108_v39, -inf }
 0x691   :  { %1111 = vmax.xlane.f32.xlu1 %v1110_v41 }
 0x718   :  { %v1115_v42 = vpop.xlane.xlu0 %1114 }
 0x719   :  { %v1117_v43 = vsub.f32 %v1109_v37, %v1115_v42 }
 0x71a   :  { %v1112_v44 = vpop.xlane.xlu1 %1111 }
 0x71b   :  { %v1120_v45 = vmul.f32 1.442695, %v1117_v43  ;;  %v1116_v46 = vsub.f32 %v1108_v39, %v1112_v44 }
 0x71d   :  { %13728 = vpow2.f32 %v1120_v45  ;;  %v1118_v47 = vmul.f32 1.442695, %v1116_v46 }
 0x71f   :  { %13730 = vpow2.f32 %v1118_v47 }
 0x72a   :  { %v13729_v48 = vpop.eup %13728 }
 0x72b   :  { %v1125_v49 = vsel %vm908_vm6, %v13729_v48, 0.0 }
 0x72c   :  { %v13731_v50 = vpop.eup %13730  ;;  %1126 = vadd.xlane.f32.xlu1 %v1125_v49 }
 0x72d   :  { %v1122_v51 = vsel %vm904_vm7, %v13731_v50, 0.0 }
 0x72e   :  { %1123 = vadd.xlane.f32.xlu0 %v1122_v51 }
 0x73d   :  { %1132 = vrot.lane.b32.xlu1 %v14785_v2, %s14448_s20 }
 0x741   :  { %1388 = vrot.lane.b32.xlu1 %v14783_v63, %s14449_s1 }
 0x744   :  { %1134 = vrot.lane.b32.xlu0 %v14783_v63, %s14448_s20 }
 0x745   :  { %1382 = vrot.lane.b32.xlu1 %v14785_v2, %s14450_s8 }
 0x748   :  { %1386 = vrot.lane.b32.xlu0 %v14785_v2, %s14449_s1 }
 0x749   :  { %1674 = vrot.lane.b32.xlu1 %v14783_v63, %s14451_s2 }
 0x74c   :  { %1384 = vrot.lane.b32.xlu0 %v14783_v63, %s14450_s8 }
 0x74d   :  { %1668 = vrot.lane.b32.xlu1 %v14785_v2, %s14452_s29 }
 0x750   :  { %1672 = vrot.lane.b32.xlu0 %v14785_v2, %s14451_s2 }
 0x754   :  { %1670 = vrot.lane.b32.xlu0 %v14783_v63, %s14452_s29 }
 0x7b5   :  { %v1127_v52 = vpop.xlane.xlu1 %1126 }
 0x7b6   :  { %13732 = vrcp.f32 %v1127_v52 }
 0x7b7   :  { %v1124_v54 = vpop.xlane.xlu0 %1123 }
 0x7b8   :  { %13734 = vrcp.f32 %v1124_v54 }
 0x7b9   :  { %v1133_v56 = vpop.permute.xlu1 %1132 }
 0x7bb   :  { %v1135_v55 = vpop.permute.xlu0 %1134 }
 0x7bc   :  { %12819 = vmatprep.subr.msk.mxu0 %vm939_vm8, %v1135_v55 }
 0x7bd   :  { %12820 = vmatpush3.msk.msra.mxu0 %vm939_vm8, %v1135_v55  ;;  %v1389_v3 = vpop.permute.xlu1 %1388 }
 0x7be   :  { %12821 = vmatprep.subr.mxu0 %v1133_v56 }
 0x7bf   :  { %12822 = vmatpush3.msra.mxu0 %v1133_v56  ;;  %v1387_v6 = vpop.permute.xlu0 %1386  ;;  %v660_v56 = vld [vmem:[%s16174_s24 + $0x10] sm:$0xff] }
 0x7c0   :  { %12826 = vmatprep.subr.mxu0 %v659_v57 }
 0x7c1   :  { %v1383_v4 = vpop.permute.xlu1 %1382 }
 0x7c3   :  { %v13733_v58 = vpop.eup %13732  ;;  %v1385_v9 = vpop.permute.xlu0 %1384 }
 0x7c4   :  { %v1131_v1 = vmul.f32 %v13733_v58, %v13729_v48 }
 0x7c5   :  { %v13735_v61 = vpop.eup %13734  ;;  %v1675_v8 = vpop.permute.xlu1 %1674 }
 0x7c6   :  { %v1129_v62 = vmul.f32 %v13735_v61, %v13731_v50 }
 0x7c7   :  { %v1673_v11 = vpop.permute.xlu0 %1672 }
 0x7c8   :  { %12823 = vmatprep.mubr.msk.f32.mxu0 %vm904_vm7, %v1129_v62 }
 0x7c9   :  { %12824 = vmatmul.mubr.msk.f32.vlgmr.msra.gmra.mxu0 %vm904_vm7, %v1131_v1  ;;  %v1669_v10 = vpop.permute.xlu1 %1668 }
 0x7ca   :  { %12827 = vmatpush3.msra.mxu0 %v659_v57  ;;  %v12835_v57 = vpop.f32.mrf.mxu1 }
 0x7cb   :  { %12836 = vmatprep.subr.msk.mxu0 %vm818_vm5, %v1389_v3  ;;  %v1671_v12 = vpop.permute.xlu0 %1670 }
 0x7cc   :  { %v1373_v58 = vpop.f32.mrf.mxu1 }
 0x889   :  { %v12825_v5 = vpop.f32.mrf.mxu0 }
 0x88b   :  { %v1211_v7 = vpop.f32.mrf.mxu0 }
 0x88c   :  { %12828 = vmatprep.mubr.msk.f32.mxu0 %vm818_vm5, %v1211_v7 }
 0x88d   :  { %12829 = vmatmul.mubr.msk.f32.vlgmr.msra.gmra.mxu0 %vm818_vm5, %v12825_v5 }
 0x88e   :  { %12837 = vmatpush3.xpose.msk.msra.mxu0 %vm818_vm5, %v1389_v3  ;;  %12840 = vmatprep.mubr.msk.f32.mxu0 %vm818_vm5, %v1383_v4 }
 0x88f   :  { %12838 = vmatprep.subr.msk.mxu0 %vm818_vm5, %v1387_v6 }
 0x892   :  { %12839 = vmatpush3.xpose.msk.msra.mxu0 %vm818_vm5, %v1387_v6 }
 0x893   :  { %12855 = vmatprep.subr.msk.mxu0 %vm818_vm5, %v1675_v8 }
 0x895   :  { %12841 = vmatmul.mubr.msk.f32.vlgmr.msra.gmra.mxu0 %vm818_vm5, %v1385_v9 }
 0x896   :  { %12856 = vmatpush3.xpose.msk.msra.mxu0 %vm818_vm5, %v1675_v8  ;;  %12859 = vmatprep.mubr.msk.f32.mxu0 %vm818_vm5, %v1669_v10  ;;  %v661_v8 = vld [vmem:[%s16174_s24 + $0x18] sm:$0xff] }
 0x897   :  { %12857 = vmatprep.subr.msk.mxu0 %vm818_vm5, %v1673_v11 }
 0x89a   :  { %12858 = vmatpush3.xpose.msk.msra.mxu0 %vm818_vm5, %v1673_v11 }
 0x89d   :  { %12860 = vmatmul.mubr.msk.f32.vlgmr.msra.gmra.mxu0 %vm818_vm5, %v1671_v12 }
 0x94d   :  { %v14871_v13 = vpop.f32.mrf.mxu0 }
 0x94e   :  { %v1379_v9 = vadd.f32 %v12835_v57, %v14871_v13  ;;  %v14940_v57 = vld [vmem:[%s16177_s6] sm:$0x7] }
 0x94f   :  { %v14873_v14 = vpop.f32.mrf.mxu0 }
 0x955   :  { %v12842_v15 = vpop.f32.mrf.mxu0 }
 0x956   :  { %v1474_v16 = vmul.f32 0.35355338, %v12842_v15 }
 0x957   :  { %v1464_v17 = vpop.f32.mrf.mxu0 }
 0x958   :  { %v1473_v18 = vmul.f32 0.35355338, %v1464_v17  ;;  %v1478_v19 = vsel %vm908_vm6, %v1474_v16, -inf  ;;  %v1374_v17 = vadd.f32 %v1373_v58, %v14873_v14 }
 0x959   :  { %1479 = vmax.xlane.f32.xlu0 %v1478_v19 }
 0x95a   :  { %v1475_v20 = vsel %vm904_vm7, %v1473_v18, -inf }
 0x95b   :  { %1476 = vmax.xlane.f32.xlu1 %v1475_v20 }
 0x95d   :  { %v12861_v31 = vpop.f32.mrf.mxu0 }
 0x95e   :  { %v1760_v34 = vmul.f32 0.35355338, %v12861_v31  ;;  %v663_v31 = vld [vmem:[%s16175_s19] sm:$0xff] }
 0x95f   :  { %v1750_v32 = vpop.f32.mrf.mxu0 }
 0x960   :  { %v1759_v33 = vmul.f32 0.35355338, %v1750_v32  ;;  %v1764_v36 = vsel %vm908_vm6, %v1760_v34, -inf }
 0x962   :  { %v1761_v35 = vsel %vm904_vm7, %v1759_v33, -inf }
 0x9e2   :  { %v1480_v21 = vpop.xlane.xlu0 %1479 }
 0x9e3   :  { %v1482_v22 = vsub.f32 %v1474_v16, %v1480_v21 }
 0x9e4   :  { %v1477_v23 = vpop.xlane.xlu1 %1476 }
 0x9e5   :  { %v1485_v24 = vmul.f32 1.442695, %v1482_v22  ;;  %v1481_v25 = vsub.f32 %v1473_v18, %v1477_v23  ;;  %v11988_v18 = vld [vmem:[#allocation8] ss:$0 sm:$0xff] }
 0x9e7   :  { %13736 = vpow2.f32 %v1485_v24  ;;  %v1483_v26 = vmul.f32 1.442695, %v1481_v25 }
 0x9e9   :  { %13738 = vpow2.f32 %v1483_v26 }
 0x9f4   :  { %v13737_v27 = vpop.eup %13736 }
 0x9f5   :  { %v1490_v28 = vsel %vm908_vm6, %v13737_v27, 0.0 }
 0x9f6   :  { %v13739_v29 = vpop.eup %13738  ;;  %1491 = vadd.xlane.f32.xlu1 %v1490_v28  ;;  %v666_v28 = vld [vmem:[%s16175_s19 + $0x18] sm:$0xff] }
 0x9f7   :  { %v1487_v30 = vsel %vm904_vm7, %v13739_v29, 0.0  ;;  %12874 = vmatprep.subr.mxu0 %v666_v28 }
 0x9f8   :  { %1488 = vadd.xlane.f32.xlu0 %v1487_v30  ;;  %12875 = vmatpush3.msra.mxu0 %v666_v28  ;;  %v664_v30 = vld [vmem:[%s16175_s19 + $0x8] sm:$0xff] }
 0xa07   :  { %1497 = vrot.lane.b32.xlu1 %v14785_v2, %s14453_s25 }
 0xa0e   :  { %1499 = vrot.lane.b32.xlu0 %v14783_v63, %s14453_s25 }
 0xa2b   :  { %1762 = vmax.xlane.f32.xlu1 %v1761_v35 }
 0xa2d   :  { %1765 = vmax.xlane.f32.xlu0 %v1764_v36 }
 0xa7f   :  { %v1492_v37 = vpop.xlane.xlu1 %1491 }
 0xa80   :  { %13740 = vrcp.f32 %v1492_v37 }
 0xa81   :  { %v1489_v38 = vpop.xlane.xlu0 %1488 }
 0xa82   :  { %13742 = vrcp.f32 %v1489_v38 }
 0xa83   :  { %v1498_v40 = vpop.permute.xlu1 %1497 }
 0xa85   :  { %v1500_v39 = vpop.permute.xlu0 %1499 }
 0xa86   :  { %12843 = vmatprep.subr.msk.mxu1 %vm939_vm8, %v1500_v39 }
 0xa87   :  { %12844 = vmatpush3.msk.msra.mxu1 %vm939_vm8, %v1500_v39 }
 0xa88   :  { %12845 = vmatprep.subr.mxu1 %v1498_v40 }
 0xa89   :  { %12846 = vmatpush3.msra.mxu1 %v1498_v40  ;;  %v11989_v40 = vld [vmem:[#allocation10] ss:$0 sm:$0xff] }
 0xa8a   :  { %12850 = vmatprep.subr.mxu1 %v660_v56 }
 0xa8d   :  { %v13741_v41 = vpop.eup %13740 }
 0xa8e   :  { %v1496_v44 = vmul.f32 %v13741_v41, %v13737_v27 }
 0xa8f   :  { %v13743_v42 = vpop.eup %13742 }
 0xa90   :  { %v1494_v43 = vmul.f32 %v13743_v42, %v13739_v29  ;;  %v665_v29 = vld [vmem:[%s16175_s19 + $0x10] sm:$0xff] }
 0xa91   :  { %12876 = vmatprep.subr.mxu0 %v665_v29 }
 0xa92   :  { %12847 = vmatprep.mubr.msk.f32.mxu1 %vm904_vm7, %v1494_v43  ;;  %12877 = vmatpush3.msra.mxu0 %v665_v29 }
 0xa93   :  { %12848 = vmatmul.mubr.msk.f32.vlgmr.msra.gmra.mxu1 %vm904_vm7, %v1496_v44  ;;  %12878 = vmatprep.subr.mxu0 %v664_v30 }
 0xa94   :  { %12851 = vmatpush3.msra.mxu1 %v660_v56  ;;  %12879 = vmatpush3.msra.mxu0 %v664_v30 }
 0xa95   :  { %12880 = vmatprep.subr.mxu0 %v663_v31 }
 0xa96   :  { %12881 = vmatpush3.msra.mxu0 %v663_v31 }
 0xab4   :  { %v1763_v45 = vpop.xlane.xlu1 %1762 }
 0xab5   :  { %v1767_v46 = vsub.f32 %v1759_v33, %v1763_v45 }
 0xab6   :  { %v1766_v47 = vpop.xlane.xlu0 %1765 }
 0xab7   :  { %v1769_v48 = vmul.f32 1.442695, %v1767_v46  ;;  %v1768_v49 = vsub.f32 %v1760_v34, %v1766_v47 }
 0xab9   :  { %13744 = vpow2.f32 %v1769_v48  ;;  %v1771_v50 = vmul.f32 1.442695, %v1768_v49  ;;  %v1992_v49 = vlaneseq }
 0xabb   :  { %13746 = vpow2.f32 %v1771_v50 }
 0xac6   :  { %v13745_v51 = vpop.eup %13744 }
 0xac7   :  { %v1773_v52 = vsel %vm904_vm7, %v13745_v51, 0.0 }
 0xac8   :  { %v13747_v54 = vpop.eup %13746  ;;  %1774 = vadd.xlane.f32.xlu0 %v1773_v52 }
 0xac9   :  { %v1776_v55 = vsel %vm908_vm6, %v13747_v54, 0.0 }
 0xaca   :  { %1777 = vadd.xlane.f32.xlu1 %v1776_v55 }
 0xadb   :  { %1783 = vrot.lane.b32.xlu1 %v14785_v2, %s14454_s10 }
 0xade   :  { %1785 = vrot.lane.b32.xlu0 %v14783_v63, %s14454_s10 }
 0xb51   :  { %v1775_v61 = vpop.xlane.xlu0 %1774 }
 0xb52   :  { %13748 = vrcp.f32 %v1775_v61 }
 0xb53   :  { %v12849_v62 = vpop.f32.mrf.mxu1  ;;  %v1778_v1 = vpop.xlane.xlu1 %1777 }
 0xb54   :  { %13750 = vrcp.f32 %v1778_v1 }
 0xb55   :  { %v1576_v3 = vpop.f32.mrf.mxu1  ;;  %v1786_v4 = vpop.permute.xlu0 %1785 }
 0xb56   :  { %12852 = vmatprep.mubr.msk.f32.mxu1 %vm818_vm5, %v1576_v3  ;;  %12862 = vmatprep.subr.msk.mxu1 %vm939_vm8, %v1786_v4 }
 0xb57   :  { %12853 = vmatmul.mubr.msk.f32.vlgmr.msra.gmra.mxu1 %vm818_vm5, %v12849_v62  ;;  %v1784_v2 = vpop.permute.xlu1 %1783  ;;  %v14945_v62 = vld [vmem:[%s16178_s11] sm:$0x7] }
 0xb58   :  { %12863 = vmatpush3.msk.msra.mxu1 %vm939_vm8, %v1786_v4 }
 0xb59   :  { %12864 = vmatprep.subr.mxu1 %v1784_v2 }
 0xb5a   :  { %12865 = vmatpush3.msra.mxu1 %v1784_v2 }
 0xb5b   :  { %12869 = vmatprep.subr.mxu1 %v661_v8 }
 0xb5f   :  { %v13749_v63 = vpop.eup %13748 }
 0xb60   :  { %v1780_v5 = vmul.f32 %v13749_v63, %v13745_v51  ;;  %v11947_v51 = vld [vmem:[%s16176_s14] ss:$0 sm:$0xff] }
 0xb61   :  { %v13751_v6 = vpop.eup %13750  ;;  %v14931_v55 = vadd.f32 %v11947_v51, %v14771_v53 }
 0xb62   :  { %12866 = vmatprep.mubr.msk.f32.mxu1 %vm904_vm7, %v1780_v5  ;;  %v1782_v7 = vmul.f32 %v13751_v6, %v13747_v54  ;;  %v14928_v54 = vshrl.u32 %v1992_v49, 7 }
 0xb64   :  { %12867 = vmatmul.mubr.msk.f32.vlgmr.msra.gmra.mxu1 %vm904_vm7, %v1782_v7  ;;  %v14937_v56 = vsub.s32 0, %v14928_v54 }
 0xb65   :  { %12870 = vmatpush3.msra.mxu1 %v661_v8 }
 0xb66   :  { %12885 = vmatprep.subr.mxu1 %v14441_v0  ;;  %v1995_v61 = vrot.slane %v14940_v57, %v14937_v56  ;;  %v2001_v2 = vrot.slane %v14945_v62, %v14937_v56 }
 0xc17   :  { %v12854_v10 = vpop.f32.mrf.mxu1 }
 0xc18   :  { %v1667_v11 = vadd.f32 %v12854_v10, %v1379_v9 }
 0xc19   :  { %v1657_v12 = vpop.f32.mrf.mxu1 }
 0xc1a   :  { %v1666_v20 = vadd.f32 %v1657_v12, %v1374_v17 }
 0xc24   :  { %v12868_v15 = vpop.f32.mrf.mxu1 }
 0xc26   :  { %v1862_v16 = vpop.f32.mrf.mxu1 }
 0xc27   :  { %12871 = vmatprep.mubr.msk.f32.mxu1 %vm818_vm5, %v1862_v16 }
 0xc28   :  { %12872 = vmatmul.mubr.msk.f32.vlgmr.msra.gmra.mxu1 %vm818_vm5, %v12868_v15 }
 0xc29   :  { %12893 = vmatprep.mubr.msk.f32.mxu1 %vm14445_vm2, %v14441_v0 }
 0xce8   :  { %v12873_v19 = vpop.f32.mrf.mxu1 }
 0xce9   :  { %v1953_v13 = vadd.f32 %v12873_v19, %v1667_v11 }
 0xcea   :  { %v1943_v21 = vpop.f32.mrf.mxu1 }
 0xceb   :  { %v1961_v22 = vadd.f32 %v11988_v18, %v1953_v13  ;;  %v1952_v23 = vadd.f32 %v1943_v21, %v1666_v20 }
 0xced   :  { %v1960_v24 = vadd.f32 %v11988_v18, %v1952_v23  ;;  %v1963_v25 = vadd.f32 %v1961_v22, %v14777_v60 }
 0xcef   :  { %v1968_v26 = vsel %vm1967_vm9, %v1963_v25, 0.0  ;;  %v1962_v27 = vadd.f32 %v1960_v24, %v14775_v59 }
 0xcf0   :  { %1969 = vadd.xlane.f32.xlu0 %v1968_v26 }
 0xcf1   :  { %v1964_v14 = vsel %vm429_vm0, %v1962_v27, 0.0 }
 0xcf2   :  { %1965 = vadd.xlane.f32.xlu1 %v1964_v14 }
 0xd79   :  { %v1970_v60 = vpop.xlane.xlu0 %1969 }
 0xd7a   :  { %v1973_v32 = vmul.f32 0.03125, %v1970_v60 }
 0xd7b   :  { %v1966_v33 = vpop.xlane.xlu1 %1965 }
 0xd7c   :  { %v1975_v59 = vsub.f32 %v1963_v25, %v1973_v32  ;;  %v1972_v34 = vmul.f32 0.03125, %v1966_v33 }
 0xd7e   :  { %v1974_v35 = vsub.f32 %v1962_v27, %v1972_v34  ;;  %v1977_v36 = vmul.f32 %v1975_v59, %v1975_v59 }
 0xd80   :  { %v1981_v37 = vsel %vm1967_vm9, %v1977_v36, 0.0  ;;  %v1976_v38 = vmul.f32 %v1974_v35, %v1974_v35 }
 0xd81   :  { %1982 = vadd.xlane.f32.xlu1 %v1981_v37 }
 0xd82   :  { %v1978_v39 = vsel %vm429_vm0, %v1976_v38, 0.0 }
 0xd83   :  { %1979 = vadd.xlane.f32.xlu0 %v1978_v39 }
 0xd92   :  { %2099 = vrot.lane.b32.xlu1 %v665_v29, %s14443_s7 }
 0xd96   :  { %2097 = vrot.lane.b32.xlu1 %v664_v30, %s14443_s7 }
 0xd99   :  { %2101 = vrot.lane.b32.xlu0 %v666_v28, %s14443_s7 }
 0xd9a   :  { %2107 = vrot.lane.b32.xlu1 %v11989_v40, %s14443_s7 }
 0xd9d   :  { %2095 = vrot.lane.b32.xlu0 %v663_v31, %s14443_s7 }
 0xe0a   :  { %v1983_v41 = vpop.xlane.xlu1 %1982 }
 0xe0b   :  { %v1985_v42 = vmul.f32 0.03125, %v1983_v41 }
 0xe0c   :  { %v1980_v43 = vpop.xlane.xlu0 %1979 }
 0xe0d   :  { %v1987_v44 = vadd.f32 1e-05, %v1985_v42  ;;  %v1984_v45 = vmul.f32 0.03125, %v1980_v43 }
 0xe0e   :  { %v2100_v46 = vpop.permute.xlu1 %2099 }
 0xe0f   :  { %13752 = vrsqrt.f32 %v1987_v44  ;;  %v1986_v47 = vadd.f32 1e-05, %v1984_v45 }
 0xe10   :  { %v2102_v48 = vpop.permute.xlu0 %2101 }
 0xe11   :  { %13754 = vrsqrt.f32 %v1986_v47  ;;  %12886 = vmatpush3.msra.mxu1 %v2102_v48  ;;  %v669_v48 = vld [vmem:[%s16179_s5 + $0x8] sm:$0xff] }
 0xe12   :  { %12887 = vmatprep.subr.mxu1 %v14441_v0  ;;  %v2098_v50 = vpop.permute.xlu1 %2097 }
 0xe13   :  { %12888 = vmatpush3.msra.mxu1 %v2100_v46 }
 0xe14   :  { %12889 = vmatprep.subr.mxu1 %v14441_v0  ;;  %v2096_v52 = vpop.permute.xlu0 %2095 }
 0xe15   :  { %12890 = vmatpush3.msra.mxu1 %v2098_v50 }
 0xe16   :  { %12891 = vmatprep.subr.mxu1 %v14441_v0  ;;  %v2108_v7 = vpop.permute.xlu1 %2107 }
 0xe17   :  { %12892 = vmatpush3.msra.mxu1 %v2096_v52 }
 0xe18   :  { %12894 = vmatmul.mubr.msk.f32.vlgmr.msra.gmra.mxu1 %vm429_vm0, %v14931_v55 }
 0xe1c   :  { %v13753_v58 = vpop.eup %13752 }
 0xe1d   :  { %v1991_v1 = vmul.f32 %v13753_v58, %v1975_v59 }
 0xe1e   :  { %v13755_v53 = vpop.eup %13754 }
 0xe1f   :  { %v1990_v3 = vmul.f32 %v13755_v53, %v1974_v35  ;;  %v1997_v4 = vmul.f32 %v1995_v61, %v1991_v1 }
 0xe21   :  { %v1996_v63 = vmul.f32 %v1995_v61, %v1990_v3  ;;  %v14951_v6 = vadd.f32 %v2001_v2, %v1997_v4 }
 0xe23   :  { %v14949_v5 = vadd.f32 %v2001_v2, %v1996_v63 }
 0xe25   :  { %12882 = vmatprep.mubr.msk.f32.mxu0 %vm429_vm0, %v14949_v5 }
 0xe26   :  { %12883 = vmatmul.mubr.msk.f32.vlgmr.msra.gmra.mxu0 %vm429_vm0, %v14951_v6 }
 0xed8   :  { %v2179_v8 = vpop.f32.mrf.mxu1 }
 0xed9   :  { %v14957_v9 = vadd.f32 %v2179_v8, %v2108_v7 }
 0xeda   :  { %v12895_v10 = vpop.f32.mrf.mxu1 }
 0xedb   :  { %2383 = vrot.lane.b32.xlu0 %v14957_v9, %s14447_s28  ;;  %12896 = vmatprep.subr.msk.mxu0 %vm818_vm5, %v14957_v9 }
 0xedc   :  { %12897 = vmatpush3.xpose.msk.msra.mxu0 %vm818_vm5, %v14957_v9 }
 0xee6   :  { %v12884_v11 = vpop.f32.mrf.mxu0 }
 0xee7   :  { %v14965_v12 = vadd.f32 %v12884_v11, %v11989_v40  ;;  %v668_v11 = vld [vmem:[%s16179_s5] sm:$0xff] }
 0xee8   :  { %v2082_v15 = vpop.f32.mrf.mxu0 }
 0xee9   :  { %v14967_v16 = vadd.f32 %v11989_v40, %v2082_v15  ;;  %2381 = vrot.lane.b32.xlu0 %v14965_v12, %s14447_s28 }
 0xeeb   :  { %2379 = vrot.lane.b32.xlu1 %v14967_v16, %s14447_s28  ;;  %12898 = vmatprep.mubr.msk.f32.mxu0 %vm818_vm5, %v14967_v16 }
 0xeec   :  { %12899 = vmatmul.mubr.msk.f32.vlgmr.msra.gmra.mxu0 %vm818_vm5, %v14965_v12 }
 0xf4d   :  { %v2384_v17 = vpop.permute.xlu0 %2383 }
 0xf4e   :  { %12906 = vmatprep.subr.msk.mxu0 %vm818_vm5, %v2384_v17 }
 0xf4f   :  { %12907 = vmatpush3.xpose.msk.msra.mxu0 %vm818_vm5, %v2384_v17 }
 0xf50   :  { %12916 = vmatprep.subr.mxu0 %v669_v48 }
 0xf5b   :  { %v2382_v19 = vpop.permute.xlu0 %2381 }
 0xf5d   :  { %v2380_v18 = vpop.permute.xlu1 %2379 }
 0xf5e   :  { %12908 = vmatprep.mubr.msk.f32.mxu0 %vm818_vm5, %v2380_v18 }
 0xf5f   :  { %12909 = vmatmul.mubr.msk.f32.vlgmr.msra.gmra.mxu0 %vm818_vm5, %v2382_v19 }
 0xf60   :  { %12917 = vmatpush3.msra.mxu0 %v669_v48 }
 0xfac   :  { %v12900_v20 = vpop.f32.mrf.mxu0 }
 0xfad   :  { %v2268_v13 = vmul.f32 0.35355338, %v12900_v20 }
 0xfae   :  { %v2258_v21 = vpop.f32.mrf.mxu0 }
 0xfaf   :  { %v2267_v22 = vmul.f32 0.35355338, %v2258_v21  ;;  %v2274_v23 = vsel %vm2273_vm10, %v2268_v13, -inf }
 0xfb0   :  { %2275 = vmax.xlane.f32.xlu0 %v2274_v23 }
 0xfb1   :  { %v2270_v24 = vsel %vm2269_vm11, %v2267_v22, -inf }
 0xfb2   :  { %2271 = vmax.xlane.f32.xlu1 %v2270_v24 }
0x101f   :  { %v12910_v25 = vpop.f32.mrf.mxu0 }
0x1020   :  { %v2467_v26 = vmul.f32 0.35355338, %v12910_v25 }
0x1021   :  { %v2457_v27 = vpop.f32.mrf.mxu0 }
0x1022   :  { %v2466_v14 = vmul.f32 0.35355338, %v2457_v27  ;;  %v2471_v28 = vsel %vm2273_vm10, %v2467_v26, -inf }
0x1023   :  { %2472 = vmax.xlane.f32.xlu1 %v2471_v28 }
0x1024   :  { %v2468_v29 = vsel %vm2269_vm11, %v2466_v14, -inf }
0x1025   :  { %2469 = vmax.xlane.f32.xlu0 %v2468_v29 }
0x1039   :  { %v2276_v30 = vpop.xlane.xlu0 %2275 }
0x103a   :  { %v2278_v31 = vsub.f32 %v2268_v13, %v2276_v30 }
0x103b   :  { %v2272_v60 = vpop.xlane.xlu1 %2271 }
0x103c   :  { %v2281_v32 = vmul.f32 1.442695, %v2278_v31  ;;  %v2277_v33 = vsub.f32 %v2267_v22, %v2272_v60 }
0x103e   :  { %13756 = vpow2.f32 %v2281_v32  ;;  %v2279_v59 = vmul.f32 1.442695, %v2277_v33 }
0x1040   :  { %13758 = vpow2.f32 %v2279_v59 }
0x104b   :  { %v13757_v34 = vpop.eup %13756 }
0x104c   :  { %v2286_v35 = vsel %vm2273_vm10, %v13757_v34, 0.0 }
0x104d   :  { %v13759_v36 = vpop.eup %13758  ;;  %2287 = vadd.xlane.f32.xlu1 %v2286_v35 }
0x104e   :  { %v2283_v37 = vsel %vm2269_vm11, %v13759_v36, 0.0 }
0x104f   :  { %2284 = vadd.xlane.f32.xlu0 %v2283_v37 }
0x10ac   :  { %v2473_v38 = vpop.xlane.xlu1 %2472 }
0x10ad   :  { %v2475_v39 = vsub.f32 %v2467_v26, %v2473_v38 }
0x10ae   :  { %v2470_v40 = vpop.xlane.xlu0 %2469 }
0x10af   :  { %v2478_v41 = vmul.f32 1.442695, %v2475_v39  ;;  %v2474_v42 = vsub.f32 %v2466_v14, %v2470_v40 }
0x10b1   :  { %13760 = vpow2.f32 %v2478_v41  ;;  %v2476_v43 = vmul.f32 1.442695, %v2474_v42 }
0x10b3   :  { %13762 = vpow2.f32 %v2476_v43 }
0x10be   :  { %v13761_v44 = vpop.eup %13760 }
0x10bf   :  { %v2483_v45 = vsel %vm2273_vm10, %v13761_v44, 0.0 }
0x10c0   :  { %v13763_v46 = vpop.eup %13762  ;;  %2484 = vadd.xlane.f32.xlu1 %v2483_v45 }
0x10c1   :  { %v2480_v47 = vsel %vm2269_vm11, %v13763_v46, 0.0 }
0x10c2   :  { %2481 = vadd.xlane.f32.xlu0 %v2480_v47 }
0x10d1   :  { %2490 = vrot.lane.b32.xlu1 %v14957_v9, %s14446_s26 }
0x10d5   :  { %2741 = vrot.lane.b32.xlu1 %v14957_v9, %s14450_s8 }
0x10d6   :  { %v2288_v52 = vpop.xlane.xlu1 %2287 }
0x10d8   :  { %2293 = vrot.lane.b32.xlu0 %v14957_v9, %s14443_s7  ;;  %v2285_v49 = vpop.xlane.xlu0 %2284 }
0x10d9   :  { %13764 = vrcp.f32 %v2285_v49  ;;  %2739 = vrot.lane.b32.xlu1 %v14965_v12, %s14450_s8 }
0x10da   :  { %13766 = vrcp.f32 %v2288_v52 }
0x10dc   :  { %2737 = vrot.lane.b32.xlu0 %v14967_v16, %s14450_s8 }
0x10e6   :  { %v13765_v50 = vpop.eup %13764 }
0x10e7   :  { %v2290_v51 = vmul.f32 %v13765_v50, %v13759_v36  ;;  %v13767_v1 = vpop.eup %13766 }
0x10e8   :  { %v2292_v4 = vmul.f32 %v13767_v1, %v13757_v34 }
0x10e9   :  { %12903 = vmatprep.mubr.msk.f32.mxu1 %vm2269_vm11, %v2290_v51 }
0x1149   :  { %v2485_v58 = vpop.xlane.xlu1 %2484 }
0x114a   :  { %13768 = vrcp.f32 %v2485_v58 }
0x114b   :  { %v2482_v61 = vpop.xlane.xlu0 %2481 }
0x114c   :  { %13770 = vrcp.f32 %v2482_v61 }
0x114d   :  { %v2491_v53 = vpop.permute.xlu1 %2490 }
0x114f   :  { %v2294_v3 = vpop.permute.xlu0 %2293 }
0x1150   :  { %12901 = vmatprep.subr.msk.mxu1 %vm2301_vm12, %v2294_v3 }
0x1151   :  { %12902 = vmatpush3.msk.msra.mxu1 %vm2301_vm12, %v2294_v3  ;;  %v2742_v2 = vpop.permute.xlu1 %2741 }
0x1152   :  { %12904 = vmatmul.mubr.msk.f32.vlgmr.msra.gmra.mxu1 %vm2269_vm11, %v2292_v4  ;;  %12911 = vmatprep.subr.msk.mxu1 %vm2301_vm12, %v2491_v53 }
0x1153   :  { %12926 = vmatprep.subr.msk.mxu0 %vm818_vm5, %v2742_v2  ;;  %12912 = vmatpush3.msk.msra.mxu1 %vm2301_vm12, %v2491_v53  ;;  %v2738_v20 = vpop.permute.xlu0 %2737 }
0x1154   :  { %12921 = vmatprep.subr.mxu1 %v668_v11 }
0x1155   :  { %v2740_v13 = vpop.permute.xlu1 %2739 }
0x1157   :  { %v13769_v63 = vpop.eup %13768 }
0x1158   :  { %v2489_v10 = vmul.f32 %v13769_v63, %v13761_v44 }
0x1159   :  { %v13771_v7 = vpop.eup %13770 }
0x115a   :  { %v2487_v8 = vmul.f32 %v13771_v7, %v13763_v46  ;;  %v670_v46 = vld [vmem:[%s16179_s5 + $0x10] sm:$0xff] }
0x115c   :  { %12913 = vmatprep.mubr.msk.f32.mxu1 %vm2269_vm11, %v2487_v8 }
0x115d   :  { %12914 = vmatmul.mubr.msk.f32.vlgmr.msra.gmra.mxu1 %vm2269_vm11, %v2489_v10 }
0x115e   :  { %12922 = vmatpush3.msra.mxu1 %v668_v11 }
0x1212   :  { %v12905_v15 = vpop.f32.mrf.mxu1 }
0x1214   :  { %v2370_v17 = vpop.f32.mrf.mxu1 }
0x1215   :  { %12923 = vmatprep.mubr.msk.f32.mxu1 %vm818_vm5, %v2370_v17 }
0x1216   :  { %12924 = vmatmul.mubr.msk.f32.vlgmr.msra.gmra.mxu1 %vm818_vm5, %v12905_v15 }
0x121d   :  { %v12915_v18 = vpop.f32.mrf.mxu1 }
0x121f   :  { %v2566_v19 = vpop.f32.mrf.mxu1 }
0x1220   :  { %12918 = vmatprep.mubr.msk.f32.mxu0 %vm818_vm5, %v2566_v19 }
0x1221   :  { %12919 = vmatmul.mubr.msk.f32.vlgmr.msra.gmra.mxu0 %vm818_vm5, %v12915_v18 }
0x1222   :  { %12927 = vmatpush3.xpose.msk.msra.mxu0 %vm818_vm5, %v2742_v2  ;;  %12928 = vmatprep.mubr.msk.f32.mxu0 %vm818_vm5, %v2738_v20 }
0x1223   :  { %12936 = vmatprep.subr.mxu0 %v670_v46 }
0x1225   :  { %12929 = vmatmul.mubr.msk.f32.vlgmr.msra.gmra.mxu0 %vm818_vm5, %v2740_v13 }
0x1226   :  { %12937 = vmatpush3.msra.mxu0 %v670_v46  ;;  %v674_v46 = vld [vmem:[%s16180_s13 + $0x8] sm:$0xff] }
0x12d6   :  { %v12925_v21 = vpop.f32.mrf.mxu1 }
0x12d8   :  { %v2728_v47 = vpop.f32.mrf.mxu1 }
0x12e1   :  { %v12920_v22 = vpop.f32.mrf.mxu0 }
0x12e2   :  { %v15017_v23 = vadd.f32 %v12925_v21, %v12920_v22 }
0x12e3   :  { %v15019_v24 = vpop.f32.mrf.mxu0 }
0x12e5   :  { %v12930_v25 = vpop.f32.mrf.mxu0 }
0x12e6   :  { %v2825_v26 = vmul.f32 0.35355338, %v12930_v25 }
0x12e7   :  { %v2815_v27 = vpop.f32.mrf.mxu0 }
0x12e8   :  { %v2824_v14 = vmul.f32 0.35355338, %v2815_v27  ;;  %v2829_v28 = vsel %vm2273_vm10, %v2825_v26, -inf }
0x12e9   :  { %2830 = vmax.xlane.f32.xlu1 %v2829_v28 }
0x12ea   :  { %v2826_v29 = vsel %vm2269_vm11, %v2824_v14, -inf }
0x12eb   :  { %2827 = vmax.xlane.f32.xlu0 %v2826_v29 }
0x12fa   :  { %2848 = vrot.lane.b32.xlu1 %v14957_v9, %s14449_s1 }
0x12fe   :  { %3016 = vrot.lane.b32.xlu1 %v14967_v16, %s14452_s29 }
0x1302   :  { %3018 = vrot.lane.b32.xlu1 %v14965_v12, %s14452_s29 }
0x1372   :  { %v2831_v30 = vpop.xlane.xlu1 %2830 }
0x1373   :  { %v2833_v31 = vsub.f32 %v2825_v26, %v2831_v30  ;;  %v671_v26 = vld [vmem:[%s16179_s5 + $0x18] sm:$0xff] }
0x1374   :  { %v2828_v60 = vpop.xlane.xlu0 %2827 }
0x1375   :  { %v2836_v32 = vmul.f32 1.442695, %v2833_v31  ;;  %v2832_v33 = vsub.f32 %v2824_v14, %v2828_v60  ;;  %v12025_v60 = vld [vmem:[#allocation11] ss:$0 sm:$0xff] }
0x1376   :  { %v2849_v59 = vpop.permute.xlu1 %2848 }
0x1377   :  { %13772 = vpow2.f32 %v2836_v32  ;;  %v2834_v34 = vmul.f32 1.442695, %v2832_v33  ;;  %12931 = vmatprep.subr.msk.mxu1 %vm2301_vm12, %v2849_v59 }
0x1378   :  { %12932 = vmatpush3.msk.msra.mxu1 %vm2301_vm12, %v2849_v59 }
0x1379   :  { %13774 = vpow2.f32 %v2834_v34 }
0x137a   :  { %v3017_v42 = vpop.permute.xlu1 %3016 }
0x137e   :  { %v3019_v45 = vpop.permute.xlu1 %3018 }
0x1384   :  { %v13773_v35 = vpop.eup %13772 }
0x1385   :  { %v2841_v36 = vsel %vm2273_vm10, %v13773_v35, 0.0 }
0x1386   :  { %v13775_v16 = vpop.eup %13774  ;;  %2842 = vadd.xlane.f32.xlu0 %v2841_v36 }
0x1387   :  { %v2838_v12 = vsel %vm2269_vm11, %v13775_v16, 0.0 }
0x138a   :  { %2839 = vadd.xlane.f32.xlu0 %v2838_v12 }
0x13a0   :  { %3020 = vrot.lane.b32.xlu0 %v14957_v9, %s14452_s29 }
0x140f   :  { %v2843_v37 = vpop.xlane.xlu0 %2842 }
0x1410   :  { %13776 = vrcp.f32 %v2843_v37 }
0x1413   :  { %v2840_v38 = vpop.xlane.xlu0 %2839 }
0x1414   :  { %13778 = vrcp.f32 %v2840_v38 }
0x1417   :  { %v3021_v39 = vpop.permute.xlu0 %3020 }
0x1418   :  { %12941 = vmatprep.subr.msk.mxu1 %vm818_vm5, %v3021_v39 }
0x141d   :  { %v13777_v40 = vpop.eup %13776 }
0x141e   :  { %v2847_v44 = vmul.f32 %v13777_v40, %v13773_v35 }
0x1421   :  { %v13779_v41 = vpop.eup %13778 }
0x1422   :  { %v2845_v43 = vmul.f32 %v13779_v41, %v13775_v16 }
0x1424   :  { %12933 = vmatprep.mubr.msk.f32.mxu1 %vm2269_vm11, %v2845_v43 }
0x1425   :  { %12934 = vmatmul.mubr.msk.f32.vlgmr.msra.gmra.mxu1 %vm2269_vm11, %v2847_v44  ;;  %v676_v44 = vld [vmem:[%s16180_s13 + $0x18] sm:$0xff] }
0x1426   :  { %12942 = vmatpush3.xpose.msk.msra.mxu1 %vm818_vm5, %v3021_v39  ;;  %12943 = vmatprep.mubr.msk.f32.mxu1 %vm818_vm5, %v3017_v42 }
0x1427   :  { %12951 = vmatprep.subr.mxu1 %v671_v26 }
0x1429   :  { %12944 = vmatmul.mubr.msk.f32.vlgmr.msra.gmra.mxu1 %vm818_vm5, %v3019_v45  ;;  %v675_v45 = vld [vmem:[%s16180_s13 + $0x10] sm:$0xff] }
0x142a   :  { %12952 = vmatpush3.msra.mxu1 %v671_v26  ;;  %v12026_v26 = vld [vmem:[#allocation13] ss:$0 sm:$0xff] }
0x14e5   :  { %v12935_v48 = vpop.f32.mrf.mxu1 }
0x14e7   :  { %v2924_v49 = vpop.f32.mrf.mxu1 }
0x14e8   :  { %12938 = vmatprep.mubr.msk.f32.mxu0 %vm818_vm5, %v2924_v49  ;;  %v684_v49 = vld [vmem:[%s16181_s15 + $0x30] sm:$0xff] }
0x14e9   :  { %12939 = vmatmul.mubr.msk.f32.vlgmr.msra.gmra.mxu0 %vm818_vm5, %v12935_v48  ;;  %v12945_v50 = vpop.f32.mrf.mxu1  ;;  %v685_v48 = vld [vmem:[%s16181_s15 + $0x38] sm:$0xff] }
0x14ea   :  { %v3104_v51 = vmul.f32 0.35355338, %v12945_v50  ;;  %12967 = vmatprep.subr.mxu1 %v685_v48  ;;  %v683_v50 = vld [vmem:[%s16181_s15 + $0x28] sm:$0xff] }
0x14eb   :  { %v3094_v52 = vpop.f32.mrf.mxu1 }
0x14ec   :  { %v3103_v58 = vmul.f32 0.35355338, %v3094_v52  ;;  %v3108_v61 = vsel %vm2273_vm10, %v3104_v51, -inf }
0x14ed   :  { %3109 = vmax.xlane.f32.xlu1 %v3108_v61 }
0x14ee   :  { %v3105_v1 = vsel %vm2269_vm11, %v3103_v58, -inf }
0x14ef   :  { %3106 = vmax.xlane.f32.xlu0 %v3105_v1 }
0x14fe   :  { %3127 = vrot.lane.b32.xlu1 %v14957_v9, %s14451_s2 }
0x1576   :  { %v3110_v53 = vpop.xlane.xlu1 %3109 }
0x1577   :  { %v3112_v3 = vsub.f32 %v3104_v51, %v3110_v53  ;;  %v682_v51 = vld [vmem:[%s16181_s15 + $0x20] sm:$0xff] }
0x1578   :  { %v3107_v4 = vpop.xlane.xlu0 %3106 }
0x1579   :  { %v3111_v2 = vsub.f32 %v3103_v58, %v3107_v4  ;;  %v3115_v7 = vmul.f32 1.442695, %v3112_v3  ;;  %v15075_v4 = vsub.s32 1, %v14928_v54 }
0x157a   :  { %v3128_v63 = vpop.permute.xlu1 %3127 }
0x157b   :  { %v3113_v8 = vmul.f32 1.442695, %v3111_v2  ;;  %12946 = vmatprep.subr.msk.mxu0 %vm2301_vm12, %v3128_v63  ;;  %v3334_v2 = vrot.slane %v14940_v57, %v15075_v4  ;;  %v691_v57 = vld [vmem:[%s16182_s23 + $0x10] sm:$0xff] }
0x157c   :  { %12947 = vmatpush3.msk.msra.mxu0 %vm2301_vm12, %v3128_v63 }
0x157d   :  { %13780 = vpow2.f32 %v3113_v8  ;;  %12956 = vmatprep.subr.mxu0 %v676_v44  ;;  %v3340_v8 = vrot.slane %v14945_v62, %v15075_v4  ;;  %v690_v62 = vld [vmem:[%s16182_s23 + $0x8] sm:$0xff] }
0x157e   :  { %13782 = vpow2.f32 %v3115_v7 }
0x158a   :  { %v13781_v10 = vpop.eup %13780 }
0x158b   :  { %v3117_v11 = vsel %vm2269_vm11, %v13781_v10, 0.0  ;;  %v13783_v15 = vpop.eup %13782 }
0x158c   :  { %3118 = vadd.xlane.f32.xlu0 %v3117_v11  ;;  %v3120_v9 = vsel %vm2273_vm10, %v13783_v15, 0.0 }
0x1590   :  { %3121 = vadd.xlane.f32.xlu0 %v3120_v9 }
0x15a9   :  { %v12940_v17 = vpop.f32.mrf.mxu0 }
0x15aa   :  { %v3015_v18 = vadd.f32 %v12940_v17, %v15017_v23  ;;  %v2729_v23 = vadd.f32 %v2728_v47, %v15019_v24  ;;  %v673_v47 = vld [vmem:[%s16180_s13] sm:$0xff] }
0x15ab   :  { %v3005_v27 = vpop.f32.mrf.mxu0 }
0x15ac   :  { %v3014_v30 = vadd.f32 %v3005_v27, %v2729_v23 }
0x1615   :  { %v3119_v19 = vpop.xlane.xlu0 %3118 }
0x1616   :  { %13784 = vrcp.f32 %v3119_v19  ;;  %v692_v19 = vld [vmem:[%s16182_s23 + $0x18] sm:$0xff] }
0x1619   :  { %v3122_v20 = vpop.xlane.xlu0 %3121 }
0x161a   :  { %13786 = vrcp.f32 %v3122_v20  ;;  %v689_v20 = vld [vmem:[%s16182_s23] sm:$0xff] }
0x1623   :  { %v13785_v13 = vpop.eup %13784 }
0x1624   :  { %v3124_v21 = vmul.f32 %v13785_v13, %v13781_v10  ;;  %v681_v13 = vld [vmem:[%s16181_s15 + $0x18] sm:$0xff] }
0x1626   :  { %12948 = vmatprep.mubr.msk.f32.mxu0 %vm2269_vm11, %v3124_v21  ;;  %v680_v21 = vld [vmem:[%s16181_s15 + $0x10] sm:$0xff] }
0x1627   :  { %v13787_v22 = vpop.eup %13786 }
0x1628   :  { %v3126_v25 = vmul.f32 %v13787_v22, %v13783_v15  ;;  %v679_v22 = vld [vmem:[%s16181_s15 + $0x8] sm:$0xff] }
0x162a   :  { %12949 = vmatmul.mubr.msk.f32.vlgmr.msra.gmra.mxu0 %vm2269_vm11, %v3126_v25  ;;  %v678_v25 = vld [vmem:[%s16181_s15] sm:$0xff] }
0x162b   :  { %12957 = vmatpush3.msra.mxu0 %v676_v44 }
0x162c   :  { %12958 = vmatprep.subr.mxu0 %v675_v45 }
0x162d   :  { %12959 = vmatpush3.msra.mxu0 %v675_v45 }
0x162e   :  { %12960 = vmatprep.subr.mxu0 %v674_v46 }
0x162f   :  { %12961 = vmatpush3.msra.mxu0 %v674_v46 }
0x1630   :  { %12962 = vmatprep.subr.mxu0 %v673_v47 }
0x1631   :  { %12963 = vmatpush3.msra.mxu0 %v673_v47 }
0x1632   :  { %12986 = vmatprep.subr.mxu0 %v14441_v0 }
0x16ea   :  { %v12950_v14 = vpop.f32.mrf.mxu0 }
0x16ec   :  { %v3203_v28 = vpop.f32.mrf.mxu0 }
0x16ed   :  { %12953 = vmatprep.mubr.msk.f32.mxu1 %vm818_vm5, %v3203_v28 }
0x16ee   :  { %12954 = vmatmul.mubr.msk.f32.vlgmr.msra.gmra.mxu1 %vm818_vm5, %v12950_v14 }
0x16ef   :  { %12968 = vmatpush3.msra.mxu1 %v685_v48 }
0x16f0   :  { %12969 = vmatprep.subr.mxu1 %v684_v49 }
0x16f1   :  { %12970 = vmatpush3.msra.mxu1 %v684_v49 }
0x16f2   :  { %12971 = vmatprep.subr.mxu1 %v683_v50 }
0x16f3   :  { %12972 = vmatpush3.msra.mxu1 %v683_v50 }
0x16f4   :  { %12973 = vmatprep.subr.mxu1 %v682_v51 }
0x16f5   :  { %12974 = vmatpush3.msra.mxu1 %v682_v51 }
0x16f6   :  { %12975 = vmatprep.subr.mxu1 %v681_v13 }
0x16f7   :  { %12976 = vmatpush3.msra.mxu1 %v681_v13 }
0x16f8   :  { %12977 = vmatprep.subr.mxu1 %v680_v21 }
0x16f9   :  { %12978 = vmatpush3.msra.mxu1 %v680_v21 }
0x16fa   :  { %12979 = vmatprep.subr.mxu1 %v679_v22 }
0x16fb   :  { %12980 = vmatpush3.msra.mxu1 %v679_v22 }
0x16fc   :  { %12981 = vmatprep.subr.mxu1 %v678_v25 }
0x16fd   :  { %12982 = vmatpush3.msra.mxu1 %v678_v25 }
0x16fe   :  { %13002 = vmatprep.subr.mxu1 %v14441_v0 }
0x17ae   :  { %v12955_v29 = vpop.f32.mrf.mxu1 }
0x17af   :  { %v3294_v31 = vadd.f32 %v12955_v29, %v3015_v18 }
0x17b0   :  { %v3284_v32 = vpop.f32.mrf.mxu1 }
0x17b1   :  { %v3293_v33 = vadd.f32 %v3284_v32, %v3014_v30  ;;  %v3302_v59 = vadd.f32 %v12025_v60, %v3294_v31  ;;  %v12032_v31 = vld [vmem:[#allocation16] ss:$0 sm:$0xff] }
0x17b3   :  { %v3301_v34 = vadd.f32 %v12025_v60, %v3293_v33  ;;  %v3304_v16 = vadd.f32 %v3302_v59, %v14951_v6 }
0x17b5   :  { %v3303_v35 = vadd.f32 %v3301_v34, %v14949_v5  ;;  %v3308_v12 = vsel %vm1967_vm9, %v3304_v16, 0.0 }
0x17b7   :  { %v3305_v36 = vsel %vm429_vm0, %v3303_v35, 0.0 }
0x17b8   :  { %3306 = vadd.xlane.f32.xlu0 %v3305_v36 }
0x17bc   :  { %3309 = vadd.xlane.f32.xlu0 %v3308_v12 }
0x1841   :  { %v3307_v24 = vpop.xlane.xlu0 %3306 }
0x1842   :  { %v3311_v37 = vmul.f32 0.03125, %v3307_v24 }
0x1844   :  { %v3313_v38 = vsub.f32 %v3303_v35, %v3311_v37 }
0x1845   :  { %v3310_v39 = vpop.xlane.xlu0 %3309 }
0x1846   :  { %v3312_v40 = vmul.f32 0.03125, %v3310_v39  ;;  %v3315_v41 = vmul.f32 %v3313_v38, %v3313_v38 }
0x1848   :  { %v3314_v42 = vsub.f32 %v3304_v16, %v3312_v40  ;;  %v3317_v5 = vsel %vm429_vm0, %v3315_v41, 0.0 }
0x1849   :  { %3318 = vadd.xlane.f32.xlu0 %v3317_v5 }
0x184a   :  { %v3316_v43 = vmul.f32 %v3314_v42, %v3314_v42 }
0x184c   :  { %v3320_v6 = vsel %vm1967_vm9, %v3316_v43, 0.0 }
0x184d   :  { %3321 = vadd.xlane.f32.xlu0 %v3320_v6 }
0x18d2   :  { %v3319_v52 = vpop.xlane.xlu0 %3318 }
0x18d3   :  { %v3323_v58 = vmul.f32 0.03125, %v3319_v52 }
0x18d5   :  { %v3325_v61 = vadd.f32 1e-05, %v3323_v58 }
0x18d6   :  { %v3322_v1 = vpop.xlane.xlu0 %3321 }
0x18d7   :  { %13788 = vrsqrt.f32 %v3325_v61  ;;  %v3324_v53 = vmul.f32 0.03125, %v3322_v1 }
0x18d9   :  { %v3326_v3 = vadd.f32 1e-05, %v3324_v53 }
0x18db   :  { %13790 = vrsqrt.f32 %v3326_v3  ;;  %v694_v3 = vld [vmem:[%s16183_s16] sm:$0xff] }
0x18e4   :  { %v13789_v63 = vpop.eup %13788 }
0x18e5   :  { %v3329_v7 = vmul.f32 %v13789_v63, %v3313_v38 }
0x18e7   :  { %v3335_v10 = vmul.f32 %v3334_v2, %v3329_v7 }
0x18e8   :  { %v13791_v11 = vpop.eup %13790 }
0x18e9   :  { %v3330_v15 = vmul.f32 %v13791_v11, %v3314_v42  ;;  %v15081_v9 = vadd.f32 %v3340_v8, %v3335_v10 }
0x18eb   :  { %v3336_v17 = vmul.f32 %v3334_v2, %v3330_v15  ;;  %12964 = vmatprep.mubr.msk.f32.mxu0 %vm429_vm0, %v15081_v9  ;;  %v695_v2 = vld [vmem:[%s16183_s16 + $0x8] sm:$0xff] }
0x18ed   :  { %v15085_v18 = vadd.f32 %v3340_v8, %v3336_v17 }
0x18ef   :  { %12965 = vmatmul.mubr.msk.f32.vlgmr.msra.gmra.mxu0 %vm429_vm0, %v15085_v18 }
0x18f0   :  { %12987 = vmatpush3.msra.mxu0 %v692_v19  ;;  %12994 = vmatprep.mubr.msk.f32.mxu0 %vm14445_vm2, %v14441_v0 }
0x18f1   :  { %12988 = vmatprep.subr.mxu0 %v14441_v0 }
0x18f2   :  { %12989 = vmatpush3.msra.mxu0 %v691_v57 }
0x18f3   :  { %12990 = vmatprep.subr.mxu0 %v14441_v0 }
0x18f4   :  { %12991 = vmatpush3.msra.mxu0 %v690_v62 }
0x18f5   :  { %12992 = vmatprep.subr.mxu0 %v14441_v0 }
0x18f6   :  { %12993 = vmatpush3.msra.mxu0 %v689_v20 }
0x18f7   :  { %12995 = vmatmul.mubr.msk.f32.vlgmr.msra.gmra.mxu0 %vm429_vm0, %v14931_v55  ;;  %12997 = vmatprep.subr.mxu0 %v14441_v0 }
0x18f8   :  { %12999 = vmatprep.mubr.msk.f32.mxu0 %vm14445_vm2, %v14441_v0 }
0x19af   :  { %v12966_v27 = vpop.f32.mrf.mxu0 }
0x19b0   :  { %v3427_v14 = vadd.f32 %v12966_v27, %v12026_v26 }
0x19b1   :  { %v3421_v28 = vpop.f32.mrf.mxu0 }
0x19b2   :  { %v3422_v23 = vadd.f32 %v12026_v26, %v3421_v28  ;;  %v3431_v30 = vmax.f32 %v3427_v14, 0.0 }
0x19b4   :  { %v3430_v29 = vmax.f32 %v3422_v23, 0.0 }
0x19b6   :  { %12983 = vmatprep.mubr.msk.f32.mxu1 %vm469_vm3, %v3430_v29 }
0x19b7   :  { %v3631_v60 = vpop.f32.mrf.mxu0  ;;  %12984 = vmatmul.mubr.msk.f32.vlgmr.msra.gmra.mxu1 %vm469_vm3, %v3431_v30 }
0x19b8   :  { %v15110_v32 = vadd.f32 %v12032_v31, %v3631_v60  ;;  %13004 = vmatprep.mubr.msk.f32.mxu1 %vm14445_vm2, %v14441_v0 }
0x19b9   :  { %v12996_v33 = vpop.f32.mrf.mxu0 }
0x19ba   :  { %3804 = vrot.lane.b32.xlu0 %v15110_v32, %s14446_s26  ;;  %3636 = vrot.lane.b32.xlu1 %v15110_v32, %s14443_s7 }
0x19be   :  { %3802 = vrot.lane.b32.xlu1 %v15110_v32, %s14447_s28 }
0x1a2c   :  { %v3637_v59 = vpop.permute.xlu1 %3636  ;;  %v3805_v34 = vpop.permute.xlu0 %3804 }
0x1a2d   :  { %12998 = vmatpush3.xpose.msk.msra.mxu0 %vm818_vm5, %v3637_v59 }
0x1a2e   :  { %13007 = vmatprep.subr.mxu0 %v14441_v0 }
0x1a30   :  { %13000 = vmatmul.mubr.msk.f32.vlgmr.msra.gmra.mxu0 %vm818_vm5, %v15110_v32  ;;  %v3803_v35 = vpop.permute.xlu1 %3802 }
0x1a31   :  { %13008 = vmatpush3.xpose.msk.msra.mxu0 %vm818_vm5, %v3805_v34  ;;  %13009 = vmatprep.mubr.msk.f32.mxu0 %vm14445_vm2, %v14441_v0 }
0x1a32   :  { %13017 = vmatprep.subr.mxu0 %v14441_v0 }
0x1a34   :  { %13010 = vmatmul.mubr.msk.f32.vlgmr.msra.gmra.mxu0 %vm818_vm5, %v3803_v35 }
0x1a35   :  { %13019 = vmatprep.mubr.msk.f32.mxu0 %vm14445_vm2, %v14441_v0  ;;  %13018 = vmatpush3.msra.mxu0 %v695_v2 }
0x1a36   :  { %13027 = vmatprep.subr.mxu0 %v14441_v0 }
0x1a77   :  { %v15157_v63 = vpop.f32.mrf.mxu1 }
0x1a79   :  { %v3510_v7 = vpop.f32.mrf.mxu1 }
0x1af0   :  { %v3708_v36 = vpop.f32.mrf.mxu0 }
0x1af1   :  { %v3712_v16 = vmul.f32 0.35355338, %v3708_v36  ;;  %v696_v36 = vld [vmem:[%s16183_s16 + $0x10] sm:$0xff] }
0x1af2   :  { %v13001_v12 = vpop.f32.mrf.mxu0 }
0x1af3   :  { %v3714_v24 = vsel %vm3713_vm13, %v3712_v16, -inf  ;;  %v12029_v12 = vld [vmem:[#allocation14] ss:$0 sm:$0xff] }
0x1af4   :  { %3715 = vmax.xlane.f32.xlu1 %v3714_v24  ;;  %v3876_v37 = vpop.f32.mrf.mxu0 }
0x1af5   :  { %v3880_v38 = vmul.f32 0.35355338, %v3876_v37  ;;  %v3511_v37 = vadd.f32 %v12029_v12, %v3510_v7  ;;  %v12054_v7 = vld [vmem:[#allocation17] ss:$0 sm:$0xff] }
0x1af6   :  { %v13011_v39 = vpop.f32.mrf.mxu0 }
0x1af7   :  { %v3881_v40 = vsel %vm3713_vm13, %v3880_v38, -inf }
0x1af8   :  { %3882 = vmax.xlane.f32.xlu0 %v3881_v40 }
0x1b0e   :  { %3892 = vrot.lane.b32.xlu0 %v15110_v32, %s14448_s20 }
0x1b7d   :  { %v3716_v41 = vpop.xlane.xlu1 %3715 }
0x1b7e   :  { %v3717_v42 = vsub.f32 %v3712_v16, %v3716_v41  ;;  %v3516_v41 = vadd.f32 %v15157_v63, %v12029_v12 }
0x1b80   :  { %v3718_v5 = vmul.f32 1.442695, %v3717_v42  ;;  %v3519_v42 = vadd.f32 %v3511_v37, %v15081_v9  ;;  %v697_v9 = vld [vmem:[%s16183_s16 + $0x18] sm:$0xff] }
0x1b81   :  { %v3883_v43 = vpop.xlane.xlu0 %3882 }
0x1b82   :  { %13792 = vpow2.f32 %v3718_v5  ;;  %v3884_v6 = vsub.f32 %v3880_v38, %v3883_v43  ;;  %v3520_v43 = vadd.f32 %v3516_v41, %v15085_v18 }
0x1b84   :  { %v3885_v44 = vmul.f32 1.442695, %v3884_v6  ;;  %v3521_v6 = vsel %vm429_vm0, %v3519_v42, 0.0 }
0x1b85   :  { %v3893_v61 = vpop.permute.xlu0 %3892 }
0x1b86   :  { %13794 = vpow2.f32 %v3885_v44  ;;  %v3524_v44 = vsel %vm1967_vm9, %v3520_v43, 0.0 }
0x1b8f   :  { %v13793_v45 = vpop.eup %13792 }
0x1b90   :  { %v3720_v46 = vsel %vm3713_vm13, %v13793_v45, 0.0 }
0x1b91   :  { %3721 = vadd.xlane.f32.xlu1 %v3720_v46 }
0x1b93   :  { %v13795_v47 = vpop.eup %13794 }
0x1b94   :  { %v3887_v48 = vsel %vm3713_vm13, %v13795_v47, 0.0 }
0x1b95   :  { %3888 = vadd.xlane.f32.xlu1 %v3887_v48 }
0x1ba6   :  { %3725 = vrot.lane.b32.xlu1 %v15110_v32, %s14444_s30 }
0x1baa   :  { %4117 = vrot.lane.b32.xlu1 %v15110_v32, %s14449_s1 }
0x1bae   :  { %4115 = vrot.lane.b32.xlu1 %v15110_v32, %s14450_s8 }
0x1c1a   :  { %v3722_v49 = vpop.xlane.xlu1 %3721 }
0x1c1b   :  { %13796 = vrcp.f32 %v3722_v49 }
0x1c1e   :  { %v3889_v50 = vpop.xlane.xlu1 %3888 }
0x1c1f   :  { %13798 = vrcp.f32 %v3889_v50 }
0x1c22   :  { %v3726_v51 = vpop.permute.xlu1 %3725 }
0x1c23   :  { %13003 = vmatpush3.msk.msra.mxu1 %vm2301_vm12, %v3726_v51 }
0x1c24   :  { %13012 = vmatprep.subr.mxu1 %v14441_v0 }
0x1c26   :  { %v4118_v10 = vpop.permute.xlu1 %4117 }
0x1c28   :  { %v13797_v52 = vpop.eup %13796 }
0x1c29   :  { %v3724_v58 = vmul.f32 %v13797_v52, %v13793_v45 }
0x1c2a   :  { %v4116_v19 = vpop.permute.xlu1 %4115 }
0x1c2b   :  { %13005 = vmatmul.mubr.msk.f32.vlgmr.msra.gmra.mxu1 %vm2269_vm11, %v3724_v58 }
0x1c2c   :  { %v13799_v1 = vpop.eup %13798  ;;  %13013 = vmatpush3.msk.msra.mxu1 %vm2301_vm12, %v3893_v61  ;;  %13014 = vmatprep.mubr.msk.f32.mxu1 %vm14445_vm2, %v14441_v0 }
0x1c2d   :  { %v3891_v53 = vmul.f32 %v13799_v1, %v13795_v47  ;;  %13022 = vmatprep.subr.mxu1 %v14441_v0 }
0x1c2f   :  { %13015 = vmatmul.mubr.msk.f32.vlgmr.msra.gmra.mxu1 %vm2269_vm11, %v3891_v53 }
0x1c30   :  { %13024 = vmatprep.mubr.msk.f32.mxu1 %vm14445_vm2, %v14441_v0  ;;  %13023 = vmatpush3.msra.mxu1 %v694_v3 }
0x1c31   :  { %13032 = vmatprep.subr.mxu1 %v14441_v0 }
0x1ceb   :  { %v3798_v8 = vpop.f32.mrf.mxu1 }
0x1cec   :  { %13025 = vmatmul.mubr.msk.f32.vlgmr.msra.gmra.mxu1 %vm818_vm5, %v3798_v8 }
0x1ced   :  { %v13006_v11 = vpop.f32.mrf.mxu1  ;;  %13034 = vmatprep.mubr.msk.f32.mxu1 %vm14445_vm2, %v14441_v0 }
0x1cef   :  { %v3965_v15 = vpop.f32.mrf.mxu1 }
0x1cf0   :  { %13020 = vmatmul.mubr.msk.f32.vlgmr.msra.gmra.mxu0 %vm818_vm5, %v3965_v15 }
0x1cf1   :  { %13028 = vmatpush3.xpose.msk.msra.mxu0 %vm818_vm5, %v4118_v10  ;;  %v13016_v17 = vpop.f32.mrf.mxu1  ;;  %13029 = vmatprep.mubr.msk.f32.mxu0 %vm14445_vm2, %v14441_v0 }
0x1cf2   :  { %13037 = vmatprep.subr.mxu0 %v14441_v0 }
0x1cf4   :  { %13030 = vmatmul.mubr.msk.f32.vlgmr.msra.gmra.mxu0 %vm818_vm5, %v4116_v19 }
0x1cf5   :  { %13039 = vmatprep.mubr.msk.f32.mxu0 %vm14445_vm2, %v14441_v0  ;;  %13038 = vmatpush3.msra.mxu0 %v696_v36 }
0x1cf6   :  { %13047 = vmatprep.subr.mxu0 %v14441_v0 }
0x1dac   :  { %v4111_v57 = vpop.f32.mrf.mxu1 }
0x1dae   :  { %v13026_v62 = vpop.f32.mrf.mxu1 }
0x1db0   :  { %v4038_v20 = vpop.f32.mrf.mxu0 }
0x1db1   :  { %v15170_v13 = vadd.f32 %v4111_v57, %v4038_v20 }
0x1db2   :  { %v13021_v21 = vpop.f32.mrf.mxu0 }
0x1db4   :  { %v4189_v22 = vpop.f32.mrf.mxu0 }
0x1db5   :  { %v4193_v25 = vmul.f32 0.35355338, %v4189_v22 }
0x1db6   :  { %v13031_v26 = vpop.f32.mrf.mxu0 }
0x1db7   :  { %v4194_v27 = vsel %vm3713_vm13, %v4193_v25, -inf  ;;  %v702_v26 = vld [vmem:[%s16184_s22 + $0x18] sm:$0xff] }
0x1db8   :  { %4195 = vmax.xlane.f32.xlu0 %v4194_v27  ;;  %v700_v27 = vld [vmem:[%s16184_s22 + $0x8] sm:$0xff] }
0x1dce   :  { %4205 = vrot.lane.b32.xlu0 %v15110_v32, %s14453_s25 }
0x1dd2   :  { %4356 = vrot.lane.b32.xlu0 %v15110_v32, %s14452_s29 }
0x1e41   :  { %v4196_v14 = vpop.xlane.xlu0 %4195 }
0x1e42   :  { %v4197_v28 = vsub.f32 %v4193_v25, %v4196_v14  ;;  %v701_v14 = vld [vmem:[%s16184_s22 + $0x10] sm:$0xff] }
0x1e44   :  { %v4198_v23 = vmul.f32 1.442695, %v4197_v28 }
0x1e45   :  { %v4206_v29 = vpop.permute.xlu0 %4205 }
0x1e46   :  { %13800 = vpow2.f32 %v4198_v23  ;;  %13033 = vmatpush3.msk.msra.mxu1 %vm2301_vm12, %v4206_v29 }
0x1e47   :  { %13042 = vmatprep.subr.mxu1 %v14441_v0 }
0x1e49   :  { %v4357_v35 = vpop.permute.xlu0 %4356 }
0x1e53   :  { %v13801_v30 = vpop.eup %13800 }
0x1e54   :  { %v4200_v31 = vsel %vm3713_vm13, %v13801_v30, 0.0 }
0x1e55   :  { %4201 = vadd.xlane.f32.xlu1 %v4200_v31 }
0x1e66   :  { %4358 = vrot.lane.b32.xlu1 %v15110_v32, %s14451_s2 }
0x1ede   :  { %v4202_v60 = vpop.xlane.xlu1 %4201 }
0x1edf   :  { %13802 = vrcp.f32 %v4202_v60 }
0x1ee2   :  { %v4359_v34 = vpop.permute.xlu1 %4358 }
0x1eec   :  { %v13803_v33 = vpop.eup %13802 }
0x1eed   :  { %v4204_v59 = vmul.f32 %v13803_v33, %v13801_v30 }
0x1eef   :  { %13035 = vmatmul.mubr.msk.f32.vlgmr.msra.gmra.mxu1 %vm2269_vm11, %v4204_v59 }
0x1ef0   :  { %13043 = vmatpush3.xpose.msk.msra.mxu1 %vm818_vm5, %v4359_v34  ;;  %13044 = vmatprep.mubr.msk.f32.mxu1 %vm14445_vm2, %v14441_v0 }
0x1ef1   :  { %13052 = vmatprep.subr.mxu1 %v14441_v0 }
0x1ef3   :  { %13045 = vmatmul.mubr.msk.f32.vlgmr.msra.gmra.mxu1 %vm818_vm5, %v4357_v35 }
0x1ef4   :  { %13054 = vmatprep.mubr.msk.f32.mxu1 %vm14445_vm2, %v14441_v0  ;;  %13053 = vmatpush3.msra.mxu1 %v697_v9 }
0x1faf   :  { %v4278_v16 = vpop.f32.mrf.mxu1 }
0x1fb0   :  { %13040 = vmatmul.mubr.msk.f32.vlgmr.msra.gmra.mxu0 %vm818_vm5, %v4278_v16  ;;  %v15229_v16 = vsub.s32 2, %v14928_v54 }
0x1fb1   :  { %v13036_v24 = vpop.f32.mrf.mxu1  ;;  %13049 = vmatprep.mubr.msk.f32.mxu0 %vm14445_vm2, %v14441_v0 }
0x1fb2   :  { %v13948_v24 = vld [vmem:[%s16177_s6] sm:$0x7] }
0x1fb3   :  { %v4430_v38 = vpop.f32.mrf.mxu1  ;;  %v3550_v37 = vrot.slane %v13948_v24, %v15229_v16 }
0x1fb4   :  { %v4434_v39 = vmul.f32 0.35355338, %v4430_v38 }
0x1fb5   :  { %v13046_v40 = vpop.f32.mrf.mxu1 }
0x1fb6   :  { %v4435_v5 = vsel %vm3713_vm13, %v4434_v39, -inf  ;;  %v13949_v40 = vld [vmem:[%s16178_s11] sm:$0x7] }
0x1fb7   :  { %4436 = vmax.xlane.f32.xlu1 %v4435_v5  ;;  %v3556_v41 = vrot.slane %v13949_v40, %v15229_v16 }
0x1fbb   :  { %3522 = vadd.xlane.f32.xlu1 %v3521_v6 }
0x1fbf   :  { %3525 = vadd.xlane.f32.xlu1 %v3524_v44 }
0x2040   :  { %v4437_v45 = vpop.xlane.xlu1 %4436 }
0x2041   :  { %v4438_v46 = vsub.f32 %v4434_v39, %v4437_v45  ;;  %v12055_v45 = vld [vmem:[#allocation19] ss:$0 sm:$0xff] }
0x2043   :  { %v4439_v47 = vmul.f32 1.442695, %v4438_v46 }
0x2044   :  { %v3523_v3 = vpop.xlane.xlu1 %3522 }
0x2045   :  { %13804 = vpow2.f32 %v4439_v47  ;;  %v3527_v2 = vmul.f32 0.03125, %v3523_v3 }
0x2047   :  { %v3529_v15 = vsub.f32 %v3519_v42, %v3527_v2 }
0x2048   :  { %v3526_v63 = vpop.xlane.xlu1 %3525 }
0x2049   :  { %v3528_v17 = vmul.f32 0.03125, %v3526_v63 }
0x204b   :  { %v3530_v62 = vsub.f32 %v3520_v43, %v3528_v17 }
0x204d   :  { %v3532_v22 = vmul.f32 %v3530_v62, %v3530_v62 }
0x204f   :  { %v3536_v25 = vsel %vm1967_vm9, %v3532_v22, 0.0 }
0x2052   :  { %v13805_v48 = vpop.eup %13804 }
0x2053   :  { %v4441_v49 = vsel %vm3713_vm13, %v13805_v48, 0.0 }
0x2054   :  { %4442 = vadd.xlane.f32.xlu0 %v4441_v49 }
0x206a   :  { %4446 = vrot.lane.b32.xlu0 %v15110_v32, %s14454_s10 }
0x206e   :  { %4718 = vrot.lane.b32.xlu0 %v702_v26, %s14443_s7 }
0x2070   :  { %v4351_v18 = vpop.f32.mrf.mxu0 }
0x2071   :  { %v4355_v50 = vadd.f32 %v4351_v18, %v15170_v13  ;;  %v3531_v13 = vmul.f32 %v3529_v15, %v3529_v15 }
0x2072   :  { %v13041_v51 = vpop.f32.mrf.mxu0  ;;  %4714 = vrot.lane.b32.xlu0 %v700_v27, %s14443_s7 }
0x2073   :  { %v3533_v21 = vsel %vm429_vm0, %v3531_v13, 0.0  ;;  %v15252_v51 = vld [vmem:[%s16186_s4] sm:$0x7] }
0x20dd   :  { %v4443_v52 = vpop.xlane.xlu0 %4442 }
0x20de   :  { %13806 = vrcp.f32 %v4443_v52 }
0x20e1   :  { %v4447_v58 = vpop.permute.xlu0 %4446 }
0x20e2   :  { %13048 = vmatpush3.msk.msra.mxu0 %vm2301_vm12, %v4447_v58 }
0x20e3   :  { %13057 = vmatprep.subr.mxu0 %v14441_v0 }
0x20e5   :  { %v4719_v12 = vpop.permute.xlu0 %4718 }
0x20e6   :  { %13068 = vmatprep.subr.mxu1 %v4719_v12 }
0x20e9   :  { %v4715_v47 = vpop.permute.xlu0 %4714 }
0x20eb   :  { %v13807_v61 = vpop.eup %13806 }
0x20ec   :  { %v4445_v1 = vmul.f32 %v13807_v61, %v13805_v48 }
0x20ee   :  { %13050 = vmatmul.mubr.msk.f32.vlgmr.msra.gmra.mxu0 %vm2269_vm11, %v4445_v1  ;;  %v4627_v1 = vrot.slane %v15252_v51, %v14937_v56 }
0x20ef   :  { %13065 = vmatprep.mubr.msk.f32.mxu0 %vm14445_vm2, %v14441_v0  ;;  %13058 = vmatpush3.msra.mxu0 %v702_v26 }
0x20f0   :  { %13059 = vmatprep.subr.mxu0 %v14441_v0 }
0x20f1   :  { %13060 = vmatpush3.msra.mxu0 %v701_v14 }
0x20f2   :  { %13061 = vmatprep.subr.mxu0 %v14441_v0 }
0x20f3   :  { %13062 = vmatpush3.msra.mxu0 %v700_v27 }
0x20f4   :  { %13063 = vmatprep.subr.mxu0 %v14441_v0 }
0x21ae   :  { %v4519_v32 = vpop.f32.mrf.mxu0 }
0x21af   :  { %13055 = vmatmul.mubr.msk.f32.vlgmr.msra.gmra.mxu1 %vm818_vm5, %v4519_v32 }
0x21b0   :  { %v13051_v53 = vpop.f32.mrf.mxu0  ;;  %13069 = vmatpush3.msra.mxu1 %v4719_v12 }
0x226f   :  { %v4592_v8 = vpop.f32.mrf.mxu1 }
0x2270   :  { %v4596_v10 = vadd.f32 %v4592_v8, %v4355_v50  ;;  %v15249_v50 = vld [vmem:[%s16185_s18] sm:$0x7] }
0x2271   :  { %v13056_v11 = vpop.f32.mrf.mxu1  ;;  %v4622_v52 = vrot.slane %v15249_v50, %v14937_v56 }
0x2272   :  { %v4603_v19 = vadd.f32 %v12054_v7, %v4596_v10 }
0x2274   :  { %v4604_v57 = vadd.f32 %v4603_v19, %v14931_v55  ;;  %v699_v55 = vld [vmem:[%s16184_s22] sm:$0xff] }
0x2275   :  { %13064 = vmatpush3.msra.mxu0 %v699_v55  ;;  %4712 = vrot.lane.b32.xlu0 %v699_v55, %s14443_s7 }
0x2276   :  { %v4606_v20 = vsel %vm4605_vm14, %v4604_v57, 0.0  ;;  %13079 = vmatprep.subr.mxu0 %v14441_v0 }
0x2277   :  { %4607 = vadd.xlane.f32.xlu1 %v4606_v20 }
0x2279   :  { %4724 = vrot.lane.b32.xlu0 %v12055_v45, %s14443_s7 }
0x227b   :  { %3534 = vadd.xlane.f32.xlu1 %v3533_v21 }
0x227f   :  { %3537 = vadd.xlane.f32.xlu1 %v3536_v25 }
0x22e7   :  { %v4713_v18 = vpop.permute.xlu0 %4712 }
0x22eb   :  { %v4725_v3 = vpop.permute.xlu0 %4724 }
0x2300   :  { %v4608_v28 = vpop.xlane.xlu1 %4607 }
0x2301   :  { %v4609_v23 = vmul.f32 0.03125, %v4608_v28 }
0x2303   :  { %v4610_v29 = vsub.f32 %v4604_v57, %v4609_v23 }
0x2304   :  { %v3535_v30 = vpop.xlane.xlu1 %3534 }
0x2305   :  { %v3539_v31 = vmul.f32 0.03125, %v3535_v30  ;;  %v4611_v60 = vmul.f32 %v4610_v29, %v4610_v29 }
0x2307   :  { %v3541_v33 = vadd.f32 1e-05, %v3539_v31  ;;  %v4612_v59 = vsel %vm4605_vm14, %v4611_v60, 0.0  ;;  %v704_v31 = vld [vmem:[%s16187_s9] sm:$0xff] }
0x2308   :  { %4613 = vadd.xlane.f32.xlu1 %v4612_v59  ;;  %v3538_v34 = vpop.xlane.xlu1 %3537 }
0x2309   :  { %13808 = vrsqrt.f32 %v3541_v33  ;;  %v3540_v35 = vmul.f32 0.03125, %v3538_v34 }
0x230b   :  { %v3542_v36 = vadd.f32 1e-05, %v3540_v35 }
0x230d   :  { %13810 = vrsqrt.f32 %v3542_v36 }
0x2316   :  { %v13809_v38 = vpop.eup %13808 }
0x2317   :  { %v3545_v39 = vmul.f32 %v13809_v38, %v3529_v15 }
0x2319   :  { %v3551_v42 = vmul.f32 %v3550_v37, %v3545_v39  ;;  %4716 = vrot.lane.b32.xlu1 %v701_v14, %s14443_s7 }
0x231a   :  { %v13811_v5 = vpop.eup %13810 }
0x231b   :  { %v3546_v43 = vmul.f32 %v13811_v5, %v3530_v62  ;;  %v15236_v6 = vadd.f32 %v3556_v41, %v3551_v42 }
0x231d   :  { %v3552_v54 = vmul.f32 %v3550_v37, %v3546_v43  ;;  %13076 = vmatprep.mubr.msk.f32.mxu1 %vm429_vm0, %v15236_v6 }
0x231f   :  { %v15240_v44 = vadd.f32 %v3556_v41, %v3552_v54 }
0x2391   :  { %v4614_v46 = vpop.xlane.xlu1 %4613 }
0x2392   :  { %v4615_v48 = vmul.f32 0.03125, %v4614_v46  ;;  %v705_v46 = vld [vmem:[%s16187_s9 + $0x8] sm:$0xff] }
0x2394   :  { %v4616_v49 = vadd.f32 1e-05, %v4615_v48 }
0x2395   :  { %v4717_v9 = vpop.permute.xlu1 %4716 }
0x2396   :  { %13812 = vrsqrt.f32 %v4616_v49  ;;  %13070 = vmatprep.subr.mxu1 %v4717_v9 }
0x2397   :  { %13071 = vmatpush3.msra.mxu1 %v4717_v9 }
0x2398   :  { %13072 = vmatprep.subr.mxu1 %v4715_v47 }
0x2399   :  { %13073 = vmatpush3.msra.mxu1 %v4715_v47 }
0x239a   :  { %13074 = vmatprep.subr.mxu1 %v4713_v18 }
0x239b   :  { %13075 = vmatpush3.msra.mxu1 %v4713_v18 }
0x239c   :  { %13077 = vmatmul.mubr.msk.f32.vlgmr.msra.gmra.mxu1 %vm429_vm0, %v15240_v44  ;;  %13086 = vmatprep.subr.mxu1 %v14441_v0 }
0x239d   :  { %13090 = vmatprep.mubr.msk.f32.mxu1 %vm14445_vm2, %v14441_v0 }
0x23a3   :  { %v13813_v58 = vpop.eup %13812 }
0x23a4   :  { %v4618_v61 = vmul.f32 %v13813_v58, %v4610_v29 }
0x23a6   :  { %v4623_v32 = vmul.f32 %v4622_v52, %v4618_v61 }
0x23a8   :  { %v15258_v53 = vadd.f32 %v4627_v1, %v4623_v32 }
0x23aa   :  { %13066 = vmatmul.mubr.msk.f32.vlgmr.msra.gmra.mxu0 %vm429_vm0, %v15258_v53 }
0x23ab   :  { %13083 = vmatprep.mubr.msk.f32.mxu0 %vm14445_vm2, %v14441_v0 }
0x245c   :  { %v13078_v2 = vpop.f32.mrf.mxu1 }
0x245d   :  { %v15264_v63 = vadd.f32 %v13078_v2, %v4725_v3 }
0x245e   :  { %v4799_v7 = vpop.f32.mrf.mxu1 }
0x245f   :  { %v15266_v8 = vadd.f32 %v4799_v7, %v4725_v3  ;;  %13080 = vmatpush3.xpose.msk.msra.mxu0 %vm818_vm5, %v15264_v63 }
0x2460   :  { %13081 = vmatprep.subr.mxu0 %v14441_v0 }
0x2461   :  { %4900 = vrot.lane.b32.xlu1 %v15266_v8, %s14443_s7 }
0x2463   :  { %13082 = vmatpush3.xpose.msk.msra.mxu0 %vm818_vm5, %v15266_v8 }
0x2464   :  { %13100 = vmatprep.subr.mxu0 %v14441_v0 }
0x246a   :  { %v4704_v10 = vpop.f32.mrf.mxu0 }
0x246b   :  { %v15276_v11 = vadd.f32 %v12055_v45, %v4704_v10 }
0x246c   :  { %v13067_v15 = vpop.f32.mrf.mxu0 }
0x246d   :  { %13084 = vmatmul.mubr.msk.f32.vlgmr.msra.gmra.mxu0 %vm818_vm5, %v15276_v11 }
0x246e   :  { %13104 = vmatprep.mubr.msk.f32.mxu0 %vm14445_vm2, %v14441_v0 }
0x24d3   :  { %v4901_v25 = vpop.permute.xlu1 %4900 }
0x252d   :  { %v4883_v17 = vpop.f32.mrf.mxu0 }
0x252e   :  { %v4887_v19 = vmul.f32 0.35355338, %v4883_v17 }
0x252f   :  { %v13085_v57 = vpop.f32.mrf.mxu0 }
0x2530   :  { %v4889_v62 = vsel %vm4888_vm15, %v4887_v19, -inf }
0x2531   :  { %4890 = vmax.xlane.f32.xlu0 %v4889_v62 }
0x2547   :  { %4902 = vrot.lane.b32.xlu0 %v15264_v63, %s14443_s7 }
0x254b   :  { %4984 = vrot.lane.b32.xlu0 %v15264_v63, %s14447_s28 }
0x254f   :  { %4982 = vrot.lane.b32.xlu0 %v15266_v8, %s14447_s28 }
0x25ba   :  { %v4891_v20 = vpop.xlane.xlu0 %4890 }
0x25bb   :  { %v4892_v13 = vsub.f32 %v4887_v19, %v4891_v20 }
0x25bd   :  { %v4893_v21 = vmul.f32 1.442695, %v4892_v13 }
0x25be   :  { %v4903_v22 = vpop.permute.xlu0 %4902 }
0x25bf   :  { %13814 = vpow2.f32 %v4893_v21  ;;  %13087 = vmatpush3.msk.msra.mxu1 %vm939_vm8, %v4903_v22 }
0x25c0   :  { %13088 = vmatprep.subr.mxu1 %v14441_v0 }
0x25c1   :  { %13089 = vmatpush3.msra.mxu1 %v4901_v25 }
0x25c2   :  { %13093 = vmatprep.subr.mxu1 %v14441_v0  ;;  %v4985_v28 = vpop.permute.xlu0 %4984 }
0x25c6   :  { %v4983_v29 = vpop.permute.xlu0 %4982 }
0x25cc   :  { %v13815_v26 = vpop.eup %13814 }
0x25cd   :  { %v4895_v27 = vsel %vm4888_vm15, %v13815_v26, 0.0 }
0x25ce   :  { %4896 = vadd.xlane.f32.xlu1 %v4895_v27 }
0x25df   :  { %4980 = vrot.lane.b32.xlu1 %v15276_v11, %s14447_s28 }
0x2657   :  { %v4897_v14 = vpop.xlane.xlu1 %4896 }
0x2658   :  { %13816 = vrcp.f32 %v4897_v14 }
0x265b   :  { %v4981_v30 = vpop.permute.xlu1 %4980 }
0x2665   :  { %v13817_v55 = vpop.eup %13816 }
0x2666   :  { %v4899_v23 = vmul.f32 %v13817_v55, %v13815_v26 }
0x2668   :  { %13091 = vmatmul.mubr.msk.f32.vlgmr.msra.gmra.mxu1 %vm904_vm7, %v4899_v23 }
0x2669   :  { %13094 = vmatpush3.xpose.msk.msra.mxu1 %vm818_vm5, %v4985_v28  ;;  %13097 = vmatprep.mubr.msk.f32.mxu1 %vm14445_vm2, %v14441_v0 }
0x266a   :  { %13095 = vmatprep.subr.mxu1 %v14441_v0 }
0x266d   :  { %13096 = vmatpush3.xpose.msk.msra.mxu1 %vm818_vm5, %v4983_v29 }
0x266e   :  { %13112 = vmatprep.subr.mxu1 %v14441_v0 }
0x2670   :  { %13098 = vmatmul.mubr.msk.f32.vlgmr.msra.gmra.mxu1 %vm818_vm5, %v4981_v30  ;;  %v706_v30 = vld [vmem:[%s16187_s9 + $0x10] sm:$0xff] }
0x2671   :  { %13114 = vmatprep.mubr.msk.f32.mxu1 %vm14445_vm2, %v14441_v0  ;;  %13113 = vmatpush3.msra.mxu1 %v704_v31 }
0x2672   :  { %13124 = vmatprep.subr.mxu1 %v14441_v0 }
0x2728   :  { %v4976_v60 = vpop.f32.mrf.mxu1 }
0x2729   :  { %13115 = vmatmul.mubr.msk.f32.vlgmr.msra.gmra.mxu1 %vm818_vm5, %v4976_v60 }
0x272a   :  { %v13092_v33 = vpop.f32.mrf.mxu1  ;;  %13128 = vmatprep.mubr.msk.f32.mxu1 %vm14445_vm2, %v14441_v0 }
0x2730   :  { %v5058_v59 = vpop.f32.mrf.mxu1 }
0x2731   :  { %v5062_v34 = vmul.f32 0.35355338, %v5058_v59 }
0x2732   :  { %v13099_v35 = vpop.f32.mrf.mxu1 }
0x2733   :  { %v5063_v36 = vsel %vm4888_vm15, %v5062_v34, -inf }
0x2734   :  { %5064 = vmax.xlane.f32.xlu0 %v5063_v36  ;;  %v707_v36 = vld [vmem:[%s16187_s9 + $0x18] sm:$0xff] }
0x274a   :  { %5076 = vrot.lane.b32.xlu0 %v15264_v63, %s14446_s26 }
0x274e   :  { %5304 = vrot.lane.b32.xlu0 %v15264_v63, %s14450_s8 }
0x2752   :  { %5300 = vrot.lane.b32.xlu0 %v15276_v11, %s14450_s8 }
0x2756   :  { %5550 = vrot.lane.b32.xlu0 %v15266_v8, %s14452_s29 }
0x27bd   :  { %v5065_v12 = vpop.xlane.xlu0 %5064 }
0x27be   :  { %v5066_v24 = vsub.f32 %v5062_v34, %v5065_v12 }
0x27c0   :  { %v5067_v37 = vmul.f32 1.442695, %v5066_v24 }
0x27c1   :  { %v5077_v38 = vpop.permute.xlu0 %5076 }
0x27c2   :  { %13818 = vpow2.f32 %v5067_v37  ;;  %13101 = vmatpush3.msk.msra.mxu0 %vm939_vm8, %v5077_v38 }
0x27c3   :  { %13102 = vmatprep.subr.mxu0 %v14441_v0 }
0x27c5   :  { %v5305_v48 = vpop.permute.xlu0 %5304 }
0x27c9   :  { %v5301_v18 = vpop.permute.xlu0 %5300 }
0x27cd   :  { %v5551_v58 = vpop.permute.xlu0 %5550 }
0x27cf   :  { %v13819_v39 = vpop.eup %13818 }
0x27d0   :  { %v5069_v40 = vsel %vm4888_vm15, %v13819_v39, 0.0 }
0x27d1   :  { %5070 = vadd.xlane.f32.xlu1 %v5069_v40 }
0x27e2   :  { %5074 = vrot.lane.b32.xlu1 %v15266_v8, %s14446_s26 }
0x27e6   :  { %5302 = vrot.lane.b32.xlu1 %v15266_v8, %s14450_s8 }
0x27e9   :  { %v15326_v41 = vpop.f32.mrf.mxu1 }
0x27ea   :  { %5552 = vrot.lane.b32.xlu1 %v15264_v63, %s14452_s29 }
0x27eb   :  { %v13116_v42 = vpop.f32.mrf.mxu1 }
0x27ec   :  { %v12083_v42 = vld [vmem:[#allocation20] ss:$0 sm:$0xff] }
0x27ee   :  { %5548 = vrot.lane.b32.xlu1 %v15276_v11, %s14452_s29 }
0x285a   :  { %v5071_v5 = vpop.xlane.xlu1 %5070 }
0x285b   :  { %13820 = vrcp.f32 %v5071_v5 }
0x285e   :  { %v5075_v43 = vpop.permute.xlu1 %5074 }
0x285f   :  { %13103 = vmatpush3.msra.mxu0 %v5075_v43 }
0x2860   :  { %13107 = vmatprep.subr.mxu0 %v14441_v0 }
0x2862   :  { %v5303_v9 = vpop.permute.xlu1 %5302 }
0x2866   :  { %v5553_v52 = vpop.permute.xlu1 %5552 }
0x2868   :  { %v13821_v54 = vpop.eup %13820 }
0x2869   :  { %v5073_v45 = vmul.f32 %v13821_v54, %v13819_v39 }
0x286a   :  { %v5549_v61 = vpop.permute.xlu1 %5548 }
0x286b   :  { %13105 = vmatmul.mubr.msk.f32.vlgmr.msra.gmra.mxu0 %vm904_vm7, %v5073_v45 }
0x286c   :  { %13108 = vmatpush3.msra.mxu0 %v705_v46  ;;  %13109 = vmatprep.mubr.msk.f32.mxu0 %vm14445_vm2, %v14441_v0 }
0x286d   :  { %13117 = vmatprep.subr.mxu0 %v14441_v0 }
0x292b   :  { %v5150_v47 = vpop.f32.mrf.mxu0 }
0x292c   :  { %13110 = vmatmul.mubr.msk.f32.vlgmr.msra.gmra.mxu0 %vm818_vm5, %v5150_v47 }
0x292d   :  { %13118 = vmatpush3.xpose.msk.msra.mxu0 %vm818_vm5, %v5305_v48  ;;  %v13106_v49 = vpop.f32.mrf.mxu0  ;;  %13121 = vmatprep.mubr.msk.f32.mxu0 %vm14445_vm2, %v14441_v0 }
0x292e   :  { %13119 = vmatprep.subr.mxu0 %v14441_v0 }
0x2931   :  { %13120 = vmatpush3.xpose.msk.msra.mxu0 %vm818_vm5, %v5303_v9 }
0x2932   :  { %13136 = vmatprep.subr.mxu0 %v14441_v0 }
0x2934   :  { %13122 = vmatmul.mubr.msk.f32.vlgmr.msra.gmra.mxu0 %vm818_vm5, %v5301_v18 }
0x2935   :  { %13137 = vmatpush3.xpose.msk.msra.mxu0 %vm818_vm5, %v5553_v52  ;;  %13140 = vmatprep.mubr.msk.f32.mxu0 %vm14445_vm2, %v14441_v0  ;;  %v712_v52 = vld [vmem:[%s16188_s17 + $0x18] sm:$0xff] }
0x2936   :  { %13138 = vmatprep.subr.mxu0 %v14441_v0 }
0x2939   :  { %13139 = vmatpush3.xpose.msk.msra.mxu0 %vm818_vm5, %v5551_v58  ;;  %v711_v58 = vld [vmem:[%s16188_s17 + $0x10] sm:$0xff] }
0x293a   :  { %13155 = vmatprep.subr.mxu0 %v14441_v0 }
0x293c   :  { %13141 = vmatmul.mubr.msk.f32.vlgmr.msra.gmra.mxu0 %vm818_vm5, %v5549_v61  ;;  %v709_v61 = vld [vmem:[%s16188_s17] sm:$0xff] }
0x293d   :  { %13163 = vmatprep.mubr.msk.f32.mxu0 %vm14445_vm2, %v14441_v0  ;;  %13156 = vmatpush3.msra.mxu0 %v712_v52 }
0x293e   :  { %13157 = vmatprep.subr.mxu0 %v14441_v0 }
0x293f   :  { %13158 = vmatpush3.msra.mxu0 %v711_v58 }
0x2940   :  { %13159 = vmatprep.subr.mxu0 %v14441_v0 }
0x29ec   :  { %v15355_v1 = vpop.f32.mrf.mxu0 }
0x29ed   :  { %v5297_v12 = vadd.f32 %v15326_v41, %v15355_v1  ;;  %v12091_v1 = vld [vmem:[%s16172_s3 + $0x38] sm:$0xff] }
0x29ee   :  { %v13111_v32 = vpop.f32.mrf.mxu0 }
0x29ef   :  { %v721_v32 = vld [vmem:[%s16189_s12 + $0x38] sm:$0xff] }
0x29f4   :  { %v5378_v3 = vpop.f32.mrf.mxu0 }
0x29f5   :  { %v5382_v2 = vmul.f32 0.35355338, %v5378_v3  ;;  %v720_v3 = vld [vmem:[%s16189_s12 + $0x30] sm:$0xff] }
0x29f6   :  { %v13123_v7 = vpop.f32.mrf.mxu0 }
0x29f7   :  { %v5383_v10 = vsel %vm4888_vm15, %v5382_v2, -inf  ;;  %v718_v7 = vld [vmem:[%s16189_s12 + $0x20] sm:$0xff] }
0x29f8   :  { %5384 = vmax.xlane.f32.xlu0 %v5383_v10  ;;  %v717_v10 = vld [vmem:[%s16189_s12 + $0x18] sm:$0xff] }
0x29fc   :  { %v5626_v11 = vpop.f32.mrf.mxu0 }
0x29fd   :  { %v5630_v17 = vmul.f32 0.35355338, %v5626_v11 }
0x29fe   :  { %v13142_v15 = vpop.f32.mrf.mxu0 }
0x29ff   :  { %v5631_v19 = vsel %vm4888_vm15, %v5630_v17, -inf }
0x2a0e   :  { %5396 = vrot.lane.b32.xlu0 %v15264_v63, %s14449_s1 }
0x2a2d   :  { %5632 = vmax.xlane.f32.xlu0 %v5631_v19  ;;  %v5820_v19 = vrot.slane %v15249_v50, %v15075_v4  ;;  %v12089_v50 = vld [vmem:[%s16172_s3 + $0x28] sm:$0xff] }
0x2a43   :  { %5644 = vrot.lane.b32.xlu0 %v15264_v63, %s14451_s2 }
0x2a81   :  { %v5385_v57 = vpop.xlane.xlu0 %5384 }
0x2a82   :  { %v5386_v62 = vsub.f32 %v5382_v2, %v5385_v57  ;;  %v719_v2 = vld [vmem:[%s16189_s12 + $0x28] sm:$0xff] }
0x2a84   :  { %v5387_v20 = vmul.f32 1.442695, %v5386_v62 }
0x2a85   :  { %v5397_v13 = vpop.permute.xlu0 %5396 }
0x2a86   :  { %13822 = vpow2.f32 %v5387_v20  ;;  %13125 = vmatpush3.msk.msra.mxu1 %vm939_vm8, %v5397_v13  ;;  %v5825_v20 = vrot.slane %v15252_v51, %v15075_v4  ;;  %v716_v51 = vld [vmem:[%s16189_s12 + $0x10] sm:$0xff] }
0x2a87   :  { %13126 = vmatprep.subr.mxu1 %v14441_v0 }
0x2a93   :  { %v13823_v21 = vpop.eup %13822 }
0x2a94   :  { %v5389_v22 = vsel %vm4888_vm15, %v13823_v21, 0.0 }
0x2a95   :  { %5390 = vadd.xlane.f32.xlu1 %v5389_v22  ;;  %v12090_v22 = vld [vmem:[%s16172_s3 + $0x30] sm:$0xff] }
0x2aa6   :  { %5394 = vrot.lane.b32.xlu1 %v15266_v8, %s14449_s1 }
0x2ab6   :  { %v5633_v25 = vpop.xlane.xlu0 %5632 }
0x2ab7   :  { %v5634_v26 = vsub.f32 %v5630_v17, %v5633_v25  ;;  %v12088_v25 = vld [vmem:[%s16172_s3 + $0x20] sm:$0xff] }
0x2ab9   :  { %v5635_v63 = vmul.f32 1.442695, %v5634_v26  ;;  %v715_v26 = vld [vmem:[%s16189_s12 + $0x8] sm:$0xff] }
0x2aba   :  { %v5645_v33 = vpop.permute.xlu0 %5644 }
0x2abb   :  { %13824 = vpow2.f32 %v5635_v63  ;;  %v714_v63 = vld [vmem:[%s16189_s12] sm:$0xff] }
0x2ac8   :  { %v13825_v27 = vpop.eup %13824 }
0x2ac9   :  { %v5637_v14 = vsel %vm4888_vm15, %v13825_v27, 0.0 }
0x2aca   :  { %5638 = vadd.xlane.f32.xlu1 %v5637_v14 }
0x2adb   :  { %5642 = vrot.lane.b32.xlu1 %v15266_v8, %s14451_s2 }
0x2b1e   :  { %v5391_v55 = vpop.xlane.xlu1 %5390 }
0x2b1f   :  { %13826 = vrcp.f32 %v5391_v55 }
0x2b22   :  { %v5395_v28 = vpop.permute.xlu1 %5394 }
0x2b23   :  { %13127 = vmatpush3.msra.mxu1 %v5395_v28 }
0x2b24   :  { %13131 = vmatprep.subr.mxu1 %v14441_v0 }
0x2b2c   :  { %v13827_v23 = vpop.eup %13826 }
0x2b2d   :  { %v5393_v29 = vmul.f32 %v13827_v23, %v13823_v21 }
0x2b2f   :  { %13129 = vmatmul.mubr.msk.f32.vlgmr.msra.gmra.mxu1 %vm904_vm7, %v5393_v29  ;;  %v12148_v29 = vld [vmem:[#allocation7 + $0x1] ss:$0 sm:$0xff] }
0x2b30   :  { %13132 = vmatpush3.msra.mxu1 %v706_v30  ;;  %13133 = vmatprep.mubr.msk.f32.mxu1 %vm14445_vm2, %v14441_v0 }
0x2b31   :  { %13143 = vmatprep.subr.mxu1 %v14441_v0 }
0x2b53   :  { %v5639_v31 = vpop.xlane.xlu1 %5638 }
0x2b54   :  { %13828 = vrcp.f32 %v5639_v31 }
0x2b57   :  { %v5643_v34 = vpop.permute.xlu1 %5642 }
0x2b61   :  { %v13829_v8 = vpop.eup %13828 }
0x2b62   :  { %v5641_v35 = vmul.f32 %v13829_v8, %v13825_v27  ;;  %v12084_v27 = vld [vmem:[#allocation22] ss:$0 sm:$0xff] }
0x2bef   :  { %v5470_v60 = vpop.f32.mrf.mxu1 }
0x2bf0   :  { %13134 = vmatmul.mubr.msk.f32.vlgmr.msra.gmra.mxu1 %vm818_vm5, %v5470_v60 }
0x2bf1   :  { %13144 = vmatpush3.msk.msra.mxu1 %vm939_vm8, %v5645_v33  ;;  %v13130_v59 = vpop.f32.mrf.mxu1  ;;  %13147 = vmatprep.mubr.msk.f32.mxu1 %vm14445_vm2, %v14441_v0 }
0x2bf2   :  { %13145 = vmatprep.subr.mxu1 %v14441_v0 }
0x2bf3   :  { %13146 = vmatpush3.msra.mxu1 %v5643_v34 }
0x2bf4   :  { %13148 = vmatmul.mubr.msk.f32.vlgmr.msra.gmra.mxu1 %vm904_vm7, %v5641_v35  ;;  %13150 = vmatprep.subr.mxu1 %v14441_v0 }
0x2bf5   :  { %13152 = vmatprep.mubr.msk.f32.mxu1 %vm14445_vm2, %v14441_v0  ;;  %13151 = vmatpush3.msra.mxu1 %v707_v36 }
0x2bf6   :  { %13166 = vmatprep.subr.mxu1 %v14441_v0 }
0x2cb0   :  { %v5543_v24 = vpop.f32.mrf.mxu1 }
0x2cb1   :  { %v5547_v37 = vadd.f32 %v5543_v24, %v5297_v12 }
0x2cb2   :  { %v13135_v38 = vpop.f32.mrf.mxu1 }
0x2cb4   :  { %v5718_v39 = vpop.f32.mrf.mxu1 }
0x2cb5   :  { %13153 = vmatmul.mubr.msk.f32.vlgmr.msra.gmra.mxu1 %vm818_vm5, %v5718_v39 }
0x2cb6   :  { %v13149_v40 = vpop.f32.mrf.mxu1  ;;  %13182 = vmatprep.mubr.msk.f32.mxu1 %vm14445_vm2, %v14441_v0  ;;  %13167 = vmatpush3.msra.mxu1 %v721_v32 }
0x2cb7   :  { %13168 = vmatprep.subr.mxu1 %v14441_v0 }
0x2cb8   :  { %13169 = vmatpush3.msra.mxu1 %v720_v3 }
0x2cb9   :  { %13170 = vmatprep.subr.mxu1 %v14441_v0 }
0x2cba   :  { %13171 = vmatpush3.msra.mxu1 %v719_v2 }
0x2cbb   :  { %13172 = vmatprep.subr.mxu1 %v14441_v0 }
0x2cbc   :  { %13173 = vmatpush3.msra.mxu1 %v718_v7 }
0x2cbd   :  { %13174 = vmatprep.subr.mxu1 %v14441_v0 }
0x2cbe   :  { %13175 = vmatpush3.msra.mxu1 %v717_v10  ;;  %v12092_v10 = vld [vmem:[%s16174_s24 + $0x20] sm:$0xff] }
0x2cbf   :  { %13176 = vmatprep.subr.mxu1 %v14441_v0 }
0x2cc0   :  { %13177 = vmatpush3.msra.mxu1 %v716_v51 }
0x2cc1   :  { %13178 = vmatprep.subr.mxu1 %v14441_v0 }
0x2cc2   :  { %13179 = vmatpush3.msra.mxu1 %v715_v26 }
0x2cc3   :  { %13180 = vmatprep.subr.mxu1 %v14441_v0 }
0x2cc4   :  { %13181 = vmatpush3.msra.mxu1 %v714_v63 }
0x2d75   :  { %v5791_v5 = vpop.f32.mrf.mxu1 }
0x2d76   :  { %v5795_v43 = vadd.f32 %v5791_v5, %v5547_v37 }
0x2d77   :  { %v13154_v54 = vpop.f32.mrf.mxu1 }
0x2d78   :  { %v5802_v45 = vadd.f32 %v12083_v42, %v5795_v43 }
0x2d7a   :  { %v5803_v41 = vadd.f32 %v5802_v45, %v15258_v53  ;;  %v710_v53 = vld [vmem:[%s16188_s17 + $0x8] sm:$0xff] }
0x2d7b   :  { %13160 = vmatpush3.msra.mxu0 %v710_v53 }
0x2d7c   :  { %v5804_v46 = vsel %vm4605_vm14, %v5803_v41, 0.0  ;;  %13161 = vmatprep.subr.mxu0 %v14441_v0 }
0x2d7d   :  { %5805 = vadd.xlane.f32.xlu0 %v5804_v46  ;;  %13162 = vmatpush3.msra.mxu0 %v709_v61 }
0x2d7e   :  { %13185 = vmatprep.subr.mxu0 %v12091_v1 }
0x2e06   :  { %v5806_v47 = vpop.xlane.xlu0 %5805 }
0x2e07   :  { %v5807_v48 = vmul.f32 0.03125, %v5806_v47 }
0x2e09   :  { %v5808_v49 = vsub.f32 %v5803_v41, %v5807_v48 }
0x2e0b   :  { %v5809_v9 = vmul.f32 %v5808_v49, %v5808_v49 }
0x2e0d   :  { %v5810_v18 = vsel %vm4605_vm14, %v5809_v9, 0.0 }
0x2e0e   :  { %5811 = vadd.xlane.f32.xlu1 %v5810_v18 }
0x2e97   :  { %v5812_v11 = vpop.xlane.xlu1 %5811 }
0x2e98   :  { %v5813_v15 = vmul.f32 0.03125, %v5812_v11 }
0x2e9a   :  { %v5814_v17 = vadd.f32 1e-05, %v5813_v15 }
0x2e9c   :  { %13830 = vrsqrt.f32 %v5814_v17 }
0x2ea9   :  { %v13831_v57 = vpop.eup %13830 }
0x2eaa   :  { %v5816_v62 = vmul.f32 %v13831_v57, %v5808_v49 }
0x2eac   :  { %v5821_v13 = vmul.f32 %v5820_v19, %v5816_v62 }
0x2eae   :  { %v15418_v21 = vadd.f32 %v5825_v20, %v5821_v13 }
0x2eb0   :  { %13164 = vmatmul.mubr.msk.f32.vlgmr.msra.gmra.mxu0 %vm429_vm0, %v15418_v21 }
0x2eb1   :  { %13186 = vmatpush3.msra.mxu0 %v12091_v1  ;;  %13193 = vmatprep.mubr.msk.f32.mxu0 %vm429_vm0, %v15236_v6 }
0x2eb2   :  { %13187 = vmatprep.subr.mxu0 %v12090_v22 }
0x2eb3   :  { %13188 = vmatpush3.msra.mxu0 %v12090_v22 }
0x2eb4   :  { %13189 = vmatprep.subr.mxu0 %v12089_v50 }
0x2eb5   :  { %13190 = vmatpush3.msra.mxu0 %v12089_v50 }
0x2eb6   :  { %13191 = vmatprep.subr.mxu0 %v12088_v25 }
0x2eb7   :  { %13192 = vmatpush3.msra.mxu0 %v12088_v25 }
0x2eb8   :  { %13194 = vmatmul.mubr.msk.f32.vlgmr.msra.gmra.mxu0 %vm429_vm0, %v15240_v44 }
0x2f70   :  { %v5902_v14 = vpop.f32.mrf.mxu0 }
0x2f71   :  { %v5903_v55 = vadd.f32 %v12084_v27, %v5902_v14 }
0x2f72   :  { %v13165_v28 = vpop.f32.mrf.mxu0 }
0x2f73   :  { %v5906_v23 = vmax.f32 %v5903_v55, 0.0 }
0x2f75   :  { %13183 = vmatmul.mubr.msk.f32.vlgmr.msra.gmra.mxu1 %vm469_vm3, %v5906_v23 }
0x2f78   :  { %v13195_v30 = vpop.f32.mrf.mxu0 }
0x2f79   :  { %v15435_v31 = vadd.f32 %v13195_v30, %v12148_v29 }
0x2f7a   :  { %v6182_v8 = vpop.f32.mrf.mxu0 }
0x2f7b   :  { %v15437_v60 = vadd.f32 %v12148_v29, %v6182_v8  ;;  %6195 = vrot.lane.b32.xlu0 %v15435_v31, %s14443_s7 }
0x2f7d   :  { %6193 = vrot.lane.b32.xlu1 %v15437_v60, %s14443_s7  ;;  %13200 = vmatprep.mubr.msk.f32.mxu0 %vm818_vm5, %v15437_v60 }
0x2fed   :  { %v6196_v33 = vpop.permute.xlu0 %6195 }
0x2fee   :  { %13196 = vmatprep.subr.msk.mxu0 %vm818_vm5, %v6196_v33 }
0x2fef   :  { %13197 = vmatpush3.xpose.msk.msra.mxu0 %vm818_vm5, %v6196_v33  ;;  %v6194_v59 = vpop.permute.xlu1 %6193  ;;  %v12093_v33 = vld [vmem:[%s16174_s24 + $0x28] sm:$0xff] }
0x2ff0   :  { %13198 = vmatprep.subr.msk.mxu0 %vm818_vm5, %v6194_v59 }
0x2ff3   :  { %13199 = vmatpush3.xpose.msk.msra.mxu0 %vm818_vm5, %v6194_v59 }
0x2ff6   :  { %13201 = vmatmul.mubr.msk.f32.vlgmr.msra.gmra.mxu0 %vm818_vm5, %v15435_v31 }
0x3035   :  { %v15451_v34 = vpop.f32.mrf.mxu1 }
0x3037   :  { %v13184_v35 = vpop.f32.mrf.mxu1 }
0x30b6   :  { %v13202_v36 = vpop.f32.mrf.mxu0 }
0x30b7   :  { %v6281_v12 = vmul.f32 0.35355338, %v13202_v36 }
0x30b8   :  { %v6271_v24 = vpop.f32.mrf.mxu0 }
0x30b9   :  { %v6280_v37 = vmul.f32 0.35355338, %v6271_v24  ;;  %v6285_v38 = vsel %vm908_vm6, %v6281_v12, -inf }
0x30ba   :  { %6286 = vmax.xlane.f32.xlu1 %v6285_v38 }
0x30bb   :  { %v6282_v39 = vsel %vm904_vm7, %v6280_v37, -inf }
0x30bc   :  { %6283 = vmax.xlane.f32.xlu0 %v6282_v39 }
0x30cb   :  { %6306 = vrot.lane.b32.xlu1 %v15435_v31, %s14444_s30 }
0x30cf   :  { %6398 = vrot.lane.b32.xlu1 %v15435_v31, %s14446_s26 }
0x30d3   :  { %6396 = vrot.lane.b32.xlu1 %v15437_v60, %s14446_s26 }
0x30d7   :  { %6394 = vrot.lane.b32.xlu1 %v15435_v31, %s14447_s28 }
0x3143   :  { %v6287_v40 = vpop.xlane.xlu1 %6286 }
0x3144   :  { %v6289_v42 = vsub.f32 %v6281_v12, %v6287_v40 }
0x3145   :  { %v6284_v5 = vpop.xlane.xlu0 %6283 }
0x3146   :  { %v6292_v43 = vmul.f32 1.442695, %v6289_v42  ;;  %v6288_v54 = vsub.f32 %v6280_v37, %v6284_v5 }
0x3147   :  { %v6307_v45 = vpop.permute.xlu1 %6306 }
0x3148   :  { %13832 = vpow2.f32 %v6292_v43  ;;  %v6290_v41 = vmul.f32 1.442695, %v6288_v54  ;;  %13203 = vmatprep.subr.msk.mxu1 %vm939_vm8, %v6307_v45 }
0x3149   :  { %13204 = vmatpush3.msk.msra.mxu1 %vm939_vm8, %v6307_v45 }
0x314a   :  { %13834 = vpow2.f32 %v6290_v41 }
0x314b   :  { %v6399_v58 = vpop.permute.xlu1 %6398 }
0x314f   :  { %v6397_v2 = vpop.permute.xlu1 %6396 }
0x3153   :  { %v6395_v7 = vpop.permute.xlu1 %6394 }
0x3155   :  { %v13833_v46 = vpop.eup %13832 }
0x3156   :  { %v6297_v47 = vsel %vm908_vm6, %v13833_v46, 0.0 }
0x3157   :  { %v13835_v48 = vpop.eup %13834  ;;  %6298 = vadd.xlane.f32.xlu0 %v6297_v47 }
0x3158   :  { %v6294_v49 = vsel %vm904_vm7, %v13835_v48, 0.0 }
0x315b   :  { %6295 = vadd.xlane.f32.xlu0 %v6294_v49 }
0x3171   :  { %6304 = vrot.lane.b32.xlu0 %v15437_v60, %s14444_s30 }
0x3175   :  { %6392 = vrot.lane.b32.xlu0 %v15437_v60, %s14447_s28 }
0x31e0   :  { %v6299_v9 = vpop.xlane.xlu0 %6298 }
0x31e1   :  { %13836 = vrcp.f32 %v6299_v9 }
0x31e4   :  { %v6296_v18 = vpop.xlane.xlu0 %6295 }
0x31e5   :  { %13838 = vrcp.f32 %v6296_v18 }
0x31e8   :  { %v6305_v52 = vpop.permute.xlu0 %6304 }
0x31e9   :  { %13205 = vmatprep.subr.mxu1 %v6305_v52 }
0x31ea   :  { %13206 = vmatpush3.msra.mxu1 %v6305_v52 }
0x31eb   :  { %13210 = vmatprep.subr.msk.mxu1 %vm818_vm5, %v6399_v58 }
0x31ec   :  { %v6393_v3 = vpop.permute.xlu0 %6392 }
0x31ee   :  { %v13837_v53 = vpop.eup %13836 }
0x31ef   :  { %v6303_v32 = vmul.f32 %v13837_v53, %v13833_v46 }
0x31f2   :  { %v13839_v61 = vpop.eup %13838 }
0x31f3   :  { %v6301_v1 = vmul.f32 %v13839_v61, %v13835_v48 }
0x31f5   :  { %13207 = vmatprep.mubr.msk.f32.mxu1 %vm904_vm7, %v6301_v1 }
0x31f6   :  { %13208 = vmatmul.mubr.msk.f32.vlgmr.msra.gmra.mxu1 %vm904_vm7, %v6303_v32 }
0x31f7   :  { %13211 = vmatpush3.xpose.msk.msra.mxu1 %vm818_vm5, %v6399_v58  ;;  %13214 = vmatprep.mubr.msk.f32.mxu1 %vm818_vm5, %v6393_v3 }
0x31f8   :  { %13212 = vmatprep.subr.msk.mxu1 %vm818_vm5, %v6397_v2 }
0x31fb   :  { %13213 = vmatpush3.xpose.msk.msra.mxu1 %vm818_vm5, %v6397_v2 }
0x31fc   :  { %13229 = vmatprep.subr.mxu1 %v12092_v10 }
0x31fe   :  { %13215 = vmatmul.mubr.msk.f32.vlgmr.msra.gmra.mxu1 %vm818_vm5, %v6395_v7 }
0x31ff   :  { %13230 = vmatpush3.msra.mxu1 %v12092_v10 }
0x32b6   :  { %v13209_v11 = vpop.f32.mrf.mxu1 }
0x32b8   :  { %v6383_v15 = vpop.f32.mrf.mxu1 }
0x32b9   :  { %13231 = vmatprep.mubr.msk.f32.mxu1 %vm818_vm5, %v6383_v15 }
0x32ba   :  { %13232 = vmatmul.mubr.msk.f32.vlgmr.msra.gmra.mxu1 %vm818_vm5, %v13209_v11 }
0x32be   :  { %v13216_v17 = vpop.f32.mrf.mxu1 }
0x32bf   :  { %v6484_v19 = vmul.f32 0.35355338, %v13216_v17 }
0x32c0   :  { %v6474_v57 = vpop.f32.mrf.mxu1 }
0x32c1   :  { %v6483_v62 = vmul.f32 0.35355338, %v6474_v57  ;;  %v6488_v20 = vsel %vm908_vm6, %v6484_v19, -inf }
0x32c2   :  { %6489 = vmax.xlane.f32.xlu1 %v6488_v20 }
0x32c3   :  { %v6485_v13 = vsel %vm904_vm7, %v6483_v62, -inf }
0x32c4   :  { %6486 = vmax.xlane.f32.xlu0 %v6485_v13 }
0x32d3   :  { %6509 = vrot.lane.b32.xlu1 %v15435_v31, %s14448_s20 }
0x32d7   :  { %6763 = vrot.lane.b32.xlu1 %v15435_v31, %s14449_s1 }
0x32db   :  { %6761 = vrot.lane.b32.xlu1 %v15437_v60, %s14449_s1 }
0x32df   :  { %6759 = vrot.lane.b32.xlu1 %v15435_v31, %s14450_s8 }
0x32e3   :  { %7047 = vrot.lane.b32.xlu1 %v15437_v60, %s14451_s2 }
0x32e7   :  { %7045 = vrot.lane.b32.xlu1 %v15435_v31, %s14452_s29 }
0x334b   :  { %v6490_v22 = vpop.xlane.xlu1 %6489 }
0x334c   :  { %v6492_v50 = vsub.f32 %v6484_v19, %v6490_v22 }
0x334d   :  { %v6487_v25 = vpop.xlane.xlu0 %6486 }
0x334e   :  { %v6495_v51 = vmul.f32 1.442695, %v6492_v50  ;;  %v6491_v26 = vsub.f32 %v6483_v62, %v6487_v25 }
0x334f   :  { %v6510_v63 = vpop.permute.xlu1 %6509 }
0x3350   :  { %13840 = vpow2.f32 %v6495_v51  ;;  %v6493_v27 = vmul.f32 1.442695, %v6491_v26  ;;  %13217 = vmatprep.subr.msk.mxu0 %vm939_vm8, %v6510_v63 }
0x3351   :  { %13218 = vmatpush3.msk.msra.mxu0 %vm939_vm8, %v6510_v63  ;;  %v12086_v63 = vld [vmem:[#allocation23] ss:$0 sm:$0xff] }
0x3352   :  { %13842 = vpow2.f32 %v6493_v27  ;;  %v5983_v27 = vadd.f32 %v12086_v63, %v15451_v34 }
0x3353   :  { %v6764_v24 = vpop.permute.xlu1 %6763 }
0x3357   :  { %v6762_v39 = vpop.permute.xlu1 %6761 }
0x335b   :  { %v6760_v5 = vpop.permute.xlu1 %6759 }
0x335d   :  { %v13841_v14 = vpop.eup %13840 }
0x335e   :  { %v6500_v55 = vsel %vm908_vm6, %v13841_v14, 0.0 }
0x335f   :  { %v13843_v28 = vpop.eup %13842  ;;  %6501 = vadd.xlane.f32.xlu0 %v6500_v55  ;;  %v7048_v54 = vpop.permute.xlu1 %7047 }
0x3360   :  { %v6497_v23 = vsel %vm904_vm7, %v13843_v28, 0.0 }
0x3363   :  { %6498 = vadd.xlane.f32.xlu0 %v6497_v23  ;;  %v7046_v45 = vpop.permute.xlu1 %7045 }
0x3379   :  { %6507 = vrot.lane.b32.xlu0 %v15437_v60, %s14448_s20 }
0x337d   :  { %6757 = vrot.lane.b32.xlu0 %v15437_v60, %s14450_s8 }
0x3381   :  { %7049 = vrot.lane.b32.xlu0 %v15435_v31, %s14451_s2 }
0x3385   :  { %7043 = vrot.lane.b32.xlu0 %v15437_v60, %s14452_s29 }
0x33e8   :  { %v6502_v29 = vpop.xlane.xlu0 %6501 }
0x33e9   :  { %13844 = vrcp.f32 %v6502_v29 }
0x33ec   :  { %v6499_v30 = vpop.xlane.xlu0 %6498 }
0x33ed   :  { %13846 = vrcp.f32 %v6499_v30  ;;  %v12094_v30 = vld [vmem:[%s16174_s24 + $0x30] sm:$0xff] }
0x33f0   :  { %v6508_v8 = vpop.permute.xlu0 %6507 }
0x33f1   :  { %13219 = vmatprep.subr.mxu0 %v6508_v8 }
0x33f2   :  { %13220 = vmatpush3.msra.mxu0 %v6508_v8 }
0x33f3   :  { %13224 = vmatprep.subr.mxu0 %v12093_v33 }
0x33f4   :  { %v6758_v37 = vpop.permute.xlu0 %6757 }
0x33f6   :  { %v13845_v59 = vpop.eup %13844 }
0x33f7   :  { %v6506_v12 = vmul.f32 %v13845_v59, %v13841_v14  ;;  %v15546_v14 = vadd.f32 %v5983_v27, %v15418_v21 }
0x33f8   :  { %v7050_v42 = vpop.permute.xlu0 %7049 }
0x33f9   :  { %v5987_v55 = vsel %vm4605_vm14, %v15546_v14, 0.0 }
0x33fa   :  { %v13847_v35 = vpop.eup %13846 }
0x33fb   :  { %v6504_v36 = vmul.f32 %v13847_v35, %v13843_v28 }
0x33fc   :  { %v7044_v43 = vpop.permute.xlu0 %7043 }
0x33fd   :  { %13221 = vmatprep.mubr.msk.f32.mxu0 %vm904_vm7, %v6504_v36 }
0x33fe   :  { %13222 = vmatmul.mubr.msk.f32.vlgmr.msra.gmra.mxu0 %vm904_vm7, %v6506_v12 }
0x33ff   :  { %13225 = vmatpush3.msra.mxu0 %v12093_v33 }
0x3400   :  { %13234 = vmatprep.subr.msk.mxu0 %vm818_vm5, %v6764_v24 }
0x34be   :  { %v13223_v38 = vpop.f32.mrf.mxu0 }
0x34c0   :  { %v6586_v40 = vpop.f32.mrf.mxu0 }
0x34c1   :  { %13226 = vmatprep.mubr.msk.f32.mxu0 %vm818_vm5, %v6586_v40 }
0x34c2   :  { %13227 = vmatmul.mubr.msk.f32.vlgmr.msra.gmra.mxu0 %vm818_vm5, %v13223_v38  ;;  %v13233_v38 = vpop.f32.mrf.mxu1 }
0x34c3   :  { %13235 = vmatpush3.xpose.msk.msra.mxu0 %vm818_vm5, %v6764_v24  ;;  %13238 = vmatprep.mubr.msk.f32.mxu0 %vm818_vm5, %v6758_v37 }
0x34c4   :  { %13236 = vmatprep.subr.msk.mxu0 %vm818_vm5, %v6762_v39 }
0x34c7   :  { %13237 = vmatpush3.xpose.msk.msra.mxu0 %vm818_vm5, %v6762_v39  ;;  %v6748_v39 = vpop.f32.mrf.mxu1 }
0x34c8   :  { %13253 = vmatprep.subr.msk.mxu0 %vm818_vm5, %v7050_v42 }
0x34ca   :  { %13239 = vmatmul.mubr.msk.f32.vlgmr.msra.gmra.mxu0 %vm818_vm5, %v6760_v5 }
0x34cb   :  { %13254 = vmatpush3.xpose.msk.msra.mxu0 %vm818_vm5, %v7050_v42  ;;  %13257 = vmatprep.mubr.msk.f32.mxu0 %vm818_vm5, %v7044_v43 }
0x34cc   :  { %13255 = vmatprep.subr.msk.mxu0 %vm818_vm5, %v7048_v54 }
0x34cf   :  { %13256 = vmatpush3.xpose.msk.msra.mxu0 %vm818_vm5, %v7048_v54 }
0x34d2   :  { %13258 = vmatmul.mubr.msk.f32.vlgmr.msra.gmra.mxu0 %vm818_vm5, %v7046_v45 }
0x3582   :  { %v15525_v41 = vpop.f32.mrf.mxu0 }
0x3584   :  { %v15527_v46 = vpop.f32.mrf.mxu0 }
0x358a   :  { %v13240_v47 = vpop.f32.mrf.mxu0 }
0x358b   :  { %v6849_v48 = vmul.f32 0.35355338, %v13240_v47 }
0x358c   :  { %v6839_v49 = vpop.f32.mrf.mxu0 }
0x358d   :  { %v6848_v9 = vmul.f32 0.35355338, %v6839_v49  ;;  %v6853_v18 = vsel %vm908_vm6, %v6849_v48, -inf  ;;  %v6754_v49 = vadd.f32 %v13233_v38, %v15525_v41  ;;  %v12187_v41 = vld [vmem:[#allocation8 + $0x1] ss:$0 sm:$0xff] }
0x358e   :  { %6854 = vmax.xlane.f32.xlu1 %v6853_v18  ;;  %v6749_v18 = vadd.f32 %v6748_v39, %v15527_v46 }
0x358f   :  { %v6850_v52 = vsel %vm904_vm7, %v6848_v9, -inf }
0x3590   :  { %6851 = vmax.xlane.f32.xlu0 %v6850_v52 }
0x3592   :  { %v13259_v58 = vpop.f32.mrf.mxu0 }
0x3593   :  { %v7135_v25 = vmul.f32 0.35355338, %v13259_v58 }
0x3594   :  { %v7125_v53 = vpop.f32.mrf.mxu0 }
0x3595   :  { %v7134_v61 = vmul.f32 0.35355338, %v7125_v53  ;;  %v7139_v26 = vsel %vm908_vm6, %v7135_v25, -inf }
0x3597   :  { %v7136_v1 = vsel %vm904_vm7, %v7134_v61, -inf }
0x359f   :  { %6874 = vrot.lane.b32.xlu1 %v15435_v31, %s14453_s25 }
0x35c3   :  { %7137 = vmax.xlane.f32.xlu1 %v7136_v1 }
0x3617   :  { %v6855_v32 = vpop.xlane.xlu1 %6854 }
0x3618   :  { %v6857_v3 = vsub.f32 %v6849_v48, %v6855_v32  ;;  %v12095_v48 = vld [vmem:[%s16174_s24 + $0x38] sm:$0xff] }
0x3619   :  { %v6852_v2 = vpop.xlane.xlu0 %6851  ;;  %v12099_v32 = vld [vmem:[%s16175_s19 + $0x38] sm:$0xff] }
0x361a   :  { %v6860_v7 = vmul.f32 1.442695, %v6857_v3  ;;  %v6856_v10 = vsub.f32 %v6848_v9, %v6852_v2  ;;  %13272 = vmatprep.subr.mxu0 %v12099_v32 }
0x361b   :  { %v6875_v11 = vpop.permute.xlu1 %6874  ;;  %13273 = vmatpush3.msra.mxu0 %v12099_v32 }
0x361c   :  { %13848 = vpow2.f32 %v6860_v7  ;;  %v6858_v15 = vmul.f32 1.442695, %v6856_v10  ;;  %13241 = vmatprep.subr.msk.mxu1 %vm939_vm8, %v6875_v11 }
0x361d   :  { %13242 = vmatpush3.msk.msra.mxu1 %vm939_vm8, %v6875_v11 }
0x361e   :  { %13850 = vpow2.f32 %v6858_v15 }
0x3629   :  { %v13849_v17 = vpop.eup %13848 }
0x362a   :  { %v6865_v19 = vsel %vm908_vm6, %v13849_v17, 0.0 }
0x362b   :  { %v13851_v57 = vpop.eup %13850  ;;  %6866 = vadd.xlane.f32.xlu0 %v6865_v19 }
0x362c   :  { %v6862_v62 = vsel %vm904_vm7, %v13851_v57, 0.0 }
0x362f   :  { %6863 = vadd.xlane.f32.xlu0 %v6862_v62 }
0x3645   :  { %6872 = vrot.lane.b32.xlu0 %v15437_v60, %s14453_s25 }
0x364c   :  { %v7138_v20 = vpop.xlane.xlu1 %7137 }
0x364d   :  { %v7142_v13 = vsub.f32 %v7134_v61, %v7138_v20 }
0x364f   :  { %v7144_v22 = vmul.f32 1.442695, %v7142_v13 }
0x3651   :  { %13852 = vpow2.f32 %v7144_v22 }
0x365e   :  { %v13853_v50 = vpop.eup %13852 }
0x365f   :  { %v7148_v51 = vsel %vm904_vm7, %v13853_v50, 0.0 }
0x3660   :  { %7149 = vadd.xlane.f32.xlu1 %v7148_v51  ;;  %v12098_v51 = vld [vmem:[%s16175_s19 + $0x30] sm:$0xff] }
0x3661   :  { %13274 = vmatprep.subr.mxu0 %v12098_v51 }
0x3662   :  { %13275 = vmatpush3.msra.mxu0 %v12098_v51 }
0x3664   :  { %7140 = vmax.xlane.f32.xlu0 %v7139_v26 }
0x3671   :  { %7160 = vrot.lane.b32.xlu1 %v15435_v31, %s14454_s10 }
0x3695   :  { %5988 = vadd.xlane.f32.xlu1 %v5987_v55 }
0x36b4   :  { %v6867_v28 = vpop.xlane.xlu0 %6866 }
0x36b5   :  { %13854 = vrcp.f32 %v6867_v28 }
0x36b8   :  { %v6864_v23 = vpop.xlane.xlu0 %6863 }
0x36b9   :  { %13856 = vrcp.f32 %v6864_v23 }
0x36bc   :  { %v6873_v29 = vpop.permute.xlu0 %6872 }
0x36bd   :  { %13243 = vmatprep.subr.mxu1 %v6873_v29 }
0x36be   :  { %13244 = vmatpush3.msra.mxu1 %v6873_v29 }
0x36bf   :  { %13248 = vmatprep.subr.mxu1 %v12094_v30 }
0x36c2   :  { %v13855_v31 = vpop.eup %13854 }
0x36c3   :  { %v6871_v34 = vmul.f32 %v13855_v31, %v13849_v17 }
0x36c6   :  { %v13857_v8 = vpop.eup %13856 }
0x36c7   :  { %v6869_v33 = vmul.f32 %v13857_v8, %v13851_v57  ;;  %v12188_v8 = vld [vmem:[#allocation10 + $0x1] ss:$0 sm:$0xff] }
0x36c9   :  { %13245 = vmatprep.mubr.msk.f32.mxu1 %vm904_vm7, %v6869_v33 }
0x36ca   :  { %13246 = vmatmul.mubr.msk.f32.vlgmr.msra.gmra.mxu1 %vm904_vm7, %v6871_v34 }
0x36cb   :  { %13249 = vmatpush3.msra.mxu1 %v12094_v30 }
0x36e9   :  { %v7150_v21 = vpop.xlane.xlu1 %7149 }
0x36ed   :  { %v7161_v59 = vpop.permute.xlu1 %7160  ;;  %v7141_v35 = vpop.xlane.xlu0 %7140 }
0x36ee   :  { %v7143_v36 = vsub.f32 %v7135_v25, %v7141_v35  ;;  %13260 = vmatprep.subr.msk.mxu1 %vm939_vm8, %v7161_v59  ;;  %v12097_v25 = vld [vmem:[%s16175_s19 + $0x28] sm:$0xff] }
0x36ef   :  { %13276 = vmatprep.subr.mxu0 %v12097_v25 }
0x36f0   :  { %v7146_v12 = vmul.f32 1.442695, %v7143_v36  ;;  %13277 = vmatpush3.msra.mxu0 %v12097_v25 }
0x36f2   :  { %13858 = vpow2.f32 %v7146_v12 }
0x36f3   :  { %13860 = vrcp.f32 %v7150_v21 }
0x36ff   :  { %v13859_v24 = vpop.eup %13858 }
0x3700   :  { %v7151_v37 = vsel %vm908_vm6, %v13859_v24, 0.0  ;;  %v13861_v40 = vpop.eup %13860 }
0x3701   :  { %7152 = vadd.xlane.f32.xlu0 %v7151_v37  ;;  %v7155_v54 = vmul.f32 %v13861_v40, %v13853_v50 }
0x3717   :  { %7158 = vrot.lane.b32.xlu0 %v15437_v60, %s14454_s10 }
0x371e   :  { %v5989_v3 = vpop.xlane.xlu1 %5988 }
0x371f   :  { %v5990_v7 = vmul.f32 0.03125, %v5989_v3 }
0x3721   :  { %v5991_v17 = vsub.f32 %v15546_v14, %v5990_v7 }
0x3723   :  { %v5992_v22 = vmul.f32 %v5991_v17, %v5991_v17 }
0x3725   :  { %v5993_v50 = vsel %vm4605_vm14, %v5992_v22, 0.0 }
0x378a   :  { %v13247_v42 = vpop.f32.mrf.mxu1  ;;  %v7153_v5 = vpop.xlane.xlu0 %7152 }
0x378b   :  { %13862 = vrcp.f32 %v7153_v5 }
0x378c   :  { %v6951_v43 = vpop.f32.mrf.mxu1 }
0x378d   :  { %13250 = vmatprep.mubr.msk.f32.mxu1 %vm818_vm5, %v6951_v43 }
0x378e   :  { %13251 = vmatmul.mubr.msk.f32.vlgmr.msra.gmra.mxu1 %vm818_vm5, %v13247_v42  ;;  %v7159_v45 = vpop.permute.xlu0 %7158 }
0x378f   :  { %13261 = vmatpush3.msk.msra.mxu1 %vm939_vm8, %v7161_v59  ;;  %13264 = vmatprep.mubr.msk.f32.mxu1 %vm904_vm7, %v7155_v54  ;;  %v13951_v54 = vld [vmem:[%s16186_s4] sm:$0x7] }
0x3790   :  { %13262 = vmatprep.subr.mxu1 %v7159_v45 }
0x3791   :  { %13263 = vmatpush3.msra.mxu1 %v7159_v45  ;;  %v6008_v45 = vrot.slane %v13951_v54, %v15229_v16  ;;  %v12101_v54 = vld [vmem:[%s16179_s5 + $0x28] sm:$0xff] }
0x3792   :  { %13267 = vmatprep.subr.mxu1 %v12095_v48 }
0x3798   :  { %v13863_v60 = vpop.eup %13862 }
0x3799   :  { %v7157_v47 = vmul.f32 %v13863_v60, %v13859_v24  ;;  %v13950_v24 = vld [vmem:[%s16185_s18] sm:$0x7] }
0x379a   :  { %v6003_v37 = vrot.slane %v13950_v24, %v15229_v16 }
0x379b   :  { %13265 = vmatmul.mubr.msk.f32.vlgmr.msra.gmra.mxu1 %vm904_vm7, %v7157_v47 }
0x379c   :  { %13268 = vmatpush3.msra.mxu1 %v12095_v48 }
0x379d   :  { %13283 = vmatprep.subr.mxu1 %v14441_v0 }
0x384e   :  { %v13252_v9 = vpop.f32.mrf.mxu1 }
0x384f   :  { %v7042_v52 = vadd.f32 %v13252_v9, %v6754_v49  ;;  %v15599_v49 = vld [vmem:[%s16177_s6 + $0x4] sm:$0x7] }
0x3850   :  { %v7032_v58 = vpop.f32.mrf.mxu1 }
0x3851   :  { %v7041_v53 = vadd.f32 %v7032_v58, %v6749_v18  ;;  %v7368_v18 = vrot.slane %v15599_v49, %v14937_v56 }
0x385b   :  { %v13266_v61 = vpop.f32.mrf.mxu1 }
0x385d   :  { %v7237_v1 = vpop.f32.mrf.mxu1 }
0x385e   :  { %13269 = vmatprep.mubr.msk.f32.mxu1 %vm818_vm5, %v7237_v1 }
0x385f   :  { %13270 = vmatmul.mubr.msk.f32.vlgmr.msra.gmra.mxu1 %vm818_vm5, %v13266_v61 }
0x3860   :  { %13291 = vmatprep.mubr.msk.f32.mxu1 %vm14445_vm2, %v14441_v0 }
0x391f   :  { %v13271_v2 = vpop.f32.mrf.mxu1 }
0x3920   :  { %v7328_v46 = vadd.f32 %v13271_v2, %v7042_v52  ;;  %v15604_v52 = vld [vmem:[%s16178_s11 + $0x4] sm:$0x7] }
0x3921   :  { %v7318_v10 = vpop.f32.mrf.mxu1 }
0x3922   :  { %v7336_v11 = vadd.f32 %v12187_v41, %v7328_v46  ;;  %v7327_v15 = vadd.f32 %v7318_v10, %v7041_v53 }
0x3924   :  { %v7335_v19 = vadd.f32 %v12187_v41, %v7327_v15  ;;  %v7338_v57 = vadd.f32 %v7336_v11, %v15240_v44  ;;  %v12096_v44 = vld [vmem:[%s16175_s19 + $0x20] sm:$0xff] }
0x3925   :  { %13278 = vmatprep.subr.mxu0 %v12096_v44 }
0x3926   :  { %v7342_v62 = vsel %vm1967_vm9, %v7338_v57, 0.0  ;;  %v7337_v20 = vadd.f32 %v7335_v19, %v15236_v6  ;;  %13279 = vmatpush3.msra.mxu0 %v12096_v44 }
0x3927   :  { %7343 = vadd.xlane.f32.xlu1 %v7342_v62 }
0x3928   :  { %v7339_v13 = vsel %vm429_vm0, %v7337_v20, 0.0 }
0x3929   :  { %7340 = vadd.xlane.f32.xlu0 %v7339_v13 }
0x392d   :  { %5994 = vadd.xlane.f32.xlu0 %v5993_v50 }
0x3938   :  { %7474 = vrot.lane.b32.xlu1 %v12099_v32, %s14443_s7  ;;  %v7374_v32 = vrot.slane %v15604_v52, %v14937_v56 }
0x393c   :  { %7470 = vrot.lane.b32.xlu1 %v12097_v25, %s14443_s7 }
0x39b0   :  { %v7344_v6 = vpop.xlane.xlu1 %7343 }
0x39b1   :  { %v7346_v26 = vmul.f32 0.03125, %v7344_v6 }
0x39b2   :  { %v7341_v63 = vpop.xlane.xlu0 %7340 }
0x39b3   :  { %v7348_v27 = vsub.f32 %v7338_v57, %v7346_v26  ;;  %v7345_v14 = vmul.f32 0.03125, %v7341_v63 }
0x39b4   :  { %v7475_v55 = vpop.permute.xlu1 %7474 }
0x39b5   :  { %v7347_v28 = vsub.f32 %v7337_v20, %v7345_v14  ;;  %v7350_v23 = vmul.f32 %v7348_v27, %v7348_v27  ;;  %13284 = vmatpush3.msra.mxu1 %v7475_v55 }
0x39b6   :  { %13285 = vmatprep.subr.mxu1 %v14441_v0  ;;  %v5995_v33 = vpop.xlane.xlu0 %5994 }
0x39b7   :  { %v7354_v29 = vsel %vm1967_vm9, %v7350_v23, 0.0  ;;  %v7349_v30 = vmul.f32 %v7347_v28, %v7347_v28  ;;  %v5996_v34 = vmul.f32 0.03125, %v5995_v33 }
0x39b8   :  { %7355 = vadd.xlane.f32.xlu0 %v7354_v29  ;;  %v7471_v35 = vpop.permute.xlu1 %7470 }
0x39b9   :  { %v7351_v31 = vsel %vm429_vm0, %v7349_v30, 0.0  ;;  %v5997_v21 = vadd.f32 1e-05, %v5996_v34 }
0x39ba   :  { %7352 = vadd.xlane.f32.xlu1 %v7351_v31 }
0x39bb   :  { %13864 = vrsqrt.f32 %v5997_v21 }
0x39c8   :  { %v13865_v59 = vpop.eup %13864 }
0x39c9   :  { %v5999_v36 = vmul.f32 %v13865_v59, %v5991_v17 }
0x39cb   :  { %7468 = vrot.lane.b32.xlu1 %v12096_v44, %s14443_s7  ;;  %v6004_v43 = vmul.f32 %v6003_v37, %v5999_v36 }
0x39cd   :  { %v15594_v48 = vadd.f32 %v6008_v45, %v6004_v43 }
0x39ce   :  { %7472 = vrot.lane.b32.xlu0 %v12098_v51, %s14443_s7 }
0x39d2   :  { %7480 = vrot.lane.b32.xlu0 %v12188_v8, %s14443_s7 }
0x3a41   :  { %v7356_v12 = vpop.xlane.xlu0 %7355 }
0x3a42   :  { %v7358_v38 = vmul.f32 0.03125, %v7356_v12 }
0x3a43   :  { %v7353_v39 = vpop.xlane.xlu1 %7352 }
0x3a44   :  { %v7360_v40 = vadd.f32 1e-05, %v7358_v38  ;;  %v7357_v42 = vmul.f32 0.03125, %v7353_v39 }
0x3a45   :  { %v7473_v5 = vpop.permute.xlu0 %7472 }
0x3a46   :  { %13866 = vrsqrt.f32 %v7360_v40  ;;  %v7359_v60 = vadd.f32 1e-05, %v7357_v42  ;;  %13286 = vmatpush3.msra.mxu1 %v7473_v5 }
0x3a47   :  { %13287 = vmatprep.subr.mxu1 %v14441_v0  ;;  %v7469_v47 = vpop.permute.xlu1 %7468 }
0x3a48   :  { %13868 = vrsqrt.f32 %v7359_v60  ;;  %13288 = vmatpush3.msra.mxu1 %v7471_v35 }
0x3a49   :  { %13289 = vmatprep.subr.mxu1 %v14441_v0  ;;  %v7481_v7 = vpop.permute.xlu0 %7480 }
0x3a4a   :  { %13290 = vmatpush3.msra.mxu1 %v7469_v47 }
0x3a4b   :  { %13292 = vmatmul.mubr.msk.f32.vlgmr.msra.gmra.mxu1 %vm429_vm0, %v15594_v48 }
0x3a53   :  { %v13867_v9 = vpop.eup %13866 }
0x3a54   :  { %v7364_v58 = vmul.f32 %v13867_v9, %v7348_v27 }
0x3a55   :  { %v13869_v53 = vpop.eup %13868 }
0x3a56   :  { %v7363_v61 = vmul.f32 %v13869_v53, %v7347_v28  ;;  %v7370_v1 = vmul.f32 %v7368_v18, %v7364_v58 }
0x3a58   :  { %v7369_v3 = vmul.f32 %v7368_v18, %v7363_v61  ;;  %v15610_v2 = vadd.f32 %v7374_v32, %v7370_v1 }
0x3a5a   :  { %v15608_v41 = vadd.f32 %v7374_v32, %v7369_v3 }
0x3a5c   :  { %13280 = vmatprep.mubr.msk.f32.mxu0 %vm429_vm0, %v15608_v41 }
0x3a5d   :  { %13281 = vmatmul.mubr.msk.f32.vlgmr.msra.gmra.mxu0 %vm429_vm0, %v15610_v2 }
0x3b0b   :  { %v7552_v46 = vpop.f32.mrf.mxu1 }
0x3b0c   :  { %v15616_v10 = vadd.f32 %v7552_v46, %v7481_v7 }
0x3b0d   :  { %v13293_v11 = vpop.f32.mrf.mxu1 }
0x3b0e   :  { %7753 = vrot.lane.b32.xlu1 %v15616_v10, %s14447_s28  ;;  %13294 = vmatprep.subr.msk.mxu0 %vm818_vm5, %v15616_v10 }
0x3b0f   :  { %13295 = vmatpush3.xpose.msk.msra.mxu0 %vm818_vm5, %v15616_v10 }
0x3b1d   :  { %v13282_v15 = vpop.f32.mrf.mxu0 }
0x3b1e   :  { %v15624_v17 = vadd.f32 %v13282_v15, %v12188_v8 }
0x3b1f   :  { %v7455_v19 = vpop.f32.mrf.mxu0 }
0x3b20   :  { %v15626_v57 = vadd.f32 %v12188_v8, %v7455_v19  ;;  %7751 = vrot.lane.b32.xlu1 %v15624_v17, %s14447_s28  ;;  %v12100_v19 = vld [vmem:[%s16179_s5 + $0x20] sm:$0xff] }
0x3b22   :  { %7749 = vrot.lane.b32.xlu0 %v15626_v57, %s14447_s28  ;;  %13296 = vmatprep.mubr.msk.f32.mxu0 %vm818_vm5, %v15626_v57 }
0x3b23   :  { %13297 = vmatmul.mubr.msk.f32.vlgmr.msra.gmra.mxu0 %vm818_vm5, %v15624_v17 }
0x3b80   :  { %v7754_v62 = vpop.permute.xlu1 %7753 }
0x3b81   :  { %13304 = vmatprep.subr.msk.mxu0 %vm818_vm5, %v7754_v62 }
0x3b82   :  { %13305 = vmatpush3.xpose.msk.msra.mxu0 %vm818_vm5, %v7754_v62 }
0x3b83   :  { %13314 = vmatprep.subr.mxu0 %v12101_v54 }
0x3b92   :  { %v7752_v13 = vpop.permute.xlu1 %7751 }
0x3b94   :  { %v7750_v20 = vpop.permute.xlu0 %7749 }
0x3b95   :  { %13306 = vmatprep.mubr.msk.f32.mxu0 %vm818_vm5, %v7750_v20 }
0x3b96   :  { %13307 = vmatmul.mubr.msk.f32.vlgmr.msra.gmra.mxu0 %vm818_vm5, %v7752_v13 }
0x3b97   :  { %13315 = vmatpush3.msra.mxu0 %v12101_v54 }
0x3be3   :  { %v13298_v22 = vpop.f32.mrf.mxu0 }
0x3be4   :  { %v7641_v50 = vmul.f32 0.35355338, %v13298_v22 }
0x3be5   :  { %v7631_v25 = vpop.f32.mrf.mxu0 }
0x3be6   :  { %v7640_v51 = vmul.f32 0.35355338, %v7631_v25  ;;  %v7645_v44 = vsel %vm2273_vm10, %v7641_v50, -inf }
0x3be7   :  { %7646 = vmax.xlane.f32.xlu1 %v7645_v44 }
0x3be8   :  { %v7642_v6 = vsel %vm2269_vm11, %v7640_v51, -inf }
0x3be9   :  { %7643 = vmax.xlane.f32.xlu0 %v7642_v6 }
0x3c56   :  { %v13308_v26 = vpop.f32.mrf.mxu0 }
0x3c57   :  { %v7837_v14 = vmul.f32 0.35355338, %v13308_v26 }
0x3c58   :  { %v7827_v63 = vpop.f32.mrf.mxu0 }
0x3c59   :  { %v7836_v27 = vmul.f32 0.35355338, %v7827_v63  ;;  %v7841_v28 = vsel %vm2273_vm10, %v7837_v14, -inf }
0x3c5b   :  { %v7838_v55 = vsel %vm2269_vm11, %v7836_v27, -inf }
0x3c5c   :  { %7839 = vmax.xlane.f32.xlu0 %v7838_v55 }
0x3c60   :  { %7842 = vmax.xlane.f32.xlu0 %v7841_v28 }
0x3c70   :  { %v7647_v23 = vpop.xlane.xlu1 %7646 }
0x3c71   :  { %v7649_v29 = vsub.f32 %v7641_v50, %v7647_v23 }
0x3c72   :  { %v7644_v30 = vpop.xlane.xlu0 %7643 }
0x3c73   :  { %v7652_v31 = vmul.f32 1.442695, %v7649_v29  ;;  %v7648_v8 = vsub.f32 %v7640_v51, %v7644_v30 }
0x3c75   :  { %13870 = vpow2.f32 %v7652_v31  ;;  %v7650_v33 = vmul.f32 1.442695, %v7648_v8 }
0x3c77   :  { %13872 = vpow2.f32 %v7650_v33 }
0x3c82   :  { %v13871_v34 = vpop.eup %13870 }
0x3c83   :  { %v7657_v21 = vsel %vm2273_vm10, %v13871_v34, 0.0 }
0x3c84   :  { %v13873_v59 = vpop.eup %13872  ;;  %7658 = vadd.xlane.f32.xlu0 %v7657_v21 }
0x3c85   :  { %v7654_v35 = vsel %vm2269_vm11, %v13873_v59, 0.0 }
0x3c86   :  { %7655 = vadd.xlane.f32.xlu1 %v7654_v35 }
0x3ce5   :  { %v7840_v36 = vpop.xlane.xlu0 %7839 }
0x3ce6   :  { %v7844_v12 = vsub.f32 %v7836_v27, %v7840_v36 }
0x3ce8   :  { %v7846_v24 = vmul.f32 1.442695, %v7844_v12 }
0x3ce9   :  { %v7843_v37 = vpop.xlane.xlu0 %7842 }
0x3cea   :  { %13874 = vpow2.f32 %v7846_v24  ;;  %v7845_v38 = vsub.f32 %v7837_v14, %v7843_v37 }
0x3cec   :  { %v7848_v39 = vmul.f32 1.442695, %v7845_v38 }
0x3cee   :  { %13876 = vpow2.f32 %v7848_v39 }
0x3cf7   :  { %v13875_v40 = vpop.eup %13874 }
0x3cf8   :  { %v7850_v42 = vsel %vm2269_vm11, %v13875_v40, 0.0 }
0x3cf9   :  { %7851 = vadd.xlane.f32.xlu1 %v7850_v42 }
0x3cfb   :  { %v13877_v5 = vpop.eup %13876 }
0x3cfc   :  { %v7853_v43 = vsel %vm2273_vm10, %v13877_v5, 0.0 }
0x3cfd   :  { %7854 = vadd.xlane.f32.xlu0 %v7853_v43  ;;  %v12102_v43 = vld [vmem:[%s16179_s5 + $0x30] sm:$0xff] }
0x3d0a   :  { %7664 = vrot.lane.b32.xlu1 %v15616_v10, %s14443_s7 }
0x3d0d   :  { %v7659_v9 = vpop.xlane.xlu0 %7658 }
0x3d0e   :  { %8111 = vrot.lane.b32.xlu1 %v15616_v10, %s14450_s8 }
0x3d0f   :  { %v7656_v45 = vpop.xlane.xlu1 %7655 }
0x3d10   :  { %13878 = vrcp.f32 %v7656_v45 }
0x3d11   :  { %13880 = vrcp.f32 %v7659_v9 }
0x3d12   :  { %8107 = vrot.lane.b32.xlu1 %v15626_v57, %s14450_s8 }
0x3d13   :  { %7860 = vrot.lane.b32.xlu0 %v15616_v10, %s14446_s26 }
0x3d17   :  { %8109 = vrot.lane.b32.xlu0 %v15624_v17, %s14450_s8 }
0x3d1d   :  { %v13879_v60 = vpop.eup %13878 }
0x3d1e   :  { %v7661_v47 = vmul.f32 %v13879_v60, %v13873_v59  ;;  %v13881_v58 = vpop.eup %13880 }
0x3d1f   :  { %v7663_v1 = vmul.f32 %v13881_v58, %v13871_v34 }
0x3d20   :  { %13301 = vmatprep.mubr.msk.f32.mxu1 %vm2269_vm11, %v7661_v47 }
0x3d82   :  { %v7852_v18 = vpop.xlane.xlu1 %7851 }
0x3d83   :  { %13882 = vrcp.f32 %v7852_v18 }
0x3d86   :  { %v7665_v53 = vpop.permute.xlu1 %7664  ;;  %v7855_v61 = vpop.xlane.xlu0 %7854 }
0x3d87   :  { %13884 = vrcp.f32 %v7855_v61  ;;  %13299 = vmatprep.subr.msk.mxu1 %vm2301_vm12, %v7665_v53 }
0x3d88   :  { %13300 = vmatpush3.msk.msra.mxu1 %vm2301_vm12, %v7665_v53 }
0x3d89   :  { %13302 = vmatmul.mubr.msk.f32.vlgmr.msra.gmra.mxu1 %vm2269_vm11, %v7663_v1 }
0x3d8a   :  { %v8112_v32 = vpop.permute.xlu1 %8111  ;;  %v7861_v3 = vpop.permute.xlu0 %7860 }
0x3d8b   :  { %13309 = vmatprep.subr.msk.mxu1 %vm2301_vm12, %v7861_v3  ;;  %13324 = vmatprep.subr.msk.mxu0 %vm818_vm5, %v8112_v32 }
0x3d8c   :  { %13310 = vmatpush3.msk.msra.mxu1 %vm2301_vm12, %v7861_v3 }
0x3d8d   :  { %13319 = vmatprep.subr.mxu1 %v12100_v19 }
0x3d8e   :  { %v8108_v50 = vpop.permute.xlu1 %8107  ;;  %v8110_v25 = vpop.permute.xlu0 %8109 }
0x3d90   :  { %v13883_v7 = vpop.eup %13882 }
0x3d91   :  { %v7857_v46 = vmul.f32 %v13883_v7, %v13875_v40 }
0x3d93   :  { %13311 = vmatprep.mubr.msk.f32.mxu1 %vm2269_vm11, %v7857_v46 }
0x3d94   :  { %v13885_v11 = vpop.eup %13884 }
0x3d95   :  { %v7859_v15 = vmul.f32 %v13885_v11, %v13877_v5 }
0x3d97   :  { %13312 = vmatmul.mubr.msk.f32.vlgmr.msra.gmra.mxu1 %vm2269_vm11, %v7859_v15 }
0x3d98   :  { %13320 = vmatpush3.msra.mxu1 %v12100_v19 }
0x3e49   :  { %v13303_v62 = vpop.f32.mrf.mxu1 }
0x3e4b   :  { %v7740_v20 = vpop.f32.mrf.mxu1 }
0x3e4c   :  { %13321 = vmatprep.mubr.msk.f32.mxu1 %vm818_vm5, %v7740_v20 }
0x3e4d   :  { %13322 = vmatmul.mubr.msk.f32.vlgmr.msra.gmra.mxu1 %vm818_vm5, %v13303_v62 }
0x3e57   :  { %v13313_v13 = vpop.f32.mrf.mxu1 }
0x3e59   :  { %v7936_v22 = vpop.f32.mrf.mxu1 }
0x3e5a   :  { %13316 = vmatprep.mubr.msk.f32.mxu0 %vm818_vm5, %v7936_v22 }
0x3e5b   :  { %13317 = vmatmul.mubr.msk.f32.vlgmr.msra.gmra.mxu0 %vm818_vm5, %v13313_v13 }
0x3e5c   :  { %13325 = vmatpush3.xpose.msk.msra.mxu0 %vm818_vm5, %v8112_v32  ;;  %13326 = vmatprep.mubr.msk.f32.mxu0 %vm818_vm5, %v8108_v50 }
0x3e5d   :  { %13334 = vmatprep.subr.mxu0 %v12102_v43 }
0x3e5f   :  { %13327 = vmatmul.mubr.msk.f32.vlgmr.msra.gmra.mxu0 %vm818_vm5, %v8110_v25 }
0x3e60   :  { %13335 = vmatpush3.msra.mxu0 %v12102_v43  ;;  %v12106_v43 = vld [vmem:[%s16180_s13 + $0x30] sm:$0xff] }
0x3f0d   :  { %v13323_v51 = vpop.f32.mrf.mxu1 }
0x3f0f   :  { %v8098_v54 = vpop.f32.mrf.mxu1 }
0x3f1b   :  { %v13318_v44 = vpop.f32.mrf.mxu0 }
0x3f1c   :  { %v15676_v6 = vadd.f32 %v13323_v51, %v13318_v44 }
0x3f1d   :  { %v15678_v26 = vpop.f32.mrf.mxu0 }
0x3f1f   :  { %v13328_v63 = vpop.f32.mrf.mxu0 }
0x3f20   :  { %v8195_v27 = vmul.f32 0.35355338, %v13328_v63 }
0x3f21   :  { %v8185_v14 = vpop.f32.mrf.mxu0 }
0x3f22   :  { %v8194_v55 = vmul.f32 0.35355338, %v8185_v14  ;;  %v8199_v28 = vsel %vm2273_vm10, %v8195_v27, -inf }
0x3f23   :  { %8200 = vmax.xlane.f32.xlu0 %v8199_v28 }
0x3f24   :  { %v8196_v23 = vsel %vm2269_vm11, %v8194_v55, -inf }
0x3f25   :  { %8197 = vmax.xlane.f32.xlu1 %v8196_v23  ;;  %v8099_v23 = vadd.f32 %v8098_v54, %v15678_v26  ;;  %v12105_v54 = vld [vmem:[%s16180_s13 + $0x28] sm:$0xff] }
0x3fac   :  { %v8201_v29 = vpop.xlane.xlu0 %8200 }
0x3fad   :  { %v8203_v30 = vsub.f32 %v8195_v27, %v8201_v29 }
0x3fae   :  { %v8198_v31 = vpop.xlane.xlu1 %8197 }
0x3faf   :  { %v8206_v8 = vmul.f32 1.442695, %v8203_v30  ;;  %v8202_v33 = vsub.f32 %v8194_v55, %v8198_v31 }
0x3fb1   :  { %13886 = vpow2.f32 %v8206_v8  ;;  %v8204_v34 = vmul.f32 1.442695, %v8202_v33  ;;  %v12224_v8 = vld [vmem:[#allocation11 + $0x1] ss:$0 sm:$0xff] }
0x3fb3   :  { %13888 = vpow2.f32 %v8204_v34 }
0x3fbe   :  { %v13887_v21 = vpop.eup %13886 }
0x3fbf   :  { %v8211_v59 = vsel %vm2273_vm10, %v13887_v21, 0.0 }
0x3fc0   :  { %v13889_v35 = vpop.eup %13888  ;;  %8212 = vadd.xlane.f32.xlu1 %v8211_v59 }
0x3fc1   :  { %v8208_v36 = vsel %vm2269_vm11, %v13889_v35, 0.0 }
0x3fc2   :  { %8209 = vadd.xlane.f32.xlu0 %v8208_v36 }
0x3fd1   :  { %8390 = vrot.lane.b32.xlu1 %v15616_v10, %s14452_s29 }
0x3fd5   :  { %8386 = vrot.lane.b32.xlu1 %v15626_v57, %s14452_s29 }
0x3fd8   :  { %8218 = vrot.lane.b32.xlu0 %v15616_v10, %s14449_s1 }
0x3fdc   :  { %8388 = vrot.lane.b32.xlu0 %v15624_v17, %s14452_s29 }
0x4049   :  { %v8213_v12 = vpop.xlane.xlu1 %8212 }
0x404a   :  { %13890 = vrcp.f32 %v8213_v12 }
0x404b   :  { %v8210_v24 = vpop.xlane.xlu0 %8209 }
0x404c   :  { %13892 = vrcp.f32 %v8210_v24 }
0x404d   :  { %v8391_v38 = vpop.permute.xlu1 %8390 }
0x404f   :  { %v8219_v37 = vpop.permute.xlu0 %8218 }
0x4050   :  { %13329 = vmatprep.subr.msk.mxu1 %vm2301_vm12, %v8219_v37 }
0x4051   :  { %13330 = vmatpush3.msk.msra.mxu1 %vm2301_vm12, %v8219_v37  ;;  %v8387_v17 = vpop.permute.xlu1 %8386 }
0x4052   :  { %13339 = vmatprep.subr.msk.mxu1 %vm818_vm5, %v8391_v38 }
0x4053   :  { %v8389_v5 = vpop.permute.xlu0 %8388 }
0x4057   :  { %v13891_v57 = vpop.eup %13890 }
0x4058   :  { %v8217_v42 = vmul.f32 %v13891_v57, %v13887_v21 }
0x4059   :  { %v13893_v39 = vpop.eup %13892 }
0x405a   :  { %v8215_v40 = vmul.f32 %v13893_v39, %v13889_v35 }
0x405c   :  { %13331 = vmatprep.mubr.msk.f32.mxu1 %vm2269_vm11, %v8215_v40 }
0x405d   :  { %13332 = vmatmul.mubr.msk.f32.vlgmr.msra.gmra.mxu1 %vm2269_vm11, %v8217_v42 }
0x405e   :  { %13340 = vmatpush3.xpose.msk.msra.mxu1 %vm818_vm5, %v8391_v38  ;;  %13341 = vmatprep.mubr.msk.f32.mxu1 %vm818_vm5, %v8387_v17 }
0x4061   :  { %13342 = vmatmul.mubr.msk.f32.vlgmr.msra.gmra.mxu1 %vm818_vm5, %v8389_v5  ;;  %v12107_v5 = vld [vmem:[%s16180_s13 + $0x38] sm:$0xff] }
0x411d   :  { %v13333_v45 = vpop.f32.mrf.mxu1 }
0x411f   :  { %v8294_v60 = vpop.f32.mrf.mxu1 }
0x4120   :  { %13336 = vmatprep.mubr.msk.f32.mxu0 %vm818_vm5, %v8294_v60  ;;  %v12115_v60 = vld [vmem:[%s16181_s15 + $0x78] sm:$0xff] }
0x4121   :  { %13337 = vmatmul.mubr.msk.f32.vlgmr.msra.gmra.mxu0 %vm818_vm5, %v13333_v45  ;;  %v13343_v47 = vpop.f32.mrf.mxu1  ;;  %v12104_v45 = vld [vmem:[%s16180_s13 + $0x20] sm:$0xff] }
0x4122   :  { %v8474_v9 = vmul.f32 0.35355338, %v13343_v47  ;;  %v12114_v47 = vld [vmem:[%s16181_s15 + $0x70] sm:$0xff] }
0x4123   :  { %v8464_v18 = vpop.f32.mrf.mxu1 }
0x4124   :  { %v8473_v58 = vmul.f32 0.35355338, %v8464_v18  ;;  %v8478_v53 = vsel %vm2273_vm10, %v8474_v9, -inf  ;;  %v12112_v18 = vld [vmem:[%s16181_s15 + $0x60] sm:$0xff] }
0x4125   :  { %8479 = vmax.xlane.f32.xlu0 %v8478_v53 }
0x4126   :  { %v8475_v61 = vsel %vm2269_vm11, %v8473_v58, -inf }
0x4127   :  { %8476 = vmax.xlane.f32.xlu1 %v8475_v61 }
0x41ae   :  { %v8480_v1 = vpop.xlane.xlu0 %8479 }
0x41af   :  { %v8482_v32 = vsub.f32 %v8474_v9, %v8480_v1  ;;  %v12113_v9 = vld [vmem:[%s16181_s15 + $0x68] sm:$0xff] }
0x41b0   :  { %v8477_v3 = vpop.xlane.xlu1 %8476 }
0x41b1   :  { %v8485_v7 = vmul.f32 1.442695, %v8482_v32  ;;  %v8481_v46 = vsub.f32 %v8473_v58, %v8477_v3 }
0x41b3   :  { %13894 = vpow2.f32 %v8485_v7  ;;  %v8483_v11 = vmul.f32 1.442695, %v8481_v46  ;;  %v8704_v7 = vrot.slane %v15599_v49, %v15075_v4  ;;  %v12120_v49 = vld [vmem:[%s16182_s23 + $0x30] sm:$0xff] }
0x41b5   :  { %13896 = vpow2.f32 %v8483_v11 }
0x41c0   :  { %v13895_v15 = vpop.eup %13894 }
0x41c1   :  { %v8490_v19 = vsel %vm2273_vm10, %v13895_v15, 0.0 }
0x41c2   :  { %v13897_v62 = vpop.eup %13896  ;;  %8491 = vadd.xlane.f32.xlu1 %v8490_v19 }
0x41c3   :  { %v8487_v20 = vsel %vm2269_vm11, %v13897_v62, 0.0 }
0x41c4   :  { %8488 = vadd.xlane.f32.xlu0 %v8487_v20 }
0x41da   :  { %8497 = vrot.lane.b32.xlu0 %v15616_v10, %s14451_s2  ;;  %v12103_v10 = vld [vmem:[%s16179_s5 + $0x38] sm:$0xff] }
0x41db   :  { %13349 = vmatprep.subr.mxu1 %v12103_v10 }
0x41dc   :  { %13350 = vmatpush3.msra.mxu1 %v12103_v10  ;;  %v12225_v10 = vld [vmem:[#allocation13 + $0x1] ss:$0 sm:$0xff] }
0x41dd   :  { %13365 = vmatprep.subr.mxu1 %v12115_v60 }
0x41e1   :  { %v13338_v13 = vpop.f32.mrf.mxu0 }
0x41e2   :  { %v8385_v22 = vadd.f32 %v13338_v13, %v15676_v6 }
0x41e3   :  { %v8375_v6 = vpop.f32.mrf.mxu0 }
0x41e4   :  { %v8384_v30 = vadd.f32 %v8375_v6, %v8099_v23 }
0x424b   :  { %v8492_v50 = vpop.xlane.xlu1 %8491 }
0x424c   :  { %13898 = vrcp.f32 %v8492_v50 }
0x424d   :  { %v8489_v25 = vpop.xlane.xlu0 %8488 }
0x424e   :  { %13900 = vrcp.f32 %v8489_v25  ;;  %v12121_v25 = vld [vmem:[%s16182_s23 + $0x38] sm:$0xff] }
0x4251   :  { %v8498_v51 = vpop.permute.xlu0 %8497 }
0x4252   :  { %13344 = vmatprep.subr.msk.mxu0 %vm2301_vm12, %v8498_v51 }
0x4253   :  { %13345 = vmatpush3.msk.msra.mxu0 %vm2301_vm12, %v8498_v51  ;;  %v12118_v51 = vld [vmem:[%s16182_s23 + $0x20] sm:$0xff] }
0x4254   :  { %13354 = vmatprep.subr.mxu0 %v12107_v5 }
0x4259   :  { %v13899_v44 = vpop.eup %13898 }
0x425a   :  { %v8496_v14 = vmul.f32 %v13899_v44, %v13895_v15  ;;  %v8710_v15 = vrot.slane %v15604_v52, %v15075_v4  ;;  %v12119_v52 = vld [vmem:[%s16182_s23 + $0x28] sm:$0xff]  ;;  %v12111_v44 = vld [vmem:[%s16181_s15 + $0x58] sm:$0xff] }
0x425b   :  { %v13901_v63 = vpop.eup %13900 }
0x425c   :  { %v8494_v27 = vmul.f32 %v13901_v63, %v13897_v62  ;;  %v12110_v63 = vld [vmem:[%s16181_s15 + $0x50] sm:$0xff] }
0x425e   :  { %13346 = vmatprep.mubr.msk.f32.mxu0 %vm2269_vm11, %v8494_v27  ;;  %v12109_v27 = vld [vmem:[%s16181_s15 + $0x48] sm:$0xff] }
0x425f   :  { %13347 = vmatmul.mubr.msk.f32.vlgmr.msra.gmra.mxu0 %vm2269_vm11, %v8496_v14  ;;  %v12108_v14 = vld [vmem:[%s16181_s15 + $0x40] sm:$0xff] }
0x4260   :  { %13355 = vmatpush3.msra.mxu0 %v12107_v5 }
0x4261   :  { %13356 = vmatprep.subr.mxu0 %v12106_v43 }
0x4262   :  { %13357 = vmatpush3.msra.mxu0 %v12106_v43 }
0x4263   :  { %13358 = vmatprep.subr.mxu0 %v12105_v54 }
0x4264   :  { %13359 = vmatpush3.msra.mxu0 %v12105_v54 }
0x4265   :  { %13360 = vmatprep.subr.mxu0 %v12104_v45 }
0x4266   :  { %13361 = vmatpush3.msra.mxu0 %v12104_v45 }
0x4267   :  { %13384 = vmatprep.subr.mxu0 %v14441_v0 }
0x431f   :  { %v13348_v55 = vpop.f32.mrf.mxu0 }
0x4321   :  { %v8573_v28 = vpop.f32.mrf.mxu0 }
0x4322   :  { %13351 = vmatprep.mubr.msk.f32.mxu1 %vm818_vm5, %v8573_v28 }
0x4323   :  { %13352 = vmatmul.mubr.msk.f32.vlgmr.msra.gmra.mxu1 %vm818_vm5, %v13348_v55 }
0x4324   :  { %13366 = vmatpush3.msra.mxu1 %v12115_v60 }
0x4325   :  { %13367 = vmatprep.subr.mxu1 %v12114_v47 }
0x4326   :  { %13368 = vmatpush3.msra.mxu1 %v12114_v47 }
0x4327   :  { %13369 = vmatprep.subr.mxu1 %v12113_v9 }
0x4328   :  { %13370 = vmatpush3.msra.mxu1 %v12113_v9 }
0x4329   :  { %13371 = vmatprep.subr.mxu1 %v12112_v18 }
0x432a   :  { %13372 = vmatpush3.msra.mxu1 %v12112_v18 }
0x432b   :  { %13373 = vmatprep.subr.mxu1 %v12111_v44 }
0x432c   :  { %13374 = vmatpush3.msra.mxu1 %v12111_v44 }
0x432d   :  { %13375 = vmatprep.subr.mxu1 %v12110_v63 }
0x432e   :  { %13376 = vmatpush3.msra.mxu1 %v12110_v63 }
0x432f   :  { %13377 = vmatprep.subr.mxu1 %v12109_v27 }
0x4330   :  { %13378 = vmatpush3.msra.mxu1 %v12109_v27 }
0x4331   :  { %13379 = vmatprep.subr.mxu1 %v12108_v14 }
0x4332   :  { %13380 = vmatpush3.msra.mxu1 %v12108_v14 }
0x4333   :  { %13400 = vmatprep.subr.mxu1 %v14441_v0 }
0x43e3   :  { %v13353_v29 = vpop.f32.mrf.mxu1 }
0x43e4   :  { %v8664_v31 = vadd.f32 %v13353_v29, %v8385_v22 }
0x43e5   :  { %v8654_v33 = vpop.f32.mrf.mxu1 }
0x43e6   :  { %v8663_v34 = vadd.f32 %v8654_v33, %v8384_v30  ;;  %v8672_v21 = vadd.f32 %v12224_v8, %v8664_v31  ;;  %v12231_v31 = vld [vmem:[#allocation16 + $0x1] ss:$0 sm:$0xff] }
0x43e8   :  { %v8671_v59 = vadd.f32 %v12224_v8, %v8663_v34  ;;  %v8674_v12 = vadd.f32 %v8672_v21, %v15610_v2 }
0x43ea   :  { %v8673_v35 = vadd.f32 %v8671_v59, %v15608_v41  ;;  %v8678_v24 = vsel %vm1967_vm9, %v8674_v12, 0.0 }
0x43ec   :  { %v8675_v36 = vsel %vm429_vm0, %v8673_v35, 0.0 }
0x43ed   :  { %8676 = vadd.xlane.f32.xlu1 %v8675_v36 }
0x43f1   :  { %8679 = vadd.xlane.f32.xlu1 %v8678_v24 }
0x4476   :  { %v8677_v26 = vpop.xlane.xlu1 %8676 }
0x4477   :  { %v8681_v37 = vmul.f32 0.03125, %v8677_v26 }
0x4479   :  { %v8683_v38 = vsub.f32 %v8673_v35, %v8681_v37 }
0x447a   :  { %v8680_v57 = vpop.xlane.xlu1 %8679 }
0x447b   :  { %v8682_v39 = vmul.f32 0.03125, %v8680_v57  ;;  %v8685_v40 = vmul.f32 %v8683_v38, %v8683_v38 }
0x447d   :  { %v8684_v42 = vsub.f32 %v8674_v12, %v8682_v39  ;;  %v8687_v41 = vsel %vm429_vm0, %v8685_v40, 0.0 }
0x447e   :  { %8688 = vadd.xlane.f32.xlu1 %v8687_v41 }
0x447f   :  { %v8686_v17 = vmul.f32 %v8684_v42, %v8684_v42 }
0x4481   :  { %v8690_v2 = vsel %vm1967_vm9, %v8686_v17, 0.0 }
0x4482   :  { %8691 = vadd.xlane.f32.xlu1 %v8690_v2 }
0x4507   :  { %v8689_v58 = vpop.xlane.xlu1 %8688 }
0x4508   :  { %v8693_v53 = vmul.f32 0.03125, %v8689_v58 }
0x450a   :  { %v8695_v61 = vadd.f32 1e-05, %v8693_v53 }
0x450b   :  { %v8692_v1 = vpop.xlane.xlu1 %8691 }
0x450c   :  { %13902 = vrsqrt.f32 %v8695_v61  ;;  %v8694_v32 = vmul.f32 0.03125, %v8692_v1 }
0x450e   :  { %v8696_v3 = vadd.f32 1e-05, %v8694_v32 }
0x4510   :  { %13904 = vrsqrt.f32 %v8696_v3  ;;  %v12122_v3 = vld [vmem:[%s16183_s16 + $0x20] sm:$0xff] }
0x4519   :  { %v13903_v46 = vpop.eup %13902 }
0x451a   :  { %v8699_v11 = vmul.f32 %v13903_v46, %v8683_v38 }
0x451c   :  { %v8705_v19 = vmul.f32 %v8704_v7, %v8699_v11 }
0x451d   :  { %v13905_v62 = vpop.eup %13904 }
0x451e   :  { %v8700_v20 = vmul.f32 %v13905_v62, %v8684_v42  ;;  %v15737_v13 = vadd.f32 %v8710_v15, %v8705_v19 }
0x4520   :  { %v8706_v22 = vmul.f32 %v8704_v7, %v8700_v20  ;;  %13362 = vmatprep.mubr.msk.f32.mxu0 %vm429_vm0, %v15737_v13  ;;  %v12123_v7 = vld [vmem:[%s16183_s16 + $0x28] sm:$0xff] }
0x4522   :  { %v15741_v50 = vadd.f32 %v8710_v15, %v8706_v22 }
0x4524   :  { %13363 = vmatmul.mubr.msk.f32.vlgmr.msra.gmra.mxu0 %vm429_vm0, %v15741_v50 }
0x4525   :  { %13385 = vmatpush3.msra.mxu0 %v12121_v25  ;;  %13392 = vmatprep.mubr.msk.f32.mxu0 %vm14445_vm2, %v14441_v0 }
0x4526   :  { %13386 = vmatprep.subr.mxu0 %v14441_v0 }
0x4527   :  { %13387 = vmatpush3.msra.mxu0 %v12120_v49 }
0x4528   :  { %13388 = vmatprep.subr.mxu0 %v14441_v0 }
0x4529   :  { %13389 = vmatpush3.msra.mxu0 %v12119_v52 }
0x452a   :  { %13390 = vmatprep.subr.mxu0 %v14441_v0 }
0x452b   :  { %13391 = vmatpush3.msra.mxu0 %v12118_v51 }
0x452c   :  { %13393 = vmatmul.mubr.msk.f32.vlgmr.msra.gmra.mxu0 %vm429_vm0, %v15594_v48  ;;  %13395 = vmatprep.subr.mxu0 %v14441_v0 }
0x452d   :  { %13397 = vmatprep.mubr.msk.f32.mxu0 %vm14445_vm2, %v14441_v0 }
0x45e4   :  { %v13364_v6 = vpop.f32.mrf.mxu0 }
0x45e5   :  { %v8797_v55 = vadd.f32 %v13364_v6, %v12225_v10 }
0x45e6   :  { %v8791_v28 = vpop.f32.mrf.mxu0 }
0x45e7   :  { %v8792_v23 = vadd.f32 %v12225_v10, %v8791_v28  ;;  %v8801_v30 = vmax.f32 %v8797_v55, 0.0 }
0x45e9   :  { %v8800_v29 = vmax.f32 %v8792_v23, 0.0 }
0x45eb   :  { %13381 = vmatprep.mubr.msk.f32.mxu1 %vm469_vm3, %v8800_v29 }
0x45ec   :  { %v9001_v8 = vpop.f32.mrf.mxu0  ;;  %13382 = vmatmul.mubr.msk.f32.vlgmr.msra.gmra.mxu1 %vm469_vm3, %v8801_v30 }
0x45ed   :  { %v15766_v33 = vadd.f32 %v12231_v31, %v9001_v8  ;;  %13402 = vmatprep.mubr.msk.f32.mxu1 %vm14445_vm2, %v14441_v0 }
0x45ee   :  { %v13394_v34 = vpop.f32.mrf.mxu0 }
0x45ef   :  { %9173 = vrot.lane.b32.xlu0 %v15766_v33, %s14446_s26  ;;  %9006 = vrot.lane.b32.xlu1 %v15766_v33, %s14443_s7 }
0x45f3   :  { %9171 = vrot.lane.b32.xlu0 %v15766_v33, %s14447_s28 }
0x4661   :  { %v9007_v21 = vpop.permute.xlu1 %9006  ;;  %v9174_v59 = vpop.permute.xlu0 %9173 }
0x4662   :  { %13396 = vmatpush3.xpose.msk.msra.mxu0 %vm818_vm5, %v9007_v21 }
0x4663   :  { %13405 = vmatprep.subr.mxu0 %v14441_v0 }
0x4665   :  { %13398 = vmatmul.mubr.msk.f32.vlgmr.msra.gmra.mxu0 %vm818_vm5, %v15766_v33  ;;  %v9172_v35 = vpop.permute.xlu0 %9171 }
0x4666   :  { %13406 = vmatpush3.xpose.msk.msra.mxu0 %vm818_vm5, %v9174_v59  ;;  %13407 = vmatprep.mubr.msk.f32.mxu0 %vm14445_vm2, %v14441_v0 }
0x4667   :  { %13415 = vmatprep.subr.mxu0 %v14441_v0 }
0x4669   :  { %13408 = vmatmul.mubr.msk.f32.vlgmr.msra.gmra.mxu0 %vm818_vm5, %v9172_v35 }
0x466a   :  { %13417 = vmatprep.mubr.msk.f32.mxu0 %vm14445_vm2, %v14441_v0  ;;  %13416 = vmatpush3.msra.mxu0 %v12123_v7  ;;  %v12128_v7 = vld [vmem:[%s16184_s22 + $0x30] sm:$0xff] }
0x466b   :  { %13425 = vmatprep.subr.mxu0 %v14441_v0 }
0x46ac   :  { %v15813_v46 = vpop.f32.mrf.mxu1 }
0x46ae   :  { %v15815_v11 = vpop.f32.mrf.mxu1 }
0x4725   :  { %v9078_v36 = vpop.f32.mrf.mxu0 }
0x4726   :  { %v9082_v12 = vmul.f32 0.35355338, %v9078_v36  ;;  %v12124_v36 = vld [vmem:[%s16183_s16 + $0x30] sm:$0xff] }
0x4727   :  { %v13399_v24 = vpop.f32.mrf.mxu0 }
0x4728   :  { %v9083_v26 = vsel %vm3713_vm13, %v9082_v12, -inf }
0x4729   :  { %9084 = vmax.xlane.f32.xlu0 %v9083_v26  ;;  %v9245_v37 = vpop.f32.mrf.mxu0 }
0x472a   :  { %v9249_v38 = vmul.f32 0.35355338, %v9245_v37 }
0x472b   :  { %v13409_v57 = vpop.f32.mrf.mxu0 }
0x472c   :  { %v9250_v39 = vsel %vm3713_vm13, %v9249_v38, -inf }
0x472d   :  { %9251 = vmax.xlane.f32.xlu1 %v9250_v39 }
0x473e   :  { %9261 = vrot.lane.b32.xlu1 %v15766_v33, %s14448_s20 }
0x4742   :  { %9486 = vrot.lane.b32.xlu1 %v15766_v33, %s14449_s1 }
0x47b2   :  { %v9085_v40 = vpop.xlane.xlu0 %9084 }
0x47b3   :  { %v9086_v42 = vsub.f32 %v9082_v12, %v9085_v40 }
0x47b5   :  { %v9087_v41 = vmul.f32 1.442695, %v9086_v42 }
0x47b6   :  { %v9252_v17 = vpop.xlane.xlu1 %9251 }
0x47b7   :  { %13906 = vpow2.f32 %v9087_v41  ;;  %v9253_v2 = vsub.f32 %v9249_v38, %v9252_v17  ;;  %v12228_v17 = vld [vmem:[#allocation14 + $0x1] ss:$0 sm:$0xff] }
0x47b9   :  { %v9254_v5 = vmul.f32 1.442695, %v9253_v2  ;;  %v8881_v2 = vadd.f32 %v12228_v17, %v15815_v11  ;;  %v12126_v11 = vld [vmem:[%s16184_s22 + $0x20] sm:$0xff] }
0x47ba   :  { %v9262_v61 = vpop.permute.xlu1 %9261 }
0x47bb   :  { %13908 = vpow2.f32 %v9254_v5 }
0x47be   :  { %v9487_v20 = vpop.permute.xlu1 %9486 }
0x47c4   :  { %v13907_v43 = vpop.eup %13906 }
0x47c5   :  { %v9089_v54 = vsel %vm3713_vm13, %v13907_v43, 0.0 }
0x47c6   :  { %9090 = vadd.xlane.f32.xlu0 %v9089_v54  ;;  %v8889_v54 = vadd.f32 %v8881_v2, %v15737_v13 }
0x47c8   :  { %v13909_v45 = vpop.eup %13908 }
0x47c9   :  { %v9256_v60 = vsel %vm3713_vm13, %v13909_v45, 0.0 }
0x47ca   :  { %9257 = vadd.xlane.f32.xlu0 %v9256_v60  ;;  %v8891_v60 = vsel %vm429_vm0, %v8889_v54, 0.0 }
0x47e0   :  { %9094 = vrot.lane.b32.xlu0 %v15766_v33, %s14444_s30 }
0x47e4   :  { %9484 = vrot.lane.b32.xlu0 %v15766_v33, %s14450_s8 }
0x484f   :  { %v9091_v47 = vpop.xlane.xlu0 %9090 }
0x4850   :  { %13910 = vrcp.f32 %v9091_v47 }
0x4853   :  { %v9258_v9 = vpop.xlane.xlu0 %9257 }
0x4854   :  { %13912 = vrcp.f32 %v9258_v9  ;;  %v12125_v9 = vld [vmem:[%s16183_s16 + $0x38] sm:$0xff] }
0x4857   :  { %v9095_v18 = vpop.permute.xlu0 %9094 }
0x4858   :  { %13401 = vmatpush3.msk.msra.mxu1 %vm2301_vm12, %v9095_v18 }
0x4859   :  { %13410 = vmatprep.subr.mxu1 %v14441_v0 }
0x485b   :  { %v9485_v25 = vpop.permute.xlu0 %9484 }
0x485d   :  { %v13911_v58 = vpop.eup %13910 }
0x485e   :  { %v9093_v53 = vmul.f32 %v13911_v58, %v13907_v43  ;;  %v8886_v43 = vadd.f32 %v15813_v46, %v12228_v17  ;;  %v12127_v46 = vld [vmem:[%s16184_s22 + $0x28] sm:$0xff] }
0x4860   :  { %13403 = vmatmul.mubr.msk.f32.vlgmr.msra.gmra.mxu1 %vm2269_vm11, %v9093_v53 }
0x4861   :  { %v13913_v1 = vpop.eup %13912  ;;  %13411 = vmatpush3.msk.msra.mxu1 %vm2301_vm12, %v9262_v61  ;;  %13412 = vmatprep.mubr.msk.f32.mxu1 %vm14445_vm2, %v14441_v0 }
0x4862   :  { %v9260_v32 = vmul.f32 %v13913_v1, %v13909_v45  ;;  %13420 = vmatprep.subr.mxu1 %v14441_v0  ;;  %v8890_v45 = vadd.f32 %v8886_v43, %v15741_v50 }
0x4864   :  { %13413 = vmatmul.mubr.msk.f32.vlgmr.msra.gmra.mxu1 %vm2269_vm11, %v9260_v32  ;;  %v8894_v47 = vsel %vm1967_vm9, %v8890_v45, 0.0 }
0x4865   :  { %13422 = vmatprep.mubr.msk.f32.mxu1 %vm14445_vm2, %v14441_v0  ;;  %13421 = vmatpush3.msra.mxu1 %v12122_v3  ;;  %v12129_v3 = vld [vmem:[%s16184_s22 + $0x38] sm:$0xff] }
0x4866   :  { %13430 = vmatprep.subr.mxu1 %v14441_v0 }
0x4920   :  { %v9167_v15 = vpop.f32.mrf.mxu1 }
0x4921   :  { %13423 = vmatmul.mubr.msk.f32.vlgmr.msra.gmra.mxu1 %vm818_vm5, %v9167_v15 }
0x4922   :  { %v13404_v19 = vpop.f32.mrf.mxu1  ;;  %13432 = vmatprep.mubr.msk.f32.mxu1 %vm14445_vm2, %v14441_v0 }
0x4924   :  { %v9334_v62 = vpop.f32.mrf.mxu1 }
0x4925   :  { %13418 = vmatmul.mubr.msk.f32.vlgmr.msra.gmra.mxu0 %vm818_vm5, %v9334_v62 }
0x4926   :  { %13426 = vmatpush3.xpose.msk.msra.mxu0 %vm818_vm5, %v9487_v20  ;;  %v13414_v22 = vpop.f32.mrf.mxu1  ;;  %13427 = vmatprep.mubr.msk.f32.mxu0 %vm14445_vm2, %v14441_v0  ;;  %v12253_v20 = vld [vmem:[#allocation17 + $0x1] ss:$0 sm:$0xff] }
0x4927   :  { %13435 = vmatprep.subr.mxu0 %v14441_v0 }
0x4929   :  { %13428 = vmatmul.mubr.msk.f32.vlgmr.msra.gmra.mxu0 %vm818_vm5, %v9485_v25 }
0x492a   :  { %13437 = vmatprep.mubr.msk.f32.mxu0 %vm14445_vm2, %v14441_v0  ;;  %13436 = vmatpush3.msra.mxu0 %v12124_v36 }
0x492b   :  { %13445 = vmatprep.subr.mxu0 %v14441_v0 }
0x49e1   :  { %v9480_v49 = vpop.f32.mrf.mxu1 }
0x49e3   :  { %v13424_v52 = vpop.f32.mrf.mxu1 }
0x49e5   :  { %v9407_v51 = vpop.f32.mrf.mxu0 }
0x49e6   :  { %v15828_v44 = vadd.f32 %v9480_v49, %v9407_v51 }
0x49e7   :  { %v13419_v63 = vpop.f32.mrf.mxu0 }
0x49e9   :  { %v9558_v27 = vpop.f32.mrf.mxu0 }
0x49ea   :  { %v9562_v14 = vmul.f32 0.35355338, %v9558_v27 }
0x49eb   :  { %v13429_v10 = vpop.f32.mrf.mxu0 }
0x49ec   :  { %v9563_v6 = vsel %vm3713_vm13, %v9562_v14, -inf }
0x49ed   :  { %9564 = vmax.xlane.f32.xlu1 %v9563_v6 }
0x49fe   :  { %9727 = vrot.lane.b32.xlu1 %v15766_v33, %s14451_s2 }
0x4a02   :  { %9725 = vrot.lane.b32.xlu1 %v15766_v33, %s14452_s29 }
0x4a76   :  { %v9565_v55 = vpop.xlane.xlu1 %9564 }
0x4a77   :  { %v9566_v28 = vsub.f32 %v9562_v14, %v9565_v55 }
0x4a79   :  { %v9567_v23 = vmul.f32 1.442695, %v9566_v28 }
0x4a7a   :  { %v9728_v21 = vpop.permute.xlu1 %9727 }
0x4a7b   :  { %13914 = vpow2.f32 %v9567_v23 }
0x4a7e   :  { %v9726_v35 = vpop.permute.xlu1 %9725 }
0x4a88   :  { %v13915_v29 = vpop.eup %13914 }
0x4a89   :  { %v9569_v30 = vsel %vm3713_vm13, %v13915_v29, 0.0 }
0x4a8a   :  { %9570 = vadd.xlane.f32.xlu0 %v9569_v30 }
0x4aa0   :  { %9574 = vrot.lane.b32.xlu0 %v15766_v33, %s14453_s25 }
0x4b13   :  { %v9571_v31 = vpop.xlane.xlu0 %9570 }
0x4b14   :  { %13916 = vrcp.f32 %v9571_v31 }
0x4b17   :  { %v9575_v8 = vpop.permute.xlu0 %9574 }
0x4b18   :  { %13431 = vmatpush3.msk.msra.mxu1 %vm2301_vm12, %v9575_v8 }
0x4b19   :  { %13440 = vmatprep.subr.mxu1 %v14441_v0 }
0x4b21   :  { %v13917_v34 = vpop.eup %13916 }
0x4b22   :  { %v9573_v59 = vmul.f32 %v13917_v34, %v13915_v29 }
0x4b24   :  { %13433 = vmatmul.mubr.msk.f32.vlgmr.msra.gmra.mxu1 %vm2269_vm11, %v9573_v59 }
0x4b25   :  { %13441 = vmatpush3.xpose.msk.msra.mxu1 %vm818_vm5, %v9728_v21  ;;  %13442 = vmatprep.mubr.msk.f32.mxu1 %vm14445_vm2, %v14441_v0 }
0x4b26   :  { %13450 = vmatprep.subr.mxu1 %v14441_v0 }
0x4b28   :  { %13443 = vmatmul.mubr.msk.f32.vlgmr.msra.gmra.mxu1 %vm818_vm5, %v9726_v35 }
0x4b29   :  { %13452 = vmatprep.mubr.msk.f32.mxu1 %vm14445_vm2, %v14441_v0  ;;  %13451 = vmatpush3.msra.mxu1 %v12125_v9 }
0x4be4   :  { %v9647_v12 = vpop.f32.mrf.mxu1 }
0x4be5   :  { %13438 = vmatmul.mubr.msk.f32.vlgmr.msra.gmra.mxu0 %vm818_vm5, %v9647_v12 }
0x4be6   :  { %v13434_v24 = vpop.f32.mrf.mxu1  ;;  %13447 = vmatprep.mubr.msk.f32.mxu0 %vm14445_vm2, %v14441_v0 }
0x4be8   :  { %v9799_v26 = vpop.f32.mrf.mxu1 }
0x4be9   :  { %v9803_v37 = vmul.f32 0.35355338, %v9799_v26 }
0x4bea   :  { %v13444_v38 = vpop.f32.mrf.mxu1 }
0x4beb   :  { %v9804_v57 = vsel %vm3713_vm13, %v9803_v37, -inf }
0x4bec   :  { %9805 = vmax.xlane.f32.xlu0 %v9804_v57 }
0x4c02   :  { %9815 = vrot.lane.b32.xlu0 %v15766_v33, %s14454_s10 }
0x4c75   :  { %v9806_v39 = vpop.xlane.xlu0 %9805 }
0x4c76   :  { %v9807_v40 = vsub.f32 %v9803_v37, %v9806_v39  ;;  %v13952_v37 = vld [vmem:[%s16177_s6 + $0x4] sm:$0x7] }
0x4c77   :  { %v8920_v38 = vrot.slane %v13952_v37, %v15229_v16 }
0x4c78   :  { %v9808_v42 = vmul.f32 1.442695, %v9807_v40  ;;  %v13953_v40 = vld [vmem:[%s16178_s11 + $0x4] sm:$0x7] }
0x4c79   :  { %v9816_v41 = vpop.permute.xlu0 %9815 }
0x4c7a   :  { %13918 = vpow2.f32 %v9808_v42  ;;  %13446 = vmatpush3.msk.msra.mxu0 %vm2301_vm12, %v9816_v41  ;;  %v8926_v42 = vrot.slane %v13953_v40, %v15229_v16 }
0x4c7b   :  { %13455 = vmatprep.subr.mxu0 %v14441_v0 }
0x4c87   :  { %v13919_v5 = vpop.eup %13918 }
0x4c88   :  { %v9810_v33 = vsel %vm3713_vm13, %v13919_v5, 0.0 }
0x4c89   :  { %9811 = vadd.xlane.f32.xlu1 %v9810_v33 }
0x4c8d   :  { %8892 = vadd.xlane.f32.xlu1 %v8891_v60 }
0x4c91   :  { %8895 = vadd.xlane.f32.xlu1 %v8894_v47 }
0x4ca5   :  { %v9720_v18 = vpop.f32.mrf.mxu0 }
0x4ca6   :  { %v9724_v58 = vadd.f32 %v9720_v18, %v15828_v44  ;;  %v15905_v18 = vld [vmem:[%s16185_s18 + $0x4] sm:$0x7] }
0x4ca7   :  { %v13439_v53 = vpop.f32.mrf.mxu0 }
0x4ca8   :  { %v9990_v53 = vrot.slane %v15905_v18, %v14937_v56 }
0x4d12   :  { %v9812_v13 = vpop.xlane.xlu1 %9811 }
0x4d13   :  { %13920 = vrcp.f32 %v9812_v13 }
0x4d16   :  { %v8893_v15 = vpop.xlane.xlu1 %8892 }
0x4d17   :  { %v8897_v19 = vmul.f32 0.03125, %v8893_v15 }
0x4d19   :  { %v8899_v52 = vsub.f32 %v8889_v54, %v8897_v19  ;;  %v12254_v54 = vld [vmem:[#allocation19 + $0x1] ss:$0 sm:$0xff] }
0x4d1a   :  { %v8896_v62 = vpop.xlane.xlu1 %8895 }
0x4d1b   :  { %v8898_v51 = vmul.f32 0.03125, %v8896_v62  ;;  %v8901_v10 = vmul.f32 %v8899_v52, %v8899_v52 }
0x4d1d   :  { %v8900_v27 = vsub.f32 %v8890_v45, %v8898_v51  ;;  %v8903_v6 = vsel %vm429_vm0, %v8901_v10, 0.0 }
0x4d1f   :  { %v8902_v55 = vmul.f32 %v8900_v27, %v8900_v27 }
0x4d20   :  { %v13921_v61 = vpop.eup %13920 }
0x4d21   :  { %v9814_v50 = vmul.f32 %v13921_v61, %v13919_v5  ;;  %v8906_v28 = vsel %vm1967_vm9, %v8902_v55, 0.0 }
0x4d23   :  { %13448 = vmatmul.mubr.msk.f32.vlgmr.msra.gmra.mxu0 %vm2269_vm11, %v9814_v50 }
0x4d24   :  { %13463 = vmatprep.mubr.msk.f32.mxu0 %vm14445_vm2, %v14441_v0  ;;  %13456 = vmatpush3.msra.mxu0 %v12129_v3 }
0x4d25   :  { %13457 = vmatprep.subr.mxu0 %v14441_v0 }
0x4d26   :  { %13458 = vmatpush3.msra.mxu0 %v12128_v7 }
0x4d27   :  { %13459 = vmatprep.subr.mxu0 %v14441_v0 }
0x4d28   :  { %13460 = vmatpush3.msra.mxu0 %v12127_v46 }
0x4d29   :  { %13461 = vmatprep.subr.mxu0 %v14441_v0 }
0x4d2a   :  { %13462 = vmatpush3.msra.mxu0 %v12126_v11 }
0x4d2b   :  { %13477 = vmatprep.subr.mxu0 %v14441_v0 }
0x4de3   :  { %v9888_v1 = vpop.f32.mrf.mxu0 }
0x4de4   :  { %13453 = vmatmul.mubr.msk.f32.vlgmr.msra.gmra.mxu1 %vm818_vm5, %v9888_v1 }
0x4de5   :  { %v13449_v32 = vpop.f32.mrf.mxu0 }
0x4ea4   :  { %v9961_v22 = vpop.f32.mrf.mxu1 }
0x4ea5   :  { %v9965_v25 = vadd.f32 %v9961_v22, %v9724_v58  ;;  %v15908_v58 = vld [vmem:[%s16186_s4 + $0x4] sm:$0x7] }
0x4ea6   :  { %v13454_v49 = vpop.f32.mrf.mxu1  ;;  %v9995_v50 = vrot.slane %v15908_v58, %v14937_v56 }
0x4ea7   :  { %v9972_v44 = vadd.f32 %v12253_v20, %v9965_v25 }
0x4ea9   :  { %v9973_v63 = vadd.f32 %v9972_v44, %v15594_v48 }
0x4eab   :  { %v9974_v14 = vsel %vm4605_vm14, %v9973_v63, 0.0 }
0x4eac   :  { %9975 = vadd.xlane.f32.xlu1 %v9974_v14 }
0x4eb0   :  { %8904 = vadd.xlane.f32.xlu1 %v8903_v6 }
0x4eb4   :  { %8907 = vadd.xlane.f32.xlu1 %v8906_v28 }
0x4ec5   :  { %10086 = vrot.lane.b32.xlu1 %v12129_v3, %s14443_s7 }
0x4ec9   :  { %10084 = vrot.lane.b32.xlu1 %v12128_v7, %s14443_s7 }
0x4ecd   :  { %10082 = vrot.lane.b32.xlu1 %v12127_v46, %s14443_s7 }
0x4ed1   :  { %10080 = vrot.lane.b32.xlu1 %v12126_v11, %s14443_s7 }
0x4f35   :  { %v9976_v48 = vpop.xlane.xlu1 %9975 }
0x4f36   :  { %v9977_v23 = vmul.f32 0.03125, %v9976_v48 }
0x4f38   :  { %v9978_v29 = vsub.f32 %v9973_v63, %v9977_v23 }
0x4f39   :  { %v8905_v30 = vpop.xlane.xlu1 %8904 }
0x4f3a   :  { %v8909_v31 = vmul.f32 0.03125, %v8905_v30  ;;  %v9979_v8 = vmul.f32 %v9978_v29, %v9978_v29 }
0x4f3c   :  { %v8911_v34 = vadd.f32 1e-05, %v8909_v31  ;;  %v9980_v21 = vsel %vm4605_vm14, %v9979_v8, 0.0  ;;  %v12130_v31 = vld [vmem:[%s16187_s9 + $0x20] sm:$0xff] }
0x4f3d   :  { %9981 = vadd.xlane.f32.xlu0 %v9980_v21  ;;  %v8908_v59 = vpop.xlane.xlu1 %8907 }
0x4f3e   :  { %13922 = vrsqrt.f32 %v8911_v34  ;;  %v8910_v35 = vmul.f32 0.03125, %v8908_v59 }
0x4f40   :  { %v8912_v36 = vadd.f32 1e-05, %v8910_v35 }
0x4f41   :  { %v10087_v12 = vpop.permute.xlu1 %10086 }
0x4f42   :  { %13924 = vrsqrt.f32 %v8912_v36  ;;  %13466 = vmatprep.subr.mxu1 %v10087_v12 }
0x4f43   :  { %13467 = vmatpush3.msra.mxu1 %v10087_v12 }
0x4f45   :  { %v10085_v24 = vpop.permute.xlu1 %10084 }
0x4f46   :  { %13468 = vmatprep.subr.mxu1 %v10085_v24 }
0x4f47   :  { %13469 = vmatpush3.msra.mxu1 %v10085_v24 }
0x4f49   :  { %v10083_v26 = vpop.permute.xlu1 %10082 }
0x4f4a   :  { %13470 = vmatprep.subr.mxu1 %v10083_v26 }
0x4f4b   :  { %v13923_v57 = vpop.eup %13922  ;;  %13471 = vmatpush3.msra.mxu1 %v10083_v26 }
0x4f4c   :  { %v8915_v39 = vmul.f32 %v13923_v57, %v8899_v52 }
0x4f4d   :  { %v10081_v41 = vpop.permute.xlu1 %10080 }
0x4f4e   :  { %v8921_v17 = vmul.f32 %v8920_v38, %v8915_v39  ;;  %13472 = vmatprep.subr.mxu1 %v10081_v41 }
0x4f4f   :  { %v13925_v2 = vpop.eup %13924  ;;  %13473 = vmatpush3.msra.mxu1 %v10081_v41 }
0x4f50   :  { %v8916_v5 = vmul.f32 %v13925_v2, %v8900_v27  ;;  %v15892_v43 = vadd.f32 %v8926_v42, %v8921_v17  ;;  %13484 = vmatprep.subr.mxu1 %v14441_v0 }
0x4f52   :  { %v8922_v33 = vmul.f32 %v8920_v38, %v8916_v5  ;;  %13474 = vmatprep.mubr.msk.f32.mxu1 %vm429_vm0, %v15892_v43  ;;  %v12131_v5 = vld [vmem:[%s16187_s9 + $0x28] sm:$0xff] }
0x4f53   :  { %10092 = vrot.lane.b32.xlu0 %v12254_v54, %s14443_s7 }
0x4f54   :  { %v15898_v45 = vadd.f32 %v8926_v42, %v8922_v33 }
0x4f56   :  { %13475 = vmatmul.mubr.msk.f32.vlgmr.msra.gmra.mxu1 %vm429_vm0, %v15898_v45 }
0x4f57   :  { %13488 = vmatprep.mubr.msk.f32.mxu1 %vm14445_vm2, %v14441_v0 }
0x4fc6   :  { %v9982_v60 = vpop.xlane.xlu0 %9981 }
0x4fc7   :  { %v9983_v47 = vmul.f32 0.03125, %v9982_v60 }
0x4fc9   :  { %v9984_v9 = vadd.f32 1e-05, %v9983_v47 }
0x4fca   :  { %v10093_v3 = vpop.permute.xlu0 %10092 }
0x4fcb   :  { %13926 = vrsqrt.f32 %v9984_v9 }
0x4fd8   :  { %v13927_v13 = vpop.eup %13926 }
0x4fd9   :  { %v9986_v61 = vmul.f32 %v13927_v13, %v9978_v29 }
0x4fdb   :  { %v9991_v1 = vmul.f32 %v9990_v53, %v9986_v61 }
0x4fdd   :  { %v15914_v32 = vadd.f32 %v9995_v50, %v9991_v1 }
0x4fdf   :  { %13464 = vmatmul.mubr.msk.f32.vlgmr.msra.gmra.mxu0 %vm429_vm0, %v15914_v32 }
0x4fe0   :  { %13481 = vmatprep.mubr.msk.f32.mxu0 %vm14445_vm2, %v14441_v0 }
0x5016   :  { %v13476_v7 = vpop.f32.mrf.mxu1 }
0x5017   :  { %v15920_v46 = vadd.f32 %v13476_v7, %v10093_v3 }
0x5018   :  { %v10167_v11 = vpop.f32.mrf.mxu1 }
0x5019   :  { %13478 = vmatpush3.xpose.msk.msra.mxu0 %vm818_vm5, %v15920_v46  ;;  %v15925_v15 = vadd.f32 %v10167_v11, %v10093_v3 }
0x501a   :  { %13479 = vmatprep.subr.mxu0 %v14441_v0 }
0x501d   :  { %13480 = vmatpush3.xpose.msk.msra.mxu0 %vm818_vm5, %v15925_v15 }
0x501e   :  { %13498 = vmatprep.subr.mxu0 %v14441_v0 }
0x509f   :  { %v10072_v19 = vpop.f32.mrf.mxu0 }
0x50a0   :  { %v15930_v62 = vadd.f32 %v12254_v54, %v10072_v19 }
0x50a1   :  { %v13465_v20 = vpop.f32.mrf.mxu0 }
0x50a2   :  { %13482 = vmatmul.mubr.msk.f32.vlgmr.msra.gmra.mxu0 %vm818_vm5, %v15930_v62 }
0x50a3   :  { %13502 = vmatprep.mubr.msk.f32.mxu0 %vm14445_vm2, %v14441_v0 }
0x5162   :  { %v10251_v22 = vpop.f32.mrf.mxu0 }
0x5163   :  { %v10255_v25 = vmul.f32 0.35355338, %v10251_v22 }
0x5164   :  { %v13483_v49 = vpop.f32.mrf.mxu0 }
0x5165   :  { %v10256_v52 = vsel %vm4888_vm15, %v10255_v25, -inf }
0x5166   :  { %10257 = vmax.xlane.f32.xlu1 %v10256_v52 }
0x5177   :  { %10269 = vrot.lane.b32.xlu1 %v15920_v46, %s14443_s7 }
0x517b   :  { %10351 = vrot.lane.b32.xlu1 %v15920_v46, %s14447_s28 }
0x517f   :  { %10349 = vrot.lane.b32.xlu1 %v15925_v15, %s14447_s28 }
0x5183   :  { %10347 = vrot.lane.b32.xlu1 %v15930_v62, %s14447_s28 }
0x51ef   :  { %v10258_v51 = vpop.xlane.xlu1 %10257 }
0x51f0   :  { %v10259_v44 = vsub.f32 %v10255_v25, %v10258_v51 }
0x51f2   :  { %v10260_v63 = vmul.f32 1.442695, %v10259_v44 }
0x51f3   :  { %v10270_v27 = vpop.permute.xlu1 %10269 }
0x51f4   :  { %13928 = vpow2.f32 %v10260_v63  ;;  %13485 = vmatpush3.msk.msra.mxu1 %vm939_vm8, %v10270_v27 }
0x51f5   :  { %13486 = vmatprep.subr.mxu1 %v14441_v0 }
0x51f7   :  { %v10352_v28 = vpop.permute.xlu1 %10351 }
0x51fb   :  { %v10350_v29 = vpop.permute.xlu1 %10349 }
0x51ff   :  { %v10348_v30 = vpop.permute.xlu1 %10347 }
0x5201   :  { %v13929_v14 = vpop.eup %13928 }
0x5202   :  { %v10262_v10 = vsel %vm4888_vm15, %v13929_v14, 0.0 }
0x5203   :  { %10263 = vadd.xlane.f32.xlu0 %v10262_v10 }
0x5219   :  { %10267 = vrot.lane.b32.xlu0 %v15925_v15, %s14443_s7  ;;  %s14456_s7 = smov 18  }
0x528c   :  { %v10264_v6 = vpop.xlane.xlu0 %10263 }
0x528d   :  { %13930 = vrcp.f32 %v10264_v6 }
0x5290   :  { %v10268_v55 = vpop.permute.xlu0 %10267 }
0x5291   :  { %13487 = vmatpush3.msra.mxu1 %v10268_v55 }
0x5292   :  { %13491 = vmatprep.subr.mxu1 %v14441_v0 }
0x529a   :  { %v13931_v48 = vpop.eup %13930 }
0x529b   :  { %v10266_v23 = vmul.f32 %v13931_v48, %v13929_v14 }
0x529d   :  { %13489 = vmatmul.mubr.msk.f32.vlgmr.msra.gmra.mxu1 %vm904_vm7, %v10266_v23 }
0x529e   :  { %13492 = vmatpush3.xpose.msk.msra.mxu1 %vm818_vm5, %v10352_v28  ;;  %13495 = vmatprep.mubr.msk.f32.mxu1 %vm14445_vm2, %v14441_v0 }
0x529f   :  { %13493 = vmatprep.subr.mxu1 %v14441_v0 }
0x52a2   :  { %13494 = vmatpush3.xpose.msk.msra.mxu1 %vm818_vm5, %v10350_v29 }
0x52a3   :  { %13510 = vmatprep.subr.mxu1 %v14441_v0 }
0x52a5   :  { %13496 = vmatmul.mubr.msk.f32.vlgmr.msra.gmra.mxu1 %vm818_vm5, %v10348_v30  ;;  %v12132_v30 = vld [vmem:[%s16187_s9 + $0x30] sm:$0xff] }
0x52a6   :  { %13512 = vmatprep.mubr.msk.f32.mxu1 %vm14445_vm2, %v14441_v0  ;;  %13511 = vmatpush3.msra.mxu1 %v12130_v31 }
0x52a7   :  { %13522 = vmatprep.subr.mxu1 %v14441_v0 }
0x535d   :  { %v10343_v8 = vpop.f32.mrf.mxu1 }
0x535e   :  { %13513 = vmatmul.mubr.msk.f32.vlgmr.msra.gmra.mxu1 %vm818_vm5, %v10343_v8 }
0x535f   :  { %v13490_v34 = vpop.f32.mrf.mxu1  ;;  %13526 = vmatprep.mubr.msk.f32.mxu1 %vm14445_vm2, %v14441_v0 }
0x5365   :  { %v10425_v21 = vpop.f32.mrf.mxu1 }
0x5366   :  { %v10429_v59 = vmul.f32 0.35355338, %v10425_v21 }
0x5367   :  { %v13497_v35 = vpop.f32.mrf.mxu1 }
0x5368   :  { %v10430_v36 = vsel %vm4888_vm15, %v10429_v59, -inf }
0x5369   :  { %10431 = vmax.xlane.f32.xlu1 %v10430_v36  ;;  %v12133_v36 = vld [vmem:[%s16187_s9 + $0x38] sm:$0xff] }
0x537a   :  { %10443 = vrot.lane.b32.xlu1 %v15920_v46, %s14446_s26 }
0x537e   :  { %10671 = vrot.lane.b32.xlu1 %v15920_v46, %s14450_s8 }
0x5382   :  { %10669 = vrot.lane.b32.xlu1 %v15925_v15, %s14450_s8 }
0x5386   :  { %10667 = vrot.lane.b32.xlu1 %v15930_v62, %s14450_s8 }
0x538a   :  { %10917 = vrot.lane.b32.xlu1 %v15925_v15, %s14452_s29 }
0x53f2   :  { %v10432_v12 = vpop.xlane.xlu1 %10431 }
0x53f3   :  { %v10433_v24 = vsub.f32 %v10429_v59, %v10432_v12 }
0x53f5   :  { %v10434_v26 = vmul.f32 1.442695, %v10433_v24 }
0x53f6   :  { %v10444_v37 = vpop.permute.xlu1 %10443 }
0x53f7   :  { %13932 = vpow2.f32 %v10434_v26  ;;  %13499 = vmatpush3.msk.msra.mxu0 %vm939_vm8, %v10444_v37 }
0x53f8   :  { %13500 = vmatprep.subr.mxu0 %v14441_v0 }
0x53fa   :  { %v10672_v54 = vpop.permute.xlu1 %10671 }
0x53fe   :  { %v10670_v60 = vpop.permute.xlu1 %10669 }
0x5402   :  { %v10668_v9 = vpop.permute.xlu1 %10667 }
0x5404   :  { %v13933_v38 = vpop.eup %13932 }
0x5405   :  { %v10436_v57 = vsel %vm4888_vm15, %v13933_v38, 0.0 }
0x5406   :  { %10437 = vadd.xlane.f32.xlu0 %v10436_v57  ;;  %v10918_v13 = vpop.permute.xlu1 %10917 }
0x541c   :  { %10441 = vrot.lane.b32.xlu0 %v15925_v15, %s14446_s26 }
0x541e   :  { %v15982_v39 = vpop.f32.mrf.mxu1 }
0x5420   :  { %10919 = vrot.lane.b32.xlu0 %v15920_v46, %s14452_s29  ;;  %v13514_v40 = vpop.f32.mrf.mxu1 }
0x5421   :  { %v12282_v40 = vld [vmem:[#allocation20 + $0x1] ss:$0 sm:$0xff] }
0x5424   :  { %10915 = vrot.lane.b32.xlu0 %v15930_v62, %s14452_s29 }
0x548f   :  { %v10438_v42 = vpop.xlane.xlu0 %10437 }
0x5490   :  { %13934 = vrcp.f32 %v10438_v42 }
0x5493   :  { %v10442_v41 = vpop.permute.xlu0 %10441 }
0x5494   :  { %13501 = vmatpush3.msra.mxu0 %v10442_v41 }
0x5495   :  { %13505 = vmatprep.subr.mxu0 %v14441_v0 }
0x5497   :  { %v10920_v53 = vpop.permute.xlu0 %10919 }
0x549b   :  { %v10916_v61 = vpop.permute.xlu0 %10915 }
0x549d   :  { %v13935_v17 = vpop.eup %13934 }
0x549e   :  { %v10440_v2 = vmul.f32 %v13935_v17, %v13933_v38 }
0x54a0   :  { %13503 = vmatmul.mubr.msk.f32.vlgmr.msra.gmra.mxu0 %vm904_vm7, %v10440_v2 }
0x54a1   :  { %13506 = vmatpush3.msra.mxu0 %v12131_v5  ;;  %13507 = vmatprep.mubr.msk.f32.mxu0 %vm14445_vm2, %v14441_v0 }
0x54a2   :  { %13515 = vmatprep.subr.mxu0 %v14441_v0 }
0x5560   :  { %v10517_v33 = vpop.f32.mrf.mxu0 }
0x5561   :  { %13508 = vmatmul.mubr.msk.f32.vlgmr.msra.gmra.mxu0 %vm818_vm5, %v10517_v33 }
0x5562   :  { %13516 = vmatpush3.xpose.msk.msra.mxu0 %vm818_vm5, %v10672_v54  ;;  %v13504_v47 = vpop.f32.mrf.mxu0  ;;  %13519 = vmatprep.mubr.msk.f32.mxu0 %vm14445_vm2, %v14441_v0 }
0x5563   :  { %13517 = vmatprep.subr.mxu0 %v14441_v0 }
0x5566   :  { %13518 = vmatpush3.xpose.msk.msra.mxu0 %vm818_vm5, %v10670_v60 }
0x5567   :  { %13534 = vmatprep.subr.mxu0 %v14441_v0 }
0x5569   :  { %13520 = vmatmul.mubr.msk.f32.vlgmr.msra.gmra.mxu0 %vm818_vm5, %v10668_v9 }
0x556a   :  { %13535 = vmatpush3.xpose.msk.msra.mxu0 %vm818_vm5, %v10920_v53  ;;  %13538 = vmatprep.mubr.msk.f32.mxu0 %vm14445_vm2, %v14441_v0  ;;  %v12137_v53 = vld [vmem:[%s16188_s17 + $0x38] sm:$0xff] }
0x556b   :  { %13536 = vmatprep.subr.mxu0 %v14441_v0 }
0x556e   :  { %13537 = vmatpush3.xpose.msk.msra.mxu0 %vm818_vm5, %v10918_v13  ;;  %v12136_v13 = vld [vmem:[%s16188_s17 + $0x30] sm:$0xff] }
0x556f   :  { %13553 = vmatprep.subr.mxu0 %v14441_v0 }
0x5571   :  { %13539 = vmatmul.mubr.msk.f32.vlgmr.msra.gmra.mxu0 %vm818_vm5, %v10916_v61  ;;  %v12134_v61 = vld [vmem:[%s16188_s17 + $0x20] sm:$0xff] }
0x5572   :  { %13561 = vmatprep.mubr.msk.f32.mxu0 %vm14445_vm2, %v14441_v0  ;;  %13554 = vmatpush3.msra.mxu0 %v12137_v53  ;;  %v11375_v53 = vrot.slane %v15908_v58, %v15229_v16 }
0x5573   :  { %13555 = vmatprep.subr.mxu0 %v14441_v0 }
0x5574   :  { %13556 = vmatpush3.msra.mxu0 %v12136_v13 }
0x5575   :  { %13557 = vmatprep.subr.mxu0 %v14441_v0 }
0x5621   :  { %v16011_v50 = vpop.f32.mrf.mxu0 }
0x5622   :  { %v10664_v12 = vadd.f32 %v15982_v39, %v16011_v50  ;;  %v12145_v50 = vld [vmem:[%s16189_s12 + $0x78] sm:$0xff] }
0x5623   :  { %v13509_v1 = vpop.f32.mrf.mxu0 }
0x5624   :  { %v12144_v1 = vld [vmem:[%s16189_s12 + $0x70] sm:$0xff] }
0x5629   :  { %v10745_v3 = vpop.f32.mrf.mxu0 }
0x562a   :  { %v10749_v7 = vmul.f32 0.35355338, %v10745_v3  ;;  %v12143_v3 = vld [vmem:[%s16189_s12 + $0x68] sm:$0xff] }
0x562b   :  { %v13521_v11 = vpop.f32.mrf.mxu0 }
0x562c   :  { %v10750_v19 = vsel %vm4888_vm15, %v10749_v7, -inf  ;;  %v12141_v11 = vld [vmem:[%s16189_s12 + $0x58] sm:$0xff] }
0x562d   :  { %10751 = vmax.xlane.f32.xlu1 %v10750_v19 }
0x5631   :  { %v10993_v62 = vpop.f32.mrf.mxu0 }
0x5632   :  { %v10997_v22 = vmul.f32 0.35355338, %v10993_v62 }
0x5633   :  { %v13540_v20 = vpop.f32.mrf.mxu0 }
0x5634   :  { %v10998_v25 = vsel %vm4888_vm15, %v10997_v22, -inf }
0x563e   :  { %10761 = vrot.lane.b32.xlu1 %v15925_v15, %s14449_s1 }
0x5662   :  { %10999 = vmax.xlane.f32.xlu1 %v10998_v25 }
0x5673   :  { %11009 = vrot.lane.b32.xlu1 %v15925_v15, %s14451_s2 }
0x56b6   :  { %v10752_v49 = vpop.xlane.xlu1 %10751 }
0x56b7   :  { %v10753_v52 = vsub.f32 %v10749_v7, %v10752_v49  ;;  %v12142_v7 = vld [vmem:[%s16189_s12 + $0x60] sm:$0xff] }
0x56b9   :  { %v10754_v51 = vmul.f32 1.442695, %v10753_v52  ;;  %v11192_v52 = vrot.slane %v15908_v58, %v15075_v4 }
0x56ba   :  { %v10762_v27 = vpop.permute.xlu1 %10761 }
0x56bb   :  { %13936 = vpow2.f32 %v10754_v51 }
0x56c8   :  { %v13937_v44 = vpop.eup %13936 }
0x56c9   :  { %v10756_v63 = vsel %vm4888_vm15, %v13937_v44, 0.0 }
0x56ca   :  { %10757 = vadd.xlane.f32.xlu0 %v10756_v63  ;;  %v12140_v63 = vld [vmem:[%s16189_s12 + $0x50] sm:$0xff] }
0x56e0   :  { %10763 = vrot.lane.b32.xlu0 %v15920_v46, %s14449_s1 }
0x56eb   :  { %v11000_v14 = vpop.xlane.xlu1 %10999 }
0x56ec   :  { %v11001_v10 = vsub.f32 %v10997_v22, %v11000_v14  ;;  %v11187_v22 = vrot.slane %v15905_v18, %v15075_v4  ;;  %v12138_v14 = vld [vmem:[%s16189_s12 + $0x40] sm:$0xff] }
0x56ee   :  { %v11002_v6 = vmul.f32 1.442695, %v11001_v10  ;;  %v12283_v10 = vld [vmem:[#allocation22 + $0x1] ss:$0 sm:$0xff] }
0x56ef   :  { %v11010_v59 = vpop.permute.xlu1 %11009 }
0x56f0   :  { %13938 = vpow2.f32 %v11002_v6 }
0x56fd   :  { %v13939_v55 = vpop.eup %13938 }
0x56fe   :  { %v11004_v15 = vsel %vm4888_vm15, %v13939_v55, 0.0 }
0x56ff   :  { %11005 = vadd.xlane.f32.xlu0 %v11004_v15 }
0x5715   :  { %11011 = vrot.lane.b32.xlu0 %v15920_v46, %s14451_s2 }
0x5753   :  { %v10758_v28 = vpop.xlane.xlu0 %10757 }
0x5754   :  { %13940 = vrcp.f32 %v10758_v28 }
0x5757   :  { %v10764_v48 = vpop.permute.xlu0 %10763 }
0x5758   :  { %13523 = vmatpush3.msk.msra.mxu1 %vm939_vm8, %v10764_v48  ;;  %v12285_v48 = vld [vmem:[#allocation23 + $0x1] ss:$0 sm:$0xff] }
0x5759   :  { %13524 = vmatprep.subr.mxu1 %v14441_v0 }
0x575a   :  { %13525 = vmatpush3.msra.mxu1 %v10762_v27  ;;  %v12139_v27 = vld [vmem:[%s16189_s12 + $0x48] sm:$0xff] }
0x575b   :  { %13529 = vmatprep.subr.mxu1 %v14441_v0 }
0x5761   :  { %v13941_v23 = vpop.eup %13940 }
0x5762   :  { %v10760_v29 = vmul.f32 %v13941_v23, %v13937_v44 }
0x5764   :  { %13527 = vmatmul.mubr.msk.f32.vlgmr.msra.gmra.mxu1 %vm904_vm7, %v10760_v29 }
0x5765   :  { %13530 = vmatpush3.msra.mxu1 %v12132_v30  ;;  %13531 = vmatprep.mubr.msk.f32.mxu1 %vm14445_vm2, %v14441_v0 }
0x5766   :  { %13541 = vmatprep.subr.mxu1 %v14441_v0 }
0x5788   :  { %v11006_v46 = vpop.xlane.xlu0 %11005 }
0x5789   :  { %13942 = vrcp.f32 %v11006_v46 }
0x578c   :  { %v11012_v34 = vpop.permute.xlu0 %11011 }
0x5796   :  { %v13943_v31 = vpop.eup %13942 }
0x5797   :  { %v11008_v35 = vmul.f32 %v13943_v31, %v13939_v55 }
0x5824   :  { %v10837_v8 = vpop.f32.mrf.mxu1 }
0x5825   :  { %13532 = vmatmul.mubr.msk.f32.vlgmr.msra.gmra.mxu1 %vm818_vm5, %v10837_v8 }
0x5826   :  { %13542 = vmatpush3.msk.msra.mxu1 %vm939_vm8, %v11012_v34  ;;  %v13528_v21 = vpop.f32.mrf.mxu1  ;;  %13545 = vmatprep.mubr.msk.f32.mxu1 %vm14445_vm2, %v14441_v0 }
0x5827   :  { %13543 = vmatprep.subr.mxu1 %v14441_v0 }
0x5828   :  { %13544 = vmatpush3.msra.mxu1 %v11010_v59 }
0x5829   :  { %13546 = vmatmul.mubr.msk.f32.vlgmr.msra.gmra.mxu1 %vm904_vm7, %v11008_v35  ;;  %13548 = vmatprep.subr.mxu1 %v14441_v0 }
0x582a   :  { %13550 = vmatprep.mubr.msk.f32.mxu1 %vm14445_vm2, %v14441_v0  ;;  %13549 = vmatpush3.msra.mxu1 %v12133_v36  ;;  %v11384_v36 = vld [vmem:[#allocation25 + $0x38] sm:$0xff] }
0x582b   :  { %13564 = vmatprep.subr.mxu1 %v14441_v0 }
0x58e5   :  { %v10910_v24 = vpop.f32.mrf.mxu1 }
0x58e6   :  { %v10914_v26 = vadd.f32 %v10910_v24, %v10664_v12  ;;  %v11383_v12 = vld [vmem:[#allocation25 + $0x30] sm:$0xff]  ;;  %v11382_v24 = vld [vmem:[#allocation25 + $0x28] sm:$0xff] }
0x58e7   :  { %v13533_v37 = vpop.f32.mrf.mxu1 }
0x58e8   :  { %v11381_v37 = vld [vmem:[#allocation25 + $0x20] sm:$0xff] }
0x58e9   :  { %v11085_v38 = vpop.f32.mrf.mxu1 }
0x58ea   :  { %13551 = vmatmul.mubr.msk.f32.vlgmr.msra.gmra.mxu1 %vm818_vm5, %v11085_v38  ;;  %v11380_v38 = vld [vmem:[#allocation25 + $0x18] sm:$0xff] }
0x58eb   :  { %v13547_v57 = vpop.f32.mrf.mxu1  ;;  %13580 = vmatprep.mubr.msk.f32.mxu1 %vm14445_vm2, %v14441_v0  ;;  %13565 = vmatpush3.msra.mxu1 %v12145_v50  ;;  %v11472_v50 = vld [vmem:[#allocation28 + $0x8] sm:$0xff] }
0x58ec   :  { %13566 = vmatprep.subr.mxu1 %v14441_v0  ;;  %v11559_v57 = vld [vmem:[#allocation31 + $0x10] sm:$0xff] }
0x58ed   :  { %13567 = vmatpush3.msra.mxu1 %v12144_v1  ;;  %v11385_v1 = vld [vmem:[#allocation26] sm:$0x3] }
0x58ee   :  { %13568 = vmatprep.subr.mxu1 %v14441_v0 }
0x58ef   :  { %13569 = vmatpush3.msra.mxu1 %v12143_v3 }
0x58f0   :  { %13570 = vmatprep.subr.mxu1 %v14441_v0 }
0x58f1   :  { %13571 = vmatpush3.msra.mxu1 %v12142_v7  ;;  %v12288_v7 = vld [vmem:[#allocation29] ss:$0 sm:$0xff] }
0x58f2   :  { %13572 = vmatprep.subr.mxu1 %v14441_v0 }
0x58f3   :  { %13573 = vmatpush3.msra.mxu1 %v12141_v11 }
0x58f4   :  { %13574 = vmatprep.subr.mxu1 %v14441_v0 }
0x58f5   :  { %13575 = vmatpush3.msra.mxu1 %v12140_v63 }
0x58f6   :  { %13576 = vmatprep.subr.mxu1 %v14441_v0 }
0x58f7   :  { %13577 = vmatpush3.msra.mxu1 %v12139_v27 }
0x58f8   :  { %13578 = vmatprep.subr.mxu1 %v14441_v0 }
0x58f9   :  { %13579 = vmatpush3.msra.mxu1 %v12138_v14 }
0x58fa   :  { %13594 = vmatprep.subr.mxu1 %v14441_v0 }
0x59aa   :  { %v11158_v42 = vpop.f32.mrf.mxu1 }
0x59ab   :  { %v11162_v41 = vadd.f32 %v11158_v42, %v10914_v26  ;;  %v11560_v26 = vld [vmem:[#allocation31 + $0x18] sm:$0xff]  ;;  %v11378_v42 = vld [vmem:[#allocation25 + $0x8] sm:$0xff] }
0x59ac   :  { %v13552_v17 = vpop.f32.mrf.mxu1 }
0x59ad   :  { %v11169_v2 = vadd.f32 %v12282_v40, %v11162_v41  ;;  %v11379_v40 = vld [vmem:[#allocation25 + $0x10] sm:$0xff]  ;;  %v11377_v17 = vld [vmem:[#allocation25] sm:$0xff] }
0x59ae   :  { %v11558_v41 = vld [vmem:[#allocation31 + $0x8] sm:$0xff] }
0x59af   :  { %v11170_v39 = vadd.f32 %v11169_v2, %v15914_v32  ;;  %v12135_v32 = vld [vmem:[%s16188_s17 + $0x28] sm:$0xff] }
0x59b0   :  { %13558 = vmatpush3.msra.mxu0 %v12135_v32  ;;  %v11474_v2 = vld [vmem:[#allocation28 + $0x18] sm:$0xff] }
0x59b1   :  { %v11171_v5 = vsel %vm4605_vm14, %v11170_v39, 0.0  ;;  %13559 = vmatprep.subr.mxu0 %v14441_v0 }
0x59b2   :  { %11172 = vadd.xlane.f32.xlu1 %v11171_v5  ;;  %13560 = vmatpush3.msra.mxu0 %v12134_v61  ;;  %v11473_v61 = vld [vmem:[#allocation28 + $0x10] sm:$0xff] }
0x59b3   :  { %11424 = vmatprep.subr.mxu0 %v11384_v36 }
0x5a3b   :  { %v11173_v54 = vpop.xlane.xlu1 %11172 }
0x5a3c   :  { %v11174_v33 = vmul.f32 0.03125, %v11173_v54 }
0x5a3e   :  { %v11175_v60 = vsub.f32 %v11170_v39, %v11174_v33  ;;  %v11557_v39 = vld [vmem:[#allocation31] sm:$0xff] }
0x5a40   :  { %v11176_v47 = vmul.f32 %v11175_v60, %v11175_v60 }
0x5a42   :  { %v11177_v9 = vsel %vm4605_vm14, %v11176_v47, 0.0 }
0x5a43   :  { %11178 = vadd.xlane.f32.xlu0 %v11177_v9 }
0x5acc   :  { %v11179_v19 = vpop.xlane.xlu0 %11178 }
0x5acd   :  { %v11180_v62 = vmul.f32 0.03125, %v11179_v19  ;;  %v11390_v19 = vrot.slane %v11385_v1, %v14937_v56 }
0x5acf   :  { %v11181_v20 = vadd.f32 1e-05, %v11180_v62 }
0x5ad1   :  { %13944 = vrsqrt.f32 %v11181_v20 }
0x5ade   :  { %v13945_v25 = vpop.eup %13944 }
0x5adf   :  { %v11183_v49 = vmul.f32 %v13945_v25, %v11175_v60  ;;  %v11370_v60 = vrot.slane %v15905_v18, %v15229_v16  ;;  %v11471_v18 = vld [vmem:[#allocation28] sm:$0xff] }
0x5ae0   :  { %v12291_v25 = vld [vmem:[#allocation32] ss:$0 sm:$0xff] }
0x5ae1   :  { %v11188_v51 = vmul.f32 %v11187_v22, %v11183_v49  ;;  %v11394_v49 = vrot.slane %v11385_v1, %v15075_v4 }
0x5ae3   :  { %v11193_v44 = vadd.f32 %v11192_v52, %v11188_v51 }
0x5ae5   :  { %13562 = vmatmul.mubr.msk.f32.vlgmr.msra.gmra.mxu0 %vm429_vm0, %v11193_v44 }
0x5ae6   :  { %11464 = vmatprep.mubr.f32.mxu0 %v14441_v0  ;;  %11425 = vmatpush1.msra.mxu0 %v11383_v12 }
0x5ae7   :  { %11426 = vmatprep.subr.mxu0 %v11382_v24 }
0x5ae8   :  { %11427 = vmatpush1.msra.mxu0 %v11381_v37 }
0x5ae9   :  { %11428 = vmatprep.subr.mxu0 %v11380_v38 }
0x5aea   :  { %11429 = vmatpush1.msra.mxu0 %v11379_v40 }
0x5aeb   :  { %11430 = vmatprep.subr.mxu0 %v11378_v42 }
0x5aec   :  { %11431 = vmatpush1.msra.mxu0 %v11377_v17 }
0x5aed   :  { %13583 = vmatprep.subr.mxu0 %v11474_v2 }
0x5ba5   :  { %v11269_v6 = vpop.f32.mrf.mxu0 }
0x5ba6   :  { %v11270_v55 = vadd.f32 %v12283_v10, %v11269_v6 }
0x5ba7   :  { %v13563_v15 = vpop.f32.mrf.mxu0 }
0x5ba8   :  { %v11273_v28 = vmax.f32 %v11270_v55, 0.0 }
0x5baa   :  { %13581 = vmatmul.mubr.msk.f32.vlgmr.msra.gmra.mxu1 %vm469_vm3, %v11273_v28 }
0x5bab   :  { %13602 = vmatprep.mubr.msk.f32.mxu1 %vm14445_vm2, %v14441_v0  ;;  %13595 = vmatpush3.msra.mxu1 %v11560_v26 }
0x5bac   :  { %13596 = vmatprep.subr.mxu1 %v14441_v0 }
0x5bad   :  { %13597 = vmatpush3.msra.mxu1 %v11559_v57 }
0x5bae   :  { %13598 = vmatprep.subr.mxu1 %v14441_v0 }
0x5baf   :  { %13599 = vmatpush3.msra.mxu1 %v11558_v41 }
0x5bb0   :  { %13600 = vmatprep.subr.mxu1 %v14441_v0 }
0x5bb1   :  { %13601 = vmatpush3.msra.mxu1 %v11557_v39 }
0x5bb2   :  { %13612 = vmatprep.subr.mxu1 %v14441_v0 }
0x5c6a   :  { %v11349_v23 = vpop.f32.mrf.mxu1 }
0x5c6b   :  { %v11350_v29 = vadd.f32 %v12285_v48, %v11349_v23 }
0x5c6c   :  { %v13582_v30 = vpop.f32.mrf.mxu1 }
0x5c6d   :  { %v11353_v46 = vadd.f32 %v11350_v29, %v11193_v44 }
0x5c6f   :  { %v11354_v31 = vsel %vm4605_vm14, %v11353_v46, 0.0 }
0x5c70   :  { %11355 = vadd.xlane.f32.xlu0 %v11354_v31 }
0x5cf9   :  { %v11356_v8 = vpop.xlane.xlu0 %11355 }
0x5cfa   :  { %v11357_v34 = vmul.f32 0.03125, %v11356_v8 }
0x5cfc   :  { %v11358_v21 = vsub.f32 %v11353_v46, %v11357_v34 }
0x5cfe   :  { %v11359_v59 = vmul.f32 %v11358_v21, %v11358_v21 }
0x5d00   :  { %v11360_v35 = vsel %vm4605_vm14, %v11359_v59, 0.0 }
0x5d01   :  { %11361 = vadd.xlane.f32.xlu0 %v11360_v35 }
0x5d8a   :  { %v11362_v5 = vpop.xlane.xlu0 %11361 }
0x5d8b   :  { %v11363_v54 = vmul.f32 0.03125, %v11362_v5 }
0x5d8d   :  { %v11364_v33 = vadd.f32 1e-05, %v11363_v54 }
0x5d8f   :  { %13946 = vrsqrt.f32 %v11364_v33 }
0x5d9c   :  { %v13947_v47 = vpop.eup %13946 }
0x5d9d   :  { %v11366_v9 = vmul.f32 %v13947_v47, %v11358_v21 }
0x5d9f   :  { %v11371_v13 = vmul.f32 %v11370_v60, %v11366_v9 }
0x5da1   :  { %v11376_v32 = vadd.f32 %v11375_v53, %v11371_v13 }
0x5da3   :  { %12287 = vmatmul.mubr.msk.f32.vlgmr.msra.gmra.mxu0 %vm429_vm0, %v11376_v32  ;;  %13603 = vmatmul.mubr.msk.f32.vlgmr.msra.gmra.mxu1 %vm429_vm0, %v11376_v32 }
0x5da4   :  { %13584 = vmatpush3.msra.mxu0 %v11474_v2  ;;  %13591 = vmatprep.mubr.msk.f32.mxu0 %vm429_vm0, %v15892_v43 }
0x5da5   :  { %13585 = vmatprep.subr.mxu0 %v11473_v61  ;;  %13616 = vmatprep.mubr.msk.f32.mxu1 %vm14445_vm2, %v14441_v0 }
0x5da6   :  { %13586 = vmatpush3.msra.mxu0 %v11473_v61 }
0x5da7   :  { %13587 = vmatprep.subr.mxu0 %v11472_v50 }
0x5da8   :  { %13588 = vmatpush3.msra.mxu0 %v11472_v50 }
0x5da9   :  { %13589 = vmatprep.subr.mxu0 %v11471_v18 }
0x5daa   :  { %13590 = vmatpush3.msra.mxu0 %v11471_v18 }
0x5dab   :  { %13592 = vmatmul.mubr.msk.f32.vlgmr.msra.gmra.mxu0 %vm429_vm0, %v15898_v45  ;;  %13605 = vmatprep.subr.mxu0 %v14441_v0  ;;  %vm11887_vm0 = vcmask 146432  }
0x5dac   :  { %13609 = vmatprep.mubr.msk.f32.mxu0 %vm14445_vm2, %v14441_v0 }
0x5e63   :  { %v11634_v16 = vpop.f32.mrf.mxu1  ;;  %v11466_v43 = vpop.f32.mrf.mxu0 }
0x5e64   :  { %v11467_v45 = vadd.f32 %v11466_v43, %v11390_v19  ;;  %v11635_v56 = vadd.f32 %v12291_v25, %v11634_v16 }
0x5e65   :  { %v13604_v58 = vpop.f32.mrf.mxu1  ;;  %v11468_v3 = vpop.f32.mrf.mxu0 }
0x5e66   :  { %v11469_v52 = vadd.f32 %v11468_v3, %v11394_v49 }
0x5e6b   :  { %v13593_v11 = vpop.f32.mrf.mxu0 }
0x5e6c   :  { %v11554_v62 = vadd.f32 %v13593_v11, %v12288_v7 }
0x5e6d   :  { %v11548_v20 = vpop.f32.mrf.mxu0 }
0x5e6e   :  { %v11549_v22 = vadd.f32 %v12288_v7, %v11548_v20  ;;  %11722 = vrot.lane.b32.xlu1 %v11554_v62, %s14444_s30  ;;  %13606 = vmatpush3.xpose.msk.msra.mxu0 %vm469_vm3, %v11554_v62 }
0x5e6f   :  { %13607 = vmatprep.subr.mxu0 %v14441_v0 }
0x5e70   :  { %11720 = vrot.lane.b32.xlu0 %v11549_v22, %s14444_s30 }
0x5e72   :  { %13608 = vmatpush3.xpose.msk.msra.mxu0 %vm469_vm3, %v11549_v22  ;;  %11718 = vrot.lane.b32.xlu1 %v11467_v45, %s14444_s30 }
0x5e73   :  { %13619 = vmatprep.subr.mxu0 %v14441_v0 }
0x5e75   :  { %13610 = vmatmul.mubr.msk.f32.vlgmr.msra.gmra.mxu0 %vm469_vm3, %v11467_v45 }
0x5e76   :  { %13620 = vmatpush3.xpose.msk.msra.mxu0 %vm469_vm3, %v11635_v56  ;;  %13621 = vmatprep.mubr.msk.f32.mxu0 %vm14445_vm2, %v14441_v0 }
0x5e79   :  { %13622 = vmatmul.mubr.msk.f32.vlgmr.msra.gmra.mxu0 %vm469_vm3, %v11469_v52 }
0x5ee0   :  { %v11723_v51 = vpop.permute.xlu1 %11722 }
0x5ee1   :  { %13613 = vmatpush3.xpose.msk.msra.mxu1 %vm469_vm3, %v11723_v51 }
0x5ee2   :  { %13614 = vmatprep.subr.mxu1 %v14441_v0  ;;  %v11721_v44 = vpop.permute.xlu0 %11720 }
0x5ee4   :  { %v11719_v4 = vpop.permute.xlu1 %11718 }
0x5ee5   :  { %13615 = vmatpush3.xpose.msk.msra.mxu1 %vm469_vm3, %v11721_v44 }
0x5ee8   :  { %13617 = vmatmul.mubr.msk.f32.vlgmr.msra.gmra.mxu1 %vm469_vm3, %v11719_v4 }
0x5f35   :  { %v11713_v63 = vpop.f32.mrf.mxu0 }
0x5f36   :  { %v11717_v48 = vmul.f32 0.125, %v11713_v63 }
0x5f37   :  { %v13611_v27 = vpop.f32.mrf.mxu0 }
0x5f39   :  { %v11873_v14 = vpop.f32.mrf.mxu0 }
0x5f3a   :  { %v11877_v28 = vmul.f32 0.125, %v11873_v14 }
0x5f3b   :  { %v13623_v10 = vpop.f32.mrf.mxu0 }
0x5fa8   :  { %v11796_v6 = vpop.f32.mrf.mxu1 }
0x5fa9   :  { %v11800_v55 = vmul.f32 0.125, %v11796_v6 }
0x5faa   :  { %v13618_v15 = vpop.f32.mrf.mxu1 }
0x5fab   :  { %11879 = vrot.lane.b32.xlu1 %v11800_v55, %s14455_s0 }
0x5faf   :  { %11883 = vrot.lane.b32.xlu1 %v11877_v28, %s14456_s7 }
0x601d   :  { %v11880_v0 = vpop.permute.xlu1 %11879 }
0x601e   :  { %v11886_v23 = vsel %vm904_vm7, %v11717_v48, %v11880_v0 }
0x6021   :  { %v11884_v29 = vpop.permute.xlu1 %11883 }
0x6022   :  { %v11888_v30 = vsel %vm11887_vm0, %v11886_v23, %v11884_v29 }
0x6023   :  { %v11890_v46 = vsel %vm11889_vm1, %v11888_v30, 0.0 }
0x6024   :  { %11891 = vst [vmem:[%s14665_s27] sm:$0x3f] %v11890_v46 }
0x6025   :  { %11896 = vsyncpa [#allocation4], 1 }
0x6026   :  { %11897 = vsyncpa [#allocation6], 1 }
0x6027   :  { %11898 = vsyncpa [#allocation9], 1 }
0x6028   :  { %11899 = vsyncpa [#allocation12], 1 }
0x6029   :  { %11900 = vsyncpa [#allocation15], 1 }
0x602a   :  { %11901 = vsyncpa [#allocation18], 1 }
0x602b   :  { %11902 = vsyncpa [#allocation21], 1 }
0x602c   :  { %11903 = vsyncpa [#allocation24], 1 }
0x602d   :  { %11904 = vsyncpa [#allocation27], 1 }
0x602e   :  { %11905 = vsyncpa [#allocation30], 1 }
0x602f   :  { %11906 = vsyncpa [#allocation33], 1 }

</bundles_post_ra>
